<compile_context>
chip_gen: v5e
topology: v5e:2x2
jax: 0.10.0
libtpu: 0.0.40
codegen_flags: <defaults>
</compile_context>

<pallas_src>
import math

import jax
import jax.numpy as jnp
from jax.experimental import pallas as pl
from jax.experimental.pallas import tpu as pltpu

NUM_LAYERS = 6
NUM_DIRS = 2
SUBLANE = 8   # f32 sublane width; batch is padded to a multiple of this


# ----------------------------------------------------------------------------
# Fused kernel: 6-layer bidirectional LSTM + masked mean + folded linear head.
#
# Packed layouts (Hd = hidden_dim // 2, H2 = 2*Hd, G = 8*Hd):
#   gate column index = gate*2*Hd + dir*Hd + k, gate order [i, f, o, g],
#   dir in {fwd, bwd}; combined state layout h = [h_fwd | h_bwd].
#   wih is dense (Din, G); whh is block-diagonal (H2, G); bias is (1, G).
#   biashead row L holds the folded head: lanes 0:H2 = w_head, lane H2 = b.
# ----------------------------------------------------------------------------
def _fused_lstm_tagger_kernel(x_ref, lens_ref, wih0_ref, wstack_ref,
                              biashead_ref, hc0_ref, out_ref):
    SB = x_ref.shape[0]
    L = biashead_ref.shape[0] - 1
    B = hc0_ref.shape[1]
    H2 = hc0_ref.shape[2]
    Hd = H2 // 2
    G = 8 * Hd
    S = SB // B

    # Lane masks, hoisted (built once per call).
    # state lanes: forward half of [h_fwd | h_bwd]
    fwd_half = jax.lax.broadcasted_iota(jnp.int32, (B, H2), 1) < Hd
    # gate lanes: forward columns of every gate block
    fwd_gate = (jax.lax.broadcasted_iota(jnp.int32, (B, G), 1) % H2) < Hd

    lens = lens_ref[...]                                   # (B, 1) f32
    # guard: a sentence starting with '<blank>' would give 0/0 -> NaN
    inv_len = 1.0 / jnp.maximum(lens, 1.0)

    x_in = x_ref[...]                                      # (S*B, E)
    for layer in range(L):                                 # fully unrolled
        wih = wih0_ref[...] if layer == 0 else wstack_ref[layer - 1]
        whh = wstack_ref[(L - 1) + layer]                  # (H2, G) bf16
        bias = biashead_ref[layer]                         # (1, G)  f32

        # Input projection for the whole sequence, off the serial path:
        # one dense matmul per layer (no zero-padded fwd/bwd duplicates).
        xp = jnp.dot(x_in.astype(jnp.bfloat16), wih,
                     preferred_element_type=jnp.float32) + bias   # (S*B, G)

        h = hc0_ref[2 * layer]                             # (B, H2) = [hf|hb]
        c = hc0_ref[2 * layer + 1]

        hs = []
        for t in range(S):                                 # fully unrolled
            # fwd gate columns take time t, bwd columns take time S-1-t
            gate_in = jnp.where(fwd_gate,
                                xp[t * B:(t + 1) * B, :],
                                xp[(S - 1 - t) * B:(S - t) * B, :])
            # whh is the same RHS for all S unrolled steps; Mosaic keeps it
            # staged across the loop (no explicit matmul_push_rhs needed).
            gates = gate_in + jnp.dot(h.astype(jnp.bfloat16), whh,
                                      preferred_element_type=jnp.float32)
            # gate order [i, f, o, g]: one sigmoid pass + one tanh pass
            sig = jax.nn.sigmoid(gates[:, 0:6 * Hd])
            i_g = sig[:, 0:2 * Hd]
            f_g = sig[:, 2 * Hd:4 * Hd]
            o_g = sig[:, 4 * Hd:6 * Hd]
            g_g = jnp.tanh(gates[:, 6 * Hd:8 * Hd])
            c = f_g * c + i_g * g_g
            h = o_g * jnp.tanh(c)
            hs.append(h)

        # Layer output in natural time order, kept in registers:
        # out[tau] = [h_fwd(tau) | h_bwd(tau)]; the backward cell produced
        # h_bwd(tau) at step S-1-tau (it runs reversed in time).
        outs = [jnp.where(fwd_half, hs[t], hs[S - 1 - t]) for t in range(S)]

        if layer < L - 1:
            x_in = jnp.concatenate(outs, axis=0)           # (S*B, H2), in-reg
        else:
            # Fused head: masked mean over valid timesteps, then the folded
            # (Linear o Linear) as a VPU multiply + lane reduce.
            acc = jnp.zeros((B, H2), jnp.float32)
            for t in range(S):
                w_t = jnp.where(lens > t, inv_len, 0.0)    # (B, 1)
                acc = acc + w_t * outs[t]
            head = biashead_ref[L]                         # (1, G) f32
            w_head = head[:, 0:H2]                         # (1, H2)
            b_head = head[:, H2:H2 + 1]                    # (1, 1)
            score = jnp.sum(acc * w_head, axis=1, keepdims=True) + b_head
            out_ref[...] = score.astype(out_ref.dtype)


def lstm_tagger_fused_call(x_flat, lens, packed):
    """x_flat: (S*Bp, E) embeddings in (t, b) row order; lens: (Bp, 1) f32."""
    SB, E = x_flat.shape
    L2, B, H2 = packed["hc0"].shape
    L = L2 // 2
    G = packed["wstack"].shape[2]
    return pl.pallas_call(
        _fused_lstm_tagger_kernel,
        out_shape=jax.ShapeDtypeStruct((B, 1), jnp.float32),
        grid=(1,),
        in_specs=[
            pl.BlockSpec((SB, E), lambda i: (0, 0)),
            pl.BlockSpec((B, 1), lambda i: (0, 0)),
            pl.BlockSpec((E, G), lambda i: (0, 0)),
            pl.BlockSpec((2 * L - 1, H2, G), lambda i: (0, 0, 0)),
            pl.BlockSpec((L + 1, 1, G), lambda i: (0, 0, 0)),
            pl.BlockSpec((2 * L, B, H2), lambda i: (0, 0, 0)),
        ],
        out_specs=pl.BlockSpec((B, 1), lambda i: (0, 0)),
        compiler_params=pltpu.CompilerParams(
            dimension_semantics=("arbitrary",)),
    )(x_flat, lens, packed["wih0"], packed["wstack"],
      packed["biashead"], packed["hc0"])


# ----------------------------------------------------------------------------
# Deterministic parameter construction (synthetic; matches __init__ shapes,
# PyTorch nn.LSTM layout: weight_ih (4*Hd, Din), gate order [i, f, g, o]).
# ----------------------------------------------------------------------------
def init_params(key, vocab_size, embedding_dim, hidden_dim):
    Hd = hidden_dim // 2
    keys = jax.random.split(key, 64)
    ki = iter(keys)
    params = {}
    params["embedding"] = jax.random.normal(
        next(ki), (vocab_size, embedding_dim), jnp.float32)

    bound = 1.0 / math.sqrt(Hd)
    lstm = []
    for layer in range(NUM_LAYERS):
        din = embedding_dim if layer == 0 else hidden_dim
        for _ in range(NUM_DIRS):
            wih = jax.random.uniform(next(ki), (4 * Hd, din), jnp.float32,
                                     -bound, bound)
            whh = jax.random.uniform(next(ki), (4 * Hd, Hd), jnp.float32,
                                     -bound, bound)
            bih = jax.random.uniform(next(ki), (4 * Hd,), jnp.float32,
                                     -bound, bound)
            bhh = jax.random.uniform(next(ki), (4 * Hd,), jnp.float32,
                                     -bound, bound)
            lstm.append((wih, whh, bih, bhh))
    params["lstm"] = lstm

    b1 = 1.0 / math.sqrt(hidden_dim)
    params["w1"] = jax.random.uniform(next(ki), (50, hidden_dim), jnp.float32,
                                      -b1, b1)
    params["b1"] = jax.random.uniform(next(ki), (50,), jnp.float32, -b1, b1)
    b2 = 1.0 / math.sqrt(50.0)
    params["w2"] = jax.random.uniform(next(ki), (1, 50), jnp.float32, -b2, b2)
    params["b2"] = jax.random.uniform(next(ki), (1,), jnp.float32, -b2, b2)
    return params


def init_hidden(key, batch_size, hidden_dim):
    # Module's init_hidden: xavier_normal_ on zeros(12, B, hidden_dim//2);
    # reproduced with a deterministic normal of the xavier std.
    Hd = hidden_dim // 2
    fan_in = batch_size * Hd
    fan_out = NUM_LAYERS * NUM_DIRS * Hd
    std = math.sqrt(2.0 / (fan_in + fan_out))
    kh, kc = jax.random.split(key)
    h0 = std * jax.random.normal(kh, (NUM_LAYERS * NUM_DIRS, batch_size, Hd),
                                 jnp.float32)
    c0 = std * jax.random.normal(kc, (NUM_LAYERS * NUM_DIRS, batch_size, Hd),
                                 jnp.float32)
    return h0, c0


# ----------------------------------------------------------------------------
# One-time packing of PyTorch-layout weights into the fused-kernel layout.
# ----------------------------------------------------------------------------
def pack_params(params, h0, c0, hidden_dim, batch_pad):
    Hd = hidden_dim // 2
    H2 = 2 * Hd
    G = 8 * Hd
    L = NUM_LAYERS
    perm = [0, 1, 3, 2]   # torch gate order [i, f, g, o] -> packed [i, f, o, g]

    def pack_in(wih_f, wih_b):
        din = wih_f.shape[1]
        tf = wih_f.T.reshape(din, 4, Hd)[:, perm, :]
        tb = wih_b.T.reshape(din, 4, Hd)[:, perm, :]
        return jnp.stack([tf, tb], axis=2).reshape(din, G)      # dense (din,G)

    def pack_rec(whh_f, whh_b):
        tf = whh_f.T.reshape(Hd, 4, Hd)[:, perm, :]
        tb = whh_b.T.reshape(Hd, 4, Hd)[:, perm, :]
        z = jnp.zeros_like(tf)
        top = jnp.stack([tf, z], axis=2).reshape(Hd, G)         # rows for h_fwd
        bot = jnp.stack([z, tb], axis=2).reshape(Hd, G)         # rows for h_bwd
        return jnp.concatenate([top, bot], axis=0)              # (H2, G)

    def pack_bias(bih_f, bhh_f, bih_b, bhh_b):
        bf = (bih_f + bhh_f).reshape(4, Hd)[perm, :]
        bb = (bih_b + bhh_b).reshape(4, Hd)[perm, :]
        return jnp.stack([bf, bb], axis=1).reshape(1, G)

    def pad_rows(a):
        if a.shape[0] == batch_pad:
            return a
        pad = jnp.zeros((batch_pad - a.shape[0],) + a.shape[1:], a.dtype)
        return jnp.concatenate([a, pad], axis=0)

    wih0 = None
    wih_rest, whh_all, biases, hc = [], [], [], []
    for layer in range(L):
        wih_f, whh_f, bih_f, bhh_f = params["lstm"][2 * layer + 0]
        wih_b, whh_b, bih_b, bhh_b = params["lstm"][2 * layer + 1]
        w = pack_in(wih_f, wih_b)
        if layer == 0:
            wih0 = w
        else:
            wih_rest.append(w)
        whh_all.append(pack_rec(whh_f, whh_b))
        biases.append(pack_bias(bih_f, bhh_f, bih_b, bhh_b))
        hc.append(pad_rows(jnp.concatenate([h0[2 * layer],
                                            h0[2 * layer + 1]], -1)))
        hc.append(pad_rows(jnp.concatenate([c0[2 * layer],
                                            c0[2 * layer + 1]], -1)))

    # Fold the two head Linears (no nonlinearity between them): exact up to
    # reassociation.  w_head (H2, 1), b_head (1,).
    w_head = params["w1"].T @ params["w2"].T
    b_head = params["b1"] @ params["w2"].T + params["b2"]
    head_row = jnp.zeros((1, 1, G), jnp.float32)
    head_row = head_row.at[0, 0, :H2].set(w_head[:, 0])
    head_row = head_row.at[0, 0, H2].set(b_head[0])

    return dict(
        wih0=wih0.astype(jnp.bfloat16),                          # (E, G)
        wstack=jnp.stack(wih_rest + whh_all, axis=0)             # (2L-1, H2, G)
                  .astype(jnp.bfloat16),
        biashead=jnp.concatenate([jnp.stack(biases, axis=0),
                                  head_row], axis=0),            # (L+1, 1, G)
        hc0=jnp.stack(hc, axis=0),                               # (2L, Bp, H2)
    )


# ----------------------------------------------------------------------------
# Full forward pass (XLA glue + one fused Pallas kernel).
# ----------------------------------------------------------------------------
def lstm_tagger_forward(params, packed, sentence, blank_idx):
    B, S = sentence.shape
    B_pad = packed["hc0"].shape[1]
    E = params["embedding"].shape[1]

    # embedding lookup + transpose(0, 1): (B,S,E) -> (S,B,E); pad the batch to
    # the 8-sublane width so every in-kernel per-step slice is full-tile.
    embeds = jnp.take(params["embedding"], sentence, axis=0)
    x = jnp.transpose(embeds, (1, 0, 2))
    if B_pad > B:
        x = jnp.concatenate([x, jnp.zeros((S, B_pad - B, E), x.dtype)], axis=1)
    x_flat = x.reshape(S * B_pad, E)

    # length per batch element: first '<blank>' position, else S        (glue)
    is_blank = sentence == blank_idx
    lengths = jnp.where(is_blank.any(axis=1),
                        jnp.argmax(is_blank, axis=1), S).astype(jnp.float32)
    lens = jnp.zeros((B_pad, 1), jnp.float32).at[:B, 0].set(lengths)

    out = lstm_tagger_fused_call(x_flat, lens, packed)     # (B_pad, 1)
    return out[:B]                                         # drop padded rows


if __name__ == "__main__":
    key = jax.random.PRNGKey(0)
    k_params, k_hidden, k_sent = jax.random.split(key, 3)

    vocab_size = 20
    embedding_dim = 32
    hidden_dim = 32
    B, S = 2, 8
    blank_idx = 1   # vocab.stoi['<blank>']

    params = init_params(k_params, vocab_size, embedding_dim, hidden_dim)
    h0, c0 = init_hidden(k_hidden, B, hidden_dim)
    B_pad = ((B + SUBLANE - 1) // SUBLANE) * SUBLANE
    packed = pack_params(params, h0, c0, hidden_dim, B_pad)

    sentence = jax.random.randint(k_sent, (B, S), 2, vocab_size, jnp.int32)
    # batch 0: padded from position 5 on; batch 1: full length
    sentence = sentence.at[0, 5].set(blank_idx)
    sentence = sentence.at[0, 6].set(blank_idx)
    sentence = sentence.at[0, 7].set(blank_idx)

    fwd = jax.jit(lstm_tagger_forward)
    out = fwd(params, packed, sentence, blank_idx)
    out = jax.block_until_ready(out)
    assert out.shape == (B, 1) and out.dtype == jnp.float32
    assert bool(jnp.all(jnp.isfinite(out)))
    print("KERNEL_OK")
</pallas_src>

<mosaic_0001>
module attributes {stable_mosaic.version = 11 : i64} {
  func.func @_fused_lstm_tagger_kernel(%arg0: i32, %arg1: memref<64x32xf32, #tpu.memory_space<vmem>>, %arg2: memref<8x1xf32, #tpu.memory_space<vmem>>, %arg3: memref<32x128xbf16, #tpu.memory_space<vmem>>, %arg4: memref<11x32x128xbf16, #tpu.memory_space<vmem>>, %arg5: memref<7x1x128xf32, #tpu.memory_space<vmem>>, %arg6: memref<12x8x32xf32, #tpu.memory_space<vmem>>, %arg7: memref<8x1xf32, #tpu.memory_space<vmem>>) attributes {dimension_semantics = [#tpu.dimension_semantics<arbitrary>], iteration_bounds = array<i64: 1>, scalar_prefetch = 0 : i64, scratch_operands = 0 : i64, tpu.core_type = #tpu.core_type<tc>, window_params = [{pipeline_mode = #tpu.pipeline_mode<synchronous>, transform_indices = @transform_0, window_bounds = array<i64: 64, 32>}, {pipeline_mode = #tpu.pipeline_mode<synchronous>, transform_indices = @transform_1, window_bounds = array<i64: 8, 1>}, {pipeline_mode = #tpu.pipeline_mode<synchronous>, transform_indices = @transform_2, window_bounds = array<i64: 32, 128>}, {pipeline_mode = #tpu.pipeline_mode<synchronous>, transform_indices = @transform_3, window_bounds = array<i64: 11, 32, 128>}, {pipeline_mode = #tpu.pipeline_mode<synchronous>, transform_indices = @transform_4, window_bounds = array<i64: 7, 1, 128>}, {pipeline_mode = #tpu.pipeline_mode<synchronous>, transform_indices = @transform_5, window_bounds = array<i64: 12, 8, 32>}, {pipeline_mode = #tpu.pipeline_mode<synchronous>, transform_indices = @transform_6, window_bounds = array<i64: 8, 1>}]} {
    %0 = tpu.iota {dimensions = array<i32: 1>} : vector<8x32xi32>
    %c16_i32 = arith.constant 16 : i32
    %1 = vector.broadcast %c16_i32 : i32 to vector<8x32xi32>
    %2 = arith.cmpi slt, %0, %1 : vector<8x32xi32>
    %3 = tpu.iota {dimensions = array<i32: 1>} : vector<8x128xi32>
    %c32_i32 = arith.constant 32 : i32
    %c0_i32 = arith.constant 0 : i32
    %4 = arith.cmpi eq, %c32_i32, %c0_i32 : i32
    %c1_i32 = arith.constant 1 : i32
    %5 = arith.select %4, %c1_i32, %c32_i32 : i32
    %6 = vector.broadcast %5 : i32 to vector<8x128xi32>
    %7 = arith.remsi %3, %6 : vector<8x128xi32>
    %c0_i32_0 = arith.constant 0 : i32
    %8 = vector.broadcast %c0_i32_0 : i32 to vector<8x128xi32>
    %9 = arith.cmpi ne, %7, %8 : vector<8x128xi32>
    %c0_i32_1 = arith.constant 0 : i32
    %10 = vector.broadcast %c0_i32_1 : i32 to vector<8x128xi32>
    %11 = arith.cmpi slt, %7, %10 : vector<8x128xi32>
    %c0_i32_2 = arith.constant 0 : i32
    %12 = arith.cmpi slt, %5, %c0_i32_2 : i32
    %13 = vector.broadcast %12 : i1 to vector<8x128xi1>
    %14 = vector.broadcast %13 : vector<8x128xi1> to vector<8x128xi1>
    %15 = arith.xori %11, %14 : vector<8x128xi1>
    %16 = arith.andi %15, %9 : vector<8x128xi1>
    %17 = vector.broadcast %5 : i32 to vector<8x128xi32>
    %18 = arith.addi %7, %17 : vector<8x128xi32>
    %19 = arith.select %16, %18, %7 : vector<8x128xi1>, vector<8x128xi32>
    %c16_i32_3 = arith.constant 16 : i32
    %20 = vector.broadcast %c16_i32_3 : i32 to vector<8x128xi32>
    %21 = arith.cmpi slt, %19, %20 : vector<8x128xi32>
    %c0 = arith.constant 0 : index
    %c0_4 = arith.constant 0 : index
    %22 = vector.load %arg2[%c0, %c0_4] : memref<8x1xf32, #tpu.memory_space<vmem>>, vector<8x1xf32>
    %cst = arith.constant 1.000000e+00 : f32
    %23 = vector.broadcast %cst : f32 to vector<8x1xf32>
    %24 = arith.maximumf %22, %23 : vector<8x1xf32>
    %cst_5 = arith.constant 1.000000e+00 : f32
    %25 = vector.broadcast %cst_5 : f32 to vector<8x1xf32>
    %26 = arith.divf %25, %24 : vector<8x1xf32>
    %c0_6 = arith.constant 0 : index
    %c0_7 = arith.constant 0 : index
    %27 = vector.load %arg1[%c0_6, %c0_7] : memref<64x32xf32, #tpu.memory_space<vmem>>, vector<64x32xf32>
    %c0_8 = arith.constant 0 : index
    %c0_9 = arith.constant 0 : index
    %28 = vector.load %arg3[%c0_8, %c0_9] : memref<32x128xbf16, #tpu.memory_space<vmem>>, vector<32x128xbf16>
    %c5 = arith.constant 5 : index
    %c0_10 = arith.constant 0 : index
    %c0_11 = arith.constant 0 : index
    %29 = vector.load %arg4[%c5, %c0_10, %c0_11] : memref<11x32x128xbf16, #tpu.memory_space<vmem>>, vector<1x32x128xbf16>
    %30 = vector.shape_cast %29 : vector<1x32x128xbf16> to vector<32x128xbf16>
    %c0_12 = arith.constant 0 : index
    %c0_13 = arith.constant 0 : index
    %c0_14 = arith.constant 0 : index
    %31 = vector.load %arg5[%c0_12, %c0_13, %c0_14] : memref<7x1x128xf32, #tpu.memory_space<vmem>>, vector<1x1x128xf32>
    %32 = vector.shape_cast %31 : vector<1x1x128xf32> to vector<1x128xf32>
    %33 = arith.truncf %27 : vector<64x32xf32> to vector<64x32xbf16>
    %cst_15 = arith.constant dense<0.000000e+00> : vector<64x128xf32>
    %34 = tpu.matmul %33, %28, %cst_15 {dimension_numbers = #tpu.dot_dimension_numbers<[1], [0], [0], [1], [0, 0, 1, 1], [], []>} : vector<64x32xbf16>, vector<32x128xbf16>, vector<64x128xf32> -> vector<64x128xf32>
    %35 = vector.broadcast %32 : vector<1x128xf32> to vector<64x128xf32>
    %36 = arith.addf %34, %35 : vector<64x128xf32>
    %c0_16 = arith.constant 0 : index
    %c0_17 = arith.constant 0 : index
    %c0_18 = arith.constant 0 : index
    %37 = vector.load %arg6[%c0_16, %c0_17, %c0_18] : memref<12x8x32xf32, #tpu.memory_space<vmem>>, vector<1x8x32xf32>
    %38 = vector.shape_cast %37 : vector<1x8x32xf32> to vector<8x32xf32>
    %c1 = arith.constant 1 : index
    %c0_19 = arith.constant 0 : index
    %c0_20 = arith.constant 0 : index
    %39 = vector.load %arg6[%c1, %c0_19, %c0_20] : memref<12x8x32xf32, #tpu.memory_space<vmem>>, vector<1x8x32xf32>
    %40 = vector.shape_cast %39 : vector<1x8x32xf32> to vector<8x32xf32>
    %41 = vector.extract_strided_slice %36 {offsets = [0, 0], sizes = [8, 128], strides = [1, 1]} : vector<64x128xf32> to vector<8x128xf32>
    %42 = vector.extract_strided_slice %36 {offsets = [56, 0], sizes = [8, 128], strides = [1, 1]} : vector<64x128xf32> to vector<8x128xf32>
    %43 = arith.select %21, %41, %42 : vector<8x128xi1>, vector<8x128xf32>
    %44 = arith.truncf %38 : vector<8x32xf32> to vector<8x32xbf16>
    %cst_21 = arith.constant dense<0.000000e+00> : vector<8x128xf32>
    %45 = tpu.matmul %44, %30, %cst_21 {dimension_numbers = #tpu.dot_dimension_numbers<[1], [0], [0], [1], [0, 0, 1, 1], [], []>} : vector<8x32xbf16>, vector<32x128xbf16>, vector<8x128xf32> -> vector<8x128xf32>
    %46 = arith.addf %43, %45 : vector<8x128xf32>
    %47 = vector.extract_strided_slice %46 {offsets = [0, 0], sizes = [8, 96], strides = [1, 1]} : vector<8x128xf32> to vector<8x96xf32>
    %48 = arith.negf %47 : vector<8x96xf32>
    %49 = math.exp %48 : vector<8x96xf32>
    %cst_22 = arith.constant 1.000000e+00 : f32
    %50 = vector.broadcast %cst_22 : f32 to vector<8x96xf32>
    %51 = arith.addf %50, %49 : vector<8x96xf32>
    %52 = arith.divf %50, %51 : vector<8x96xf32>
    %53 = vector.extract_strided_slice %52 {offsets = [0, 0], sizes = [8, 32], strides = [1, 1]} : vector<8x96xf32> to vector<8x32xf32>
    %54 = vector.extract_strided_slice %52 {offsets = [0, 32], sizes = [8, 32], strides = [1, 1]} : vector<8x96xf32> to vector<8x32xf32>
    %55 = vector.extract_strided_slice %52 {offsets = [0, 64], sizes = [8, 32], strides = [1, 1]} : vector<8x96xf32> to vector<8x32xf32>
    %56 = vector.extract_strided_slice %46 {offsets = [0, 96], sizes = [8, 32], strides = [1, 1]} : vector<8x128xf32> to vector<8x32xf32>
    %57 = math.tanh %56 : vector<8x32xf32>
    %58 = arith.mulf %54, %40 : vector<8x32xf32>
    %59 = arith.mulf %53, %57 : vector<8x32xf32>
    %60 = arith.addf %58, %59 : vector<8x32xf32>
    %61 = math.tanh %60 : vector<8x32xf32>
    %62 = arith.mulf %55, %61 : vector<8x32xf32>
    %63 = vector.extract_strided_slice %36 {offsets = [8, 0], sizes = [8, 128], strides = [1, 1]} : vector<64x128xf32> to vector<8x128xf32>
    %64 = vector.extract_strided_slice %36 {offsets = [48, 0], sizes = [8, 128], strides = [1, 1]} : vector<64x128xf32> to vector<8x128xf32>
    %65 = arith.select %21, %63, %64 : vector<8x128xi1>, vector<8x128xf32>
    %66 = arith.truncf %62 : vector<8x32xf32> to vector<8x32xbf16>
    %cst_23 = arith.constant dense<0.000000e+00> : vector<8x128xf32>
    %67 = tpu.matmul %66, %30, %cst_23 {dimension_numbers = #tpu.dot_dimension_numbers<[1], [0], [0], [1], [0, 0, 1, 1], [], []>} : vector<8x32xbf16>, vector<32x128xbf16>, vector<8x128xf32> -> vector<8x128xf32>
    %68 = arith.addf %65, %67 : vector<8x128xf32>
    %69 = vector.extract_strided_slice %68 {offsets = [0, 0], sizes = [8, 96], strides = [1, 1]} : vector<8x128xf32> to vector<8x96xf32>
    %70 = arith.negf %69 : vector<8x96xf32>
    %71 = math.exp %70 : vector<8x96xf32>
    %cst_24 = arith.constant 1.000000e+00 : f32
    %72 = vector.broadcast %cst_24 : f32 to vector<8x96xf32>
    %73 = arith.addf %72, %71 : vector<8x96xf32>
    %74 = arith.divf %72, %73 : vector<8x96xf32>
    %75 = vector.extract_strided_slice %74 {offsets = [0, 0], sizes = [8, 32], strides = [1, 1]} : vector<8x96xf32> to vector<8x32xf32>
    %76 = vector.extract_strided_slice %74 {offsets = [0, 32], sizes = [8, 32], strides = [1, 1]} : vector<8x96xf32> to vector<8x32xf32>
    %77 = vector.extract_strided_slice %74 {offsets = [0, 64], sizes = [8, 32], strides = [1, 1]} : vector<8x96xf32> to vector<8x32xf32>
    %78 = vector.extract_strided_slice %68 {offsets = [0, 96], sizes = [8, 32], strides = [1, 1]} : vector<8x128xf32> to vector<8x32xf32>
    %79 = math.tanh %78 : vector<8x32xf32>
    %80 = arith.mulf %76, %60 : vector<8x32xf32>
    %81 = arith.mulf %75, %79 : vector<8x32xf32>
    %82 = arith.addf %80, %81 : vector<8x32xf32>
    %83 = math.tanh %82 : vector<8x32xf32>
    %84 = arith.mulf %77, %83 : vector<8x32xf32>
    %85 = vector.extract_strided_slice %36 {offsets = [16, 0], sizes = [8, 128], strides = [1, 1]} : vector<64x128xf32> to vector<8x128xf32>
    %86 = vector.extract_strided_slice %36 {offsets = [40, 0], sizes = [8, 128], strides = [1, 1]} : vector<64x128xf32> to vector<8x128xf32>
    %87 = arith.select %21, %85, %86 : vector<8x128xi1>, vector<8x128xf32>
    %88 = arith.truncf %84 : vector<8x32xf32> to vector<8x32xbf16>
    %cst_25 = arith.constant dense<0.000000e+00> : vector<8x128xf32>
    %89 = tpu.matmul %88, %30, %cst_25 {dimension_numbers = #tpu.dot_dimension_numbers<[1], [0], [0], [1], [0, 0, 1, 1], [], []>} : vector<8x32xbf16>, vector<32x128xbf16>, vector<8x128xf32> -> vector<8x128xf32>
    %90 = arith.addf %87, %89 : vector<8x128xf32>
    %91 = vector.extract_strided_slice %90 {offsets = [0, 0], sizes = [8, 96], strides = [1, 1]} : vector<8x128xf32> to vector<8x96xf32>
    %92 = arith.negf %91 : vector<8x96xf32>
    %93 = math.exp %92 : vector<8x96xf32>
    %cst_26 = arith.constant 1.000000e+00 : f32
    %94 = vector.broadcast %cst_26 : f32 to vector<8x96xf32>
    %95 = arith.addf %94, %93 : vector<8x96xf32>
    %96 = arith.divf %94, %95 : vector<8x96xf32>
    %97 = vector.extract_strided_slice %96 {offsets = [0, 0], sizes = [8, 32], strides = [1, 1]} : vector<8x96xf32> to vector<8x32xf32>
    %98 = vector.extract_strided_slice %96 {offsets = [0, 32], sizes = [8, 32], strides = [1, 1]} : vector<8x96xf32> to vector<8x32xf32>
    %99 = vector.extract_strided_slice %96 {offsets = [0, 64], sizes = [8, 32], strides = [1, 1]} : vector<8x96xf32> to vector<8x32xf32>
    %100 = vector.extract_strided_slice %90 {offsets = [0, 96], sizes = [8, 32], strides = [1, 1]} : vector<8x128xf32> to vector<8x32xf32>
    %101 = math.tanh %100 : vector<8x32xf32>
    %102 = arith.mulf %98, %82 : vector<8x32xf32>
    %103 = arith.mulf %97, %101 : vector<8x32xf32>
    %104 = arith.addf %102, %103 : vector<8x32xf32>
    %105 = math.tanh %104 : vector<8x32xf32>
    %106 = arith.mulf %99, %105 : vector<8x32xf32>
    %107 = vector.extract_strided_slice %36 {offsets = [24, 0], sizes = [8, 128], strides = [1, 1]} : vector<64x128xf32> to vector<8x128xf32>
    %108 = vector.extract_strided_slice %36 {offsets = [32, 0], sizes = [8, 128], strides = [1, 1]} : vector<64x128xf32> to vector<8x128xf32>
    %109 = arith.select %21, %107, %108 : vector<8x128xi1>, vector<8x128xf32>
    %110 = arith.truncf %106 : vector<8x32xf32> to vector<8x32xbf16>
    %cst_27 = arith.constant dense<0.000000e+00> : vector<8x128xf32>
    %111 = tpu.matmul %110, %30, %cst_27 {dimension_numbers = #tpu.dot_dimension_numbers<[1], [0], [0], [1], [0, 0, 1, 1], [], []>} : vector<8x32xbf16>, vector<32x128xbf16>, vector<8x128xf32> -> vector<8x128xf32>
    %112 = arith.addf %109, %111 : vector<8x128xf32>
    %113 = vector.extract_strided_slice %112 {offsets = [0, 0], sizes = [8, 96], strides = [1, 1]} : vector<8x128xf32> to vector<8x96xf32>
    %114 = arith.negf %113 : vector<8x96xf32>
    %115 = math.exp %114 : vector<8x96xf32>
    %cst_28 = arith.constant 1.000000e+00 : f32
    %116 = vector.broadcast %cst_28 : f32 to vector<8x96xf32>
    %117 = arith.addf %116, %115 : vector<8x96xf32>
    %118 = arith.divf %116, %117 : vector<8x96xf32>
    %119 = vector.extract_strided_slice %118 {offsets = [0, 0], sizes = [8, 32], strides = [1, 1]} : vector<8x96xf32> to vector<8x32xf32>
    %120 = vector.extract_strided_slice %118 {offsets = [0, 32], sizes = [8, 32], strides = [1, 1]} : vector<8x96xf32> to vector<8x32xf32>
    %121 = vector.extract_strided_slice %118 {offsets = [0, 64], sizes = [8, 32], strides = [1, 1]} : vector<8x96xf32> to vector<8x32xf32>
    %122 = vector.extract_strided_slice %112 {offsets = [0, 96], sizes = [8, 32], strides = [1, 1]} : vector<8x128xf32> to vector<8x32xf32>
    %123 = math.tanh %122 : vector<8x32xf32>
    %124 = arith.mulf %120, %104 : vector<8x32xf32>
    %125 = arith.mulf %119, %123 : vector<8x32xf32>
    %126 = arith.addf %124, %125 : vector<8x32xf32>
    %127 = math.tanh %126 : vector<8x32xf32>
    %128 = arith.mulf %121, %127 : vector<8x32xf32>
    %129 = vector.extract_strided_slice %36 {offsets = [32, 0], sizes = [8, 128], strides = [1, 1]} : vector<64x128xf32> to vector<8x128xf32>
    %130 = vector.extract_strided_slice %36 {offsets = [24, 0], sizes = [8, 128], strides = [1, 1]} : vector<64x128xf32> to vector<8x128xf32>
    %131 = arith.select %21, %129, %130 : vector<8x128xi1>, vector<8x128xf32>
    %132 = arith.truncf %128 : vector<8x32xf32> to vector<8x32xbf16>
    %cst_29 = arith.constant dense<0.000000e+00> : vector<8x128xf32>
    %133 = tpu.matmul %132, %30, %cst_29 {dimension_numbers = #tpu.dot_dimension_numbers<[1], [0], [0], [1], [0, 0, 1, 1], [], []>} : vector<8x32xbf16>, vector<32x128xbf16>, vector<8x128xf32> -> vector<8x128xf32>
    %134 = arith.addf %131, %133 : vector<8x128xf32>
    %135 = vector.extract_strided_slice %134 {offsets = [0, 0], sizes = [8, 96], strides = [1, 1]} : vector<8x128xf32> to vector<8x96xf32>
    %136 = arith.negf %135 : vector<8x96xf32>
    %137 = math.exp %136 : vector<8x96xf32>
    %cst_30 = arith.constant 1.000000e+00 : f32
    %138 = vector.broadcast %cst_30 : f32 to vector<8x96xf32>
    %139 = arith.addf %138, %137 : vector<8x96xf32>
    %140 = arith.divf %138, %139 : vector<8x96xf32>
    %141 = vector.extract_strided_slice %140 {offsets = [0, 0], sizes = [8, 32], strides = [1, 1]} : vector<8x96xf32> to vector<8x32xf32>
    %142 = vector.extract_strided_slice %140 {offsets = [0, 32], sizes = [8, 32], strides = [1, 1]} : vector<8x96xf32> to vector<8x32xf32>
    %143 = vector.extract_strided_slice %140 {offsets = [0, 64], sizes = [8, 32], strides = [1, 1]} : vector<8x96xf32> to vector<8x32xf32>
    %144 = vector.extract_strided_slice %134 {offsets = [0, 96], sizes = [8, 32], strides = [1, 1]} : vector<8x128xf32> to vector<8x32xf32>
    %145 = math.tanh %144 : vector<8x32xf32>
    %146 = arith.mulf %142, %126 : vector<8x32xf32>
    %147 = arith.mulf %141, %145 : vector<8x32xf32>
    %148 = arith.addf %146, %147 : vector<8x32xf32>
    %149 = math.tanh %148 : vector<8x32xf32>
    %150 = arith.mulf %143, %149 : vector<8x32xf32>
    %151 = vector.extract_strided_slice %36 {offsets = [40, 0], sizes = [8, 128], strides = [1, 1]} : vector<64x128xf32> to vector<8x128xf32>
    %152 = vector.extract_strided_slice %36 {offsets = [16, 0], sizes = [8, 128], strides = [1, 1]} : vector<64x128xf32> to vector<8x128xf32>
    %153 = arith.select %21, %151, %152 : vector<8x128xi1>, vector<8x128xf32>
    %154 = arith.truncf %150 : vector<8x32xf32> to vector<8x32xbf16>
    %cst_31 = arith.constant dense<0.000000e+00> : vector<8x128xf32>
    %155 = tpu.matmul %154, %30, %cst_31 {dimension_numbers = #tpu.dot_dimension_numbers<[1], [0], [0], [1], [0, 0, 1, 1], [], []>} : vector<8x32xbf16>, vector<32x128xbf16>, vector<8x128xf32> -> vector<8x128xf32>
    %156 = arith.addf %153, %155 : vector<8x128xf32>
    %157 = vector.extract_strided_slice %156 {offsets = [0, 0], sizes = [8, 96], strides = [1, 1]} : vector<8x128xf32> to vector<8x96xf32>
    %158 = arith.negf %157 : vector<8x96xf32>
    %159 = math.exp %158 : vector<8x96xf32>
    %cst_32 = arith.constant 1.000000e+00 : f32
    %160 = vector.broadcast %cst_32 : f32 to vector<8x96xf32>
    %161 = arith.addf %160, %159 : vector<8x96xf32>
    %162 = arith.divf %160, %161 : vector<8x96xf32>
    %163 = vector.extract_strided_slice %162 {offsets = [0, 0], sizes = [8, 32], strides = [1, 1]} : vector<8x96xf32> to vector<8x32xf32>
    %164 = vector.extract_strided_slice %162 {offsets = [0, 32], sizes = [8, 32], strides = [1, 1]} : vector<8x96xf32> to vector<8x32xf32>
    %165 = vector.extract_strided_slice %162 {offsets = [0, 64], sizes = [8, 32], strides = [1, 1]} : vector<8x96xf32> to vector<8x32xf32>
    %166 = vector.extract_strided_slice %156 {offsets = [0, 96], sizes = [8, 32], strides = [1, 1]} : vector<8x128xf32> to vector<8x32xf32>
    %167 = math.tanh %166 : vector<8x32xf32>
    %168 = arith.mulf %164, %148 : vector<8x32xf32>
    %169 = arith.mulf %163, %167 : vector<8x32xf32>
    %170 = arith.addf %168, %169 : vector<8x32xf32>
    %171 = math.tanh %170 : vector<8x32xf32>
    %172 = arith.mulf %165, %171 : vector<8x32xf32>
    %173 = vector.extract_strided_slice %36 {offsets = [48, 0], sizes = [8, 128], strides = [1, 1]} : vector<64x128xf32> to vector<8x128xf32>
    %174 = vector.extract_strided_slice %36 {offsets = [8, 0], sizes = [8, 128], strides = [1, 1]} : vector<64x128xf32> to vector<8x128xf32>
    %175 = arith.select %21, %173, %174 : vector<8x128xi1>, vector<8x128xf32>
    %176 = arith.truncf %172 : vector<8x32xf32> to vector<8x32xbf16>
    %cst_33 = arith.constant dense<0.000000e+00> : vector<8x128xf32>
    %177 = tpu.matmul %176, %30, %cst_33 {dimension_numbers = #tpu.dot_dimension_numbers<[1], [0], [0], [1], [0, 0, 1, 1], [], []>} : vector<8x32xbf16>, vector<32x128xbf16>, vector<8x128xf32> -> vector<8x128xf32>
    %178 = arith.addf %175, %177 : vector<8x128xf32>
    %179 = vector.extract_strided_slice %178 {offsets = [0, 0], sizes = [8, 96], strides = [1, 1]} : vector<8x128xf32> to vector<8x96xf32>
    %180 = arith.negf %179 : vector<8x96xf32>
    %181 = math.exp %180 : vector<8x96xf32>
    %cst_34 = arith.constant 1.000000e+00 : f32
    %182 = vector.broadcast %cst_34 : f32 to vector<8x96xf32>
    %183 = arith.addf %182, %181 : vector<8x96xf32>
    %184 = arith.divf %182, %183 : vector<8x96xf32>
    %185 = vector.extract_strided_slice %184 {offsets = [0, 0], sizes = [8, 32], strides = [1, 1]} : vector<8x96xf32> to vector<8x32xf32>
    %186 = vector.extract_strided_slice %184 {offsets = [0, 32], sizes = [8, 32], strides = [1, 1]} : vector<8x96xf32> to vector<8x32xf32>
    %187 = vector.extract_strided_slice %184 {offsets = [0, 64], sizes = [8, 32], strides = [1, 1]} : vector<8x96xf32> to vector<8x32xf32>
    %188 = vector.extract_strided_slice %178 {offsets = [0, 96], sizes = [8, 32], strides = [1, 1]} : vector<8x128xf32> to vector<8x32xf32>
    %189 = math.tanh %188 : vector<8x32xf32>
    %190 = arith.mulf %186, %170 : vector<8x32xf32>
    %191 = arith.mulf %185, %189 : vector<8x32xf32>
    %192 = arith.addf %190, %191 : vector<8x32xf32>
    %193 = math.tanh %192 : vector<8x32xf32>
    %194 = arith.mulf %187, %193 : vector<8x32xf32>
    %195 = vector.extract_strided_slice %36 {offsets = [56, 0], sizes = [8, 128], strides = [1, 1]} : vector<64x128xf32> to vector<8x128xf32>
    %196 = vector.extract_strided_slice %36 {offsets = [0, 0], sizes = [8, 128], strides = [1, 1]} : vector<64x128xf32> to vector<8x128xf32>
    %197 = arith.select %21, %195, %196 : vector<8x128xi1>, vector<8x128xf32>
    %198 = arith.truncf %194 : vector<8x32xf32> to vector<8x32xbf16>
    %cst_35 = arith.constant dense<0.000000e+00> : vector<8x128xf32>
    %199 = tpu.matmul %198, %30, %cst_35 {dimension_numbers = #tpu.dot_dimension_numbers<[1], [0], [0], [1], [0, 0, 1, 1], [], []>} : vector<8x32xbf16>, vector<32x128xbf16>, vector<8x128xf32> -> vector<8x128xf32>
    %200 = arith.addf %197, %199 : vector<8x128xf32>
    %201 = vector.extract_strided_slice %200 {offsets = [0, 0], sizes = [8, 96], strides = [1, 1]} : vector<8x128xf32> to vector<8x96xf32>
    %202 = arith.negf %201 : vector<8x96xf32>
    %203 = math.exp %202 : vector<8x96xf32>
    %cst_36 = arith.constant 1.000000e+00 : f32
    %204 = vector.broadcast %cst_36 : f32 to vector<8x96xf32>
    %205 = arith.addf %204, %203 : vector<8x96xf32>
    %206 = arith.divf %204, %205 : vector<8x96xf32>
    %207 = vector.extract_strided_slice %206 {offsets = [0, 0], sizes = [8, 32], strides = [1, 1]} : vector<8x96xf32> to vector<8x32xf32>
    %208 = vector.extract_strided_slice %206 {offsets = [0, 32], sizes = [8, 32], strides = [1, 1]} : vector<8x96xf32> to vector<8x32xf32>
    %209 = vector.extract_strided_slice %206 {offsets = [0, 64], sizes = [8, 32], strides = [1, 1]} : vector<8x96xf32> to vector<8x32xf32>
    %210 = vector.extract_strided_slice %200 {offsets = [0, 96], sizes = [8, 32], strides = [1, 1]} : vector<8x128xf32> to vector<8x32xf32>
    %211 = math.tanh %210 : vector<8x32xf32>
    %212 = arith.mulf %208, %192 : vector<8x32xf32>
    %213 = arith.mulf %207, %211 : vector<8x32xf32>
    %214 = arith.addf %212, %213 : vector<8x32xf32>
    %215 = math.tanh %214 : vector<8x32xf32>
    %216 = arith.mulf %209, %215 : vector<8x32xf32>
    %217 = arith.select %2, %62, %216 : vector<8x32xi1>, vector<8x32xf32>
    %218 = arith.select %2, %84, %194 : vector<8x32xi1>, vector<8x32xf32>
    %219 = arith.select %2, %106, %172 : vector<8x32xi1>, vector<8x32xf32>
    %220 = arith.select %2, %128, %150 : vector<8x32xi1>, vector<8x32xf32>
    %221 = arith.select %2, %150, %128 : vector<8x32xi1>, vector<8x32xf32>
    %222 = arith.select %2, %172, %106 : vector<8x32xi1>, vector<8x32xf32>
    %223 = arith.select %2, %194, %84 : vector<8x32xi1>, vector<8x32xf32>
    %224 = arith.select %2, %216, %62 : vector<8x32xi1>, vector<8x32xf32>
    %225 = tpu.concatenate %217, %218, %219, %220, %221, %222, %223, %224 in 0 : vector<8x32xf32>, vector<8x32xf32>, vector<8x32xf32>, vector<8x32xf32>, vector<8x32xf32>, vector<8x32xf32>, vector<8x32xf32>, vector<8x32xf32> -> vector<64x32xf32>
    %c0_37 = arith.constant 0 : index
    %c0_38 = arith.constant 0 : index
    %c0_39 = arith.constant 0 : index
    %226 = vector.load %arg4[%c0_37, %c0_38, %c0_39] : memref<11x32x128xbf16, #tpu.memory_space<vmem>>, vector<1x32x128xbf16>
    %227 = vector.shape_cast %226 : vector<1x32x128xbf16> to vector<32x128xbf16>
    %c6 = arith.constant 6 : index
    %c0_40 = arith.constant 0 : index
    %c0_41 = arith.constant 0 : index
    %228 = vector.load %arg4[%c6, %c0_40, %c0_41] : memref<11x32x128xbf16, #tpu.memory_space<vmem>>, vector<1x32x128xbf16>
    %229 = vector.shape_cast %228 : vector<1x32x128xbf16> to vector<32x128xbf16>
    %c1_42 = arith.constant 1 : index
    %c0_43 = arith.constant 0 : index
    %c0_44 = arith.constant 0 : index
    %230 = vector.load %arg5[%c1_42, %c0_43, %c0_44] : memref<7x1x128xf32, #tpu.memory_space<vmem>>, vector<1x1x128xf32>
    %231 = vector.shape_cast %230 : vector<1x1x128xf32> to vector<1x128xf32>
    %232 = arith.truncf %225 : vector<64x32xf32> to vector<64x32xbf16>
    %cst_45 = arith.constant dense<0.000000e+00> : vector<64x128xf32>
    %233 = tpu.matmul %232, %227, %cst_45 {dimension_numbers = #tpu.dot_dimension_numbers<[1], [0], [0], [1], [0, 0, 1, 1], [], []>} : vector<64x32xbf16>, vector<32x128xbf16>, vector<64x128xf32> -> vector<64x128xf32>
    %234 = vector.broadcast %231 : vector<1x128xf32> to vector<64x128xf32>
    %235 = arith.addf %233, %234 : vector<64x128xf32>
    %c2 = arith.constant 2 : index
    %c0_46 = arith.constant 0 : index
    %c0_47 = arith.constant 0 : index
    %236 = vector.load %arg6[%c2, %c0_46, %c0_47] : memref<12x8x32xf32, #tpu.memory_space<vmem>>, vector<1x8x32xf32>
    %237 = vector.shape_cast %236 : vector<1x8x32xf32> to vector<8x32xf32>
    %c3 = arith.constant 3 : index
    %c0_48 = arith.constant 0 : index
    %c0_49 = arith.constant 0 : index
    %238 = vector.load %arg6[%c3, %c0_48, %c0_49] : memref<12x8x32xf32, #tpu.memory_space<vmem>>, vector<1x8x32xf32>
    %239 = vector.shape_cast %238 : vector<1x8x32xf32> to vector<8x32xf32>
    %240 = vector.extract_strided_slice %235 {offsets = [0, 0], sizes = [8, 128], strides = [1, 1]} : vector<64x128xf32> to vector<8x128xf32>
    %241 = vector.extract_strided_slice %235 {offsets = [56, 0], sizes = [8, 128], strides = [1, 1]} : vector<64x128xf32> to vector<8x128xf32>
    %242 = arith.select %21, %240, %241 : vector<8x128xi1>, vector<8x128xf32>
    %243 = arith.truncf %237 : vector<8x32xf32> to vector<8x32xbf16>
    %cst_50 = arith.constant dense<0.000000e+00> : vector<8x128xf32>
    %244 = tpu.matmul %243, %229, %cst_50 {dimension_numbers = #tpu.dot_dimension_numbers<[1], [0], [0], [1], [0, 0, 1, 1], [], []>} : vector<8x32xbf16>, vector<32x128xbf16>, vector<8x128xf32> -> vector<8x128xf32>
    %245 = arith.addf %242, %244 : vector<8x128xf32>
    %246 = vector.extract_strided_slice %245 {offsets = [0, 0], sizes = [8, 96], strides = [1, 1]} : vector<8x128xf32> to vector<8x96xf32>
    %247 = arith.negf %246 : vector<8x96xf32>
    %248 = math.exp %247 : vector<8x96xf32>
    %cst_51 = arith.constant 1.000000e+00 : f32
    %249 = vector.broadcast %cst_51 : f32 to vector<8x96xf32>
    %250 = arith.addf %249, %248 : vector<8x96xf32>
    %251 = arith.divf %249, %250 : vector<8x96xf32>
    %252 = vector.extract_strided_slice %251 {offsets = [0, 0], sizes = [8, 32], strides = [1, 1]} : vector<8x96xf32> to vector<8x32xf32>
    %253 = vector.extract_strided_slice %251 {offsets = [0, 32], sizes = [8, 32], strides = [1, 1]} : vector<8x96xf32> to vector<8x32xf32>
    %254 = vector.extract_strided_slice %251 {offsets = [0, 64], sizes = [8, 32], strides = [1, 1]} : vector<8x96xf32> to vector<8x32xf32>
    %255 = vector.extract_strided_slice %245 {offsets = [0, 96], sizes = [8, 32], strides = [1, 1]} : vector<8x128xf32> to vector<8x32xf32>
    %256 = math.tanh %255 : vector<8x32xf32>
    %257 = arith.mulf %253, %239 : vector<8x32xf32>
    %258 = arith.mulf %252, %256 : vector<8x32xf32>
    %259 = arith.addf %257, %258 : vector<8x32xf32>
    %260 = math.tanh %259 : vector<8x32xf32>
    %261 = arith.mulf %254, %260 : vector<8x32xf32>
    %262 = vector.extract_strided_slice %235 {offsets = [8, 0], sizes = [8, 128], strides = [1, 1]} : vector<64x128xf32> to vector<8x128xf32>
    %263 = vector.extract_strided_slice %235 {offsets = [48, 0], sizes = [8, 128], strides = [1, 1]} : vector<64x128xf32> to vector<8x128xf32>
    %264 = arith.select %21, %262, %263 : vector<8x128xi1>, vector<8x128xf32>
    %265 = arith.truncf %261 : vector<8x32xf32> to vector<8x32xbf16>
    %cst_52 = arith.constant dense<0.000000e+00> : vector<8x128xf32>
    %266 = tpu.matmul %265, %229, %cst_52 {dimension_numbers = #tpu.dot_dimension_numbers<[1], [0], [0], [1], [0, 0, 1, 1], [], []>} : vector<8x32xbf16>, vector<32x128xbf16>, vector<8x128xf32> -> vector<8x128xf32>
    %267 = arith.addf %264, %266 : vector<8x128xf32>
    %268 = vector.extract_strided_slice %267 {offsets = [0, 0], sizes = [8, 96], strides = [1, 1]} : vector<8x128xf32> to vector<8x96xf32>
    %269 = arith.negf %268 : vector<8x96xf32>
    %270 = math.exp %269 : vector<8x96xf32>
    %cst_53 = arith.constant 1.000000e+00 : f32
    %271 = vector.broadcast %cst_53 : f32 to vector<8x96xf32>
    %272 = arith.addf %271, %270 : vector<8x96xf32>
    %273 = arith.divf %271, %272 : vector<8x96xf32>
    %274 = vector.extract_strided_slice %273 {offsets = [0, 0], sizes = [8, 32], strides = [1, 1]} : vector<8x96xf32> to vector<8x32xf32>
    %275 = vector.extract_strided_slice %273 {offsets = [0, 32], sizes = [8, 32], strides = [1, 1]} : vector<8x96xf32> to vector<8x32xf32>
    %276 = vector.extract_strided_slice %273 {offsets = [0, 64], sizes = [8, 32], strides = [1, 1]} : vector<8x96xf32> to vector<8x32xf32>
    %277 = vector.extract_strided_slice %267 {offsets = [0, 96], sizes = [8, 32], strides = [1, 1]} : vector<8x128xf32> to vector<8x32xf32>
    %278 = math.tanh %277 : vector<8x32xf32>
    %279 = arith.mulf %275, %259 : vector<8x32xf32>
    %280 = arith.mulf %274, %278 : vector<8x32xf32>
    %281 = arith.addf %279, %280 : vector<8x32xf32>
    %282 = math.tanh %281 : vector<8x32xf32>
    %283 = arith.mulf %276, %282 : vector<8x32xf32>
    %284 = vector.extract_strided_slice %235 {offsets = [16, 0], sizes = [8, 128], strides = [1, 1]} : vector<64x128xf32> to vector<8x128xf32>
    %285 = vector.extract_strided_slice %235 {offsets = [40, 0], sizes = [8, 128], strides = [1, 1]} : vector<64x128xf32> to vector<8x128xf32>
    %286 = arith.select %21, %284, %285 : vector<8x128xi1>, vector<8x128xf32>
    %287 = arith.truncf %283 : vector<8x32xf32> to vector<8x32xbf16>
    %cst_54 = arith.constant dense<0.000000e+00> : vector<8x128xf32>
    %288 = tpu.matmul %287, %229, %cst_54 {dimension_numbers = #tpu.dot_dimension_numbers<[1], [0], [0], [1], [0, 0, 1, 1], [], []>} : vector<8x32xbf16>, vector<32x128xbf16>, vector<8x128xf32> -> vector<8x128xf32>
    %289 = arith.addf %286, %288 : vector<8x128xf32>
    %290 = vector.extract_strided_slice %289 {offsets = [0, 0], sizes = [8, 96], strides = [1, 1]} : vector<8x128xf32> to vector<8x96xf32>
    %291 = arith.negf %290 : vector<8x96xf32>
    %292 = math.exp %291 : vector<8x96xf32>
    %cst_55 = arith.constant 1.000000e+00 : f32
    %293 = vector.broadcast %cst_55 : f32 to vector<8x96xf32>
    %294 = arith.addf %293, %292 : vector<8x96xf32>
    %295 = arith.divf %293, %294 : vector<8x96xf32>
    %296 = vector.extract_strided_slice %295 {offsets = [0, 0], sizes = [8, 32], strides = [1, 1]} : vector<8x96xf32> to vector<8x32xf32>
    %297 = vector.extract_strided_slice %295 {offsets = [0, 32], sizes = [8, 32], strides = [1, 1]} : vector<8x96xf32> to vector<8x32xf32>
    %298 = vector.extract_strided_slice %295 {offsets = [0, 64], sizes = [8, 32], strides = [1, 1]} : vector<8x96xf32> to vector<8x32xf32>
    %299 = vector.extract_strided_slice %289 {offsets = [0, 96], sizes = [8, 32], strides = [1, 1]} : vector<8x128xf32> to vector<8x32xf32>
    %300 = math.tanh %299 : vector<8x32xf32>
    %301 = arith.mulf %297, %281 : vector<8x32xf32>
    %302 = arith.mulf %296, %300 : vector<8x32xf32>
    %303 = arith.addf %301, %302 : vector<8x32xf32>
    %304 = math.tanh %303 : vector<8x32xf32>
    %305 = arith.mulf %298, %304 : vector<8x32xf32>
    %306 = vector.extract_strided_slice %235 {offsets = [24, 0], sizes = [8, 128], strides = [1, 1]} : vector<64x128xf32> to vector<8x128xf32>
    %307 = vector.extract_strided_slice %235 {offsets = [32, 0], sizes = [8, 128], strides = [1, 1]} : vector<64x128xf32> to vector<8x128xf32>
    %308 = arith.select %21, %306, %307 : vector<8x128xi1>, vector<8x128xf32>
    %309 = arith.truncf %305 : vector<8x32xf32> to vector<8x32xbf16>
    %cst_56 = arith.constant dense<0.000000e+00> : vector<8x128xf32>
    %310 = tpu.matmul %309, %229, %cst_56 {dimension_numbers = #tpu.dot_dimension_numbers<[1], [0], [0], [1], [0, 0, 1, 1], [], []>} : vector<8x32xbf16>, vector<32x128xbf16>, vector<8x128xf32> -> vector<8x128xf32>
    %311 = arith.addf %308, %310 : vector<8x128xf32>
    %312 = vector.extract_strided_slice %311 {offsets = [0, 0], sizes = [8, 96], strides = [1, 1]} : vector<8x128xf32> to vector<8x96xf32>
    %313 = arith.negf %312 : vector<8x96xf32>
    %314 = math.exp %313 : vector<8x96xf32>
    %cst_57 = arith.constant 1.000000e+00 : f32
    %315 = vector.broadcast %cst_57 : f32 to vector<8x96xf32>
    %316 = arith.addf %315, %314 : vector<8x96xf32>
    %317 = arith.divf %315, %316 : vector<8x96xf32>
    %318 = vector.extract_strided_slice %317 {offsets = [0, 0], sizes = [8, 32], strides = [1, 1]} : vector<8x96xf32> to vector<8x32xf32>
    %319 = vector.extract_strided_slice %317 {offsets = [0, 32], sizes = [8, 32], strides = [1, 1]} : vector<8x96xf32> to vector<8x32xf32>
    %320 = vector.extract_strided_slice %317 {offsets = [0, 64], sizes = [8, 32], strides = [1, 1]} : vector<8x96xf32> to vector<8x32xf32>
    %321 = vector.extract_strided_slice %311 {offsets = [0, 96], sizes = [8, 32], strides = [1, 1]} : vector<8x128xf32> to vector<8x32xf32>
    %322 = math.tanh %321 : vector<8x32xf32>
    %323 = arith.mulf %319, %303 : vector<8x32xf32>
    %324 = arith.mulf %318, %322 : vector<8x32xf32>
    %325 = arith.addf %323, %324 : vector<8x32xf32>
    %326 = math.tanh %325 : vector<8x32xf32>
    %327 = arith.mulf %320, %326 : vector<8x32xf32>
    %328 = vector.extract_strided_slice %235 {offsets = [32, 0], sizes = [8, 128], strides = [1, 1]} : vector<64x128xf32> to vector<8x128xf32>
    %329 = vector.extract_strided_slice %235 {offsets = [24, 0], sizes = [8, 128], strides = [1, 1]} : vector<64x128xf32> to vector<8x128xf32>
    %330 = arith.select %21, %328, %329 : vector<8x128xi1>, vector<8x128xf32>
    %331 = arith.truncf %327 : vector<8x32xf32> to vector<8x32xbf16>
    %cst_58 = arith.constant dense<0.000000e+00> : vector<8x128xf32>
    %332 = tpu.matmul %331, %229, %cst_58 {dimension_numbers = #tpu.dot_dimension_numbers<[1], [0], [0], [1], [0, 0, 1, 1], [], []>} : vector<8x32xbf16>, vector<32x128xbf16>, vector<8x128xf32> -> vector<8x128xf32>
    %333 = arith.addf %330, %332 : vector<8x128xf32>
    %334 = vector.extract_strided_slice %333 {offsets = [0, 0], sizes = [8, 96], strides = [1, 1]} : vector<8x128xf32> to vector<8x96xf32>
    %335 = arith.negf %334 : vector<8x96xf32>
    %336 = math.exp %335 : vector<8x96xf32>
    %cst_59 = arith.constant 1.000000e+00 : f32
    %337 = vector.broadcast %cst_59 : f32 to vector<8x96xf32>
    %338 = arith.addf %337, %336 : vector<8x96xf32>
    %339 = arith.divf %337, %338 : vector<8x96xf32>
    %340 = vector.extract_strided_slice %339 {offsets = [0, 0], sizes = [8, 32], strides = [1, 1]} : vector<8x96xf32> to vector<8x32xf32>
    %341 = vector.extract_strided_slice %339 {offsets = [0, 32], sizes = [8, 32], strides = [1, 1]} : vector<8x96xf32> to vector<8x32xf32>
    %342 = vector.extract_strided_slice %339 {offsets = [0, 64], sizes = [8, 32], strides = [1, 1]} : vector<8x96xf32> to vector<8x32xf32>
    %343 = vector.extract_strided_slice %333 {offsets = [0, 96], sizes = [8, 32], strides = [1, 1]} : vector<8x128xf32> to vector<8x32xf32>
    %344 = math.tanh %343 : vector<8x32xf32>
    %345 = arith.mulf %341, %325 : vector<8x32xf32>
    %346 = arith.mulf %340, %344 : vector<8x32xf32>
    %347 = arith.addf %345, %346 : vector<8x32xf32>
    %348 = math.tanh %347 : vector<8x32xf32>
    %349 = arith.mulf %342, %348 : vector<8x32xf32>
    %350 = vector.extract_strided_slice %235 {offsets = [40, 0], sizes = [8, 128], strides = [1, 1]} : vector<64x128xf32> to vector<8x128xf32>
    %351 = vector.extract_strided_slice %235 {offsets = [16, 0], sizes = [8, 128], strides = [1, 1]} : vector<64x128xf32> to vector<8x128xf32>
    %352 = arith.select %21, %350, %351 : vector<8x128xi1>, vector<8x128xf32>
    %353 = arith.truncf %349 : vector<8x32xf32> to vector<8x32xbf16>
    %cst_60 = arith.constant dense<0.000000e+00> : vector<8x128xf32>
    %354 = tpu.matmul %353, %229, %cst_60 {dimension_numbers = #tpu.dot_dimension_numbers<[1], [0], [0], [1], [0, 0, 1, 1], [], []>} : vector<8x32xbf16>, vector<32x128xbf16>, vector<8x128xf32> -> vector<8x128xf32>
    %355 = arith.addf %352, %354 : vector<8x128xf32>
    %356 = vector.extract_strided_slice %355 {offsets = [0, 0], sizes = [8, 96], strides = [1, 1]} : vector<8x128xf32> to vector<8x96xf32>
    %357 = arith.negf %356 : vector<8x96xf32>
    %358 = math.exp %357 : vector<8x96xf32>
    %cst_61 = arith.constant 1.000000e+00 : f32
    %359 = vector.broadcast %cst_61 : f32 to vector<8x96xf32>
    %360 = arith.addf %359, %358 : vector<8x96xf32>
    %361 = arith.divf %359, %360 : vector<8x96xf32>
    %362 = vector.extract_strided_slice %361 {offsets = [0, 0], sizes = [8, 32], strides = [1, 1]} : vector<8x96xf32> to vector<8x32xf32>
    %363 = vector.extract_strided_slice %361 {offsets = [0, 32], sizes = [8, 32], strides = [1, 1]} : vector<8x96xf32> to vector<8x32xf32>
    %364 = vector.extract_strided_slice %361 {offsets = [0, 64], sizes = [8, 32], strides = [1, 1]} : vector<8x96xf32> to vector<8x32xf32>
    %365 = vector.extract_strided_slice %355 {offsets = [0, 96], sizes = [8, 32], strides = [1, 1]} : vector<8x128xf32> to vector<8x32xf32>
    %366 = math.tanh %365 : vector<8x32xf32>
    %367 = arith.mulf %363, %347 : vector<8x32xf32>
    %368 = arith.mulf %362, %366 : vector<8x32xf32>
    %369 = arith.addf %367, %368 : vector<8x32xf32>
    %370 = math.tanh %369 : vector<8x32xf32>
    %371 = arith.mulf %364, %370 : vector<8x32xf32>
    %372 = vector.extract_strided_slice %235 {offsets = [48, 0], sizes = [8, 128], strides = [1, 1]} : vector<64x128xf32> to vector<8x128xf32>
    %373 = vector.extract_strided_slice %235 {offsets = [8, 0], sizes = [8, 128], strides = [1, 1]} : vector<64x128xf32> to vector<8x128xf32>
    %374 = arith.select %21, %372, %373 : vector<8x128xi1>, vector<8x128xf32>
    %375 = arith.truncf %371 : vector<8x32xf32> to vector<8x32xbf16>
    %cst_62 = arith.constant dense<0.000000e+00> : vector<8x128xf32>
    %376 = tpu.matmul %375, %229, %cst_62 {dimension_numbers = #tpu.dot_dimension_numbers<[1], [0], [0], [1], [0, 0, 1, 1], [], []>} : vector<8x32xbf16>, vector<32x128xbf16>, vector<8x128xf32> -> vector<8x128xf32>
    %377 = arith.addf %374, %376 : vector<8x128xf32>
    %378 = vector.extract_strided_slice %377 {offsets = [0, 0], sizes = [8, 96], strides = [1, 1]} : vector<8x128xf32> to vector<8x96xf32>
    %379 = arith.negf %378 : vector<8x96xf32>
    %380 = math.exp %379 : vector<8x96xf32>
    %cst_63 = arith.constant 1.000000e+00 : f32
    %381 = vector.broadcast %cst_63 : f32 to vector<8x96xf32>
    %382 = arith.addf %381, %380 : vector<8x96xf32>
    %383 = arith.divf %381, %382 : vector<8x96xf32>
    %384 = vector.extract_strided_slice %383 {offsets = [0, 0], sizes = [8, 32], strides = [1, 1]} : vector<8x96xf32> to vector<8x32xf32>
    %385 = vector.extract_strided_slice %383 {offsets = [0, 32], sizes = [8, 32], strides = [1, 1]} : vector<8x96xf32> to vector<8x32xf32>
    %386 = vector.extract_strided_slice %383 {offsets = [0, 64], sizes = [8, 32], strides = [1, 1]} : vector<8x96xf32> to vector<8x32xf32>
    %387 = vector.extract_strided_slice %377 {offsets = [0, 96], sizes = [8, 32], strides = [1, 1]} : vector<8x128xf32> to vector<8x32xf32>
    %388 = math.tanh %387 : vector<8x32xf32>
    %389 = arith.mulf %385, %369 : vector<8x32xf32>
    %390 = arith.mulf %384, %388 : vector<8x32xf32>
    %391 = arith.addf %389, %390 : vector<8x32xf32>
    %392 = math.tanh %391 : vector<8x32xf32>
    %393 = arith.mulf %386, %392 : vector<8x32xf32>
    %394 = vector.extract_strided_slice %235 {offsets = [56, 0], sizes = [8, 128], strides = [1, 1]} : vector<64x128xf32> to vector<8x128xf32>
    %395 = vector.extract_strided_slice %235 {offsets = [0, 0], sizes = [8, 128], strides = [1, 1]} : vector<64x128xf32> to vector<8x128xf32>
    %396 = arith.select %21, %394, %395 : vector<8x128xi1>, vector<8x128xf32>
    %397 = arith.truncf %393 : vector<8x32xf32> to vector<8x32xbf16>
    %cst_64 = arith.constant dense<0.000000e+00> : vector<8x128xf32>
    %398 = tpu.matmul %397, %229, %cst_64 {dimension_numbers = #tpu.dot_dimension_numbers<[1], [0], [0], [1], [0, 0, 1, 1], [], []>} : vector<8x32xbf16>, vector<32x128xbf16>, vector<8x128xf32> -> vector<8x128xf32>
    %399 = arith.addf %396, %398 : vector<8x128xf32>
    %400 = vector.extract_strided_slice %399 {offsets = [0, 0], sizes = [8, 96], strides = [1, 1]} : vector<8x128xf32> to vector<8x96xf32>
    %401 = arith.negf %400 : vector<8x96xf32>
    %402 = math.exp %401 : vector<8x96xf32>
    %cst_65 = arith.constant 1.000000e+00 : f32
    %403 = vector.broadcast %cst_65 : f32 to vector<8x96xf32>
    %404 = arith.addf %403, %402 : vector<8x96xf32>
    %405 = arith.divf %403, %404 : vector<8x96xf32>
    %406 = vector.extract_strided_slice %405 {offsets = [0, 0], sizes = [8, 32], strides = [1, 1]} : vector<8x96xf32> to vector<8x32xf32>
    %407 = vector.extract_strided_slice %405 {offsets = [0, 32], sizes = [8, 32], strides = [1, 1]} : vector<8x96xf32> to vector<8x32xf32>
    %408 = vector.extract_strided_slice %405 {offsets = [0, 64], sizes = [8, 32], strides = [1, 1]} : vector<8x96xf32> to vector<8x32xf32>
    %409 = vector.extract_strided_slice %399 {offsets = [0, 96], sizes = [8, 32], strides = [1, 1]} : vector<8x128xf32> to vector<8x32xf32>
    %410 = math.tanh %409 : vector<8x32xf32>
    %411 = arith.mulf %407, %391 : vector<8x32xf32>
    %412 = arith.mulf %406, %410 : vector<8x32xf32>
    %413 = arith.addf %411, %412 : vector<8x32xf32>
    %414 = math.tanh %413 : vector<8x32xf32>
    %415 = arith.mulf %408, %414 : vector<8x32xf32>
    %416 = arith.select %2, %261, %415 : vector<8x32xi1>, vector<8x32xf32>
    %417 = arith.select %2, %283, %393 : vector<8x32xi1>, vector<8x32xf32>
    %418 = arith.select %2, %305, %371 : vector<8x32xi1>, vector<8x32xf32>
    %419 = arith.select %2, %327, %349 : vector<8x32xi1>, vector<8x32xf32>
    %420 = arith.select %2, %349, %327 : vector<8x32xi1>, vector<8x32xf32>
    %421 = arith.select %2, %371, %305 : vector<8x32xi1>, vector<8x32xf32>
    %422 = arith.select %2, %393, %283 : vector<8x32xi1>, vector<8x32xf32>
    %423 = arith.select %2, %415, %261 : vector<8x32xi1>, vector<8x32xf32>
    %424 = tpu.concatenate %416, %417, %418, %419, %420, %421, %422, %423 in 0 : vector<8x32xf32>, vector<8x32xf32>, vector<8x32xf32>, vector<8x32xf32>, vector<8x32xf32>, vector<8x32xf32>, vector<8x32xf32>, vector<8x32xf32> -> vector<64x32xf32>
    %c1_66 = arith.constant 1 : index
    %c0_67 = arith.constant 0 : index
    %c0_68 = arith.constant 0 : index
    %425 = vector.load %arg4[%c1_66, %c0_67, %c0_68] : memref<11x32x128xbf16, #tpu.memory_space<vmem>>, vector<1x32x128xbf16>
    %426 = vector.shape_cast %425 : vector<1x32x128xbf16> to vector<32x128xbf16>
    %c7 = arith.constant 7 : index
    %c0_69 = arith.constant 0 : index
    %c0_70 = arith.constant 0 : index
    %427 = vector.load %arg4[%c7, %c0_69, %c0_70] : memref<11x32x128xbf16, #tpu.memory_space<vmem>>, vector<1x32x128xbf16>
    %428 = vector.shape_cast %427 : vector<1x32x128xbf16> to vector<32x128xbf16>
    %c2_71 = arith.constant 2 : index
    %c0_72 = arith.constant 0 : index
    %c0_73 = arith.constant 0 : index
    %429 = vector.load %arg5[%c2_71, %c0_72, %c0_73] : memref<7x1x128xf32, #tpu.memory_space<vmem>>, vector<1x1x128xf32>
    %430 = vector.shape_cast %429 : vector<1x1x128xf32> to vector<1x128xf32>
    %431 = arith.truncf %424 : vector<64x32xf32> to vector<64x32xbf16>
    %cst_74 = arith.constant dense<0.000000e+00> : vector<64x128xf32>
    %432 = tpu.matmul %431, %426, %cst_74 {dimension_numbers = #tpu.dot_dimension_numbers<[1], [0], [0], [1], [0, 0, 1, 1], [], []>} : vector<64x32xbf16>, vector<32x128xbf16>, vector<64x128xf32> -> vector<64x128xf32>
    %433 = vector.broadcast %430 : vector<1x128xf32> to vector<64x128xf32>
    %434 = arith.addf %432, %433 : vector<64x128xf32>
    %c4 = arith.constant 4 : index
    %c0_75 = arith.constant 0 : index
    %c0_76 = arith.constant 0 : index
    %435 = vector.load %arg6[%c4, %c0_75, %c0_76] : memref<12x8x32xf32, #tpu.memory_space<vmem>>, vector<1x8x32xf32>
    %436 = vector.shape_cast %435 : vector<1x8x32xf32> to vector<8x32xf32>
    %c5_77 = arith.constant 5 : index
    %c0_78 = arith.constant 0 : index
    %c0_79 = arith.constant 0 : index
    %437 = vector.load %arg6[%c5_77, %c0_78, %c0_79] : memref<12x8x32xf32, #tpu.memory_space<vmem>>, vector<1x8x32xf32>
    %438 = vector.shape_cast %437 : vector<1x8x32xf32> to vector<8x32xf32>
    %439 = vector.extract_strided_slice %434 {offsets = [0, 0], sizes = [8, 128], strides = [1, 1]} : vector<64x128xf32> to vector<8x128xf32>
    %440 = vector.extract_strided_slice %434 {offsets = [56, 0], sizes = [8, 128], strides = [1, 1]} : vector<64x128xf32> to vector<8x128xf32>
    %441 = arith.select %21, %439, %440 : vector<8x128xi1>, vector<8x128xf32>
    %442 = arith.truncf %436 : vector<8x32xf32> to vector<8x32xbf16>
    %cst_80 = arith.constant dense<0.000000e+00> : vector<8x128xf32>
    %443 = tpu.matmul %442, %428, %cst_80 {dimension_numbers = #tpu.dot_dimension_numbers<[1], [0], [0], [1], [0, 0, 1, 1], [], []>} : vector<8x32xbf16>, vector<32x128xbf16>, vector<8x128xf32> -> vector<8x128xf32>
    %444 = arith.addf %441, %443 : vector<8x128xf32>
    %445 = vector.extract_strided_slice %444 {offsets = [0, 0], sizes = [8, 96], strides = [1, 1]} : vector<8x128xf32> to vector<8x96xf32>
    %446 = arith.negf %445 : vector<8x96xf32>
    %447 = math.exp %446 : vector<8x96xf32>
    %cst_81 = arith.constant 1.000000e+00 : f32
    %448 = vector.broadcast %cst_81 : f32 to vector<8x96xf32>
    %449 = arith.addf %448, %447 : vector<8x96xf32>
    %450 = arith.divf %448, %449 : vector<8x96xf32>
    %451 = vector.extract_strided_slice %450 {offsets = [0, 0], sizes = [8, 32], strides = [1, 1]} : vector<8x96xf32> to vector<8x32xf32>
    %452 = vector.extract_strided_slice %450 {offsets = [0, 32], sizes = [8, 32], strides = [1, 1]} : vector<8x96xf32> to vector<8x32xf32>
    %453 = vector.extract_strided_slice %450 {offsets = [0, 64], sizes = [8, 32], strides = [1, 1]} : vector<8x96xf32> to vector<8x32xf32>
    %454 = vector.extract_strided_slice %444 {offsets = [0, 96], sizes = [8, 32], strides = [1, 1]} : vector<8x128xf32> to vector<8x32xf32>
    %455 = math.tanh %454 : vector<8x32xf32>
    %456 = arith.mulf %452, %438 : vector<8x32xf32>
    %457 = arith.mulf %451, %455 : vector<8x32xf32>
    %458 = arith.addf %456, %457 : vector<8x32xf32>
    %459 = math.tanh %458 : vector<8x32xf32>
    %460 = arith.mulf %453, %459 : vector<8x32xf32>
    %461 = vector.extract_strided_slice %434 {offsets = [8, 0], sizes = [8, 128], strides = [1, 1]} : vector<64x128xf32> to vector<8x128xf32>
    %462 = vector.extract_strided_slice %434 {offsets = [48, 0], sizes = [8, 128], strides = [1, 1]} : vector<64x128xf32> to vector<8x128xf32>
    %463 = arith.select %21, %461, %462 : vector<8x128xi1>, vector<8x128xf32>
    %464 = arith.truncf %460 : vector<8x32xf32> to vector<8x32xbf16>
    %cst_82 = arith.constant dense<0.000000e+00> : vector<8x128xf32>
    %465 = tpu.matmul %464, %428, %cst_82 {dimension_numbers = #tpu.dot_dimension_numbers<[1], [0], [0], [1], [0, 0, 1, 1], [], []>} : vector<8x32xbf16>, vector<32x128xbf16>, vector<8x128xf32> -> vector<8x128xf32>
    %466 = arith.addf %463, %465 : vector<8x128xf32>
    %467 = vector.extract_strided_slice %466 {offsets = [0, 0], sizes = [8, 96], strides = [1, 1]} : vector<8x128xf32> to vector<8x96xf32>
    %468 = arith.negf %467 : vector<8x96xf32>
    %469 = math.exp %468 : vector<8x96xf32>
    %cst_83 = arith.constant 1.000000e+00 : f32
    %470 = vector.broadcast %cst_83 : f32 to vector<8x96xf32>
    %471 = arith.addf %470, %469 : vector<8x96xf32>
    %472 = arith.divf %470, %471 : vector<8x96xf32>
    %473 = vector.extract_strided_slice %472 {offsets = [0, 0], sizes = [8, 32], strides = [1, 1]} : vector<8x96xf32> to vector<8x32xf32>
    %474 = vector.extract_strided_slice %472 {offsets = [0, 32], sizes = [8, 32], strides = [1, 1]} : vector<8x96xf32> to vector<8x32xf32>
    %475 = vector.extract_strided_slice %472 {offsets = [0, 64], sizes = [8, 32], strides = [1, 1]} : vector<8x96xf32> to vector<8x32xf32>
    %476 = vector.extract_strided_slice %466 {offsets = [0, 96], sizes = [8, 32], strides = [1, 1]} : vector<8x128xf32> to vector<8x32xf32>
    %477 = math.tanh %476 : vector<8x32xf32>
    %478 = arith.mulf %474, %458 : vector<8x32xf32>
    %479 = arith.mulf %473, %477 : vector<8x32xf32>
    %480 = arith.addf %478, %479 : vector<8x32xf32>
    %481 = math.tanh %480 : vector<8x32xf32>
    %482 = arith.mulf %475, %481 : vector<8x32xf32>
    %483 = vector.extract_strided_slice %434 {offsets = [16, 0], sizes = [8, 128], strides = [1, 1]} : vector<64x128xf32> to vector<8x128xf32>
    %484 = vector.extract_strided_slice %434 {offsets = [40, 0], sizes = [8, 128], strides = [1, 1]} : vector<64x128xf32> to vector<8x128xf32>
    %485 = arith.select %21, %483, %484 : vector<8x128xi1>, vector<8x128xf32>
    %486 = arith.truncf %482 : vector<8x32xf32> to vector<8x32xbf16>
    %cst_84 = arith.constant dense<0.000000e+00> : vector<8x128xf32>
    %487 = tpu.matmul %486, %428, %cst_84 {dimension_numbers = #tpu.dot_dimension_numbers<[1], [0], [0], [1], [0, 0, 1, 1], [], []>} : vector<8x32xbf16>, vector<32x128xbf16>, vector<8x128xf32> -> vector<8x128xf32>
    %488 = arith.addf %485, %487 : vector<8x128xf32>
    %489 = vector.extract_strided_slice %488 {offsets = [0, 0], sizes = [8, 96], strides = [1, 1]} : vector<8x128xf32> to vector<8x96xf32>
    %490 = arith.negf %489 : vector<8x96xf32>
    %491 = math.exp %490 : vector<8x96xf32>
    %cst_85 = arith.constant 1.000000e+00 : f32
    %492 = vector.broadcast %cst_85 : f32 to vector<8x96xf32>
    %493 = arith.addf %492, %491 : vector<8x96xf32>
    %494 = arith.divf %492, %493 : vector<8x96xf32>
    %495 = vector.extract_strided_slice %494 {offsets = [0, 0], sizes = [8, 32], strides = [1, 1]} : vector<8x96xf32> to vector<8x32xf32>
    %496 = vector.extract_strided_slice %494 {offsets = [0, 32], sizes = [8, 32], strides = [1, 1]} : vector<8x96xf32> to vector<8x32xf32>
    %497 = vector.extract_strided_slice %494 {offsets = [0, 64], sizes = [8, 32], strides = [1, 1]} : vector<8x96xf32> to vector<8x32xf32>
    %498 = vector.extract_strided_slice %488 {offsets = [0, 96], sizes = [8, 32], strides = [1, 1]} : vector<8x128xf32> to vector<8x32xf32>
    %499 = math.tanh %498 : vector<8x32xf32>
    %500 = arith.mulf %496, %480 : vector<8x32xf32>
    %501 = arith.mulf %495, %499 : vector<8x32xf32>
    %502 = arith.addf %500, %501 : vector<8x32xf32>
    %503 = math.tanh %502 : vector<8x32xf32>
    %504 = arith.mulf %497, %503 : vector<8x32xf32>
    %505 = vector.extract_strided_slice %434 {offsets = [24, 0], sizes = [8, 128], strides = [1, 1]} : vector<64x128xf32> to vector<8x128xf32>
    %506 = vector.extract_strided_slice %434 {offsets = [32, 0], sizes = [8, 128], strides = [1, 1]} : vector<64x128xf32> to vector<8x128xf32>
    %507 = arith.select %21, %505, %506 : vector<8x128xi1>, vector<8x128xf32>
    %508 = arith.truncf %504 : vector<8x32xf32> to vector<8x32xbf16>
    %cst_86 = arith.constant dense<0.000000e+00> : vector<8x128xf32>
    %509 = tpu.matmul %508, %428, %cst_86 {dimension_numbers = #tpu.dot_dimension_numbers<[1], [0], [0], [1], [0, 0, 1, 1], [], []>} : vector<8x32xbf16>, vector<32x128xbf16>, vector<8x128xf32> -> vector<8x128xf32>
    %510 = arith.addf %507, %509 : vector<8x128xf32>
    %511 = vector.extract_strided_slice %510 {offsets = [0, 0], sizes = [8, 96], strides = [1, 1]} : vector<8x128xf32> to vector<8x96xf32>
    %512 = arith.negf %511 : vector<8x96xf32>
    %513 = math.exp %512 : vector<8x96xf32>
    %cst_87 = arith.constant 1.000000e+00 : f32
    %514 = vector.broadcast %cst_87 : f32 to vector<8x96xf32>
    %515 = arith.addf %514, %513 : vector<8x96xf32>
    %516 = arith.divf %514, %515 : vector<8x96xf32>
    %517 = vector.extract_strided_slice %516 {offsets = [0, 0], sizes = [8, 32], strides = [1, 1]} : vector<8x96xf32> to vector<8x32xf32>
    %518 = vector.extract_strided_slice %516 {offsets = [0, 32], sizes = [8, 32], strides = [1, 1]} : vector<8x96xf32> to vector<8x32xf32>
    %519 = vector.extract_strided_slice %516 {offsets = [0, 64], sizes = [8, 32], strides = [1, 1]} : vector<8x96xf32> to vector<8x32xf32>
    %520 = vector.extract_strided_slice %510 {offsets = [0, 96], sizes = [8, 32], strides = [1, 1]} : vector<8x128xf32> to vector<8x32xf32>
    %521 = math.tanh %520 : vector<8x32xf32>
    %522 = arith.mulf %518, %502 : vector<8x32xf32>
    %523 = arith.mulf %517, %521 : vector<8x32xf32>
    %524 = arith.addf %522, %523 : vector<8x32xf32>
    %525 = math.tanh %524 : vector<8x32xf32>
    %526 = arith.mulf %519, %525 : vector<8x32xf32>
    %527 = vector.extract_strided_slice %434 {offsets = [32, 0], sizes = [8, 128], strides = [1, 1]} : vector<64x128xf32> to vector<8x128xf32>
    %528 = vector.extract_strided_slice %434 {offsets = [24, 0], sizes = [8, 128], strides = [1, 1]} : vector<64x128xf32> to vector<8x128xf32>
    %529 = arith.select %21, %527, %528 : vector<8x128xi1>, vector<8x128xf32>
    %530 = arith.truncf %526 : vector<8x32xf32> to vector<8x32xbf16>
    %cst_88 = arith.constant dense<0.000000e+00> : vector<8x128xf32>
    %531 = tpu.matmul %530, %428, %cst_88 {dimension_numbers = #tpu.dot_dimension_numbers<[1], [0], [0], [1], [0, 0, 1, 1], [], []>} : vector<8x32xbf16>, vector<32x128xbf16>, vector<8x128xf32> -> vector<8x128xf32>
    %532 = arith.addf %529, %531 : vector<8x128xf32>
    %533 = vector.extract_strided_slice %532 {offsets = [0, 0], sizes = [8, 96], strides = [1, 1]} : vector<8x128xf32> to vector<8x96xf32>
    %534 = arith.negf %533 : vector<8x96xf32>
    %535 = math.exp %534 : vector<8x96xf32>
    %cst_89 = arith.constant 1.000000e+00 : f32
    %536 = vector.broadcast %cst_89 : f32 to vector<8x96xf32>
    %537 = arith.addf %536, %535 : vector<8x96xf32>
    %538 = arith.divf %536, %537 : vector<8x96xf32>
    %539 = vector.extract_strided_slice %538 {offsets = [0, 0], sizes = [8, 32], strides = [1, 1]} : vector<8x96xf32> to vector<8x32xf32>
    %540 = vector.extract_strided_slice %538 {offsets = [0, 32], sizes = [8, 32], strides = [1, 1]} : vector<8x96xf32> to vector<8x32xf32>
    %541 = vector.extract_strided_slice %538 {offsets = [0, 64], sizes = [8, 32], strides = [1, 1]} : vector<8x96xf32> to vector<8x32xf32>
    %542 = vector.extract_strided_slice %532 {offsets = [0, 96], sizes = [8, 32], strides = [1, 1]} : vector<8x128xf32> to vector<8x32xf32>
    %543 = math.tanh %542 : vector<8x32xf32>
    %544 = arith.mulf %540, %524 : vector<8x32xf32>
    %545 = arith.mulf %539, %543 : vector<8x32xf32>
    %546 = arith.addf %544, %545 : vector<8x32xf32>
    %547 = math.tanh %546 : vector<8x32xf32>
    %548 = arith.mulf %541, %547 : vector<8x32xf32>
    %549 = vector.extract_strided_slice %434 {offsets = [40, 0], sizes = [8, 128], strides = [1, 1]} : vector<64x128xf32> to vector<8x128xf32>
    %550 = vector.extract_strided_slice %434 {offsets = [16, 0], sizes = [8, 128], strides = [1, 1]} : vector<64x128xf32> to vector<8x128xf32>
    %551 = arith.select %21, %549, %550 : vector<8x128xi1>, vector<8x128xf32>
    %552 = arith.truncf %548 : vector<8x32xf32> to vector<8x32xbf16>
    %cst_90 = arith.constant dense<0.000000e+00> : vector<8x128xf32>
    %553 = tpu.matmul %552, %428, %cst_90 {dimension_numbers = #tpu.dot_dimension_numbers<[1], [0], [0], [1], [0, 0, 1, 1], [], []>} : vector<8x32xbf16>, vector<32x128xbf16>, vector<8x128xf32> -> vector<8x128xf32>
    %554 = arith.addf %551, %553 : vector<8x128xf32>
    %555 = vector.extract_strided_slice %554 {offsets = [0, 0], sizes = [8, 96], strides = [1, 1]} : vector<8x128xf32> to vector<8x96xf32>
    %556 = arith.negf %555 : vector<8x96xf32>
    %557 = math.exp %556 : vector<8x96xf32>
    %cst_91 = arith.constant 1.000000e+00 : f32
    %558 = vector.broadcast %cst_91 : f32 to vector<8x96xf32>
    %559 = arith.addf %558, %557 : vector<8x96xf32>
    %560 = arith.divf %558, %559 : vector<8x96xf32>
    %561 = vector.extract_strided_slice %560 {offsets = [0, 0], sizes = [8, 32], strides = [1, 1]} : vector<8x96xf32> to vector<8x32xf32>
    %562 = vector.extract_strided_slice %560 {offsets = [0, 32], sizes = [8, 32], strides = [1, 1]} : vector<8x96xf32> to vector<8x32xf32>
    %563 = vector.extract_strided_slice %560 {offsets = [0, 64], sizes = [8, 32], strides = [1, 1]} : vector<8x96xf32> to vector<8x32xf32>
    %564 = vector.extract_strided_slice %554 {offsets = [0, 96], sizes = [8, 32], strides = [1, 1]} : vector<8x128xf32> to vector<8x32xf32>
    %565 = math.tanh %564 : vector<8x32xf32>
    %566 = arith.mulf %562, %546 : vector<8x32xf32>
    %567 = arith.mulf %561, %565 : vector<8x32xf32>
    %568 = arith.addf %566, %567 : vector<8x32xf32>
    %569 = math.tanh %568 : vector<8x32xf32>
    %570 = arith.mulf %563, %569 : vector<8x32xf32>
    %571 = vector.extract_strided_slice %434 {offsets = [48, 0], sizes = [8, 128], strides = [1, 1]} : vector<64x128xf32> to vector<8x128xf32>
    %572 = vector.extract_strided_slice %434 {offsets = [8, 0], sizes = [8, 128], strides = [1, 1]} : vector<64x128xf32> to vector<8x128xf32>
    %573 = arith.select %21, %571, %572 : vector<8x128xi1>, vector<8x128xf32>
    %574 = arith.truncf %570 : vector<8x32xf32> to vector<8x32xbf16>
    %cst_92 = arith.constant dense<0.000000e+00> : vector<8x128xf32>
    %575 = tpu.matmul %574, %428, %cst_92 {dimension_numbers = #tpu.dot_dimension_numbers<[1], [0], [0], [1], [0, 0, 1, 1], [], []>} : vector<8x32xbf16>, vector<32x128xbf16>, vector<8x128xf32> -> vector<8x128xf32>
    %576 = arith.addf %573, %575 : vector<8x128xf32>
    %577 = vector.extract_strided_slice %576 {offsets = [0, 0], sizes = [8, 96], strides = [1, 1]} : vector<8x128xf32> to vector<8x96xf32>
    %578 = arith.negf %577 : vector<8x96xf32>
    %579 = math.exp %578 : vector<8x96xf32>
    %cst_93 = arith.constant 1.000000e+00 : f32
    %580 = vector.broadcast %cst_93 : f32 to vector<8x96xf32>
    %581 = arith.addf %580, %579 : vector<8x96xf32>
    %582 = arith.divf %580, %581 : vector<8x96xf32>
    %583 = vector.extract_strided_slice %582 {offsets = [0, 0], sizes = [8, 32], strides = [1, 1]} : vector<8x96xf32> to vector<8x32xf32>
    %584 = vector.extract_strided_slice %582 {offsets = [0, 32], sizes = [8, 32], strides = [1, 1]} : vector<8x96xf32> to vector<8x32xf32>
    %585 = vector.extract_strided_slice %582 {offsets = [0, 64], sizes = [8, 32], strides = [1, 1]} : vector<8x96xf32> to vector<8x32xf32>
    %586 = vector.extract_strided_slice %576 {offsets = [0, 96], sizes = [8, 32], strides = [1, 1]} : vector<8x128xf32> to vector<8x32xf32>
    %587 = math.tanh %586 : vector<8x32xf32>
    %588 = arith.mulf %584, %568 : vector<8x32xf32>
    %589 = arith.mulf %583, %587 : vector<8x32xf32>
    %590 = arith.addf %588, %589 : vector<8x32xf32>
    %591 = math.tanh %590 : vector<8x32xf32>
    %592 = arith.mulf %585, %591 : vector<8x32xf32>
    %593 = vector.extract_strided_slice %434 {offsets = [56, 0], sizes = [8, 128], strides = [1, 1]} : vector<64x128xf32> to vector<8x128xf32>
    %594 = vector.extract_strided_slice %434 {offsets = [0, 0], sizes = [8, 128], strides = [1, 1]} : vector<64x128xf32> to vector<8x128xf32>
    %595 = arith.select %21, %593, %594 : vector<8x128xi1>, vector<8x128xf32>
    %596 = arith.truncf %592 : vector<8x32xf32> to vector<8x32xbf16>
    %cst_94 = arith.constant dense<0.000000e+00> : vector<8x128xf32>
    %597 = tpu.matmul %596, %428, %cst_94 {dimension_numbers = #tpu.dot_dimension_numbers<[1], [0], [0], [1], [0, 0, 1, 1], [], []>} : vector<8x32xbf16>, vector<32x128xbf16>, vector<8x128xf32> -> vector<8x128xf32>
    %598 = arith.addf %595, %597 : vector<8x128xf32>
    %599 = vector.extract_strided_slice %598 {offsets = [0, 0], sizes = [8, 96], strides = [1, 1]} : vector<8x128xf32> to vector<8x96xf32>
    %600 = arith.negf %599 : vector<8x96xf32>
    %601 = math.exp %600 : vector<8x96xf32>
    %cst_95 = arith.constant 1.000000e+00 : f32
    %602 = vector.broadcast %cst_95 : f32 to vector<8x96xf32>
    %603 = arith.addf %602, %601 : vector<8x96xf32>
    %604 = arith.divf %602, %603 : vector<8x96xf32>
    %605 = vector.extract_strided_slice %604 {offsets = [0, 0], sizes = [8, 32], strides = [1, 1]} : vector<8x96xf32> to vector<8x32xf32>
    %606 = vector.extract_strided_slice %604 {offsets = [0, 32], sizes = [8, 32], strides = [1, 1]} : vector<8x96xf32> to vector<8x32xf32>
    %607 = vector.extract_strided_slice %604 {offsets = [0, 64], sizes = [8, 32], strides = [1, 1]} : vector<8x96xf32> to vector<8x32xf32>
    %608 = vector.extract_strided_slice %598 {offsets = [0, 96], sizes = [8, 32], strides = [1, 1]} : vector<8x128xf32> to vector<8x32xf32>
    %609 = math.tanh %608 : vector<8x32xf32>
    %610 = arith.mulf %606, %590 : vector<8x32xf32>
    %611 = arith.mulf %605, %609 : vector<8x32xf32>
    %612 = arith.addf %610, %611 : vector<8x32xf32>
    %613 = math.tanh %612 : vector<8x32xf32>
    %614 = arith.mulf %607, %613 : vector<8x32xf32>
    %615 = arith.select %2, %460, %614 : vector<8x32xi1>, vector<8x32xf32>
    %616 = arith.select %2, %482, %592 : vector<8x32xi1>, vector<8x32xf32>
    %617 = arith.select %2, %504, %570 : vector<8x32xi1>, vector<8x32xf32>
    %618 = arith.select %2, %526, %548 : vector<8x32xi1>, vector<8x32xf32>
    %619 = arith.select %2, %548, %526 : vector<8x32xi1>, vector<8x32xf32>
    %620 = arith.select %2, %570, %504 : vector<8x32xi1>, vector<8x32xf32>
    %621 = arith.select %2, %592, %482 : vector<8x32xi1>, vector<8x32xf32>
    %622 = arith.select %2, %614, %460 : vector<8x32xi1>, vector<8x32xf32>
    %623 = tpu.concatenate %615, %616, %617, %618, %619, %620, %621, %622 in 0 : vector<8x32xf32>, vector<8x32xf32>, vector<8x32xf32>, vector<8x32xf32>, vector<8x32xf32>, vector<8x32xf32>, vector<8x32xf32>, vector<8x32xf32> -> vector<64x32xf32>
    %c2_96 = arith.constant 2 : index
    %c0_97 = arith.constant 0 : index
    %c0_98 = arith.constant 0 : index
    %624 = vector.load %arg4[%c2_96, %c0_97, %c0_98] : memref<11x32x128xbf16, #tpu.memory_space<vmem>>, vector<1x32x128xbf16>
    %625 = vector.shape_cast %624 : vector<1x32x128xbf16> to vector<32x128xbf16>
    %c8 = arith.constant 8 : index
    %c0_99 = arith.constant 0 : index
    %c0_100 = arith.constant 0 : index
    %626 = vector.load %arg4[%c8, %c0_99, %c0_100] : memref<11x32x128xbf16, #tpu.memory_space<vmem>>, vector<1x32x128xbf16>
    %627 = vector.shape_cast %626 : vector<1x32x128xbf16> to vector<32x128xbf16>
    %c3_101 = arith.constant 3 : index
    %c0_102 = arith.constant 0 : index
    %c0_103 = arith.constant 0 : index
    %628 = vector.load %arg5[%c3_101, %c0_102, %c0_103] : memref<7x1x128xf32, #tpu.memory_space<vmem>>, vector<1x1x128xf32>
    %629 = vector.shape_cast %628 : vector<1x1x128xf32> to vector<1x128xf32>
    %630 = arith.truncf %623 : vector<64x32xf32> to vector<64x32xbf16>
    %cst_104 = arith.constant dense<0.000000e+00> : vector<64x128xf32>
    %631 = tpu.matmul %630, %625, %cst_104 {dimension_numbers = #tpu.dot_dimension_numbers<[1], [0], [0], [1], [0, 0, 1, 1], [], []>} : vector<64x32xbf16>, vector<32x128xbf16>, vector<64x128xf32> -> vector<64x128xf32>
    %632 = vector.broadcast %629 : vector<1x128xf32> to vector<64x128xf32>
    %633 = arith.addf %631, %632 : vector<64x128xf32>
    %c6_105 = arith.constant 6 : index
    %c0_106 = arith.constant 0 : index
    %c0_107 = arith.constant 0 : index
    %634 = vector.load %arg6[%c6_105, %c0_106, %c0_107] : memref<12x8x32xf32, #tpu.memory_space<vmem>>, vector<1x8x32xf32>
    %635 = vector.shape_cast %634 : vector<1x8x32xf32> to vector<8x32xf32>
    %c7_108 = arith.constant 7 : index
    %c0_109 = arith.constant 0 : index
    %c0_110 = arith.constant 0 : index
    %636 = vector.load %arg6[%c7_108, %c0_109, %c0_110] : memref<12x8x32xf32, #tpu.memory_space<vmem>>, vector<1x8x32xf32>
    %637 = vector.shape_cast %636 : vector<1x8x32xf32> to vector<8x32xf32>
    %638 = vector.extract_strided_slice %633 {offsets = [0, 0], sizes = [8, 128], strides = [1, 1]} : vector<64x128xf32> to vector<8x128xf32>
    %639 = vector.extract_strided_slice %633 {offsets = [56, 0], sizes = [8, 128], strides = [1, 1]} : vector<64x128xf32> to vector<8x128xf32>
    %640 = arith.select %21, %638, %639 : vector<8x128xi1>, vector<8x128xf32>
    %641 = arith.truncf %635 : vector<8x32xf32> to vector<8x32xbf16>
    %cst_111 = arith.constant dense<0.000000e+00> : vector<8x128xf32>
    %642 = tpu.matmul %641, %627, %cst_111 {dimension_numbers = #tpu.dot_dimension_numbers<[1], [0], [0], [1], [0, 0, 1, 1], [], []>} : vector<8x32xbf16>, vector<32x128xbf16>, vector<8x128xf32> -> vector<8x128xf32>
    %643 = arith.addf %640, %642 : vector<8x128xf32>
    %644 = vector.extract_strided_slice %643 {offsets = [0, 0], sizes = [8, 96], strides = [1, 1]} : vector<8x128xf32> to vector<8x96xf32>
    %645 = arith.negf %644 : vector<8x96xf32>
    %646 = math.exp %645 : vector<8x96xf32>
    %cst_112 = arith.constant 1.000000e+00 : f32
    %647 = vector.broadcast %cst_112 : f32 to vector<8x96xf32>
    %648 = arith.addf %647, %646 : vector<8x96xf32>
    %649 = arith.divf %647, %648 : vector<8x96xf32>
    %650 = vector.extract_strided_slice %649 {offsets = [0, 0], sizes = [8, 32], strides = [1, 1]} : vector<8x96xf32> to vector<8x32xf32>
    %651 = vector.extract_strided_slice %649 {offsets = [0, 32], sizes = [8, 32], strides = [1, 1]} : vector<8x96xf32> to vector<8x32xf32>
    %652 = vector.extract_strided_slice %649 {offsets = [0, 64], sizes = [8, 32], strides = [1, 1]} : vector<8x96xf32> to vector<8x32xf32>
    %653 = vector.extract_strided_slice %643 {offsets = [0, 96], sizes = [8, 32], strides = [1, 1]} : vector<8x128xf32> to vector<8x32xf32>
    %654 = math.tanh %653 : vector<8x32xf32>
    %655 = arith.mulf %651, %637 : vector<8x32xf32>
    %656 = arith.mulf %650, %654 : vector<8x32xf32>
    %657 = arith.addf %655, %656 : vector<8x32xf32>
    %658 = math.tanh %657 : vector<8x32xf32>
    %659 = arith.mulf %652, %658 : vector<8x32xf32>
    %660 = vector.extract_strided_slice %633 {offsets = [8, 0], sizes = [8, 128], strides = [1, 1]} : vector<64x128xf32> to vector<8x128xf32>
    %661 = vector.extract_strided_slice %633 {offsets = [48, 0], sizes = [8, 128], strides = [1, 1]} : vector<64x128xf32> to vector<8x128xf32>
    %662 = arith.select %21, %660, %661 : vector<8x128xi1>, vector<8x128xf32>
    %663 = arith.truncf %659 : vector<8x32xf32> to vector<8x32xbf16>
    %cst_113 = arith.constant dense<0.000000e+00> : vector<8x128xf32>
    %664 = tpu.matmul %663, %627, %cst_113 {dimension_numbers = #tpu.dot_dimension_numbers<[1], [0], [0], [1], [0, 0, 1, 1], [], []>} : vector<8x32xbf16>, vector<32x128xbf16>, vector<8x128xf32> -> vector<8x128xf32>
    %665 = arith.addf %662, %664 : vector<8x128xf32>
    %666 = vector.extract_strided_slice %665 {offsets = [0, 0], sizes = [8, 96], strides = [1, 1]} : vector<8x128xf32> to vector<8x96xf32>
    %667 = arith.negf %666 : vector<8x96xf32>
    %668 = math.exp %667 : vector<8x96xf32>
    %cst_114 = arith.constant 1.000000e+00 : f32
    %669 = vector.broadcast %cst_114 : f32 to vector<8x96xf32>
    %670 = arith.addf %669, %668 : vector<8x96xf32>
    %671 = arith.divf %669, %670 : vector<8x96xf32>
    %672 = vector.extract_strided_slice %671 {offsets = [0, 0], sizes = [8, 32], strides = [1, 1]} : vector<8x96xf32> to vector<8x32xf32>
    %673 = vector.extract_strided_slice %671 {offsets = [0, 32], sizes = [8, 32], strides = [1, 1]} : vector<8x96xf32> to vector<8x32xf32>
    %674 = vector.extract_strided_slice %671 {offsets = [0, 64], sizes = [8, 32], strides = [1, 1]} : vector<8x96xf32> to vector<8x32xf32>
    %675 = vector.extract_strided_slice %665 {offsets = [0, 96], sizes = [8, 32], strides = [1, 1]} : vector<8x128xf32> to vector<8x32xf32>
    %676 = math.tanh %675 : vector<8x32xf32>
    %677 = arith.mulf %673, %657 : vector<8x32xf32>
    %678 = arith.mulf %672, %676 : vector<8x32xf32>
    %679 = arith.addf %677, %678 : vector<8x32xf32>
    %680 = math.tanh %679 : vector<8x32xf32>
    %681 = arith.mulf %674, %680 : vector<8x32xf32>
    %682 = vector.extract_strided_slice %633 {offsets = [16, 0], sizes = [8, 128], strides = [1, 1]} : vector<64x128xf32> to vector<8x128xf32>
    %683 = vector.extract_strided_slice %633 {offsets = [40, 0], sizes = [8, 128], strides = [1, 1]} : vector<64x128xf32> to vector<8x128xf32>
    %684 = arith.select %21, %682, %683 : vector<8x128xi1>, vector<8x128xf32>
    %685 = arith.truncf %681 : vector<8x32xf32> to vector<8x32xbf16>
    %cst_115 = arith.constant dense<0.000000e+00> : vector<8x128xf32>
    %686 = tpu.matmul %685, %627, %cst_115 {dimension_numbers = #tpu.dot_dimension_numbers<[1], [0], [0], [1], [0, 0, 1, 1], [], []>} : vector<8x32xbf16>, vector<32x128xbf16>, vector<8x128xf32> -> vector<8x128xf32>
    %687 = arith.addf %684, %686 : vector<8x128xf32>
    %688 = vector.extract_strided_slice %687 {offsets = [0, 0], sizes = [8, 96], strides = [1, 1]} : vector<8x128xf32> to vector<8x96xf32>
    %689 = arith.negf %688 : vector<8x96xf32>
    %690 = math.exp %689 : vector<8x96xf32>
    %cst_116 = arith.constant 1.000000e+00 : f32
    %691 = vector.broadcast %cst_116 : f32 to vector<8x96xf32>
    %692 = arith.addf %691, %690 : vector<8x96xf32>
    %693 = arith.divf %691, %692 : vector<8x96xf32>
    %694 = vector.extract_strided_slice %693 {offsets = [0, 0], sizes = [8, 32], strides = [1, 1]} : vector<8x96xf32> to vector<8x32xf32>
    %695 = vector.extract_strided_slice %693 {offsets = [0, 32], sizes = [8, 32], strides = [1, 1]} : vector<8x96xf32> to vector<8x32xf32>
    %696 = vector.extract_strided_slice %693 {offsets = [0, 64], sizes = [8, 32], strides = [1, 1]} : vector<8x96xf32> to vector<8x32xf32>
    %697 = vector.extract_strided_slice %687 {offsets = [0, 96], sizes = [8, 32], strides = [1, 1]} : vector<8x128xf32> to vector<8x32xf32>
    %698 = math.tanh %697 : vector<8x32xf32>
    %699 = arith.mulf %695, %679 : vector<8x32xf32>
    %700 = arith.mulf %694, %698 : vector<8x32xf32>
    %701 = arith.addf %699, %700 : vector<8x32xf32>
    %702 = math.tanh %701 : vector<8x32xf32>
    %703 = arith.mulf %696, %702 : vector<8x32xf32>
    %704 = vector.extract_strided_slice %633 {offsets = [24, 0], sizes = [8, 128], strides = [1, 1]} : vector<64x128xf32> to vector<8x128xf32>
    %705 = vector.extract_strided_slice %633 {offsets = [32, 0], sizes = [8, 128], strides = [1, 1]} : vector<64x128xf32> to vector<8x128xf32>
    %706 = arith.select %21, %704, %705 : vector<8x128xi1>, vector<8x128xf32>
    %707 = arith.truncf %703 : vector<8x32xf32> to vector<8x32xbf16>
    %cst_117 = arith.constant dense<0.000000e+00> : vector<8x128xf32>
    %708 = tpu.matmul %707, %627, %cst_117 {dimension_numbers = #tpu.dot_dimension_numbers<[1], [0], [0], [1], [0, 0, 1, 1], [], []>} : vector<8x32xbf16>, vector<32x128xbf16>, vector<8x128xf32> -> vector<8x128xf32>
    %709 = arith.addf %706, %708 : vector<8x128xf32>
    %710 = vector.extract_strided_slice %709 {offsets = [0, 0], sizes = [8, 96], strides = [1, 1]} : vector<8x128xf32> to vector<8x96xf32>
    %711 = arith.negf %710 : vector<8x96xf32>
    %712 = math.exp %711 : vector<8x96xf32>
    %cst_118 = arith.constant 1.000000e+00 : f32
    %713 = vector.broadcast %cst_118 : f32 to vector<8x96xf32>
    %714 = arith.addf %713, %712 : vector<8x96xf32>
    %715 = arith.divf %713, %714 : vector<8x96xf32>
    %716 = vector.extract_strided_slice %715 {offsets = [0, 0], sizes = [8, 32], strides = [1, 1]} : vector<8x96xf32> to vector<8x32xf32>
    %717 = vector.extract_strided_slice %715 {offsets = [0, 32], sizes = [8, 32], strides = [1, 1]} : vector<8x96xf32> to vector<8x32xf32>
    %718 = vector.extract_strided_slice %715 {offsets = [0, 64], sizes = [8, 32], strides = [1, 1]} : vector<8x96xf32> to vector<8x32xf32>
    %719 = vector.extract_strided_slice %709 {offsets = [0, 96], sizes = [8, 32], strides = [1, 1]} : vector<8x128xf32> to vector<8x32xf32>
    %720 = math.tanh %719 : vector<8x32xf32>
    %721 = arith.mulf %717, %701 : vector<8x32xf32>
    %722 = arith.mulf %716, %720 : vector<8x32xf32>
    %723 = arith.addf %721, %722 : vector<8x32xf32>
    %724 = math.tanh %723 : vector<8x32xf32>
    %725 = arith.mulf %718, %724 : vector<8x32xf32>
    %726 = vector.extract_strided_slice %633 {offsets = [32, 0], sizes = [8, 128], strides = [1, 1]} : vector<64x128xf32> to vector<8x128xf32>
    %727 = vector.extract_strided_slice %633 {offsets = [24, 0], sizes = [8, 128], strides = [1, 1]} : vector<64x128xf32> to vector<8x128xf32>
    %728 = arith.select %21, %726, %727 : vector<8x128xi1>, vector<8x128xf32>
    %729 = arith.truncf %725 : vector<8x32xf32> to vector<8x32xbf16>
    %cst_119 = arith.constant dense<0.000000e+00> : vector<8x128xf32>
    %730 = tpu.matmul %729, %627, %cst_119 {dimension_numbers = #tpu.dot_dimension_numbers<[1], [0], [0], [1], [0, 0, 1, 1], [], []>} : vector<8x32xbf16>, vector<32x128xbf16>, vector<8x128xf32> -> vector<8x128xf32>
    %731 = arith.addf %728, %730 : vector<8x128xf32>
    %732 = vector.extract_strided_slice %731 {offsets = [0, 0], sizes = [8, 96], strides = [1, 1]} : vector<8x128xf32> to vector<8x96xf32>
    %733 = arith.negf %732 : vector<8x96xf32>
    %734 = math.exp %733 : vector<8x96xf32>
    %cst_120 = arith.constant 1.000000e+00 : f32
    %735 = vector.broadcast %cst_120 : f32 to vector<8x96xf32>
    %736 = arith.addf %735, %734 : vector<8x96xf32>
    %737 = arith.divf %735, %736 : vector<8x96xf32>
    %738 = vector.extract_strided_slice %737 {offsets = [0, 0], sizes = [8, 32], strides = [1, 1]} : vector<8x96xf32> to vector<8x32xf32>
    %739 = vector.extract_strided_slice %737 {offsets = [0, 32], sizes = [8, 32], strides = [1, 1]} : vector<8x96xf32> to vector<8x32xf32>
    %740 = vector.extract_strided_slice %737 {offsets = [0, 64], sizes = [8, 32], strides = [1, 1]} : vector<8x96xf32> to vector<8x32xf32>
    %741 = vector.extract_strided_slice %731 {offsets = [0, 96], sizes = [8, 32], strides = [1, 1]} : vector<8x128xf32> to vector<8x32xf32>
    %742 = math.tanh %741 : vector<8x32xf32>
    %743 = arith.mulf %739, %723 : vector<8x32xf32>
    %744 = arith.mulf %738, %742 : vector<8x32xf32>
    %745 = arith.addf %743, %744 : vector<8x32xf32>
    %746 = math.tanh %745 : vector<8x32xf32>
    %747 = arith.mulf %740, %746 : vector<8x32xf32>
    %748 = vector.extract_strided_slice %633 {offsets = [40, 0], sizes = [8, 128], strides = [1, 1]} : vector<64x128xf32> to vector<8x128xf32>
    %749 = vector.extract_strided_slice %633 {offsets = [16, 0], sizes = [8, 128], strides = [1, 1]} : vector<64x128xf32> to vector<8x128xf32>
    %750 = arith.select %21, %748, %749 : vector<8x128xi1>, vector<8x128xf32>
    %751 = arith.truncf %747 : vector<8x32xf32> to vector<8x32xbf16>
    %cst_121 = arith.constant dense<0.000000e+00> : vector<8x128xf32>
    %752 = tpu.matmul %751, %627, %cst_121 {dimension_numbers = #tpu.dot_dimension_numbers<[1], [0], [0], [1], [0, 0, 1, 1], [], []>} : vector<8x32xbf16>, vector<32x128xbf16>, vector<8x128xf32> -> vector<8x128xf32>
    %753 = arith.addf %750, %752 : vector<8x128xf32>
    %754 = vector.extract_strided_slice %753 {offsets = [0, 0], sizes = [8, 96], strides = [1, 1]} : vector<8x128xf32> to vector<8x96xf32>
    %755 = arith.negf %754 : vector<8x96xf32>
    %756 = math.exp %755 : vector<8x96xf32>
    %cst_122 = arith.constant 1.000000e+00 : f32
    %757 = vector.broadcast %cst_122 : f32 to vector<8x96xf32>
    %758 = arith.addf %757, %756 : vector<8x96xf32>
    %759 = arith.divf %757, %758 : vector<8x96xf32>
    %760 = vector.extract_strided_slice %759 {offsets = [0, 0], sizes = [8, 32], strides = [1, 1]} : vector<8x96xf32> to vector<8x32xf32>
    %761 = vector.extract_strided_slice %759 {offsets = [0, 32], sizes = [8, 32], strides = [1, 1]} : vector<8x96xf32> to vector<8x32xf32>
    %762 = vector.extract_strided_slice %759 {offsets = [0, 64], sizes = [8, 32], strides = [1, 1]} : vector<8x96xf32> to vector<8x32xf32>
    %763 = vector.extract_strided_slice %753 {offsets = [0, 96], sizes = [8, 32], strides = [1, 1]} : vector<8x128xf32> to vector<8x32xf32>
    %764 = math.tanh %763 : vector<8x32xf32>
    %765 = arith.mulf %761, %745 : vector<8x32xf32>
    %766 = arith.mulf %760, %764 : vector<8x32xf32>
    %767 = arith.addf %765, %766 : vector<8x32xf32>
    %768 = math.tanh %767 : vector<8x32xf32>
    %769 = arith.mulf %762, %768 : vector<8x32xf32>
    %770 = vector.extract_strided_slice %633 {offsets = [48, 0], sizes = [8, 128], strides = [1, 1]} : vector<64x128xf32> to vector<8x128xf32>
    %771 = vector.extract_strided_slice %633 {offsets = [8, 0], sizes = [8, 128], strides = [1, 1]} : vector<64x128xf32> to vector<8x128xf32>
    %772 = arith.select %21, %770, %771 : vector<8x128xi1>, vector<8x128xf32>
    %773 = arith.truncf %769 : vector<8x32xf32> to vector<8x32xbf16>
    %cst_123 = arith.constant dense<0.000000e+00> : vector<8x128xf32>
    %774 = tpu.matmul %773, %627, %cst_123 {dimension_numbers = #tpu.dot_dimension_numbers<[1], [0], [0], [1], [0, 0, 1, 1], [], []>} : vector<8x32xbf16>, vector<32x128xbf16>, vector<8x128xf32> -> vector<8x128xf32>
    %775 = arith.addf %772, %774 : vector<8x128xf32>
    %776 = vector.extract_strided_slice %775 {offsets = [0, 0], sizes = [8, 96], strides = [1, 1]} : vector<8x128xf32> to vector<8x96xf32>
    %777 = arith.negf %776 : vector<8x96xf32>
    %778 = math.exp %777 : vector<8x96xf32>
    %cst_124 = arith.constant 1.000000e+00 : f32
    %779 = vector.broadcast %cst_124 : f32 to vector<8x96xf32>
    %780 = arith.addf %779, %778 : vector<8x96xf32>
    %781 = arith.divf %779, %780 : vector<8x96xf32>
    %782 = vector.extract_strided_slice %781 {offsets = [0, 0], sizes = [8, 32], strides = [1, 1]} : vector<8x96xf32> to vector<8x32xf32>
    %783 = vector.extract_strided_slice %781 {offsets = [0, 32], sizes = [8, 32], strides = [1, 1]} : vector<8x96xf32> to vector<8x32xf32>
    %784 = vector.extract_strided_slice %781 {offsets = [0, 64], sizes = [8, 32], strides = [1, 1]} : vector<8x96xf32> to vector<8x32xf32>
    %785 = vector.extract_strided_slice %775 {offsets = [0, 96], sizes = [8, 32], strides = [1, 1]} : vector<8x128xf32> to vector<8x32xf32>
    %786 = math.tanh %785 : vector<8x32xf32>
    %787 = arith.mulf %783, %767 : vector<8x32xf32>
    %788 = arith.mulf %782, %786 : vector<8x32xf32>
    %789 = arith.addf %787, %788 : vector<8x32xf32>
    %790 = math.tanh %789 : vector<8x32xf32>
    %791 = arith.mulf %784, %790 : vector<8x32xf32>
    %792 = vector.extract_strided_slice %633 {offsets = [56, 0], sizes = [8, 128], strides = [1, 1]} : vector<64x128xf32> to vector<8x128xf32>
    %793 = vector.extract_strided_slice %633 {offsets = [0, 0], sizes = [8, 128], strides = [1, 1]} : vector<64x128xf32> to vector<8x128xf32>
    %794 = arith.select %21, %792, %793 : vector<8x128xi1>, vector<8x128xf32>
    %795 = arith.truncf %791 : vector<8x32xf32> to vector<8x32xbf16>
    %cst_125 = arith.constant dense<0.000000e+00> : vector<8x128xf32>
    %796 = tpu.matmul %795, %627, %cst_125 {dimension_numbers = #tpu.dot_dimension_numbers<[1], [0], [0], [1], [0, 0, 1, 1], [], []>} : vector<8x32xbf16>, vector<32x128xbf16>, vector<8x128xf32> -> vector<8x128xf32>
    %797 = arith.addf %794, %796 : vector<8x128xf32>
    %798 = vector.extract_strided_slice %797 {offsets = [0, 0], sizes = [8, 96], strides = [1, 1]} : vector<8x128xf32> to vector<8x96xf32>
    %799 = arith.negf %798 : vector<8x96xf32>
    %800 = math.exp %799 : vector<8x96xf32>
    %cst_126 = arith.constant 1.000000e+00 : f32
    %801 = vector.broadcast %cst_126 : f32 to vector<8x96xf32>
    %802 = arith.addf %801, %800 : vector<8x96xf32>
    %803 = arith.divf %801, %802 : vector<8x96xf32>
    %804 = vector.extract_strided_slice %803 {offsets = [0, 0], sizes = [8, 32], strides = [1, 1]} : vector<8x96xf32> to vector<8x32xf32>
    %805 = vector.extract_strided_slice %803 {offsets = [0, 32], sizes = [8, 32], strides = [1, 1]} : vector<8x96xf32> to vector<8x32xf32>
    %806 = vector.extract_strided_slice %803 {offsets = [0, 64], sizes = [8, 32], strides = [1, 1]} : vector<8x96xf32> to vector<8x32xf32>
    %807 = vector.extract_strided_slice %797 {offsets = [0, 96], sizes = [8, 32], strides = [1, 1]} : vector<8x128xf32> to vector<8x32xf32>
    %808 = math.tanh %807 : vector<8x32xf32>
    %809 = arith.mulf %805, %789 : vector<8x32xf32>
    %810 = arith.mulf %804, %808 : vector<8x32xf32>
    %811 = arith.addf %809, %810 : vector<8x32xf32>
    %812 = math.tanh %811 : vector<8x32xf32>
    %813 = arith.mulf %806, %812 : vector<8x32xf32>
    %814 = arith.select %2, %659, %813 : vector<8x32xi1>, vector<8x32xf32>
    %815 = arith.select %2, %681, %791 : vector<8x32xi1>, vector<8x32xf32>
    %816 = arith.select %2, %703, %769 : vector<8x32xi1>, vector<8x32xf32>
    %817 = arith.select %2, %725, %747 : vector<8x32xi1>, vector<8x32xf32>
    %818 = arith.select %2, %747, %725 : vector<8x32xi1>, vector<8x32xf32>
    %819 = arith.select %2, %769, %703 : vector<8x32xi1>, vector<8x32xf32>
    %820 = arith.select %2, %791, %681 : vector<8x32xi1>, vector<8x32xf32>
    %821 = arith.select %2, %813, %659 : vector<8x32xi1>, vector<8x32xf32>
    %822 = tpu.concatenate %814, %815, %816, %817, %818, %819, %820, %821 in 0 : vector<8x32xf32>, vector<8x32xf32>, vector<8x32xf32>, vector<8x32xf32>, vector<8x32xf32>, vector<8x32xf32>, vector<8x32xf32>, vector<8x32xf32> -> vector<64x32xf32>
    %c3_127 = arith.constant 3 : index
    %c0_128 = arith.constant 0 : index
    %c0_129 = arith.constant 0 : index
    %823 = vector.load %arg4[%c3_127, %c0_128, %c0_129] : memref<11x32x128xbf16, #tpu.memory_space<vmem>>, vector<1x32x128xbf16>
    %824 = vector.shape_cast %823 : vector<1x32x128xbf16> to vector<32x128xbf16>
    %c9 = arith.constant 9 : index
    %c0_130 = arith.constant 0 : index
    %c0_131 = arith.constant 0 : index
    %825 = vector.load %arg4[%c9, %c0_130, %c0_131] : memref<11x32x128xbf16, #tpu.memory_space<vmem>>, vector<1x32x128xbf16>
    %826 = vector.shape_cast %825 : vector<1x32x128xbf16> to vector<32x128xbf16>
    %c4_132 = arith.constant 4 : index
    %c0_133 = arith.constant 0 : index
    %c0_134 = arith.constant 0 : index
    %827 = vector.load %arg5[%c4_132, %c0_133, %c0_134] : memref<7x1x128xf32, #tpu.memory_space<vmem>>, vector<1x1x128xf32>
    %828 = vector.shape_cast %827 : vector<1x1x128xf32> to vector<1x128xf32>
    %829 = arith.truncf %822 : vector<64x32xf32> to vector<64x32xbf16>
    %cst_135 = arith.constant dense<0.000000e+00> : vector<64x128xf32>
    %830 = tpu.matmul %829, %824, %cst_135 {dimension_numbers = #tpu.dot_dimension_numbers<[1], [0], [0], [1], [0, 0, 1, 1], [], []>} : vector<64x32xbf16>, vector<32x128xbf16>, vector<64x128xf32> -> vector<64x128xf32>
    %831 = vector.broadcast %828 : vector<1x128xf32> to vector<64x128xf32>
    %832 = arith.addf %830, %831 : vector<64x128xf32>
    %c8_136 = arith.constant 8 : index
    %c0_137 = arith.constant 0 : index
    %c0_138 = arith.constant 0 : index
    %833 = vector.load %arg6[%c8_136, %c0_137, %c0_138] : memref<12x8x32xf32, #tpu.memory_space<vmem>>, vector<1x8x32xf32>
    %834 = vector.shape_cast %833 : vector<1x8x32xf32> to vector<8x32xf32>
    %c9_139 = arith.constant 9 : index
    %c0_140 = arith.constant 0 : index
    %c0_141 = arith.constant 0 : index
    %835 = vector.load %arg6[%c9_139, %c0_140, %c0_141] : memref<12x8x32xf32, #tpu.memory_space<vmem>>, vector<1x8x32xf32>
    %836 = vector.shape_cast %835 : vector<1x8x32xf32> to vector<8x32xf32>
    %837 = vector.extract_strided_slice %832 {offsets = [0, 0], sizes = [8, 128], strides = [1, 1]} : vector<64x128xf32> to vector<8x128xf32>
    %838 = vector.extract_strided_slice %832 {offsets = [56, 0], sizes = [8, 128], strides = [1, 1]} : vector<64x128xf32> to vector<8x128xf32>
    %839 = arith.select %21, %837, %838 : vector<8x128xi1>, vector<8x128xf32>
    %840 = arith.truncf %834 : vector<8x32xf32> to vector<8x32xbf16>
    %cst_142 = arith.constant dense<0.000000e+00> : vector<8x128xf32>
    %841 = tpu.matmul %840, %826, %cst_142 {dimension_numbers = #tpu.dot_dimension_numbers<[1], [0], [0], [1], [0, 0, 1, 1], [], []>} : vector<8x32xbf16>, vector<32x128xbf16>, vector<8x128xf32> -> vector<8x128xf32>
    %842 = arith.addf %839, %841 : vector<8x128xf32>
    %843 = vector.extract_strided_slice %842 {offsets = [0, 0], sizes = [8, 96], strides = [1, 1]} : vector<8x128xf32> to vector<8x96xf32>
    %844 = arith.negf %843 : vector<8x96xf32>
    %845 = math.exp %844 : vector<8x96xf32>
    %cst_143 = arith.constant 1.000000e+00 : f32
    %846 = vector.broadcast %cst_143 : f32 to vector<8x96xf32>
    %847 = arith.addf %846, %845 : vector<8x96xf32>
    %848 = arith.divf %846, %847 : vector<8x96xf32>
    %849 = vector.extract_strided_slice %848 {offsets = [0, 0], sizes = [8, 32], strides = [1, 1]} : vector<8x96xf32> to vector<8x32xf32>
    %850 = vector.extract_strided_slice %848 {offsets = [0, 32], sizes = [8, 32], strides = [1, 1]} : vector<8x96xf32> to vector<8x32xf32>
    %851 = vector.extract_strided_slice %848 {offsets = [0, 64], sizes = [8, 32], strides = [1, 1]} : vector<8x96xf32> to vector<8x32xf32>
    %852 = vector.extract_strided_slice %842 {offsets = [0, 96], sizes = [8, 32], strides = [1, 1]} : vector<8x128xf32> to vector<8x32xf32>
    %853 = math.tanh %852 : vector<8x32xf32>
    %854 = arith.mulf %850, %836 : vector<8x32xf32>
    %855 = arith.mulf %849, %853 : vector<8x32xf32>
    %856 = arith.addf %854, %855 : vector<8x32xf32>
    %857 = math.tanh %856 : vector<8x32xf32>
    %858 = arith.mulf %851, %857 : vector<8x32xf32>
    %859 = vector.extract_strided_slice %832 {offsets = [8, 0], sizes = [8, 128], strides = [1, 1]} : vector<64x128xf32> to vector<8x128xf32>
    %860 = vector.extract_strided_slice %832 {offsets = [48, 0], sizes = [8, 128], strides = [1, 1]} : vector<64x128xf32> to vector<8x128xf32>
    %861 = arith.select %21, %859, %860 : vector<8x128xi1>, vector<8x128xf32>
    %862 = arith.truncf %858 : vector<8x32xf32> to vector<8x32xbf16>
    %cst_144 = arith.constant dense<0.000000e+00> : vector<8x128xf32>
    %863 = tpu.matmul %862, %826, %cst_144 {dimension_numbers = #tpu.dot_dimension_numbers<[1], [0], [0], [1], [0, 0, 1, 1], [], []>} : vector<8x32xbf16>, vector<32x128xbf16>, vector<8x128xf32> -> vector<8x128xf32>
    %864 = arith.addf %861, %863 : vector<8x128xf32>
    %865 = vector.extract_strided_slice %864 {offsets = [0, 0], sizes = [8, 96], strides = [1, 1]} : vector<8x128xf32> to vector<8x96xf32>
    %866 = arith.negf %865 : vector<8x96xf32>
    %867 = math.exp %866 : vector<8x96xf32>
    %cst_145 = arith.constant 1.000000e+00 : f32
    %868 = vector.broadcast %cst_145 : f32 to vector<8x96xf32>
    %869 = arith.addf %868, %867 : vector<8x96xf32>
    %870 = arith.divf %868, %869 : vector<8x96xf32>
    %871 = vector.extract_strided_slice %870 {offsets = [0, 0], sizes = [8, 32], strides = [1, 1]} : vector<8x96xf32> to vector<8x32xf32>
    %872 = vector.extract_strided_slice %870 {offsets = [0, 32], sizes = [8, 32], strides = [1, 1]} : vector<8x96xf32> to vector<8x32xf32>
    %873 = vector.extract_strided_slice %870 {offsets = [0, 64], sizes = [8, 32], strides = [1, 1]} : vector<8x96xf32> to vector<8x32xf32>
    %874 = vector.extract_strided_slice %864 {offsets = [0, 96], sizes = [8, 32], strides = [1, 1]} : vector<8x128xf32> to vector<8x32xf32>
    %875 = math.tanh %874 : vector<8x32xf32>
    %876 = arith.mulf %872, %856 : vector<8x32xf32>
    %877 = arith.mulf %871, %875 : vector<8x32xf32>
    %878 = arith.addf %876, %877 : vector<8x32xf32>
    %879 = math.tanh %878 : vector<8x32xf32>
    %880 = arith.mulf %873, %879 : vector<8x32xf32>
    %881 = vector.extract_strided_slice %832 {offsets = [16, 0], sizes = [8, 128], strides = [1, 1]} : vector<64x128xf32> to vector<8x128xf32>
    %882 = vector.extract_strided_slice %832 {offsets = [40, 0], sizes = [8, 128], strides = [1, 1]} : vector<64x128xf32> to vector<8x128xf32>
    %883 = arith.select %21, %881, %882 : vector<8x128xi1>, vector<8x128xf32>
    %884 = arith.truncf %880 : vector<8x32xf32> to vector<8x32xbf16>
    %cst_146 = arith.constant dense<0.000000e+00> : vector<8x128xf32>
    %885 = tpu.matmul %884, %826, %cst_146 {dimension_numbers = #tpu.dot_dimension_numbers<[1], [0], [0], [1], [0, 0, 1, 1], [], []>} : vector<8x32xbf16>, vector<32x128xbf16>, vector<8x128xf32> -> vector<8x128xf32>
    %886 = arith.addf %883, %885 : vector<8x128xf32>
    %887 = vector.extract_strided_slice %886 {offsets = [0, 0], sizes = [8, 96], strides = [1, 1]} : vector<8x128xf32> to vector<8x96xf32>
    %888 = arith.negf %887 : vector<8x96xf32>
    %889 = math.exp %888 : vector<8x96xf32>
    %cst_147 = arith.constant 1.000000e+00 : f32
    %890 = vector.broadcast %cst_147 : f32 to vector<8x96xf32>
    %891 = arith.addf %890, %889 : vector<8x96xf32>
    %892 = arith.divf %890, %891 : vector<8x96xf32>
    %893 = vector.extract_strided_slice %892 {offsets = [0, 0], sizes = [8, 32], strides = [1, 1]} : vector<8x96xf32> to vector<8x32xf32>
    %894 = vector.extract_strided_slice %892 {offsets = [0, 32], sizes = [8, 32], strides = [1, 1]} : vector<8x96xf32> to vector<8x32xf32>
    %895 = vector.extract_strided_slice %892 {offsets = [0, 64], sizes = [8, 32], strides = [1, 1]} : vector<8x96xf32> to vector<8x32xf32>
    %896 = vector.extract_strided_slice %886 {offsets = [0, 96], sizes = [8, 32], strides = [1, 1]} : vector<8x128xf32> to vector<8x32xf32>
    %897 = math.tanh %896 : vector<8x32xf32>
    %898 = arith.mulf %894, %878 : vector<8x32xf32>
    %899 = arith.mulf %893, %897 : vector<8x32xf32>
    %900 = arith.addf %898, %899 : vector<8x32xf32>
    %901 = math.tanh %900 : vector<8x32xf32>
    %902 = arith.mulf %895, %901 : vector<8x32xf32>
    %903 = vector.extract_strided_slice %832 {offsets = [24, 0], sizes = [8, 128], strides = [1, 1]} : vector<64x128xf32> to vector<8x128xf32>
    %904 = vector.extract_strided_slice %832 {offsets = [32, 0], sizes = [8, 128], strides = [1, 1]} : vector<64x128xf32> to vector<8x128xf32>
    %905 = arith.select %21, %903, %904 : vector<8x128xi1>, vector<8x128xf32>
    %906 = arith.truncf %902 : vector<8x32xf32> to vector<8x32xbf16>
    %cst_148 = arith.constant dense<0.000000e+00> : vector<8x128xf32>
    %907 = tpu.matmul %906, %826, %cst_148 {dimension_numbers = #tpu.dot_dimension_numbers<[1], [0], [0], [1], [0, 0, 1, 1], [], []>} : vector<8x32xbf16>, vector<32x128xbf16>, vector<8x128xf32> -> vector<8x128xf32>
    %908 = arith.addf %905, %907 : vector<8x128xf32>
    %909 = vector.extract_strided_slice %908 {offsets = [0, 0], sizes = [8, 96], strides = [1, 1]} : vector<8x128xf32> to vector<8x96xf32>
    %910 = arith.negf %909 : vector<8x96xf32>
    %911 = math.exp %910 : vector<8x96xf32>
    %cst_149 = arith.constant 1.000000e+00 : f32
    %912 = vector.broadcast %cst_149 : f32 to vector<8x96xf32>
    %913 = arith.addf %912, %911 : vector<8x96xf32>
    %914 = arith.divf %912, %913 : vector<8x96xf32>
    %915 = vector.extract_strided_slice %914 {offsets = [0, 0], sizes = [8, 32], strides = [1, 1]} : vector<8x96xf32> to vector<8x32xf32>
    %916 = vector.extract_strided_slice %914 {offsets = [0, 32], sizes = [8, 32], strides = [1, 1]} : vector<8x96xf32> to vector<8x32xf32>
    %917 = vector.extract_strided_slice %914 {offsets = [0, 64], sizes = [8, 32], strides = [1, 1]} : vector<8x96xf32> to vector<8x32xf32>
    %918 = vector.extract_strided_slice %908 {offsets = [0, 96], sizes = [8, 32], strides = [1, 1]} : vector<8x128xf32> to vector<8x32xf32>
    %919 = math.tanh %918 : vector<8x32xf32>
    %920 = arith.mulf %916, %900 : vector<8x32xf32>
    %921 = arith.mulf %915, %919 : vector<8x32xf32>
    %922 = arith.addf %920, %921 : vector<8x32xf32>
    %923 = math.tanh %922 : vector<8x32xf32>
    %924 = arith.mulf %917, %923 : vector<8x32xf32>
    %925 = vector.extract_strided_slice %832 {offsets = [32, 0], sizes = [8, 128], strides = [1, 1]} : vector<64x128xf32> to vector<8x128xf32>
    %926 = vector.extract_strided_slice %832 {offsets = [24, 0], sizes = [8, 128], strides = [1, 1]} : vector<64x128xf32> to vector<8x128xf32>
    %927 = arith.select %21, %925, %926 : vector<8x128xi1>, vector<8x128xf32>
    %928 = arith.truncf %924 : vector<8x32xf32> to vector<8x32xbf16>
    %cst_150 = arith.constant dense<0.000000e+00> : vector<8x128xf32>
    %929 = tpu.matmul %928, %826, %cst_150 {dimension_numbers = #tpu.dot_dimension_numbers<[1], [0], [0], [1], [0, 0, 1, 1], [], []>} : vector<8x32xbf16>, vector<32x128xbf16>, vector<8x128xf32> -> vector<8x128xf32>
    %930 = arith.addf %927, %929 : vector<8x128xf32>
    %931 = vector.extract_strided_slice %930 {offsets = [0, 0], sizes = [8, 96], strides = [1, 1]} : vector<8x128xf32> to vector<8x96xf32>
    %932 = arith.negf %931 : vector<8x96xf32>
    %933 = math.exp %932 : vector<8x96xf32>
    %cst_151 = arith.constant 1.000000e+00 : f32
    %934 = vector.broadcast %cst_151 : f32 to vector<8x96xf32>
    %935 = arith.addf %934, %933 : vector<8x96xf32>
    %936 = arith.divf %934, %935 : vector<8x96xf32>
    %937 = vector.extract_strided_slice %936 {offsets = [0, 0], sizes = [8, 32], strides = [1, 1]} : vector<8x96xf32> to vector<8x32xf32>
    %938 = vector.extract_strided_slice %936 {offsets = [0, 32], sizes = [8, 32], strides = [1, 1]} : vector<8x96xf32> to vector<8x32xf32>
    %939 = vector.extract_strided_slice %936 {offsets = [0, 64], sizes = [8, 32], strides = [1, 1]} : vector<8x96xf32> to vector<8x32xf32>
    %940 = vector.extract_strided_slice %930 {offsets = [0, 96], sizes = [8, 32], strides = [1, 1]} : vector<8x128xf32> to vector<8x32xf32>
    %941 = math.tanh %940 : vector<8x32xf32>
    %942 = arith.mulf %938, %922 : vector<8x32xf32>
    %943 = arith.mulf %937, %941 : vector<8x32xf32>
    %944 = arith.addf %942, %943 : vector<8x32xf32>
    %945 = math.tanh %944 : vector<8x32xf32>
    %946 = arith.mulf %939, %945 : vector<8x32xf32>
    %947 = vector.extract_strided_slice %832 {offsets = [40, 0], sizes = [8, 128], strides = [1, 1]} : vector<64x128xf32> to vector<8x128xf32>
    %948 = vector.extract_strided_slice %832 {offsets = [16, 0], sizes = [8, 128], strides = [1, 1]} : vector<64x128xf32> to vector<8x128xf32>
    %949 = arith.select %21, %947, %948 : vector<8x128xi1>, vector<8x128xf32>
    %950 = arith.truncf %946 : vector<8x32xf32> to vector<8x32xbf16>
    %cst_152 = arith.constant dense<0.000000e+00> : vector<8x128xf32>
    %951 = tpu.matmul %950, %826, %cst_152 {dimension_numbers = #tpu.dot_dimension_numbers<[1], [0], [0], [1], [0, 0, 1, 1], [], []>} : vector<8x32xbf16>, vector<32x128xbf16>, vector<8x128xf32> -> vector<8x128xf32>
    %952 = arith.addf %949, %951 : vector<8x128xf32>
    %953 = vector.extract_strided_slice %952 {offsets = [0, 0], sizes = [8, 96], strides = [1, 1]} : vector<8x128xf32> to vector<8x96xf32>
    %954 = arith.negf %953 : vector<8x96xf32>
    %955 = math.exp %954 : vector<8x96xf32>
    %cst_153 = arith.constant 1.000000e+00 : f32
    %956 = vector.broadcast %cst_153 : f32 to vector<8x96xf32>
    %957 = arith.addf %956, %955 : vector<8x96xf32>
    %958 = arith.divf %956, %957 : vector<8x96xf32>
    %959 = vector.extract_strided_slice %958 {offsets = [0, 0], sizes = [8, 32], strides = [1, 1]} : vector<8x96xf32> to vector<8x32xf32>
    %960 = vector.extract_strided_slice %958 {offsets = [0, 32], sizes = [8, 32], strides = [1, 1]} : vector<8x96xf32> to vector<8x32xf32>
    %961 = vector.extract_strided_slice %958 {offsets = [0, 64], sizes = [8, 32], strides = [1, 1]} : vector<8x96xf32> to vector<8x32xf32>
    %962 = vector.extract_strided_slice %952 {offsets = [0, 96], sizes = [8, 32], strides = [1, 1]} : vector<8x128xf32> to vector<8x32xf32>
    %963 = math.tanh %962 : vector<8x32xf32>
    %964 = arith.mulf %960, %944 : vector<8x32xf32>
    %965 = arith.mulf %959, %963 : vector<8x32xf32>
    %966 = arith.addf %964, %965 : vector<8x32xf32>
    %967 = math.tanh %966 : vector<8x32xf32>
    %968 = arith.mulf %961, %967 : vector<8x32xf32>
    %969 = vector.extract_strided_slice %832 {offsets = [48, 0], sizes = [8, 128], strides = [1, 1]} : vector<64x128xf32> to vector<8x128xf32>
    %970 = vector.extract_strided_slice %832 {offsets = [8, 0], sizes = [8, 128], strides = [1, 1]} : vector<64x128xf32> to vector<8x128xf32>
    %971 = arith.select %21, %969, %970 : vector<8x128xi1>, vector<8x128xf32>
    %972 = arith.truncf %968 : vector<8x32xf32> to vector<8x32xbf16>
    %cst_154 = arith.constant dense<0.000000e+00> : vector<8x128xf32>
    %973 = tpu.matmul %972, %826, %cst_154 {dimension_numbers = #tpu.dot_dimension_numbers<[1], [0], [0], [1], [0, 0, 1, 1], [], []>} : vector<8x32xbf16>, vector<32x128xbf16>, vector<8x128xf32> -> vector<8x128xf32>
    %974 = arith.addf %971, %973 : vector<8x128xf32>
    %975 = vector.extract_strided_slice %974 {offsets = [0, 0], sizes = [8, 96], strides = [1, 1]} : vector<8x128xf32> to vector<8x96xf32>
    %976 = arith.negf %975 : vector<8x96xf32>
    %977 = math.exp %976 : vector<8x96xf32>
    %cst_155 = arith.constant 1.000000e+00 : f32
    %978 = vector.broadcast %cst_155 : f32 to vector<8x96xf32>
    %979 = arith.addf %978, %977 : vector<8x96xf32>
    %980 = arith.divf %978, %979 : vector<8x96xf32>
    %981 = vector.extract_strided_slice %980 {offsets = [0, 0], sizes = [8, 32], strides = [1, 1]} : vector<8x96xf32> to vector<8x32xf32>
    %982 = vector.extract_strided_slice %980 {offsets = [0, 32], sizes = [8, 32], strides = [1, 1]} : vector<8x96xf32> to vector<8x32xf32>
    %983 = vector.extract_strided_slice %980 {offsets = [0, 64], sizes = [8, 32], strides = [1, 1]} : vector<8x96xf32> to vector<8x32xf32>
    %984 = vector.extract_strided_slice %974 {offsets = [0, 96], sizes = [8, 32], strides = [1, 1]} : vector<8x128xf32> to vector<8x32xf32>
    %985 = math.tanh %984 : vector<8x32xf32>
    %986 = arith.mulf %982, %966 : vector<8x32xf32>
    %987 = arith.mulf %981, %985 : vector<8x32xf32>
    %988 = arith.addf %986, %987 : vector<8x32xf32>
    %989 = math.tanh %988 : vector<8x32xf32>
    %990 = arith.mulf %983, %989 : vector<8x32xf32>
    %991 = vector.extract_strided_slice %832 {offsets = [56, 0], sizes = [8, 128], strides = [1, 1]} : vector<64x128xf32> to vector<8x128xf32>
    %992 = vector.extract_strided_slice %832 {offsets = [0, 0], sizes = [8, 128], strides = [1, 1]} : vector<64x128xf32> to vector<8x128xf32>
    %993 = arith.select %21, %991, %992 : vector<8x128xi1>, vector<8x128xf32>
    %994 = arith.truncf %990 : vector<8x32xf32> to vector<8x32xbf16>
    %cst_156 = arith.constant dense<0.000000e+00> : vector<8x128xf32>
    %995 = tpu.matmul %994, %826, %cst_156 {dimension_numbers = #tpu.dot_dimension_numbers<[1], [0], [0], [1], [0, 0, 1, 1], [], []>} : vector<8x32xbf16>, vector<32x128xbf16>, vector<8x128xf32> -> vector<8x128xf32>
    %996 = arith.addf %993, %995 : vector<8x128xf32>
    %997 = vector.extract_strided_slice %996 {offsets = [0, 0], sizes = [8, 96], strides = [1, 1]} : vector<8x128xf32> to vector<8x96xf32>
    %998 = arith.negf %997 : vector<8x96xf32>
    %999 = math.exp %998 : vector<8x96xf32>
    %cst_157 = arith.constant 1.000000e+00 : f32
    %1000 = vector.broadcast %cst_157 : f32 to vector<8x96xf32>
    %1001 = arith.addf %1000, %999 : vector<8x96xf32>
    %1002 = arith.divf %1000, %1001 : vector<8x96xf32>
    %1003 = vector.extract_strided_slice %1002 {offsets = [0, 0], sizes = [8, 32], strides = [1, 1]} : vector<8x96xf32> to vector<8x32xf32>
    %1004 = vector.extract_strided_slice %1002 {offsets = [0, 32], sizes = [8, 32], strides = [1, 1]} : vector<8x96xf32> to vector<8x32xf32>
    %1005 = vector.extract_strided_slice %1002 {offsets = [0, 64], sizes = [8, 32], strides = [1, 1]} : vector<8x96xf32> to vector<8x32xf32>
    %1006 = vector.extract_strided_slice %996 {offsets = [0, 96], sizes = [8, 32], strides = [1, 1]} : vector<8x128xf32> to vector<8x32xf32>
    %1007 = math.tanh %1006 : vector<8x32xf32>
    %1008 = arith.mulf %1004, %988 : vector<8x32xf32>
    %1009 = arith.mulf %1003, %1007 : vector<8x32xf32>
    %1010 = arith.addf %1008, %1009 : vector<8x32xf32>
    %1011 = math.tanh %1010 : vector<8x32xf32>
    %1012 = arith.mulf %1005, %1011 : vector<8x32xf32>
    %1013 = arith.select %2, %858, %1012 : vector<8x32xi1>, vector<8x32xf32>
    %1014 = arith.select %2, %880, %990 : vector<8x32xi1>, vector<8x32xf32>
    %1015 = arith.select %2, %902, %968 : vector<8x32xi1>, vector<8x32xf32>
    %1016 = arith.select %2, %924, %946 : vector<8x32xi1>, vector<8x32xf32>
    %1017 = arith.select %2, %946, %924 : vector<8x32xi1>, vector<8x32xf32>
    %1018 = arith.select %2, %968, %902 : vector<8x32xi1>, vector<8x32xf32>
    %1019 = arith.select %2, %990, %880 : vector<8x32xi1>, vector<8x32xf32>
    %1020 = arith.select %2, %1012, %858 : vector<8x32xi1>, vector<8x32xf32>
    %1021 = tpu.concatenate %1013, %1014, %1015, %1016, %1017, %1018, %1019, %1020 in 0 : vector<8x32xf32>, vector<8x32xf32>, vector<8x32xf32>, vector<8x32xf32>, vector<8x32xf32>, vector<8x32xf32>, vector<8x32xf32>, vector<8x32xf32> -> vector<64x32xf32>
    %c4_158 = arith.constant 4 : index
    %c0_159 = arith.constant 0 : index
    %c0_160 = arith.constant 0 : index
    %1022 = vector.load %arg4[%c4_158, %c0_159, %c0_160] : memref<11x32x128xbf16, #tpu.memory_space<vmem>>, vector<1x32x128xbf16>
    %1023 = vector.shape_cast %1022 : vector<1x32x128xbf16> to vector<32x128xbf16>
    %c10 = arith.constant 10 : index
    %c0_161 = arith.constant 0 : index
    %c0_162 = arith.constant 0 : index
    %1024 = vector.load %arg4[%c10, %c0_161, %c0_162] : memref<11x32x128xbf16, #tpu.memory_space<vmem>>, vector<1x32x128xbf16>
    %1025 = vector.shape_cast %1024 : vector<1x32x128xbf16> to vector<32x128xbf16>
    %c5_163 = arith.constant 5 : index
    %c0_164 = arith.constant 0 : index
    %c0_165 = arith.constant 0 : index
    %1026 = vector.load %arg5[%c5_163, %c0_164, %c0_165] : memref<7x1x128xf32, #tpu.memory_space<vmem>>, vector<1x1x128xf32>
    %1027 = vector.shape_cast %1026 : vector<1x1x128xf32> to vector<1x128xf32>
    %1028 = arith.truncf %1021 : vector<64x32xf32> to vector<64x32xbf16>
    %cst_166 = arith.constant dense<0.000000e+00> : vector<64x128xf32>
    %1029 = tpu.matmul %1028, %1023, %cst_166 {dimension_numbers = #tpu.dot_dimension_numbers<[1], [0], [0], [1], [0, 0, 1, 1], [], []>} : vector<64x32xbf16>, vector<32x128xbf16>, vector<64x128xf32> -> vector<64x128xf32>
    %1030 = vector.broadcast %1027 : vector<1x128xf32> to vector<64x128xf32>
    %1031 = arith.addf %1029, %1030 : vector<64x128xf32>
    %c10_167 = arith.constant 10 : index
    %c0_168 = arith.constant 0 : index
    %c0_169 = arith.constant 0 : index
    %1032 = vector.load %arg6[%c10_167, %c0_168, %c0_169] : memref<12x8x32xf32, #tpu.memory_space<vmem>>, vector<1x8x32xf32>
    %1033 = vector.shape_cast %1032 : vector<1x8x32xf32> to vector<8x32xf32>
    %c11 = arith.constant 11 : index
    %c0_170 = arith.constant 0 : index
    %c0_171 = arith.constant 0 : index
    %1034 = vector.load %arg6[%c11, %c0_170, %c0_171] : memref<12x8x32xf32, #tpu.memory_space<vmem>>, vector<1x8x32xf32>
    %1035 = vector.shape_cast %1034 : vector<1x8x32xf32> to vector<8x32xf32>
    %1036 = vector.extract_strided_slice %1031 {offsets = [0, 0], sizes = [8, 128], strides = [1, 1]} : vector<64x128xf32> to vector<8x128xf32>
    %1037 = vector.extract_strided_slice %1031 {offsets = [56, 0], sizes = [8, 128], strides = [1, 1]} : vector<64x128xf32> to vector<8x128xf32>
    %1038 = arith.select %21, %1036, %1037 : vector<8x128xi1>, vector<8x128xf32>
    %1039 = arith.truncf %1033 : vector<8x32xf32> to vector<8x32xbf16>
    %cst_172 = arith.constant dense<0.000000e+00> : vector<8x128xf32>
    %1040 = tpu.matmul %1039, %1025, %cst_172 {dimension_numbers = #tpu.dot_dimension_numbers<[1], [0], [0], [1], [0, 0, 1, 1], [], []>} : vector<8x32xbf16>, vector<32x128xbf16>, vector<8x128xf32> -> vector<8x128xf32>
    %1041 = arith.addf %1038, %1040 : vector<8x128xf32>
    %1042 = vector.extract_strided_slice %1041 {offsets = [0, 0], sizes = [8, 96], strides = [1, 1]} : vector<8x128xf32> to vector<8x96xf32>
    %1043 = arith.negf %1042 : vector<8x96xf32>
    %1044 = math.exp %1043 : vector<8x96xf32>
    %cst_173 = arith.constant 1.000000e+00 : f32
    %1045 = vector.broadcast %cst_173 : f32 to vector<8x96xf32>
    %1046 = arith.addf %1045, %1044 : vector<8x96xf32>
    %1047 = arith.divf %1045, %1046 : vector<8x96xf32>
    %1048 = vector.extract_strided_slice %1047 {offsets = [0, 0], sizes = [8, 32], strides = [1, 1]} : vector<8x96xf32> to vector<8x32xf32>
    %1049 = vector.extract_strided_slice %1047 {offsets = [0, 32], sizes = [8, 32], strides = [1, 1]} : vector<8x96xf32> to vector<8x32xf32>
    %1050 = vector.extract_strided_slice %1047 {offsets = [0, 64], sizes = [8, 32], strides = [1, 1]} : vector<8x96xf32> to vector<8x32xf32>
    %1051 = vector.extract_strided_slice %1041 {offsets = [0, 96], sizes = [8, 32], strides = [1, 1]} : vector<8x128xf32> to vector<8x32xf32>
    %1052 = math.tanh %1051 : vector<8x32xf32>
    %1053 = arith.mulf %1049, %1035 : vector<8x32xf32>
    %1054 = arith.mulf %1048, %1052 : vector<8x32xf32>
    %1055 = arith.addf %1053, %1054 : vector<8x32xf32>
    %1056 = math.tanh %1055 : vector<8x32xf32>
    %1057 = arith.mulf %1050, %1056 : vector<8x32xf32>
    %1058 = vector.extract_strided_slice %1031 {offsets = [8, 0], sizes = [8, 128], strides = [1, 1]} : vector<64x128xf32> to vector<8x128xf32>
    %1059 = vector.extract_strided_slice %1031 {offsets = [48, 0], sizes = [8, 128], strides = [1, 1]} : vector<64x128xf32> to vector<8x128xf32>
    %1060 = arith.select %21, %1058, %1059 : vector<8x128xi1>, vector<8x128xf32>
    %1061 = arith.truncf %1057 : vector<8x32xf32> to vector<8x32xbf16>
    %cst_174 = arith.constant dense<0.000000e+00> : vector<8x128xf32>
    %1062 = tpu.matmul %1061, %1025, %cst_174 {dimension_numbers = #tpu.dot_dimension_numbers<[1], [0], [0], [1], [0, 0, 1, 1], [], []>} : vector<8x32xbf16>, vector<32x128xbf16>, vector<8x128xf32> -> vector<8x128xf32>
    %1063 = arith.addf %1060, %1062 : vector<8x128xf32>
    %1064 = vector.extract_strided_slice %1063 {offsets = [0, 0], sizes = [8, 96], strides = [1, 1]} : vector<8x128xf32> to vector<8x96xf32>
    %1065 = arith.negf %1064 : vector<8x96xf32>
    %1066 = math.exp %1065 : vector<8x96xf32>
    %cst_175 = arith.constant 1.000000e+00 : f32
    %1067 = vector.broadcast %cst_175 : f32 to vector<8x96xf32>
    %1068 = arith.addf %1067, %1066 : vector<8x96xf32>
    %1069 = arith.divf %1067, %1068 : vector<8x96xf32>
    %1070 = vector.extract_strided_slice %1069 {offsets = [0, 0], sizes = [8, 32], strides = [1, 1]} : vector<8x96xf32> to vector<8x32xf32>
    %1071 = vector.extract_strided_slice %1069 {offsets = [0, 32], sizes = [8, 32], strides = [1, 1]} : vector<8x96xf32> to vector<8x32xf32>
    %1072 = vector.extract_strided_slice %1069 {offsets = [0, 64], sizes = [8, 32], strides = [1, 1]} : vector<8x96xf32> to vector<8x32xf32>
    %1073 = vector.extract_strided_slice %1063 {offsets = [0, 96], sizes = [8, 32], strides = [1, 1]} : vector<8x128xf32> to vector<8x32xf32>
    %1074 = math.tanh %1073 : vector<8x32xf32>
    %1075 = arith.mulf %1071, %1055 : vector<8x32xf32>
    %1076 = arith.mulf %1070, %1074 : vector<8x32xf32>
    %1077 = arith.addf %1075, %1076 : vector<8x32xf32>
    %1078 = math.tanh %1077 : vector<8x32xf32>
    %1079 = arith.mulf %1072, %1078 : vector<8x32xf32>
    %1080 = vector.extract_strided_slice %1031 {offsets = [16, 0], sizes = [8, 128], strides = [1, 1]} : vector<64x128xf32> to vector<8x128xf32>
    %1081 = vector.extract_strided_slice %1031 {offsets = [40, 0], sizes = [8, 128], strides = [1, 1]} : vector<64x128xf32> to vector<8x128xf32>
    %1082 = arith.select %21, %1080, %1081 : vector<8x128xi1>, vector<8x128xf32>
    %1083 = arith.truncf %1079 : vector<8x32xf32> to vector<8x32xbf16>
    %cst_176 = arith.constant dense<0.000000e+00> : vector<8x128xf32>
    %1084 = tpu.matmul %1083, %1025, %cst_176 {dimension_numbers = #tpu.dot_dimension_numbers<[1], [0], [0], [1], [0, 0, 1, 1], [], []>} : vector<8x32xbf16>, vector<32x128xbf16>, vector<8x128xf32> -> vector<8x128xf32>
    %1085 = arith.addf %1082, %1084 : vector<8x128xf32>
    %1086 = vector.extract_strided_slice %1085 {offsets = [0, 0], sizes = [8, 96], strides = [1, 1]} : vector<8x128xf32> to vector<8x96xf32>
    %1087 = arith.negf %1086 : vector<8x96xf32>
    %1088 = math.exp %1087 : vector<8x96xf32>
    %cst_177 = arith.constant 1.000000e+00 : f32
    %1089 = vector.broadcast %cst_177 : f32 to vector<8x96xf32>
    %1090 = arith.addf %1089, %1088 : vector<8x96xf32>
    %1091 = arith.divf %1089, %1090 : vector<8x96xf32>
    %1092 = vector.extract_strided_slice %1091 {offsets = [0, 0], sizes = [8, 32], strides = [1, 1]} : vector<8x96xf32> to vector<8x32xf32>
    %1093 = vector.extract_strided_slice %1091 {offsets = [0, 32], sizes = [8, 32], strides = [1, 1]} : vector<8x96xf32> to vector<8x32xf32>
    %1094 = vector.extract_strided_slice %1091 {offsets = [0, 64], sizes = [8, 32], strides = [1, 1]} : vector<8x96xf32> to vector<8x32xf32>
    %1095 = vector.extract_strided_slice %1085 {offsets = [0, 96], sizes = [8, 32], strides = [1, 1]} : vector<8x128xf32> to vector<8x32xf32>
    %1096 = math.tanh %1095 : vector<8x32xf32>
    %1097 = arith.mulf %1093, %1077 : vector<8x32xf32>
    %1098 = arith.mulf %1092, %1096 : vector<8x32xf32>
    %1099 = arith.addf %1097, %1098 : vector<8x32xf32>
    %1100 = math.tanh %1099 : vector<8x32xf32>
    %1101 = arith.mulf %1094, %1100 : vector<8x32xf32>
    %1102 = vector.extract_strided_slice %1031 {offsets = [24, 0], sizes = [8, 128], strides = [1, 1]} : vector<64x128xf32> to vector<8x128xf32>
    %1103 = vector.extract_strided_slice %1031 {offsets = [32, 0], sizes = [8, 128], strides = [1, 1]} : vector<64x128xf32> to vector<8x128xf32>
    %1104 = arith.select %21, %1102, %1103 : vector<8x128xi1>, vector<8x128xf32>
    %1105 = arith.truncf %1101 : vector<8x32xf32> to vector<8x32xbf16>
    %cst_178 = arith.constant dense<0.000000e+00> : vector<8x128xf32>
    %1106 = tpu.matmul %1105, %1025, %cst_178 {dimension_numbers = #tpu.dot_dimension_numbers<[1], [0], [0], [1], [0, 0, 1, 1], [], []>} : vector<8x32xbf16>, vector<32x128xbf16>, vector<8x128xf32> -> vector<8x128xf32>
    %1107 = arith.addf %1104, %1106 : vector<8x128xf32>
    %1108 = vector.extract_strided_slice %1107 {offsets = [0, 0], sizes = [8, 96], strides = [1, 1]} : vector<8x128xf32> to vector<8x96xf32>
    %1109 = arith.negf %1108 : vector<8x96xf32>
    %1110 = math.exp %1109 : vector<8x96xf32>
    %cst_179 = arith.constant 1.000000e+00 : f32
    %1111 = vector.broadcast %cst_179 : f32 to vector<8x96xf32>
    %1112 = arith.addf %1111, %1110 : vector<8x96xf32>
    %1113 = arith.divf %1111, %1112 : vector<8x96xf32>
    %1114 = vector.extract_strided_slice %1113 {offsets = [0, 0], sizes = [8, 32], strides = [1, 1]} : vector<8x96xf32> to vector<8x32xf32>
    %1115 = vector.extract_strided_slice %1113 {offsets = [0, 32], sizes = [8, 32], strides = [1, 1]} : vector<8x96xf32> to vector<8x32xf32>
    %1116 = vector.extract_strided_slice %1113 {offsets = [0, 64], sizes = [8, 32], strides = [1, 1]} : vector<8x96xf32> to vector<8x32xf32>
    %1117 = vector.extract_strided_slice %1107 {offsets = [0, 96], sizes = [8, 32], strides = [1, 1]} : vector<8x128xf32> to vector<8x32xf32>
    %1118 = math.tanh %1117 : vector<8x32xf32>
    %1119 = arith.mulf %1115, %1099 : vector<8x32xf32>
    %1120 = arith.mulf %1114, %1118 : vector<8x32xf32>
    %1121 = arith.addf %1119, %1120 : vector<8x32xf32>
    %1122 = math.tanh %1121 : vector<8x32xf32>
    %1123 = arith.mulf %1116, %1122 : vector<8x32xf32>
    %1124 = vector.extract_strided_slice %1031 {offsets = [32, 0], sizes = [8, 128], strides = [1, 1]} : vector<64x128xf32> to vector<8x128xf32>
    %1125 = vector.extract_strided_slice %1031 {offsets = [24, 0], sizes = [8, 128], strides = [1, 1]} : vector<64x128xf32> to vector<8x128xf32>
    %1126 = arith.select %21, %1124, %1125 : vector<8x128xi1>, vector<8x128xf32>
    %1127 = arith.truncf %1123 : vector<8x32xf32> to vector<8x32xbf16>
    %cst_180 = arith.constant dense<0.000000e+00> : vector<8x128xf32>
    %1128 = tpu.matmul %1127, %1025, %cst_180 {dimension_numbers = #tpu.dot_dimension_numbers<[1], [0], [0], [1], [0, 0, 1, 1], [], []>} : vector<8x32xbf16>, vector<32x128xbf16>, vector<8x128xf32> -> vector<8x128xf32>
    %1129 = arith.addf %1126, %1128 : vector<8x128xf32>
    %1130 = vector.extract_strided_slice %1129 {offsets = [0, 0], sizes = [8, 96], strides = [1, 1]} : vector<8x128xf32> to vector<8x96xf32>
    %1131 = arith.negf %1130 : vector<8x96xf32>
    %1132 = math.exp %1131 : vector<8x96xf32>
    %cst_181 = arith.constant 1.000000e+00 : f32
    %1133 = vector.broadcast %cst_181 : f32 to vector<8x96xf32>
    %1134 = arith.addf %1133, %1132 : vector<8x96xf32>
    %1135 = arith.divf %1133, %1134 : vector<8x96xf32>
    %1136 = vector.extract_strided_slice %1135 {offsets = [0, 0], sizes = [8, 32], strides = [1, 1]} : vector<8x96xf32> to vector<8x32xf32>
    %1137 = vector.extract_strided_slice %1135 {offsets = [0, 32], sizes = [8, 32], strides = [1, 1]} : vector<8x96xf32> to vector<8x32xf32>
    %1138 = vector.extract_strided_slice %1135 {offsets = [0, 64], sizes = [8, 32], strides = [1, 1]} : vector<8x96xf32> to vector<8x32xf32>
    %1139 = vector.extract_strided_slice %1129 {offsets = [0, 96], sizes = [8, 32], strides = [1, 1]} : vector<8x128xf32> to vector<8x32xf32>
    %1140 = math.tanh %1139 : vector<8x32xf32>
    %1141 = arith.mulf %1137, %1121 : vector<8x32xf32>
    %1142 = arith.mulf %1136, %1140 : vector<8x32xf32>
    %1143 = arith.addf %1141, %1142 : vector<8x32xf32>
    %1144 = math.tanh %1143 : vector<8x32xf32>
    %1145 = arith.mulf %1138, %1144 : vector<8x32xf32>
    %1146 = vector.extract_strided_slice %1031 {offsets = [40, 0], sizes = [8, 128], strides = [1, 1]} : vector<64x128xf32> to vector<8x128xf32>
    %1147 = vector.extract_strided_slice %1031 {offsets = [16, 0], sizes = [8, 128], strides = [1, 1]} : vector<64x128xf32> to vector<8x128xf32>
    %1148 = arith.select %21, %1146, %1147 : vector<8x128xi1>, vector<8x128xf32>
    %1149 = arith.truncf %1145 : vector<8x32xf32> to vector<8x32xbf16>
    %cst_182 = arith.constant dense<0.000000e+00> : vector<8x128xf32>
    %1150 = tpu.matmul %1149, %1025, %cst_182 {dimension_numbers = #tpu.dot_dimension_numbers<[1], [0], [0], [1], [0, 0, 1, 1], [], []>} : vector<8x32xbf16>, vector<32x128xbf16>, vector<8x128xf32> -> vector<8x128xf32>
    %1151 = arith.addf %1148, %1150 : vector<8x128xf32>
    %1152 = vector.extract_strided_slice %1151 {offsets = [0, 0], sizes = [8, 96], strides = [1, 1]} : vector<8x128xf32> to vector<8x96xf32>
    %1153 = arith.negf %1152 : vector<8x96xf32>
    %1154 = math.exp %1153 : vector<8x96xf32>
    %cst_183 = arith.constant 1.000000e+00 : f32
    %1155 = vector.broadcast %cst_183 : f32 to vector<8x96xf32>
    %1156 = arith.addf %1155, %1154 : vector<8x96xf32>
    %1157 = arith.divf %1155, %1156 : vector<8x96xf32>
    %1158 = vector.extract_strided_slice %1157 {offsets = [0, 0], sizes = [8, 32], strides = [1, 1]} : vector<8x96xf32> to vector<8x32xf32>
    %1159 = vector.extract_strided_slice %1157 {offsets = [0, 32], sizes = [8, 32], strides = [1, 1]} : vector<8x96xf32> to vector<8x32xf32>
    %1160 = vector.extract_strided_slice %1157 {offsets = [0, 64], sizes = [8, 32], strides = [1, 1]} : vector<8x96xf32> to vector<8x32xf32>
    %1161 = vector.extract_strided_slice %1151 {offsets = [0, 96], sizes = [8, 32], strides = [1, 1]} : vector<8x128xf32> to vector<8x32xf32>
    %1162 = math.tanh %1161 : vector<8x32xf32>
    %1163 = arith.mulf %1159, %1143 : vector<8x32xf32>
    %1164 = arith.mulf %1158, %1162 : vector<8x32xf32>
    %1165 = arith.addf %1163, %1164 : vector<8x32xf32>
    %1166 = math.tanh %1165 : vector<8x32xf32>
    %1167 = arith.mulf %1160, %1166 : vector<8x32xf32>
    %1168 = vector.extract_strided_slice %1031 {offsets = [48, 0], sizes = [8, 128], strides = [1, 1]} : vector<64x128xf32> to vector<8x128xf32>
    %1169 = vector.extract_strided_slice %1031 {offsets = [8, 0], sizes = [8, 128], strides = [1, 1]} : vector<64x128xf32> to vector<8x128xf32>
    %1170 = arith.select %21, %1168, %1169 : vector<8x128xi1>, vector<8x128xf32>
    %1171 = arith.truncf %1167 : vector<8x32xf32> to vector<8x32xbf16>
    %cst_184 = arith.constant dense<0.000000e+00> : vector<8x128xf32>
    %1172 = tpu.matmul %1171, %1025, %cst_184 {dimension_numbers = #tpu.dot_dimension_numbers<[1], [0], [0], [1], [0, 0, 1, 1], [], []>} : vector<8x32xbf16>, vector<32x128xbf16>, vector<8x128xf32> -> vector<8x128xf32>
    %1173 = arith.addf %1170, %1172 : vector<8x128xf32>
    %1174 = vector.extract_strided_slice %1173 {offsets = [0, 0], sizes = [8, 96], strides = [1, 1]} : vector<8x128xf32> to vector<8x96xf32>
    %1175 = arith.negf %1174 : vector<8x96xf32>
    %1176 = math.exp %1175 : vector<8x96xf32>
    %cst_185 = arith.constant 1.000000e+00 : f32
    %1177 = vector.broadcast %cst_185 : f32 to vector<8x96xf32>
    %1178 = arith.addf %1177, %1176 : vector<8x96xf32>
    %1179 = arith.divf %1177, %1178 : vector<8x96xf32>
    %1180 = vector.extract_strided_slice %1179 {offsets = [0, 0], sizes = [8, 32], strides = [1, 1]} : vector<8x96xf32> to vector<8x32xf32>
    %1181 = vector.extract_strided_slice %1179 {offsets = [0, 32], sizes = [8, 32], strides = [1, 1]} : vector<8x96xf32> to vector<8x32xf32>
    %1182 = vector.extract_strided_slice %1179 {offsets = [0, 64], sizes = [8, 32], strides = [1, 1]} : vector<8x96xf32> to vector<8x32xf32>
    %1183 = vector.extract_strided_slice %1173 {offsets = [0, 96], sizes = [8, 32], strides = [1, 1]} : vector<8x128xf32> to vector<8x32xf32>
    %1184 = math.tanh %1183 : vector<8x32xf32>
    %1185 = arith.mulf %1181, %1165 : vector<8x32xf32>
    %1186 = arith.mulf %1180, %1184 : vector<8x32xf32>
    %1187 = arith.addf %1185, %1186 : vector<8x32xf32>
    %1188 = math.tanh %1187 : vector<8x32xf32>
    %1189 = arith.mulf %1182, %1188 : vector<8x32xf32>
    %1190 = vector.extract_strided_slice %1031 {offsets = [56, 0], sizes = [8, 128], strides = [1, 1]} : vector<64x128xf32> to vector<8x128xf32>
    %1191 = vector.extract_strided_slice %1031 {offsets = [0, 0], sizes = [8, 128], strides = [1, 1]} : vector<64x128xf32> to vector<8x128xf32>
    %1192 = arith.select %21, %1190, %1191 : vector<8x128xi1>, vector<8x128xf32>
    %1193 = arith.truncf %1189 : vector<8x32xf32> to vector<8x32xbf16>
    %cst_186 = arith.constant dense<0.000000e+00> : vector<8x128xf32>
    %1194 = tpu.matmul %1193, %1025, %cst_186 {dimension_numbers = #tpu.dot_dimension_numbers<[1], [0], [0], [1], [0, 0, 1, 1], [], []>} : vector<8x32xbf16>, vector<32x128xbf16>, vector<8x128xf32> -> vector<8x128xf32>
    %1195 = arith.addf %1192, %1194 : vector<8x128xf32>
    %1196 = vector.extract_strided_slice %1195 {offsets = [0, 0], sizes = [8, 96], strides = [1, 1]} : vector<8x128xf32> to vector<8x96xf32>
    %1197 = arith.negf %1196 : vector<8x96xf32>
    %1198 = math.exp %1197 : vector<8x96xf32>
    %cst_187 = arith.constant 1.000000e+00 : f32
    %1199 = vector.broadcast %cst_187 : f32 to vector<8x96xf32>
    %1200 = arith.addf %1199, %1198 : vector<8x96xf32>
    %1201 = arith.divf %1199, %1200 : vector<8x96xf32>
    %1202 = vector.extract_strided_slice %1201 {offsets = [0, 0], sizes = [8, 32], strides = [1, 1]} : vector<8x96xf32> to vector<8x32xf32>
    %1203 = vector.extract_strided_slice %1201 {offsets = [0, 32], sizes = [8, 32], strides = [1, 1]} : vector<8x96xf32> to vector<8x32xf32>
    %1204 = vector.extract_strided_slice %1201 {offsets = [0, 64], sizes = [8, 32], strides = [1, 1]} : vector<8x96xf32> to vector<8x32xf32>
    %1205 = vector.extract_strided_slice %1195 {offsets = [0, 96], sizes = [8, 32], strides = [1, 1]} : vector<8x128xf32> to vector<8x32xf32>
    %1206 = math.tanh %1205 : vector<8x32xf32>
    %1207 = arith.mulf %1203, %1187 : vector<8x32xf32>
    %1208 = arith.mulf %1202, %1206 : vector<8x32xf32>
    %1209 = arith.addf %1207, %1208 : vector<8x32xf32>
    %1210 = math.tanh %1209 : vector<8x32xf32>
    %1211 = arith.mulf %1204, %1210 : vector<8x32xf32>
    %1212 = arith.select %2, %1057, %1211 : vector<8x32xi1>, vector<8x32xf32>
    %1213 = arith.select %2, %1079, %1189 : vector<8x32xi1>, vector<8x32xf32>
    %1214 = arith.select %2, %1101, %1167 : vector<8x32xi1>, vector<8x32xf32>
    %1215 = arith.select %2, %1123, %1145 : vector<8x32xi1>, vector<8x32xf32>
    %1216 = arith.select %2, %1145, %1123 : vector<8x32xi1>, vector<8x32xf32>
    %1217 = arith.select %2, %1167, %1101 : vector<8x32xi1>, vector<8x32xf32>
    %1218 = arith.select %2, %1189, %1079 : vector<8x32xi1>, vector<8x32xf32>
    %1219 = arith.select %2, %1211, %1057 : vector<8x32xi1>, vector<8x32xf32>
    %cst_188 = arith.constant 0.000000e+00 : f32
    %1220 = vector.broadcast %cst_188 : f32 to vector<8x32xf32>
    %cst_189 = arith.constant 0.000000e+00 : f32
    %1221 = vector.broadcast %cst_189 : f32 to vector<8x1xf32>
    %1222 = arith.cmpf ogt, %22, %1221 : vector<8x1xf32>
    %cst_190 = arith.constant 0.000000e+00 : f32
    %1223 = vector.broadcast %cst_190 : f32 to vector<8x1xf32>
    %1224 = arith.select %1222, %26, %1223 : vector<8x1xi1>, vector<8x1xf32>
    %1225 = vector.broadcast %1224 : vector<8x1xf32> to vector<8x32xf32>
    %1226 = arith.mulf %1225, %1212 : vector<8x32xf32>
    %1227 = arith.addf %1220, %1226 : vector<8x32xf32>
    %cst_191 = arith.constant 1.000000e+00 : f32
    %1228 = vector.broadcast %cst_191 : f32 to vector<8x1xf32>
    %1229 = arith.cmpf ogt, %22, %1228 : vector<8x1xf32>
    %cst_192 = arith.constant 0.000000e+00 : f32
    %1230 = vector.broadcast %cst_192 : f32 to vector<8x1xf32>
    %1231 = arith.select %1229, %26, %1230 : vector<8x1xi1>, vector<8x1xf32>
    %1232 = vector.broadcast %1231 : vector<8x1xf32> to vector<8x32xf32>
    %1233 = arith.mulf %1232, %1213 : vector<8x32xf32>
    %1234 = arith.addf %1227, %1233 : vector<8x32xf32>
    %cst_193 = arith.constant 2.000000e+00 : f32
    %1235 = vector.broadcast %cst_193 : f32 to vector<8x1xf32>
    %1236 = arith.cmpf ogt, %22, %1235 : vector<8x1xf32>
    %cst_194 = arith.constant 0.000000e+00 : f32
    %1237 = vector.broadcast %cst_194 : f32 to vector<8x1xf32>
    %1238 = arith.select %1236, %26, %1237 : vector<8x1xi1>, vector<8x1xf32>
    %1239 = vector.broadcast %1238 : vector<8x1xf32> to vector<8x32xf32>
    %1240 = arith.mulf %1239, %1214 : vector<8x32xf32>
    %1241 = arith.addf %1234, %1240 : vector<8x32xf32>
    %cst_195 = arith.constant 3.000000e+00 : f32
    %1242 = vector.broadcast %cst_195 : f32 to vector<8x1xf32>
    %1243 = arith.cmpf ogt, %22, %1242 : vector<8x1xf32>
    %cst_196 = arith.constant 0.000000e+00 : f32
    %1244 = vector.broadcast %cst_196 : f32 to vector<8x1xf32>
    %1245 = arith.select %1243, %26, %1244 : vector<8x1xi1>, vector<8x1xf32>
    %1246 = vector.broadcast %1245 : vector<8x1xf32> to vector<8x32xf32>
    %1247 = arith.mulf %1246, %1215 : vector<8x32xf32>
    %1248 = arith.addf %1241, %1247 : vector<8x32xf32>
    %cst_197 = arith.constant 4.000000e+00 : f32
    %1249 = vector.broadcast %cst_197 : f32 to vector<8x1xf32>
    %1250 = arith.cmpf ogt, %22, %1249 : vector<8x1xf32>
    %cst_198 = arith.constant 0.000000e+00 : f32
    %1251 = vector.broadcast %cst_198 : f32 to vector<8x1xf32>
    %1252 = arith.select %1250, %26, %1251 : vector<8x1xi1>, vector<8x1xf32>
    %1253 = vector.broadcast %1252 : vector<8x1xf32> to vector<8x32xf32>
    %1254 = arith.mulf %1253, %1216 : vector<8x32xf32>
    %1255 = arith.addf %1248, %1254 : vector<8x32xf32>
    %cst_199 = arith.constant 5.000000e+00 : f32
    %1256 = vector.broadcast %cst_199 : f32 to vector<8x1xf32>
    %1257 = arith.cmpf ogt, %22, %1256 : vector<8x1xf32>
    %cst_200 = arith.constant 0.000000e+00 : f32
    %1258 = vector.broadcast %cst_200 : f32 to vector<8x1xf32>
    %1259 = arith.select %1257, %26, %1258 : vector<8x1xi1>, vector<8x1xf32>
    %1260 = vector.broadcast %1259 : vector<8x1xf32> to vector<8x32xf32>
    %1261 = arith.mulf %1260, %1217 : vector<8x32xf32>
    %1262 = arith.addf %1255, %1261 : vector<8x32xf32>
    %cst_201 = arith.constant 6.000000e+00 : f32
    %1263 = vector.broadcast %cst_201 : f32 to vector<8x1xf32>
    %1264 = arith.cmpf ogt, %22, %1263 : vector<8x1xf32>
    %cst_202 = arith.constant 0.000000e+00 : f32
    %1265 = vector.broadcast %cst_202 : f32 to vector<8x1xf32>
    %1266 = arith.select %1264, %26, %1265 : vector<8x1xi1>, vector<8x1xf32>
    %1267 = vector.broadcast %1266 : vector<8x1xf32> to vector<8x32xf32>
    %1268 = arith.mulf %1267, %1218 : vector<8x32xf32>
    %1269 = arith.addf %1262, %1268 : vector<8x32xf32>
    %cst_203 = arith.constant 7.000000e+00 : f32
    %1270 = vector.broadcast %cst_203 : f32 to vector<8x1xf32>
    %1271 = arith.cmpf ogt, %22, %1270 : vector<8x1xf32>
    %cst_204 = arith.constant 0.000000e+00 : f32
    %1272 = vector.broadcast %cst_204 : f32 to vector<8x1xf32>
    %1273 = arith.select %1271, %26, %1272 : vector<8x1xi1>, vector<8x1xf32>
    %1274 = vector.broadcast %1273 : vector<8x1xf32> to vector<8x32xf32>
    %1275 = arith.mulf %1274, %1219 : vector<8x32xf32>
    %1276 = arith.addf %1269, %1275 : vector<8x32xf32>
    %c6_205 = arith.constant 6 : index
    %c0_206 = arith.constant 0 : index
    %c0_207 = arith.constant 0 : index
    %1277 = vector.load %arg5[%c6_205, %c0_206, %c0_207] : memref<7x1x128xf32, #tpu.memory_space<vmem>>, vector<1x1x128xf32>
    %1278 = vector.shape_cast %1277 : vector<1x1x128xf32> to vector<1x128xf32>
    %1279 = vector.extract_strided_slice %1278 {offsets = [0, 0], sizes = [1, 32], strides = [1, 1]} : vector<1x128xf32> to vector<1x32xf32>
    %1280 = vector.extract_strided_slice %1278 {offsets = [0, 32], sizes = [1, 1], strides = [1, 1]} : vector<1x128xf32> to vector<1x1xf32>
    %1281 = vector.broadcast %1279 : vector<1x32xf32> to vector<8x32xf32>
    %1282 = arith.mulf %1276, %1281 : vector<8x32xf32>
    %cst_208 = arith.constant dense<0.000000e+00> : vector<8xf32>
    %1283 = vector.multi_reduction <add>, %1282, %cst_208 [1] : vector<8x32xf32> to vector<8xf32>
    %1284 = vector.shape_cast %1283 : vector<8xf32> to vector<8x1xf32>
    %1285 = vector.broadcast %1280 : vector<1x1xf32> to vector<8x1xf32>
    %1286 = arith.addf %1284, %1285 : vector<8x1xf32>
    %c0_209 = arith.constant 0 : index
    %c0_210 = arith.constant 0 : index
    %1287 = vector.load %arg7[%c0_209, %c0_210] : memref<8x1xf32, #tpu.memory_space<vmem>>, vector<8x1xf32>
    tpu.vector_store %arg7[%c0_209, %c0_210], %1286 {strides = array<i32>} : memref<8x1xf32, #tpu.memory_space<vmem>>, vector<8x1xf32>,
    return
  }
  func.func @transform_0(%arg0: i32) -> (i32, i32) {
    %c0_i32 = arith.constant 0 : i32
    %c0_i32_0 = arith.constant 0 : i32
    %c0_i32_1 = arith.constant 0 : i32
    return %c0_i32, %c0_i32_0 : i32, i32
  }
  func.func @transform_1(%arg0: i32) -> (i32, i32) {
    %c0_i32 = arith.constant 0 : i32
    %c0_i32_0 = arith.constant 0 : i32
    %c0_i32_1 = arith.constant 0 : i32
    return %c0_i32, %c0_i32_0 : i32, i32
  }
  func.func @transform_2(%arg0: i32) -> (i32, i32) {
    %c0_i32 = arith.constant 0 : i32
    %c0_i32_0 = arith.constant 0 : i32
    %c0_i32_1 = arith.constant 0 : i32
    return %c0_i32, %c0_i32_0 : i32, i32
  }
  func.func @transform_3(%arg0: i32) -> (i32, i32, i32) {
    %c0_i32 = arith.constant 0 : i32
    %c0_i32_0 = arith.constant 0 : i32
    %c0_i32_1 = arith.constant 0 : i32
    %c0_i32_2 = arith.constant 0 : i32
    return %c0_i32, %c0_i32_0, %c0_i32_1 : i32, i32, i32
  }
  func.func @transform_4(%arg0: i32) -> (i32, i32, i32) {
    %c0_i32 = arith.constant 0 : i32
    %c0_i32_0 = arith.constant 0 : i32
    %c0_i32_1 = arith.constant 0 : i32
    %c0_i32_2 = arith.constant 0 : i32
    return %c0_i32, %c0_i32_0, %c0_i32_1 : i32, i32, i32
  }
  func.func @transform_5(%arg0: i32) -> (i32, i32, i32) {
    %c0_i32 = arith.constant 0 : i32
    %c0_i32_0 = arith.constant 0 : i32
    %c0_i32_1 = arith.constant 0 : i32
    %c0_i32_2 = arith.constant 0 : i32
    return %c0_i32, %c0_i32_0, %c0_i32_1 : i32, i32, i32
  }
  func.func @transform_6(%arg0: i32) -> (i32, i32) {
    %c0_i32 = arith.constant 0 : i32
    %c0_i32_0 = arith.constant 0 : i32
    %c0_i32_1 = arith.constant 0 : i32
    return %c0_i32, %c0_i32_0 : i32, i32
  }
}

</mosaic_0001>

<bundles_post_ra>
// kernel: lstm_tagger_forward.1
= control target key start
LH: loop header
LB: loop body
LE: loop exit
PB: predicated region body
PF: predicated region fallthrough
CT: control target
= control target key end

     0   :  { %vm94_vm0 = vcmask 261120   ;;  %v24_v24 = vlaneseq  ;;  %s4558_s26 = smov 64   ;;  %s5935_s2 = inlined_call_operand.vmem [shape: bf16[32,128], index: 2, kind: input, shape index: {}]   ;;  %s5936_s0 = inlined_call_operand.vmem [shape: f32[64,32], index: 0, kind: input, shape index: {}]   ;;  %s5937_s4 = inlined_call_operand.vmem [shape: f32[7,1,128], index: 4, kind: input, shape index: {}]   ;;  %s5938_s3 = inlined_call_operand.vmem [shape: bf16[11,32,128], index: 3, kind: input, shape index: {}]   ;;  %s5939_s5 = inlined_call_operand.vmem [shape: f32[12,8,32], index: 5, kind: input, shape index: {}]   ;;  %s5940_s1 = inlined_call_operand.vmem [shape: f32[8,1], index: 1, kind: input, shape index: {}]   ;;  %s5941_s6 = inlined_call_operand.vmem [shape: f32[8,1], index: 6, kind: output, shape index: {}]  }
   0x1   :  { %v4034_v0 = vld [vmem:[%s5935_s2 + $0x8] sm:$0xff]  ;;  %v4033_v1 = vld [vmem:[%s5935_s2] sm:$0xff]  ;;  %v4612_v5 = vld [vmem:[%s5938_s3 + $0x58] sm:$0xff] }
   0x2   :  { %113 = vmatpush.bf16.msra.mxu0 %v4034_v0  ;;  %v57_v2 = vld [vmem:[%s5936_s0] sm:$0xff]  ;;  %v58_v3 = vld [vmem:[%s5936_s0 + $0x8] sm:$0xff]  ;;  %162 = vmatpush.bf16.msra.mxu1 %v4612_v5  ;;  %v59_v6 = vld [vmem:[%s5936_s0 + $0x10] sm:$0xff]  ;;  %v4663_v26 = vand.u32 127, %v24_v24 }
   0x3   :  { %v75_v4 = vpack.c.bf16 %v58_v3, %v57_v2  ;;  %225 = vmatpush.bf16.msra.mxu2 %v4612_v5  ;;  %284 = vmatpush.bf16.msra.mxu3 %v4612_v5  ;;  %v60_v7 = vld [vmem:[%s5936_s0 + $0x18] sm:$0xff]  ;;  %v4626_v9 = vld [vmem:[%s5938_s3 + $0x50] sm:$0xff]  ;;  %v136_v10 = vld [vmem:[%s5939_s5] sm:$0xff] }
   0x4   :  { %v76_v8 = vpack.c.bf16 %v60_v7, %v59_v6  ;;  %v140_v11 = vpack.c.bf16 %v136_v10, %v136_v10  ;;  %v61_v12 = vld [vmem:[%s5936_s0 + $0x20] sm:$0xff]  ;;  %v62_v13 = vld [vmem:[%s5936_s0 + $0x28] sm:$0xff]  ;;  %v63_v15 = vld [vmem:[%s5936_s0 + $0x30] sm:$0xff]  ;;  %v31_v28 = vand.u32 31, %v4663_v26 }
   0x5   :  { %v77_v14 = vpack.c.bf16 %v62_v13, %v61_v12  ;;  %v64_v16 = vld [vmem:[%s5936_s0 + $0x38] sm:$0xff]  ;;  %v4164_v20 = vld [vmem:[%s5937_s4] ss:$0 sm:$0xff]  ;;  %s4557_s0 = smov 32   ;;  %v3776_v51 = vld [vmem:[%s5939_s5 + $0x8] sm:$0xff] }
   0x6   :  { %114 = vmatpush.bf16.msra.mxu0 %v4033_v1  ;;  %163 = vmatpush.bf16.msra.mxu1 %v4626_v9  ;;  %v78_v17 = vpack.c.bf16 %v64_v16, %v63_v15  ;;  %vm4666_vm1 = vcmp.lt.s32.totalorder %v31_v28, 16 }
   0x7   :  { %226 = vmatpush.bf16.msra.mxu2 %v4626_v9  ;;  %285 = vmatpush.bf16.msra.mxu3 %v4626_v9 }
   0x9   :  { %3772 = vmatmul.msk.bf16.vlgmr.msra.gmra.mxu0 %vm94_vm0, %v75_v4  ;;  %3785 = vmatmul.msk.bf16.vlgmr.msra.gmra.mxu1 %vm94_vm0, %v140_v11 }
   0xa   :  { %343 = vmatpush.bf16.msrb.mxu1 %v4612_v5 }
   0xb   :  { %402 = vmatpush.bf16.msrb.mxu2 %v4612_v5  ;;  %461 = vmatpush.bf16.msrb.mxu3 %v4612_v5 }
   0xe   :  { %344 = vmatpush.bf16.msrb.mxu1 %v4626_v9 }
   0xf   :  { %403 = vmatpush.bf16.msrb.mxu2 %v4626_v9  ;;  %462 = vmatpush.bf16.msrb.mxu3 %v4626_v9 }
  0x12   :  { %520 = vmatpush.bf16.msra.mxu1 %v4612_v5 }
  0x16   :  { %521 = vmatpush.bf16.msra.mxu1 %v4626_v9 }
  0x19   :  { %3773 = vmatmul.msk.bf16.gmra.mxu0 %vm94_vm0, %v76_v8 }
  0x29   :  { %3774 = vmatmul.msk.bf16.gmra.mxu0 %vm94_vm0, %v77_v14 }
  0x39   :  { %3775 = vmatmul.msk.bf16.gmra.mxu0 %vm94_vm0, %v78_v17 }
  0x86   :  { %v116_v18 = vpop.f32.mrf.mxu0  ;;  %v165_v23 = vpop.f32.mrf.mxu1 }
  0x87   :  { %v4704_v45 = vadd.f32 %v4164_v20, %v116_v18 }
  0x8e   :  { %v118_v19 = vpop.f32.mrf.mxu0  ;;  %v167_v27 = vpop.f32.mrf.mxu1 }
  0x8f   :  { %v4692_v40 = vadd.f32 %v4164_v20, %v118_v19 }
  0x96   :  { %v121_v21 = vpop.f32.mrf.mxu0 }
  0x97   :  { %v4661_v22 = vadd.f32 %v4164_v20, %v121_v21 }
  0x9e   :  { %v123_v25 = vpop.f32.mrf.mxu0 }
  0x9f   :  { %v4670_v31 = vadd.f32 %v4164_v20, %v123_v25 }
  0xa6   :  { %v126_v29 = vpop.f32.mrf.mxu0 }
  0xa7   :  { %v4672_v32 = vadd.f32 %v4164_v20, %v126_v29 }
  0xa9   :  { %v329_v33 = vsel %vm4666_vm1, %v4670_v31, %v4672_v32  ;;  %v388_v34 = vsel %vm4666_vm1, %v4672_v32, %v4670_v31 }
  0xae   :  { %v128_v35 = vpop.f32.mrf.mxu0 }
  0xaf   :  { %v4682_v36 = vadd.f32 %v4164_v20, %v128_v35 }
  0xb1   :  { %v270_v37 = vsel %vm4666_vm1, %v4661_v22, %v4682_v36  ;;  %v447_v38 = vsel %vm4666_vm1, %v4682_v36, %v4661_v22 }
  0xb6   :  { %v131_v39 = vpop.f32.mrf.mxu0 }
  0xb7   :  { %v4694_v41 = vadd.f32 %v4164_v20, %v131_v39 }
  0xb9   :  { %v211_v42 = vsel %vm4666_vm1, %v4692_v40, %v4694_v41  ;;  %v506_v43 = vsel %vm4666_vm1, %v4694_v41, %v4692_v40 }
  0xbe   :  { %v133_v44 = vpop.f32.mrf.mxu0 }
  0xbf   :  { %v4706_v46 = vadd.f32 %v4164_v20, %v133_v44 }
  0xc1   :  { %v139_v47 = vsel %vm4666_vm1, %v4704_v45, %v4706_v46  ;;  %v565_v48 = vsel %vm4666_vm1, %v4706_v46, %v4704_v45 }
  0xc2   :  { %v169_v49 = vadd.f32 %v165_v23, %v139_v47 }
  0xc4   :  { %4171 = vtanh.f32 %v169_v49  ;;  %v3786_v52 = vmul.f32 -1.442695, %v169_v49 }
  0xc6   :  { %4173 = vpow2.f32 %v3786_v52 }
  0xca   :  { %v4172_v50 = vpop.eup %4171 }
  0xcb   :  { %196 = vrot.lane.b32.xlu0 %v4172_v50, %s4557_s0 }
  0xcc   :  { %v4174_v53 = vpop.eup %4173 }
  0xcd   :  { %v173_v54 = vadd.f32 1.0, %v4174_v53 }
  0xcf   :  { %4175 = vrcp.f32 %v173_v54  ;;  %v185_v60 = vand.u32 2147483648, %v173_v54  ;;  %vm179_vm3 = vweird.f32 %v173_v54  ;;  %v183_v61 = vand.u32 2147483647, %v173_v54 }
  0xd1   :  { %v186_v63 = vor.u32 1.1754944e-38, %v185_v60  ;;  %vm184_vm5 = vcmp.eq.f32.partialorder %v183_v61, 8.507059e+37 }
  0xd3   :  { %191 = vrot.lane.b32.xlu0 %v3776_v51, %s4557_s0 }
  0xd5   :  { %v4176_v55 = vpop.eup %4175 }
  0xd6   :  { %v175_v56 = vmul.f32 %v4176_v55, %v173_v54  ;;  %vm180_vm2 = vweird.f32 %v4176_v55 }
  0xd7   :  { %vm181_vm4 = vmor %vm179_vm3, %vm180_vm2 }
  0xd8   :  { %v176_v57 = vsub.f32 1.0, %v175_v56 }
  0xda   :  { %v177_v58 = vmul.f32 %v4176_v55, %v176_v57 }
  0xdc   :  { %v178_v59 = vadd.f32 %v4176_v55, %v177_v58 }
  0xde   :  { %v182_v62 = vsel %vm181_vm4, %v4176_v55, %v178_v59 }
  0xdf   :  { %v187_v1 = vsel %vm184_vm5, %v186_v63, %v182_v62 }
 0x13d   :  { %v197_v0 = vpop.permute.xlu0 %196 }
 0x13e   :  { %v199_v2 = vmul.f32 %v197_v0, %v187_v1 }
 0x140   :  { %201 = vrot.lane.b32.xlu1 %v199_v2, %s4557_s0 }
 0x145   :  { %v192_v3 = vpop.permute.xlu0 %191 }
 0x146   :  { %v194_v4 = vmul.f32 %v192_v3, %v187_v1 }
 0x1b2   :  { %v202_v6 = vpop.permute.xlu1 %201 }
 0x1b3   :  { %v204_v7 = vadd.f32 %v202_v6, %v194_v4 }
 0x1b5   :  { %4177 = vtanh.f32 %v204_v7 }
 0x1bb   :  { %v4178_v8 = vpop.eup %4177 }
 0x1bc   :  { %207 = vrot.lane.b32.xlu1 %v4178_v8, %s4557_s0 }
 0x22e   :  { %v208_v10 = vpop.permute.xlu1 %207 }
 0x22f   :  { %v4723_v11 = vmul.f32 %v208_v10, %v187_v1 }
 0x231   :  { %v212_v12 = vpack.c.bf16 %v4723_v11, %v4723_v11 }
 0x233   :  { %214 = vrot.lane.b32.xlu2 %v212_v12, %s4558_s26 }
 0x28d   :  { %v215_v13 = vpop.permute.xlu2 %214 }
 0x28e   :  { %3787 = vmatmul.msk.bf16.vlgmr.msra.gmra.mxu2 %vm94_vm0, %v215_v13 }
 0x28f   :  { %579 = vmatpush.bf16.msra.mxu2 %v4612_v5 }
 0x293   :  { %580 = vmatpush.bf16.msra.mxu2 %v4626_v9 }
 0x311   :  { %v228_v14 = vpop.f32.mrf.mxu2 }
 0x312   :  { %v232_v15 = vadd.f32 %v228_v14, %v211_v42 }
 0x314   :  { %4179 = vtanh.f32 %v232_v15  ;;  %v3788_v18 = vmul.f32 -1.442695, %v232_v15 }
 0x316   :  { %4181 = vpow2.f32 %v3788_v18 }
 0x319   :  { %v230_v16 = vpop.f32.mrf.mxu2 }
 0x31a   :  { %v4180_v17 = vpop.eup %4179 }
 0x31b   :  { %255 = vrot.lane.b32.xlu2 %v4180_v17, %s4557_s0 }
 0x31c   :  { %v4182_v19 = vpop.eup %4181 }
 0x31d   :  { %v236_v20 = vadd.f32 1.0, %v4182_v19 }
 0x31f   :  { %4183 = vrcp.f32 %v236_v20  ;;  %v248_v5 = vand.u32 2147483648, %v236_v20  ;;  %vm242_vm7 = vweird.f32 %v236_v20  ;;  %v246_v9 = vand.u32 2147483647, %v236_v20 }
 0x321   :  { %v249_v29 = vor.u32 1.1754944e-38, %v248_v5  ;;  %vm247_vm9 = vcmp.eq.f32.partialorder %v246_v9, 8.507059e+37 }
 0x325   :  { %v4184_v21 = vpop.eup %4183 }
 0x326   :  { %v238_v23 = vmul.f32 %v4184_v21, %v236_v20  ;;  %vm243_vm6 = vweird.f32 %v4184_v21 }
 0x327   :  { %vm244_vm8 = vmor %vm242_vm7, %vm243_vm6 }
 0x328   :  { %v239_v24 = vsub.f32 1.0, %v238_v23 }
 0x32a   :  { %v240_v25 = vmul.f32 %v4184_v21, %v239_v24 }
 0x32c   :  { %v241_v27 = vadd.f32 %v4184_v21, %v240_v25 }
 0x32e   :  { %v245_v28 = vsel %vm244_vm8, %v4184_v21, %v241_v27 }
 0x32f   :  { %v250_v39 = vsel %vm247_vm9, %v249_v29, %v245_v28 }
 0x330   :  { %v253_v44 = vmul.f32 %v250_v39, %v204_v7 }
 0x375   :  { %v256_v35 = vpop.permute.xlu2 %255 }
 0x376   :  { %v258_v42 = vmul.f32 %v256_v35, %v250_v39 }
 0x378   :  { %260 = vrot.lane.b32.xlu0 %v258_v42, %s4557_s0 }
 0x3ea   :  { %v261_v47 = vpop.permute.xlu0 %260 }
 0x3eb   :  { %v263_v49 = vadd.f32 %v261_v47, %v253_v44 }
 0x3ed   :  { %4185 = vtanh.f32 %v263_v49 }
 0x3f3   :  { %v4186_v50 = vpop.eup %4185 }
 0x3f4   :  { %266 = vrot.lane.b32.xlu1 %v4186_v50, %s4557_s0 }
 0x466   :  { %v267_v51 = vpop.permute.xlu1 %266 }
 0x467   :  { %v4734_v52 = vmul.f32 %v267_v51, %v250_v39 }
 0x469   :  { %v271_v53 = vpack.c.bf16 %v4734_v52, %v4734_v52 }
 0x46b   :  { %273 = vrot.lane.b32.xlu2 %v271_v53, %s4558_s26 }
 0x4c5   :  { %v274_v54 = vpop.permute.xlu2 %273 }
 0x4c6   :  { %3789 = vmatmul.msk.bf16.vlgmr.msra.gmra.mxu3 %vm94_vm0, %v274_v54 }
 0x549   :  { %v287_v55 = vpop.f32.mrf.mxu3 }
 0x54a   :  { %v291_v56 = vadd.f32 %v287_v55, %v270_v37 }
 0x54c   :  { %4187 = vtanh.f32 %v291_v56  ;;  %v3790_v59 = vmul.f32 -1.442695, %v291_v56 }
 0x54e   :  { %4189 = vpow2.f32 %v3790_v59 }
 0x551   :  { %v289_v57 = vpop.f32.mrf.mxu3 }
 0x552   :  { %v4188_v58 = vpop.eup %4187 }
 0x553   :  { %314 = vrot.lane.b32.xlu0 %v4188_v58, %s4557_s0 }
 0x554   :  { %v4190_v60 = vpop.eup %4189 }
 0x555   :  { %v295_v61 = vadd.f32 1.0, %v4190_v60 }
 0x557   :  { %4191 = vrcp.f32 %v295_v61  ;;  %v307_v3 = vand.u32 2147483648, %v295_v61  ;;  %vm301_vm11 = vweird.f32 %v295_v61  ;;  %v305_v4 = vand.u32 2147483647, %v295_v61 }
 0x559   :  { %v308_v6 = vor.u32 1.1754944e-38, %v307_v3  ;;  %vm306_vm13 = vcmp.eq.f32.partialorder %v305_v4, 8.507059e+37 }
 0x55d   :  { %v4192_v62 = vpop.eup %4191 }
 0x55e   :  { %v297_v63 = vmul.f32 %v4192_v62, %v295_v61  ;;  %vm302_vm10 = vweird.f32 %v4192_v62 }
 0x55f   :  { %vm303_vm12 = vmor %vm301_vm11, %vm302_vm10 }
 0x560   :  { %v298_v0 = vsub.f32 1.0, %v297_v63 }
 0x562   :  { %v299_v1 = vmul.f32 %v4192_v62, %v298_v0 }
 0x564   :  { %v300_v2 = vadd.f32 %v4192_v62, %v299_v1 }
 0x566   :  { %v304_v37 = vsel %vm303_vm12, %v4192_v62, %v300_v2 }
 0x567   :  { %v309_v8 = vsel %vm306_vm13, %v308_v6, %v304_v37 }
 0x568   :  { %v312_v12 = vmul.f32 %v309_v8, %v263_v49 }
 0x5c5   :  { %v315_v7 = vpop.permute.xlu0 %314 }
 0x5c6   :  { %v317_v10 = vmul.f32 %v315_v7, %v309_v8 }
 0x5c8   :  { %319 = vrot.lane.b32.xlu1 %v317_v10, %s4557_s0 }
 0x63a   :  { %v320_v13 = vpop.permute.xlu1 %319 }
 0x63b   :  { %v322_v14 = vadd.f32 %v320_v13, %v312_v12 }
 0x63d   :  { %4193 = vtanh.f32 %v322_v14 }
 0x643   :  { %v4194_v15 = vpop.eup %4193 }
 0x644   :  { %325 = vrot.lane.b32.xlu2 %v4194_v15, %s4557_s0 }
 0x69e   :  { %v326_v16 = vpop.permute.xlu2 %325 }
 0x69f   :  { %v4748_v17 = vmul.f32 %v326_v16, %v309_v8 }
 0x6a1   :  { %v330_v18 = vpack.c.bf16 %v4748_v17, %v4748_v17 }
 0x6a3   :  { %332 = vrot.lane.b32.xlu0 %v330_v18, %s4558_s26 }
 0x715   :  { %v333_v19 = vpop.permute.xlu0 %332 }
 0x716   :  { %3791 = vmatmul.msk.bf16.vlgmr.msrb.gmra.mxu1 %vm94_vm0, %v333_v19 }
 0x793   :  { %v346_v20 = vpop.f32.mrf.mxu1 }
 0x794   :  { %v350_v21 = vadd.f32 %v346_v20, %v329_v33 }
 0x796   :  { %4195 = vtanh.f32 %v350_v21  ;;  %v3792_v25 = vmul.f32 -1.442695, %v350_v21 }
 0x798   :  { %4197 = vpow2.f32 %v3792_v25 }
 0x79b   :  { %v348_v23 = vpop.f32.mrf.mxu1 }
 0x79c   :  { %v4196_v24 = vpop.eup %4195 }
 0x79d   :  { %373 = vrot.lane.b32.xlu1 %v4196_v24, %s4557_s0 }
 0x79e   :  { %v4198_v27 = vpop.eup %4197 }
 0x79f   :  { %v354_v5 = vadd.f32 1.0, %v4198_v27 }
 0x7a1   :  { %4199 = vrcp.f32 %v354_v5  ;;  %v366_v42 = vand.u32 2147483648, %v354_v5  ;;  %vm360_vm15 = vweird.f32 %v354_v5  ;;  %v364_v44 = vand.u32 2147483647, %v354_v5 }
 0x7a3   :  { %v367_v47 = vor.u32 1.1754944e-38, %v366_v42  ;;  %vm365_vm3 = vcmp.eq.f32.partialorder %v364_v44, 8.507059e+37 }
 0x7a7   :  { %v4200_v9 = vpop.eup %4199 }
 0x7a8   :  { %v356_v28 = vmul.f32 %v4200_v9, %v354_v5  ;;  %vm361_vm14 = vweird.f32 %v4200_v9 }
 0x7a9   :  { %vm362_vm2 = vmor %vm360_vm15, %vm361_vm14 }
 0x7aa   :  { %v357_v29 = vsub.f32 1.0, %v356_v28 }
 0x7ac   :  { %v358_v35 = vmul.f32 %v4200_v9, %v357_v29 }
 0x7ae   :  { %v359_v39 = vadd.f32 %v4200_v9, %v358_v35 }
 0x7b0   :  { %v363_v33 = vsel %vm362_vm2, %v4200_v9, %v359_v39 }
 0x7b1   :  { %v368_v50 = vsel %vm365_vm3, %v367_v47, %v363_v33 }
 0x7b2   :  { %v371_v53 = vmul.f32 %v368_v50, %v322_v14 }
 0x80f   :  { %v374_v49 = vpop.permute.xlu1 %373 }
 0x810   :  { %v376_v51 = vmul.f32 %v374_v49, %v368_v50 }
 0x812   :  { %378 = vrot.lane.b32.xlu2 %v376_v51, %s4557_s0 }
 0x86c   :  { %v379_v54 = vpop.permute.xlu2 %378 }
 0x86d   :  { %v381_v55 = vadd.f32 %v379_v54, %v371_v53 }
 0x86f   :  { %4201 = vtanh.f32 %v381_v55 }
 0x875   :  { %v4202_v56 = vpop.eup %4201 }
 0x876   :  { %384 = vrot.lane.b32.xlu0 %v4202_v56, %s4557_s0 }
 0x8e8   :  { %v385_v57 = vpop.permute.xlu0 %384 }
 0x8e9   :  { %v4762_v58 = vmul.f32 %v385_v57, %v368_v50 }
 0x8eb   :  { %v389_v59 = vpack.c.bf16 %v4762_v58, %v4762_v58 }
 0x8ed   :  { %391 = vrot.lane.b32.xlu1 %v389_v59, %s4558_s26 }
 0x95f   :  { %v392_v60 = vpop.permute.xlu1 %391 }
 0x960   :  { %3793 = vmatmul.msk.bf16.vlgmr.msrb.gmra.mxu2 %vm94_vm0, %v392_v60 }
 0x9e3   :  { %v405_v61 = vpop.f32.mrf.mxu2 }
 0x9e4   :  { %v409_v62 = vadd.f32 %v405_v61, %v388_v34 }
 0x9e6   :  { %4203 = vtanh.f32 %v409_v62  ;;  %v3794_v1 = vmul.f32 -1.442695, %v409_v62 }
 0x9e8   :  { %4205 = vpow2.f32 %v3794_v1 }
 0x9eb   :  { %v407_v63 = vpop.f32.mrf.mxu2 }
 0x9ec   :  { %v4204_v0 = vpop.eup %4203 }
 0x9ed   :  { %432 = vrot.lane.b32.xlu2 %v4204_v0, %s4557_s0 }
 0x9ee   :  { %v4206_v2 = vpop.eup %4205 }
 0x9ef   :  { %v413_v3 = vadd.f32 1.0, %v4206_v2 }
 0x9f1   :  { %4207 = vrcp.f32 %v413_v3  ;;  %v425_v10 = vand.u32 2147483648, %v413_v3  ;;  %vm419_vm5 = vweird.f32 %v413_v3  ;;  %v423_v31 = vand.u32 2147483647, %v413_v3 }
 0x9f3   :  { %v426_v34 = vor.u32 1.1754944e-38, %v425_v10  ;;  %vm424_vm7 = vcmp.eq.f32.partialorder %v423_v31, 8.507059e+37 }
 0x9f7   :  { %v4208_v4 = vpop.eup %4207 }
 0x9f8   :  { %v415_v37 = vmul.f32 %v4208_v4, %v413_v3  ;;  %vm420_vm4 = vweird.f32 %v4208_v4 }
 0x9f9   :  { %vm421_vm6 = vmor %vm419_vm5, %vm420_vm4 }
 0x9fa   :  { %v416_v6 = vsub.f32 1.0, %v415_v37 }
 0x9fc   :  { %v417_v7 = vmul.f32 %v4208_v4, %v416_v6 }
 0x9fe   :  { %v418_v8 = vadd.f32 %v4208_v4, %v417_v7 }
 0xa00   :  { %v422_v32 = vsel %vm421_vm6, %v4208_v4, %v418_v8  ;;  %vm26_vm6 = vcmp.lt.s32.totalorder %v4663_v26, 16 }
 0xa01   :  { %v427_v13 = vsel %vm424_vm7, %v426_v34, %v422_v32 }
 0xa02   :  { %v430_v15 = vmul.f32 %v427_v13, %v381_v55 }
 0xa47   :  { %v433_v12 = vpop.permute.xlu2 %432 }
 0xa48   :  { %v435_v14 = vmul.f32 %v433_v12, %v427_v13 }
 0xa4a   :  { %437 = vrot.lane.b32.xlu0 %v435_v14, %s4557_s0 }
 0xabc   :  { %v438_v16 = vpop.permute.xlu0 %437 }
 0xabd   :  { %v440_v18 = vadd.f32 %v438_v16, %v430_v15 }
 0xabf   :  { %4209 = vtanh.f32 %v440_v18 }
 0xac5   :  { %v4210_v19 = vpop.eup %4209 }
 0xac6   :  { %443 = vrot.lane.b32.xlu1 %v4210_v19, %s4557_s0 }
 0xb38   :  { %v444_v20 = vpop.permute.xlu1 %443 }
 0xb39   :  { %v4776_v21 = vmul.f32 %v444_v20, %v427_v13 }
 0xb3b   :  { %v448_v23 = vpack.c.bf16 %v4776_v21, %v4776_v21 }
 0xb3d   :  { %450 = vrot.lane.b32.xlu2 %v448_v23, %s4558_s26 }
 0xb97   :  { %v451_v24 = vpop.permute.xlu2 %450 }
 0xb98   :  { %3795 = vmatmul.msk.bf16.vlgmr.msrb.gmra.mxu3 %vm94_vm0, %v451_v24 }
 0xc1b   :  { %v464_v25 = vpop.f32.mrf.mxu3 }
 0xc1c   :  { %v468_v27 = vadd.f32 %v464_v25, %v447_v38 }
 0xc1e   :  { %4211 = vtanh.f32 %v468_v27  ;;  %v3796_v28 = vmul.f32 -1.442695, %v468_v27 }
 0xc20   :  { %4213 = vpow2.f32 %v3796_v28 }
 0xc23   :  { %v466_v5 = vpop.f32.mrf.mxu3 }
 0xc24   :  { %v4212_v9 = vpop.eup %4211 }
 0xc25   :  { %491 = vrot.lane.b32.xlu0 %v4212_v9, %s4557_s0 }
 0xc26   :  { %v4214_v29 = vpop.eup %4213 }
 0xc27   :  { %v472_v35 = vadd.f32 1.0, %v4214_v29 }
 0xc29   :  { %4215 = vrcp.f32 %v472_v35  ;;  %v484_v49 = vand.u32 2147483648, %v472_v35  ;;  %vm478_vm9 = vweird.f32 %v472_v35  ;;  %v482_v22 = vand.u32 2147483647, %v472_v35 }
 0xc2b   :  { %v485_v38 = vor.u32 1.1754944e-38, %v484_v49  ;;  %vm483_vm11 = vcmp.eq.f32.partialorder %v482_v22, 8.507059e+37 }
 0xc2f   :  { %v4216_v39 = vpop.eup %4215 }
 0xc30   :  { %v474_v42 = vmul.f32 %v4216_v39, %v472_v35  ;;  %vm479_vm8 = vweird.f32 %v4216_v39 }
 0xc31   :  { %vm480_vm10 = vmor %vm478_vm9, %vm479_vm8 }
 0xc32   :  { %v475_v44 = vsub.f32 1.0, %v474_v42 }
 0xc34   :  { %v476_v33 = vmul.f32 %v4216_v39, %v475_v44 }
 0xc36   :  { %v477_v47 = vadd.f32 %v4216_v39, %v476_v33 }
 0xc38   :  { %v481_v36 = vsel %vm480_vm10, %v4216_v39, %v477_v47 }
 0xc39   :  { %v486_v51 = vsel %vm483_vm11, %v485_v38, %v481_v36 }
 0xc3a   :  { %v489_v54 = vmul.f32 %v486_v51, %v440_v18 }
 0xc97   :  { %v492_v50 = vpop.permute.xlu0 %491 }
 0xc98   :  { %v494_v53 = vmul.f32 %v492_v50, %v486_v51 }
 0xc9a   :  { %496 = vrot.lane.b32.xlu1 %v494_v53, %s4557_s0 }
 0xd0c   :  { %v497_v55 = vpop.permute.xlu1 %496 }
 0xd0d   :  { %v499_v56 = vadd.f32 %v497_v55, %v489_v54 }
 0xd0f   :  { %4217 = vtanh.f32 %v499_v56 }
 0xd15   :  { %v4218_v57 = vpop.eup %4217 }
 0xd16   :  { %502 = vrot.lane.b32.xlu2 %v4218_v57, %s4557_s0  ;;  %v4038_v57 = vld [vmem:[%s5938_s3 + $0x8] sm:$0xff] }
 0xd17   :  { %712 = vmatpush.bf16.msra.mxu3 %v4038_v57 }
 0xd70   :  { %v503_v59 = vpop.permute.xlu2 %502 }
 0xd71   :  { %v4790_v60 = vmul.f32 %v503_v59, %v486_v51 }
 0xd73   :  { %v507_v61 = vpack.c.bf16 %v4790_v60, %v4790_v60 }
 0xd75   :  { %509 = vrot.lane.b32.xlu0 %v507_v61, %s4558_s26 }
 0xde7   :  { %v510_v62 = vpop.permute.xlu0 %509 }
 0xde8   :  { %3797 = vmatmul.msk.bf16.vlgmr.msra.gmra.mxu1 %vm94_vm0, %v510_v62 }
 0xe65   :  { %v523_v63 = vpop.f32.mrf.mxu1 }
 0xe66   :  { %v527_v0 = vadd.f32 %v523_v63, %v506_v43 }
 0xe68   :  { %4219 = vtanh.f32 %v527_v0  ;;  %v3798_v3 = vmul.f32 -1.442695, %v527_v0 }
 0xe6a   :  { %4221 = vpow2.f32 %v3798_v3 }
 0xe6d   :  { %v525_v1 = vpop.f32.mrf.mxu1 }
 0xe6e   :  { %v4220_v2 = vpop.eup %4219 }
 0xe6f   :  { %550 = vrot.lane.b32.xlu1 %v4220_v2, %s4557_s0 }
 0xe70   :  { %v4222_v4 = vpop.eup %4221 }
 0xe71   :  { %v531_v37 = vadd.f32 1.0, %v4222_v4 }
 0xe73   :  { %4223 = vrcp.f32 %v531_v37  ;;  %v543_v32 = vand.u32 2147483648, %v531_v37  ;;  %vm537_vm13 = vweird.f32 %v531_v37  ;;  %v541_v40 = vand.u32 2147483647, %v531_v37 }
 0xe75   :  { %v544_v43 = vor.u32 1.1754944e-38, %v543_v32  ;;  %vm542_vm15 = vcmp.eq.f32.partialorder %v541_v40, 8.507059e+37 }
 0xe79   :  { %v4224_v6 = vpop.eup %4223 }
 0xe7a   :  { %v533_v7 = vmul.f32 %v4224_v6, %v531_v37  ;;  %vm538_vm12 = vweird.f32 %v4224_v6 }
 0xe7b   :  { %vm539_vm14 = vmor %vm537_vm13, %vm538_vm12 }
 0xe7c   :  { %v534_v8 = vsub.f32 1.0, %v533_v7 }
 0xe7e   :  { %v535_v10 = vmul.f32 %v4224_v6, %v534_v8 }
 0xe80   :  { %v536_v31 = vadd.f32 %v4224_v6, %v535_v10 }
 0xe82   :  { %v540_v41 = vsel %vm539_vm14, %v4224_v6, %v536_v31 }
 0xe83   :  { %v545_v12 = vsel %vm542_vm15, %v544_v43, %v540_v41  ;;  %v4844_v41 = vld [vmem:[%s5938_s3 + $0x68] sm:$0xff]  ;;  %v3819_v43 = vld [vmem:[%s5939_s5 + $0x18] sm:$0xff] }
 0xe84   :  { %v548_v14 = vmul.f32 %v545_v12, %v499_v56  ;;  %v4071_v56 = vpack.i.bf16 %v4790_v60, %v4748_v17  ;;  %v4076_v17 = vpack.i.bf16 %v4776_v21, %v4762_v58  ;;  %762 = vmatpush.bf16.msrb.mxu1 %v4844_v41  ;;  %825 = vmatpush.bf16.msrb.mxu2 %v4844_v41 }
 0xe85   :  { %884 = vmatpush.bf16.msrb.mxu0 %v4844_v41 }
 0xee1   :  { %v551_v34 = vpop.permute.xlu1 %550 }
 0xee2   :  { %v553_v13 = vmul.f32 %v551_v34, %v545_v12  ;;  %v4853_v34 = vld [vmem:[%s5938_s3 + $0x60] sm:$0xff] }
 0xee3   :  { %763 = vmatpush.bf16.msrb.mxu1 %v4853_v34  ;;  %826 = vmatpush.bf16.msrb.mxu2 %v4853_v34 }
 0xee4   :  { %555 = vrot.lane.b32.xlu2 %v553_v13, %s4557_s0  ;;  %885 = vmatpush.bf16.msrb.mxu0 %v4853_v34 }
 0xee7   :  { %943 = vmatpush.bf16.msra.mxu1 %v4844_v41 }
 0xee8   :  { %1061 = vmatpush.bf16.msra.mxu0 %v4844_v41 }
 0xeeb   :  { %944 = vmatpush.bf16.msra.mxu1 %v4853_v34 }
 0xeec   :  { %1062 = vmatpush.bf16.msra.mxu0 %v4853_v34 }
 0xf3e   :  { %v556_v15 = vpop.permute.xlu2 %555 }
 0xf3f   :  { %v558_v16 = vadd.f32 %v556_v15, %v548_v14 }
 0xf41   :  { %4225 = vtanh.f32 %v558_v16 }
 0xf47   :  { %v4226_v18 = vpop.eup %4225 }
 0xf48   :  { %561 = vrot.lane.b32.xlu0 %v4226_v18, %s4557_s0 }
 0xfba   :  { %v562_v19 = vpop.permute.xlu0 %561 }
 0xfbb   :  { %v564_v20 = vmul.f32 %v562_v19, %v545_v12  ;;  %v3818_v12 = vld [vmem:[%s5939_s5 + $0x10] sm:$0xff] }
 0xfbc   :  { %v740_v13 = vpack.c.bf16 %v3818_v12, %v3818_v12 }
 0xfbd   :  { %v566_v23 = vpack.c.bf16 %v564_v20, %v564_v20  ;;  %v4066_v50 = vpack.i.bf16 %v564_v20, %v4734_v52  ;;  %v4037_v52 = vld [vmem:[%s5938_s3] sm:$0xff] }
 0xfbe   :  { %713 = vmatpush.bf16.msra.mxu3 %v4037_v52  ;;  %3828 = vmatmul.msk.bf16.vlgmr.msrb.gmra.mxu1 %vm94_vm0, %v740_v13 }
 0xfbf   :  { %568 = vrot.lane.b32.xlu1 %v566_v23, %s4558_s26  ;;  %1120 = vmatpush.bf16.msrb.mxu1 %v4844_v41 }
 0xfc3   :  { %1121 = vmatpush.bf16.msrb.mxu1 %v4853_v34 }
0x1031   :  { %v569_v24 = vpop.permute.xlu1 %568 }
0x1032   :  { %3799 = vmatmul.msk.bf16.vlgmr.msra.gmra.mxu2 %vm94_vm0, %v569_v24 }
0x1033   :  { %1002 = vmatpush.bf16.msra.mxu2 %v4844_v41 }
0x1037   :  { %1003 = vmatpush.bf16.msra.mxu2 %v4853_v34 }
0x10b5   :  { %v582_v25 = vpop.f32.mrf.mxu2 }
0x10b6   :  { %v586_v27 = vadd.f32 %v582_v25, %v565_v48  ;;  %v4165_v25 = vld [vmem:[%s5937_s4 + $0x1] ss:$0 sm:$0xff] }
0x10b8   :  { %4227 = vtanh.f32 %v586_v27  ;;  %v3800_v28 = vmul.f32 -1.442695, %v586_v27 }
0x10ba   :  { %4229 = vpow2.f32 %v3800_v28 }
0x10bd   :  { %v584_v5 = vpop.f32.mrf.mxu2 }
0x10be   :  { %v4228_v9 = vpop.eup %4227 }
0x10bf   :  { %609 = vrot.lane.b32.xlu2 %v4228_v9, %s4557_s0  ;;  %v765_v9 = vpop.f32.mrf.mxu1 }
0x10c0   :  { %v4230_v29 = vpop.eup %4229 }
0x10c1   :  { %v590_v35 = vadd.f32 1.0, %v4230_v29 }
0x10c3   :  { %4231 = vrcp.f32 %v590_v35  ;;  %v602_v49 = vand.u32 2147483648, %v590_v35  ;;  %vm596_vm3 = vweird.f32 %v590_v35  ;;  %v600_v45 = vand.u32 2147483647, %v590_v35 }
0x10c5   :  { %v603_v48 = vor.u32 1.1754944e-38, %v602_v49  ;;  %vm601_vm5 = vcmp.eq.f32.partialorder %v600_v45, 8.507059e+37 }
0x10c7   :  { %v767_v29 = vpop.f32.mrf.mxu1 }
0x10c9   :  { %v4232_v39 = vpop.eup %4231 }
0x10ca   :  { %v592_v42 = vmul.f32 %v4232_v39, %v590_v35  ;;  %vm597_vm2 = vweird.f32 %v4232_v39 }
0x10cb   :  { %vm598_vm4 = vmor %vm596_vm3, %vm597_vm2 }
0x10cc   :  { %v593_v44 = vsub.f32 1.0, %v592_v42 }
0x10ce   :  { %v594_v33 = vmul.f32 %v4232_v39, %v593_v44 }
0x10d0   :  { %v595_v47 = vadd.f32 %v4232_v39, %v594_v33 }
0x10d2   :  { %v599_v46 = vsel %vm598_vm4, %v4232_v39, %v595_v47 }
0x10d3   :  { %v604_v36 = vsel %vm601_vm5, %v603_v48, %v599_v46 }
0x10d4   :  { %v607_v51 = vmul.f32 %v604_v36, %v558_v16 }
0x1119   :  { %v610_v22 = vpop.permute.xlu2 %609 }
0x111a   :  { %v612_v38 = vmul.f32 %v610_v22, %v604_v36 }
0x111c   :  { %614 = vrot.lane.b32.xlu0 %v612_v38, %s4557_s0 }
0x1124   :  { %4067 = vrot.lane.b32.xlu0 %v4066_v50, %s4558_s26 }
0x118e   :  { %v615_v53 = vpop.permute.xlu0 %614 }
0x118f   :  { %v617_v54 = vadd.f32 %v615_v53, %v607_v51 }
0x1191   :  { %4233 = vtanh.f32 %v617_v54 }
0x1196   :  { %v4068_v60 = vpop.permute.xlu0 %4067 }
0x1197   :  { %v4234_v55 = vpop.eup %4233  ;;  %v4070_v63 = vunpack.i.h.bf16 %v4068_v60  ;;  %v4069_v0 = vunpack.i.l.bf16 %v4068_v60 }
0x1198   :  { %620 = vrot.lane.b32.xlu1 %v4234_v55, %s4557_s0 }
0x1199   :  { %v641_v4 = vsel %vm26_vm6, %v4069_v0, %v4070_v63  ;;  %v662_v19 = vsel %vm26_vm6, %v4070_v63, %v4069_v0 }
0x11a0   :  { %4072 = vrot.lane.b32.xlu1 %v4071_v56, %s4558_s26 }
0x11a8   :  { %791 = vrot.lane.b32.xlu1 %v3819_v43, %s4557_s0 }
0x120a   :  { %v621_v59 = vpop.permute.xlu1 %620 }
0x120b   :  { %v623_v61 = vmul.f32 %v621_v59, %v604_v36 }
0x120d   :  { %v4061_v62 = vpack.i.bf16 %v623_v61, %v4723_v11 }
0x120f   :  { %4062 = vrot.lane.b32.xlu2 %v4061_v62, %s4558_s26 }
0x1212   :  { %v4073_v21 = vpop.permute.xlu1 %4072 }
0x1213   :  { %v4075_v8 = vunpack.i.h.bf16 %v4073_v21  ;;  %v4074_v10 = vunpack.i.l.bf16 %v4073_v21 }
0x1215   :  { %v650_v32 = vsel %vm26_vm6, %v4074_v10, %v4075_v8  ;;  %v661_v15 = vsel %vm26_vm6, %v4075_v8, %v4074_v10 }
0x1217   :  { %4077 = vrot.lane.b32.xlu2 %v4076_v17, %s4558_s26 }
0x1269   :  { %v4063_v1 = vpop.permute.xlu2 %4062 }
0x126a   :  { %v4065_v2 = vunpack.i.h.bf16 %v4063_v1  ;;  %v4064_v3 = vunpack.i.l.bf16 %v4063_v1 }
0x126c   :  { %v632_v11 = vsel %vm26_vm6, %v4064_v3, %v4065_v2  ;;  %v663_v18 = vsel %vm26_vm6, %v4065_v2, %v4064_v3 }
0x126d   :  { %v675_v37 = vpack.c.bf16 %v641_v4, %v632_v11  ;;  %v678_v20 = vpack.c.bf16 %v663_v18, %v662_v19 }
0x126f   :  { %3814 = vmatmul.msk.bf16.vlgmr.msra.gmra.mxu3 %vm94_vm0, %v675_v37 }
0x1271   :  { %v4078_v58 = vpop.permute.xlu2 %4077 }
0x1272   :  { %v4080_v6 = vunpack.i.h.bf16 %v4078_v58  ;;  %v4079_v7 = vunpack.i.l.bf16 %v4078_v58 }
0x1274   :  { %v659_v31 = vsel %vm26_vm6, %v4079_v7, %v4080_v6  ;;  %v660_v14 = vsel %vm26_vm6, %v4080_v6, %v4079_v7  ;;  %v792_v6 = vpop.permute.xlu1 %791 }
0x1275   :  { %v676_v40 = vpack.c.bf16 %v659_v31, %v650_v32  ;;  %v677_v16 = vpack.c.bf16 %v661_v15, %v660_v14 }
0x127f   :  { %3815 = vmatmul.msk.bf16.gmra.mxu3 %vm94_vm0, %v676_v40 }
0x128f   :  { %3816 = vmatmul.msk.bf16.gmra.mxu3 %vm94_vm0, %v677_v16 }
0x129f   :  { %3817 = vmatmul.msk.bf16.gmra.mxu3 %vm94_vm0, %v678_v20 }
0x12f2   :  { %v715_v23 = vpop.f32.mrf.mxu3 }
0x12f3   :  { %v4922_v53 = vadd.f32 %v4165_v25, %v715_v23 }
0x12fa   :  { %v717_v24 = vpop.f32.mrf.mxu3 }
0x12fb   :  { %v4910_v22 = vadd.f32 %v4165_v25, %v717_v24 }
0x1302   :  { %v720_v27 = vpop.f32.mrf.mxu3 }
0x1303   :  { %v4886_v5 = vadd.f32 %v4165_v25, %v720_v27 }
0x130a   :  { %v722_v28 = vpop.f32.mrf.mxu3 }
0x130b   :  { %v4888_v39 = vadd.f32 %v4165_v25, %v722_v28 }
0x1312   :  { %v725_v35 = vpop.f32.mrf.mxu3 }
0x1313   :  { %v4890_v42 = vadd.f32 %v4165_v25, %v725_v35 }
0x1315   :  { %v929_v44 = vsel %vm4666_vm1, %v4888_v39, %v4890_v42  ;;  %v988_v33 = vsel %vm4666_vm1, %v4890_v42, %v4888_v39 }
0x131a   :  { %v727_v47 = vpop.f32.mrf.mxu3 }
0x131b   :  { %v4900_v49 = vadd.f32 %v4165_v25, %v727_v47 }
0x131d   :  { %v870_v45 = vsel %vm4666_vm1, %v4886_v5, %v4900_v49  ;;  %v1047_v46 = vsel %vm4666_vm1, %v4900_v49, %v4886_v5 }
0x1322   :  { %v730_v48 = vpop.f32.mrf.mxu3 }
0x1323   :  { %v4912_v36 = vadd.f32 %v4165_v25, %v730_v48 }
0x1325   :  { %v811_v38 = vsel %vm4666_vm1, %v4910_v22, %v4912_v36  ;;  %v1106_v50 = vsel %vm4666_vm1, %v4912_v36, %v4910_v22 }
0x132a   :  { %v732_v51 = vpop.f32.mrf.mxu3 }
0x132b   :  { %v4924_v54 = vadd.f32 %v4165_v25, %v732_v51 }
0x132d   :  { %v739_v55 = vsel %vm4666_vm1, %v4922_v53, %v4924_v54  ;;  %v1165_v56 = vsel %vm4666_vm1, %v4924_v54, %v4922_v53 }
0x132e   :  { %v769_v57 = vadd.f32 %v765_v9, %v739_v55 }
0x1330   :  { %4235 = vtanh.f32 %v769_v57  ;;  %v3829_v59 = vmul.f32 -1.442695, %v769_v57 }
0x1332   :  { %4237 = vpow2.f32 %v3829_v59 }
0x1336   :  { %v4236_v52 = vpop.eup %4235 }
0x1337   :  { %796 = vrot.lane.b32.xlu0 %v4236_v52, %s4557_s0 }
0x1338   :  { %v4238_v61 = vpop.eup %4237 }
0x1339   :  { %v773_v62 = vadd.f32 1.0, %v4238_v61 }
0x133b   :  { %4239 = vrcp.f32 %v773_v62  ;;  %v785_v2 = vand.u32 2147483648, %v773_v62  ;;  %vm779_vm8 = vweird.f32 %v773_v62  ;;  %v783_v3 = vand.u32 2147483647, %v773_v62 }
0x133d   :  { %v786_v11 = vor.u32 1.1754944e-38, %v785_v2  ;;  %vm784_vm10 = vcmp.eq.f32.partialorder %v783_v3, 8.507059e+37 }
0x1341   :  { %v4240_v17 = vpop.eup %4239 }
0x1342   :  { %v775_v60 = vmul.f32 %v4240_v17, %v773_v62  ;;  %vm780_vm7 = vweird.f32 %v4240_v17 }
0x1343   :  { %vm781_vm9 = vmor %vm779_vm8, %vm780_vm7 }
0x1344   :  { %v776_v63 = vsub.f32 1.0, %v775_v60 }
0x1346   :  { %v777_v0 = vmul.f32 %v4240_v17, %v776_v63 }
0x1348   :  { %v778_v1 = vadd.f32 %v4240_v17, %v777_v0 }
0x134a   :  { %v782_v4 = vsel %vm781_vm9, %v4240_v17, %v778_v1 }
0x134b   :  { %v787_v37 = vsel %vm784_vm10, %v786_v11, %v782_v4 }
0x134c   :  { %v794_v7 = vmul.f32 %v792_v6, %v787_v37 }
0x13a9   :  { %v797_v58 = vpop.permute.xlu0 %796 }
0x13aa   :  { %v799_v21 = vmul.f32 %v797_v58, %v787_v37 }
0x13ac   :  { %801 = vrot.lane.b32.xlu2 %v799_v21, %s4557_s0 }
0x1406   :  { %v802_v8 = vpop.permute.xlu2 %801 }
0x1407   :  { %v804_v10 = vadd.f32 %v802_v8, %v794_v7 }
0x1409   :  { %4241 = vtanh.f32 %v804_v10 }
0x140f   :  { %v4242_v31 = vpop.eup %4241 }
0x1410   :  { %807 = vrot.lane.b32.xlu0 %v4242_v31, %s4557_s0 }
0x1482   :  { %v808_v32 = vpop.permute.xlu0 %807 }
0x1483   :  { %v4937_v40 = vmul.f32 %v808_v32, %v787_v37 }
0x1485   :  { %v812_v43 = vpack.c.bf16 %v4937_v40, %v4937_v40 }
0x1487   :  { %814 = vrot.lane.b32.xlu1 %v812_v43, %s4558_s26 }
0x14f9   :  { %v815_v12 = vpop.permute.xlu1 %814 }
0x14fa   :  { %3830 = vmatmul.msk.bf16.vlgmr.msrb.gmra.mxu2 %vm94_vm0, %v815_v12 }
0x14fb   :  { %1179 = vmatpush.bf16.msrb.mxu2 %v4844_v41 }
0x14ff   :  { %1180 = vmatpush.bf16.msrb.mxu2 %v4853_v34 }
0x157d   :  { %v828_v13 = vpop.f32.mrf.mxu2 }
0x157e   :  { %v832_v14 = vadd.f32 %v828_v13, %v811_v38 }
0x1580   :  { %4243 = vtanh.f32 %v832_v14  ;;  %v3831_v18 = vmul.f32 -1.442695, %v832_v14 }
0x1582   :  { %4245 = vpow2.f32 %v3831_v18 }
0x1585   :  { %v830_v15 = vpop.f32.mrf.mxu2 }
0x1586   :  { %v4244_v16 = vpop.eup %4243 }
0x1587   :  { %855 = vrot.lane.b32.xlu2 %v4244_v16, %s4557_s0 }
0x1588   :  { %v4246_v19 = vpop.eup %4245 }
0x1589   :  { %v836_v20 = vadd.f32 1.0, %v4246_v19 }
0x158b   :  { %4247 = vrcp.f32 %v836_v20  ;;  %v848_v41 = vand.u32 2147483648, %v836_v20  ;;  %vm842_vm12 = vweird.f32 %v836_v20  ;;  %v846_v34 = vand.u32 2147483647, %v836_v20 }
0x158d   :  { %v849_v29 = vor.u32 1.1754944e-38, %v848_v41  ;;  %vm847_vm14 = vcmp.eq.f32.partialorder %v846_v34, 8.507059e+37 }
0x1591   :  { %v4248_v23 = vpop.eup %4247 }
0x1592   :  { %v838_v24 = vmul.f32 %v4248_v23, %v836_v20  ;;  %vm843_vm11 = vweird.f32 %v4248_v23 }
0x1593   :  { %vm844_vm13 = vmor %vm842_vm12, %vm843_vm11 }
0x1594   :  { %v839_v25 = vsub.f32 1.0, %v838_v24 }
0x1596   :  { %v840_v27 = vmul.f32 %v4248_v23, %v839_v25 }
0x1598   :  { %v841_v9 = vadd.f32 %v4248_v23, %v840_v27 }
0x159a   :  { %v845_v28 = vsel %vm844_vm13, %v4248_v23, %v841_v9 }
0x159b   :  { %v850_v47 = vsel %vm847_vm14, %v849_v29, %v845_v28 }
0x159c   :  { %v853_v38 = vmul.f32 %v850_v47, %v804_v10 }
0x15e1   :  { %v856_v35 = vpop.permute.xlu2 %855 }
0x15e2   :  { %v858_v48 = vmul.f32 %v856_v35, %v850_v47 }
0x15e4   :  { %860 = vrot.lane.b32.xlu0 %v858_v48, %s4557_s0 }
0x1656   :  { %v861_v51 = vpop.permute.xlu0 %860 }
0x1657   :  { %v863_v55 = vadd.f32 %v861_v51, %v853_v38 }
0x1659   :  { %4249 = vtanh.f32 %v863_v55 }
0x165f   :  { %v4250_v57 = vpop.eup %4249 }
0x1660   :  { %866 = vrot.lane.b32.xlu1 %v4250_v57, %s4557_s0 }
0x16d2   :  { %v867_v52 = vpop.permute.xlu1 %866 }
0x16d3   :  { %v4948_v59 = vmul.f32 %v867_v52, %v850_v47 }
0x16d5   :  { %v871_v61 = vpack.c.bf16 %v4948_v59, %v4948_v59 }
0x16d7   :  { %873 = vrot.lane.b32.xlu2 %v871_v61, %s4558_s26 }
0x1731   :  { %v874_v62 = vpop.permute.xlu2 %873 }
0x1732   :  { %3832 = vmatmul.msk.bf16.vlgmr.msrb.gmra.mxu0 %vm94_vm0, %v874_v62 }
0x17af   :  { %v887_v17 = vpop.f32.mrf.mxu0 }
0x17b0   :  { %v891_v60 = vadd.f32 %v887_v17, %v870_v45 }
0x17b2   :  { %4251 = vtanh.f32 %v891_v60  ;;  %v3833_v1 = vmul.f32 -1.442695, %v891_v60 }
0x17b4   :  { %4253 = vpow2.f32 %v3833_v1 }
0x17b7   :  { %v889_v63 = vpop.f32.mrf.mxu0 }
0x17b8   :  { %v4252_v0 = vpop.eup %4251 }
0x17b9   :  { %914 = vrot.lane.b32.xlu0 %v4252_v0, %s4557_s0 }
0x17ba   :  { %v4254_v2 = vpop.eup %4253 }
0x17bb   :  { %v895_v3 = vadd.f32 1.0, %v4254_v2 }
0x17bd   :  { %4255 = vrcp.f32 %v895_v3  ;;  %v907_v6 = vand.u32 2147483648, %v895_v3  ;;  %vm901_vm2 = vweird.f32 %v895_v3  ;;  %v905_v7 = vand.u32 2147483647, %v895_v3 }
0x17bf   :  { %v908_v8 = vor.u32 1.1754944e-38, %v907_v6  ;;  %vm906_vm4 = vcmp.eq.f32.partialorder %v905_v7, 8.507059e+37 }
0x17c3   :  { %v4256_v4 = vpop.eup %4255 }
0x17c4   :  { %v897_v11 = vmul.f32 %v4256_v4, %v895_v3  ;;  %vm902_vm15 = vweird.f32 %v4256_v4 }
0x17c5   :  { %vm903_vm3 = vmor %vm901_vm2, %vm902_vm15 }
0x17c6   :  { %v898_v37 = vsub.f32 1.0, %v897_v11 }
0x17c8   :  { %v899_v58 = vmul.f32 %v4256_v4, %v898_v37 }
0x17ca   :  { %v900_v21 = vadd.f32 %v4256_v4, %v899_v58 }
0x17cc   :  { %v904_v45 = vsel %vm903_vm3, %v4256_v4, %v900_v21 }
0x17cd   :  { %v909_v31 = vsel %vm906_vm4, %v908_v8, %v904_v45 }
0x17ce   :  { %v912_v43 = vmul.f32 %v909_v31, %v863_v55 }
0x182b   :  { %v915_v10 = vpop.permute.xlu0 %914 }
0x182c   :  { %v917_v32 = vmul.f32 %v915_v10, %v909_v31 }
0x182e   :  { %919 = vrot.lane.b32.xlu1 %v917_v32, %s4557_s0 }
0x18a0   :  { %v920_v12 = vpop.permute.xlu1 %919 }
0x18a1   :  { %v922_v13 = vadd.f32 %v920_v12, %v912_v43 }
0x18a3   :  { %4257 = vtanh.f32 %v922_v13 }
0x18a9   :  { %v4258_v14 = vpop.eup %4257 }
0x18aa   :  { %925 = vrot.lane.b32.xlu2 %v4258_v14, %s4557_s0 }
0x1904   :  { %v926_v15 = vpop.permute.xlu2 %925 }
0x1905   :  { %v4962_v16 = vmul.f32 %v926_v15, %v909_v31 }
0x1907   :  { %v930_v18 = vpack.c.bf16 %v4962_v16, %v4962_v16 }
0x1909   :  { %932 = vrot.lane.b32.xlu0 %v930_v18, %s4558_s26 }
0x197b   :  { %v933_v19 = vpop.permute.xlu0 %932 }
0x197c   :  { %3834 = vmatmul.msk.bf16.vlgmr.msra.gmra.mxu1 %vm94_vm0, %v933_v19 }
0x19f9   :  { %v946_v20 = vpop.f32.mrf.mxu1 }
0x19fa   :  { %v950_v23 = vadd.f32 %v946_v20, %v929_v44 }
0x19fc   :  { %4259 = vtanh.f32 %v950_v23  ;;  %v3835_v27 = vmul.f32 -1.442695, %v950_v23 }
0x19fe   :  { %4261 = vpow2.f32 %v3835_v27 }
0x1a01   :  { %v948_v24 = vpop.f32.mrf.mxu1 }
0x1a02   :  { %v4260_v25 = vpop.eup %4259 }
0x1a03   :  { %973 = vrot.lane.b32.xlu1 %v4260_v25, %s4557_s0 }
0x1a04   :  { %v4262_v9 = vpop.eup %4261 }
0x1a05   :  { %v954_v41 = vadd.f32 1.0, %v4262_v9 }
0x1a07   :  { %4263 = vrcp.f32 %v954_v41  ;;  %v966_v48 = vand.u32 2147483648, %v954_v41  ;;  %vm960_vm7 = vweird.f32 %v954_v41  ;;  %v964_v38 = vand.u32 2147483647, %v954_v41 }
0x1a09   :  { %v967_v51 = vor.u32 1.1754944e-38, %v966_v48  ;;  %vm965_vm9 = vcmp.eq.f32.partialorder %v964_v38, 8.507059e+37 }
0x1a0d   :  { %v4264_v34 = vpop.eup %4263 }
0x1a0e   :  { %v956_v28 = vmul.f32 %v4264_v34, %v954_v41  ;;  %vm961_vm5 = vweird.f32 %v4264_v34 }
0x1a0f   :  { %vm962_vm8 = vmor %vm960_vm7, %vm961_vm5 }
0x1a10   :  { %v957_v29 = vsub.f32 1.0, %v956_v28 }
0x1a12   :  { %v958_v35 = vmul.f32 %v4264_v34, %v957_v29 }
0x1a14   :  { %v959_v47 = vadd.f32 %v4264_v34, %v958_v35 }
0x1a16   :  { %v963_v44 = vsel %vm962_vm8, %v4264_v34, %v959_v47 }
0x1a17   :  { %v968_v57 = vsel %vm965_vm9, %v967_v51, %v963_v44 }
0x1a18   :  { %v971_v61 = vmul.f32 %v968_v57, %v922_v13 }
0x1a75   :  { %v974_v55 = vpop.permute.xlu1 %973 }
0x1a76   :  { %v976_v52 = vmul.f32 %v974_v55, %v968_v57 }
0x1a78   :  { %978 = vrot.lane.b32.xlu2 %v976_v52, %s4557_s0 }
0x1ad2   :  { %v979_v62 = vpop.permute.xlu2 %978 }
0x1ad3   :  { %v981_v17 = vadd.f32 %v979_v62, %v971_v61 }
0x1ad5   :  { %4265 = vtanh.f32 %v981_v17 }
0x1adb   :  { %v4266_v60 = vpop.eup %4265 }
0x1adc   :  { %984 = vrot.lane.b32.xlu0 %v4266_v60, %s4557_s0 }
0x1b4e   :  { %v985_v63 = vpop.permute.xlu0 %984 }
0x1b4f   :  { %v4976_v0 = vmul.f32 %v985_v63, %v968_v57 }
0x1b51   :  { %v989_v1 = vpack.c.bf16 %v4976_v0, %v4976_v0 }
0x1b53   :  { %991 = vrot.lane.b32.xlu1 %v989_v1, %s4558_s26 }
0x1bc5   :  { %v992_v2 = vpop.permute.xlu1 %991 }
0x1bc6   :  { %3836 = vmatmul.msk.bf16.vlgmr.msra.gmra.mxu2 %vm94_vm0, %v992_v2 }
0x1c49   :  { %v1005_v3 = vpop.f32.mrf.mxu2 }
0x1c4a   :  { %v1009_v4 = vadd.f32 %v1005_v3, %v988_v33 }
0x1c4c   :  { %4267 = vtanh.f32 %v1009_v4  ;;  %v3837_v58 = vmul.f32 -1.442695, %v1009_v4 }
0x1c4e   :  { %4269 = vpow2.f32 %v3837_v58 }
0x1c51   :  { %v1007_v11 = vpop.f32.mrf.mxu2 }
0x1c52   :  { %v4268_v37 = vpop.eup %4267 }
0x1c53   :  { %1032 = vrot.lane.b32.xlu2 %v4268_v37, %s4557_s0 }
0x1c54   :  { %v4270_v21 = vpop.eup %4269 }
0x1c55   :  { %v1013_v6 = vadd.f32 1.0, %v4270_v21 }
0x1c57   :  { %4271 = vrcp.f32 %v1013_v6  ;;  %v1025_v32 = vand.u32 2147483648, %v1013_v6  ;;  %vm1019_vm11 = vweird.f32 %v1013_v6  ;;  %v1023_v39 = vand.u32 2147483647, %v1013_v6 }
0x1c59   :  { %v1026_v33 = vor.u32 1.1754944e-38, %v1025_v32  ;;  %vm1024_vm13 = vcmp.eq.f32.partialorder %v1023_v39, 8.507059e+37 }
0x1c5d   :  { %v4272_v7 = vpop.eup %4271 }
0x1c5e   :  { %v1015_v45 = vmul.f32 %v4272_v7, %v1013_v6  ;;  %vm1020_vm10 = vweird.f32 %v4272_v7 }
0x1c5f   :  { %vm1021_vm12 = vmor %vm1019_vm11, %vm1020_vm10 }
0x1c60   :  { %v1016_v8 = vsub.f32 1.0, %v1015_v45 }
0x1c62   :  { %v1017_v10 = vmul.f32 %v4272_v7, %v1016_v8 }
0x1c64   :  { %v1018_v31 = vadd.f32 %v4272_v7, %v1017_v10 }
0x1c66   :  { %v1022_v42 = vsel %vm1021_vm12, %v4272_v7, %v1018_v31 }
0x1c67   :  { %v1027_v12 = vsel %vm1024_vm13, %v1026_v33, %v1022_v42 }
0x1c68   :  { %v1030_v14 = vmul.f32 %v1027_v12, %v981_v17 }
0x1cad   :  { %v1033_v43 = vpop.permute.xlu2 %1032 }
0x1cae   :  { %v1035_v13 = vmul.f32 %v1033_v43, %v1027_v12 }
0x1cb0   :  { %1037 = vrot.lane.b32.xlu0 %v1035_v13, %s4557_s0 }
0x1d22   :  { %v1038_v15 = vpop.permute.xlu0 %1037 }
0x1d23   :  { %v1040_v18 = vadd.f32 %v1038_v15, %v1030_v14 }
0x1d25   :  { %4273 = vtanh.f32 %v1040_v18 }
0x1d2b   :  { %v4274_v19 = vpop.eup %4273 }
0x1d2c   :  { %1043 = vrot.lane.b32.xlu1 %v4274_v19, %s4557_s0 }
0x1d9e   :  { %v1044_v20 = vpop.permute.xlu1 %1043 }
0x1d9f   :  { %v4990_v23 = vmul.f32 %v1044_v20, %v1027_v12 }
0x1da1   :  { %v1048_v24 = vpack.c.bf16 %v4990_v23, %v4990_v23 }
0x1da3   :  { %1050 = vrot.lane.b32.xlu2 %v1048_v24, %s4558_s26 }
0x1dfd   :  { %v1051_v25 = vpop.permute.xlu2 %1050 }
0x1dfe   :  { %3838 = vmatmul.msk.bf16.vlgmr.msra.gmra.mxu0 %vm94_vm0, %v1051_v25 }
0x1e7b   :  { %v1064_v27 = vpop.f32.mrf.mxu0 }
0x1e7c   :  { %v1068_v9 = vadd.f32 %v1064_v27, %v1047_v46 }
0x1e7e   :  { %4275 = vtanh.f32 %v1068_v9  ;;  %v3839_v28 = vmul.f32 -1.442695, %v1068_v9 }
0x1e80   :  { %4277 = vpow2.f32 %v3839_v28 }
0x1e83   :  { %v1066_v41 = vpop.f32.mrf.mxu0 }
0x1e84   :  { %v4276_v34 = vpop.eup %4275 }
0x1e85   :  { %1091 = vrot.lane.b32.xlu0 %v4276_v34, %s4557_s0 }
0x1e86   :  { %v4278_v29 = vpop.eup %4277 }
0x1e87   :  { %v1072_v35 = vadd.f32 1.0, %v4278_v29 }
0x1e89   :  { %4279 = vrcp.f32 %v1072_v35  ;;  %v1084_v55 = vand.u32 2147483648, %v1072_v35  ;;  %vm1078_vm15 = vweird.f32 %v1072_v35  ;;  %v1082_v5 = vand.u32 2147483647, %v1072_v35 }
0x1e8b   :  { %v1085_v46 = vor.u32 1.1754944e-38, %v1084_v55  ;;  %vm1083_vm3 = vcmp.eq.f32.partialorder %v1082_v5, 8.507059e+37 }
0x1e8f   :  { %v4280_v47 = vpop.eup %4279 }
0x1e90   :  { %v1074_v48 = vmul.f32 %v4280_v47, %v1072_v35  ;;  %vm1079_vm14 = vweird.f32 %v4280_v47 }
0x1e91   :  { %vm1080_vm2 = vmor %vm1078_vm15, %vm1079_vm14 }
0x1e92   :  { %v1075_v38 = vsub.f32 1.0, %v1074_v48 }
0x1e94   :  { %v1076_v44 = vmul.f32 %v4280_v47, %v1075_v38 }
0x1e96   :  { %v1077_v51 = vadd.f32 %v4280_v47, %v1076_v44 }
0x1e98   :  { %v1081_v49 = vsel %vm1080_vm2, %v4280_v47, %v1077_v51 }
0x1e99   :  { %v1086_v52 = vsel %vm1083_vm3, %v1085_v46, %v1081_v49 }
0x1e9a   :  { %v1089_v62 = vmul.f32 %v1086_v52, %v1040_v18 }
0x1ef7   :  { %v1092_v57 = vpop.permute.xlu0 %1091 }
0x1ef8   :  { %v1094_v61 = vmul.f32 %v1092_v57, %v1086_v52 }
0x1efa   :  { %1096 = vrot.lane.b32.xlu1 %v1094_v61, %s4557_s0 }
0x1f6c   :  { %v1097_v17 = vpop.permute.xlu1 %1096 }
0x1f6d   :  { %v1099_v60 = vadd.f32 %v1097_v17, %v1089_v62 }
0x1f6f   :  { %4281 = vtanh.f32 %v1099_v60 }
0x1f75   :  { %v4282_v63 = vpop.eup %4281 }
0x1f76   :  { %1102 = vrot.lane.b32.xlu2 %v4282_v63, %s4557_s0  ;;  %v4042_v63 = vld [vmem:[%s5938_s3 + $0x18] sm:$0xff] }
0x1f77   :  { %1313 = vmatpush.bf16.msrb.mxu0 %v4042_v63 }
0x1fd0   :  { %v1103_v1 = vpop.permute.xlu2 %1102 }
0x1fd1   :  { %v5004_v2 = vmul.f32 %v1103_v1, %v1086_v52 }
0x1fd3   :  { %v1107_v3 = vpack.c.bf16 %v5004_v2, %v5004_v2 }
0x1fd5   :  { %1109 = vrot.lane.b32.xlu0 %v1107_v3, %s4558_s26 }
0x2047   :  { %v1110_v4 = vpop.permute.xlu0 %1109 }
0x2048   :  { %3840 = vmatmul.msk.bf16.vlgmr.msrb.gmra.mxu1 %vm94_vm0, %v1110_v4 }
0x20c5   :  { %v1123_v11 = vpop.f32.mrf.mxu1 }
0x20c6   :  { %v1127_v37 = vadd.f32 %v1123_v11, %v1106_v50 }
0x20c8   :  { %4283 = vtanh.f32 %v1127_v37  ;;  %v3841_v6 = vmul.f32 -1.442695, %v1127_v37 }
0x20ca   :  { %4285 = vpow2.f32 %v3841_v6 }
0x20cd   :  { %v1125_v58 = vpop.f32.mrf.mxu1 }
0x20ce   :  { %v4284_v21 = vpop.eup %4283 }
0x20cf   :  { %1150 = vrot.lane.b32.xlu1 %v4284_v21, %s4557_s0 }
0x20d0   :  { %v4286_v7 = vpop.eup %4285 }
0x20d1   :  { %v1131_v45 = vadd.f32 1.0, %v4286_v7 }
0x20d3   :  { %4287 = vrcp.f32 %v1131_v45  ;;  %v1143_v42 = vand.u32 2147483648, %v1131_v45  ;;  %vm1137_vm5 = vweird.f32 %v1131_v45  ;;  %v1141_v22 = vand.u32 2147483647, %v1131_v45 }
0x20d5   :  { %v1144_v50 = vor.u32 1.1754944e-38, %v1143_v42  ;;  %vm1142_vm8 = vcmp.eq.f32.partialorder %v1141_v22, 8.507059e+37 }
0x20d9   :  { %v4288_v8 = vpop.eup %4287 }
0x20da   :  { %v1133_v10 = vmul.f32 %v4288_v8, %v1131_v45  ;;  %vm1138_vm4 = vweird.f32 %v4288_v8 }
0x20db   :  { %vm1139_vm7 = vmor %vm1137_vm5, %vm1138_vm4 }
0x20dc   :  { %v1134_v31 = vsub.f32 1.0, %v1133_v10 }
0x20de   :  { %v1135_v32 = vmul.f32 %v4288_v8, %v1134_v31 }
0x20e0   :  { %v1136_v39 = vadd.f32 %v4288_v8, %v1135_v32 }
0x20e2   :  { %v1140_v36 = vsel %vm1139_vm7, %v4288_v8, %v1136_v39 }
0x20e3   :  { %v1145_v43 = vsel %vm1142_vm8, %v1144_v50, %v1140_v36  ;;  %v5064_v50 = vld [vmem:[%s5938_s3 + $0x70] sm:$0xff] }
0x20e4   :  { %v1148_v13 = vmul.f32 %v1145_v43, %v1099_v60  ;;  %v4091_v60 = vpack.i.bf16 %v5004_v2, %v4962_v16  ;;  %v4096_v16 = vpack.i.bf16 %v4990_v23, %v4976_v0  ;;  %v5052_v0 = vld [vmem:[%s5938_s3 + $0x78] sm:$0xff] }
0x20e5   :  { %1363 = vmatpush.bf16.msra.mxu1 %v5052_v0  ;;  %1426 = vmatpush.bf16.msra.mxu2 %v5052_v0 }
0x20e6   :  { %1485 = vmatpush.bf16.msrb.mxu3 %v5052_v0 }
0x20e9   :  { %1364 = vmatpush.bf16.msra.mxu1 %v5064_v50  ;;  %1427 = vmatpush.bf16.msra.mxu2 %v5064_v50 }
0x20ea   :  { %1486 = vmatpush.bf16.msrb.mxu3 %v5064_v50 }
0x20ed   :  { %1544 = vmatpush.bf16.msrb.mxu1 %v5052_v0 }
0x20ee   :  { %1662 = vmatpush.bf16.msra.mxu3 %v5052_v0 }
0x20f1   :  { %1545 = vmatpush.bf16.msrb.mxu1 %v5064_v50 }
0x20f2   :  { %1663 = vmatpush.bf16.msra.mxu3 %v5064_v50 }
0x2141   :  { %v1151_v33 = vpop.permute.xlu1 %1150 }
0x2142   :  { %v1153_v12 = vmul.f32 %v1151_v33, %v1145_v43  ;;  %v3865_v33 = vld [vmem:[%s5939_s5 + $0x20] sm:$0xff] }
0x2144   :  { %1155 = vrot.lane.b32.xlu2 %v1153_v12, %s4557_s0  ;;  %v1341_v12 = vpack.c.bf16 %v3865_v33, %v3865_v33 }
0x2146   :  { %3875 = vmatmul.msk.bf16.vlgmr.msra.gmra.mxu1 %vm94_vm0, %v1341_v12 }
0x2147   :  { %1721 = vmatpush.bf16.msra.mxu1 %v5052_v0 }
0x214b   :  { %1722 = vmatpush.bf16.msra.mxu1 %v5064_v50 }
0x219e   :  { %v1156_v14 = vpop.permute.xlu2 %1155 }
0x219f   :  { %v1158_v15 = vadd.f32 %v1156_v14, %v1148_v13 }
0x21a1   :  { %4289 = vtanh.f32 %v1158_v15 }
0x21a7   :  { %v4290_v18 = vpop.eup %4289 }
0x21a8   :  { %1161 = vrot.lane.b32.xlu0 %v4290_v18, %s4557_s0 }
0x221a   :  { %v1162_v19 = vpop.permute.xlu0 %1161 }
0x221b   :  { %v1164_v20 = vmul.f32 %v1162_v19, %v1145_v43  ;;  %v3866_v43 = vld [vmem:[%s5939_s5 + $0x28] sm:$0xff] }
0x221d   :  { %v1166_v24 = vpack.c.bf16 %v1164_v20, %v1164_v20  ;;  %v4086_v57 = vpack.i.bf16 %v1164_v20, %v4948_v59  ;;  %v4041_v59 = vld [vmem:[%s5938_s3 + $0x10] sm:$0xff] }
0x221e   :  { %1314 = vmatpush.bf16.msrb.mxu0 %v4041_v59 }
0x221f   :  { %1168 = vrot.lane.b32.xlu1 %v1166_v24, %s4558_s26 }
0x2291   :  { %v1169_v25 = vpop.permute.xlu1 %1168 }
0x2292   :  { %3842 = vmatmul.msk.bf16.vlgmr.msrb.gmra.mxu2 %vm94_vm0, %v1169_v25  ;;  %v4166_v25 = vld [vmem:[%s5937_s4 + $0x2] ss:$0 sm:$0xff] }
0x2293   :  { %1603 = vmatpush.bf16.msrb.mxu2 %v5052_v0 }
0x2297   :  { %1604 = vmatpush.bf16.msrb.mxu2 %v5064_v50 }
0x2315   :  { %v1182_v27 = vpop.f32.mrf.mxu2 }
0x2316   :  { %v1186_v9 = vadd.f32 %v1182_v27, %v1165_v56 }
0x2318   :  { %4291 = vtanh.f32 %v1186_v9  ;;  %v3843_v28 = vmul.f32 -1.442695, %v1186_v9 }
0x231a   :  { %4293 = vpow2.f32 %v3843_v28  ;;  %v1366_v28 = vpop.f32.mrf.mxu1 }
0x231d   :  { %v1184_v41 = vpop.f32.mrf.mxu2 }
0x231e   :  { %v4292_v34 = vpop.eup %4291 }
0x231f   :  { %1209 = vrot.lane.b32.xlu2 %v4292_v34, %s4557_s0 }
0x2320   :  { %v4294_v29 = vpop.eup %4293 }
0x2321   :  { %v1190_v35 = vadd.f32 1.0, %v4294_v29 }
0x2323   :  { %4295 = vrcp.f32 %v1190_v35  ;;  %v1202_v55 = vand.u32 2147483648, %v1190_v35  ;;  %vm1196_vm10 = vweird.f32 %v1190_v35  ;;  %v1200_v53 = vand.u32 2147483647, %v1190_v35 }
0x2325   :  { %v1203_v56 = vor.u32 1.1754944e-38, %v1202_v55  ;;  %vm1201_vm12 = vcmp.eq.f32.partialorder %v1200_v53, 8.507059e+37 }
0x2329   :  { %v4296_v47 = vpop.eup %4295 }
0x232a   :  { %v1192_v48 = vmul.f32 %v4296_v47, %v1190_v35  ;;  %vm1197_vm9 = vweird.f32 %v4296_v47 }
0x232b   :  { %vm1198_vm11 = vmor %vm1196_vm10, %vm1197_vm9 }
0x232c   :  { %v1193_v38 = vsub.f32 1.0, %v1192_v48 }
0x232e   :  { %v1194_v44 = vmul.f32 %v4296_v47, %v1193_v38 }
0x2330   :  { %v1195_v51 = vadd.f32 %v4296_v47, %v1194_v44 }
0x2332   :  { %v1199_v54 = vsel %vm1198_vm11, %v4296_v47, %v1195_v51  ;;  %v1368_v47 = vpop.f32.mrf.mxu1 }
0x2333   :  { %v1204_v49 = vsel %vm1201_vm12, %v1203_v56, %v1199_v54 }
0x2334   :  { %v1207_v52 = vmul.f32 %v1204_v49, %v1158_v15 }
0x2379   :  { %v1210_v5 = vpop.permute.xlu2 %1209 }
0x237a   :  { %v1212_v46 = vmul.f32 %v1210_v5, %v1204_v49 }
0x237c   :  { %1214 = vrot.lane.b32.xlu0 %v1212_v46, %s4557_s0 }
0x2384   :  { %4087 = vrot.lane.b32.xlu0 %v4086_v57, %s4558_s26 }
0x23ee   :  { %v1215_v61 = vpop.permute.xlu0 %1214 }
0x23ef   :  { %v1217_v62 = vadd.f32 %v1215_v61, %v1207_v52 }
0x23f1   :  { %4297 = vtanh.f32 %v1217_v62 }
0x23f6   :  { %v4088_v2 = vpop.permute.xlu0 %4087 }
0x23f7   :  { %v4298_v17 = vpop.eup %4297  ;;  %v4090_v11 = vunpack.i.h.bf16 %v4088_v2  ;;  %v4089_v37 = vunpack.i.l.bf16 %v4088_v2 }
0x23f8   :  { %1220 = vrot.lane.b32.xlu1 %v4298_v17, %s4557_s0 }
0x23f9   :  { %v1241_v7 = vsel %vm26_vm6, %v4089_v37, %v4090_v11  ;;  %v1262_v19 = vsel %vm26_vm6, %v4090_v11, %v4089_v37 }
0x2400   :  { %4092 = vrot.lane.b32.xlu1 %v4091_v60, %s4558_s26 }
0x2408   :  { %1392 = vrot.lane.b32.xlu1 %v3866_v43, %s4557_s0 }
0x246a   :  { %v1221_v1 = vpop.permute.xlu1 %1220 }
0x246b   :  { %v1223_v3 = vmul.f32 %v1221_v1, %v1204_v49 }
0x246d   :  { %v4081_v4 = vpack.i.bf16 %v1223_v3, %v4937_v40 }
0x246f   :  { %4082 = vrot.lane.b32.xlu2 %v4081_v4, %s4558_s26 }
0x2472   :  { %v4093_v8 = vpop.permute.xlu1 %4092 }
0x2473   :  { %v4095_v32 = vunpack.i.h.bf16 %v4093_v8  ;;  %v4094_v39 = vunpack.i.l.bf16 %v4093_v8 }
0x2475   :  { %v1250_v22 = vsel %vm26_vm6, %v4094_v39, %v4095_v32  ;;  %v1261_v14 = vsel %vm26_vm6, %v4095_v32, %v4094_v39 }
0x2477   :  { %4097 = vrot.lane.b32.xlu2 %v4096_v16, %s4558_s26 }
0x24c9   :  { %v4083_v58 = vpop.permute.xlu2 %4082 }
0x24ca   :  { %v4085_v21 = vunpack.i.h.bf16 %v4083_v58  ;;  %v4084_v6 = vunpack.i.l.bf16 %v4083_v58 }
0x24cc   :  { %v1232_v45 = vsel %vm26_vm6, %v4084_v6, %v4085_v21  ;;  %v1263_v18 = vsel %vm26_vm6, %v4085_v21, %v4084_v6 }
0x24cd   :  { %v1276_v40 = vpack.c.bf16 %v1241_v7, %v1232_v45  ;;  %v1279_v20 = vpack.c.bf16 %v1263_v18, %v1262_v19 }
0x24cf   :  { %3861 = vmatmul.msk.bf16.vlgmr.msrb.gmra.mxu0 %vm94_vm0, %v1276_v40 }
0x24d1   :  { %v4098_v23 = vpop.permute.xlu2 %4097 }
0x24d2   :  { %v4100_v10 = vunpack.i.h.bf16 %v4098_v23  ;;  %v4099_v31 = vunpack.i.l.bf16 %v4098_v23 }
0x24d4   :  { %v1259_v42 = vsel %vm26_vm6, %v4099_v31, %v4100_v10  ;;  %v1260_v13 = vsel %vm26_vm6, %v4100_v10, %v4099_v31  ;;  %v1393_v10 = vpop.permute.xlu1 %1392 }
0x24d5   :  { %v1277_v36 = vpack.c.bf16 %v1259_v42, %v1250_v22  ;;  %v1278_v15 = vpack.c.bf16 %v1261_v14, %v1260_v13 }
0x24df   :  { %3862 = vmatmul.msk.bf16.gmra.mxu0 %vm94_vm0, %v1277_v36 }
0x24ef   :  { %3863 = vmatmul.msk.bf16.gmra.mxu0 %vm94_vm0, %v1278_v15 }
0x24ff   :  { %3864 = vmatmul.msk.bf16.gmra.mxu0 %vm94_vm0, %v1279_v20 }
0x254c   :  { %v1316_v24 = vpop.f32.mrf.mxu0 }
0x254d   :  { %v5135_v61 = vadd.f32 %v4166_v25, %v1316_v24 }
0x2554   :  { %v1318_v27 = vpop.f32.mrf.mxu0 }
0x2555   :  { %v5099_v9 = vadd.f32 %v4166_v25, %v1318_v27 }
0x255c   :  { %v1321_v41 = vpop.f32.mrf.mxu0 }
0x255d   :  { %v5101_v34 = vadd.f32 %v4166_v25, %v1321_v41 }
0x2564   :  { %v1323_v29 = vpop.f32.mrf.mxu0 }
0x2565   :  { %v5103_v35 = vadd.f32 %v4166_v25, %v1323_v29 }
0x256c   :  { %v1326_v48 = vpop.f32.mrf.mxu0 }
0x256d   :  { %v5105_v38 = vadd.f32 %v4166_v25, %v1326_v48 }
0x256f   :  { %v1530_v44 = vsel %vm4666_vm1, %v5103_v35, %v5105_v38  ;;  %v1589_v51 = vsel %vm4666_vm1, %v5105_v38, %v5103_v35 }
0x2574   :  { %v1328_v55 = vpop.f32.mrf.mxu0 }
0x2575   :  { %v5115_v53 = vadd.f32 %v4166_v25, %v1328_v55 }
0x2577   :  { %v1471_v54 = vsel %vm4666_vm1, %v5101_v34, %v5115_v53  ;;  %v1648_v56 = vsel %vm4666_vm1, %v5115_v53, %v5101_v34 }
0x257c   :  { %v1331_v5 = vpop.f32.mrf.mxu0 }
0x257d   :  { %v5125_v49 = vadd.f32 %v4166_v25, %v1331_v5 }
0x257f   :  { %v1412_v46 = vsel %vm4666_vm1, %v5099_v9, %v5125_v49  ;;  %v1707_v57 = vsel %vm4666_vm1, %v5125_v49, %v5099_v9 }
0x2584   :  { %v1333_v52 = vpop.f32.mrf.mxu0 }
0x2585   :  { %v5137_v62 = vadd.f32 %v4166_v25, %v1333_v52 }
0x2587   :  { %v1340_v17 = vsel %vm4666_vm1, %v5135_v61, %v5137_v62  ;;  %v1766_v60 = vsel %vm4666_vm1, %v5137_v62, %v5135_v61 }
0x2588   :  { %v1370_v63 = vadd.f32 %v1366_v28, %v1340_v17 }
0x258a   :  { %4299 = vtanh.f32 %v1370_v63  ;;  %v3876_v1 = vmul.f32 -1.442695, %v1370_v63 }
0x258c   :  { %4301 = vpow2.f32 %v3876_v1 }
0x2590   :  { %v4300_v59 = vpop.eup %4299 }
0x2591   :  { %1397 = vrot.lane.b32.xlu0 %v4300_v59, %s4557_s0 }
0x2592   :  { %v4302_v3 = vpop.eup %4301 }
0x2593   :  { %v1374_v4 = vadd.f32 1.0, %v4302_v3 }
0x2595   :  { %4303 = vrcp.f32 %v1374_v4  ;;  %v1386_v21 = vand.u32 2147483648, %v1374_v4  ;;  %vm1380_vm14 = vweird.f32 %v1374_v4  ;;  %v1384_v6 = vand.u32 2147483647, %v1374_v4 }
0x2597   :  { %v1387_v45 = vor.u32 1.1754944e-38, %v1386_v21  ;;  %vm1385_vm2 = vcmp.eq.f32.partialorder %v1384_v6, 8.507059e+37 }
0x259b   :  { %v4304_v16 = vpop.eup %4303 }
0x259c   :  { %v1376_v2 = vmul.f32 %v4304_v16, %v1374_v4  ;;  %vm1381_vm13 = vweird.f32 %v4304_v16 }
0x259d   :  { %vm1382_vm15 = vmor %vm1380_vm14, %vm1381_vm13 }
0x259e   :  { %v1377_v11 = vsub.f32 1.0, %v1376_v2 }
0x25a0   :  { %v1378_v37 = vmul.f32 %v4304_v16, %v1377_v11 }
0x25a2   :  { %v1379_v58 = vadd.f32 %v4304_v16, %v1378_v37 }
0x25a4   :  { %v1383_v7 = vsel %vm1382_vm15, %v4304_v16, %v1379_v58 }
0x25a5   :  { %v1388_v40 = vsel %vm1385_vm2, %v1387_v45, %v1383_v7 }
0x25a6   :  { %v1395_v31 = vmul.f32 %v1393_v10, %v1388_v40 }
0x2603   :  { %v1398_v23 = vpop.permute.xlu0 %1397 }
0x2604   :  { %v1400_v8 = vmul.f32 %v1398_v23, %v1388_v40 }
0x2606   :  { %1402 = vrot.lane.b32.xlu2 %v1400_v8, %s4557_s0 }
0x2660   :  { %v1403_v32 = vpop.permute.xlu2 %1402 }
0x2661   :  { %v1405_v39 = vadd.f32 %v1403_v32, %v1395_v31 }
0x2663   :  { %4305 = vtanh.f32 %v1405_v39 }
0x2669   :  { %v4306_v42 = vpop.eup %4305 }
0x266a   :  { %1408 = vrot.lane.b32.xlu0 %v4306_v42, %s4557_s0 }
0x26dc   :  { %v1409_v22 = vpop.permute.xlu0 %1408 }
0x26dd   :  { %v5150_v36 = vmul.f32 %v1409_v22, %v1388_v40 }
0x26df   :  { %v1413_v33 = vpack.c.bf16 %v5150_v36, %v5150_v36 }
0x26e1   :  { %1415 = vrot.lane.b32.xlu1 %v1413_v33, %s4558_s26 }
0x2753   :  { %v1416_v43 = vpop.permute.xlu1 %1415 }
0x2754   :  { %3877 = vmatmul.msk.bf16.vlgmr.msra.gmra.mxu2 %vm94_vm0, %v1416_v43 }
0x2755   :  { %1780 = vmatpush.bf16.msra.mxu2 %v5052_v0 }
0x2759   :  { %1781 = vmatpush.bf16.msra.mxu2 %v5064_v50 }
0x27d7   :  { %v1429_v12 = vpop.f32.mrf.mxu2 }
0x27d8   :  { %v1433_v13 = vadd.f32 %v1429_v12, %v1412_v46 }
0x27da   :  { %4307 = vtanh.f32 %v1433_v13  ;;  %v3878_v18 = vmul.f32 -1.442695, %v1433_v13 }
0x27dc   :  { %4309 = vpow2.f32 %v3878_v18 }
0x27df   :  { %v1431_v14 = vpop.f32.mrf.mxu2 }
0x27e0   :  { %v4308_v15 = vpop.eup %4307 }
0x27e1   :  { %1456 = vrot.lane.b32.xlu2 %v4308_v15, %s4557_s0 }
0x27e2   :  { %v4310_v19 = vpop.eup %4309 }
0x27e3   :  { %v1437_v20 = vadd.f32 1.0, %v4310_v19 }
0x27e5   :  { %4311 = vrcp.f32 %v1437_v20  ;;  %v1449_v0 = vand.u32 2147483648, %v1437_v20  ;;  %vm1443_vm4 = vweird.f32 %v1437_v20  ;;  %v1447_v50 = vand.u32 2147483647, %v1437_v20 }
0x27e7   :  { %v1450_v47 = vor.u32 1.1754944e-38, %v1449_v0  ;;  %vm1448_vm7 = vcmp.eq.f32.partialorder %v1447_v50, 8.507059e+37 }
0x27eb   :  { %v4312_v24 = vpop.eup %4311 }
0x27ec   :  { %v1439_v25 = vmul.f32 %v4312_v24, %v1437_v20  ;;  %vm1444_vm3 = vweird.f32 %v4312_v24 }
0x27ed   :  { %vm1445_vm5 = vmor %vm1443_vm4, %vm1444_vm3 }
0x27ee   :  { %v1440_v27 = vsub.f32 1.0, %v1439_v25 }
0x27f0   :  { %v1441_v41 = vmul.f32 %v4312_v24, %v1440_v27 }
0x27f2   :  { %v1442_v28 = vadd.f32 %v4312_v24, %v1441_v41 }
0x27f4   :  { %v1446_v29 = vsel %vm1445_vm5, %v4312_v24, %v1442_v28 }
0x27f5   :  { %v1451_v55 = vsel %vm1448_vm7, %v1450_v47, %v1446_v29 }
0x27f6   :  { %v1454_v46 = vmul.f32 %v1451_v55, %v1405_v39 }
0x283b   :  { %v1457_v48 = vpop.permute.xlu2 %1456 }
0x283c   :  { %v1459_v5 = vmul.f32 %v1457_v48, %v1451_v55 }
0x283e   :  { %1461 = vrot.lane.b32.xlu0 %v1459_v5, %s4557_s0 }
0x28b0   :  { %v1462_v52 = vpop.permute.xlu0 %1461 }
0x28b1   :  { %v1464_v17 = vadd.f32 %v1462_v52, %v1454_v46 }
0x28b3   :  { %4313 = vtanh.f32 %v1464_v17 }
0x28b9   :  { %v4314_v63 = vpop.eup %4313 }
0x28ba   :  { %1467 = vrot.lane.b32.xlu1 %v4314_v63, %s4557_s0 }
0x292c   :  { %v1468_v59 = vpop.permute.xlu1 %1467 }
0x292d   :  { %v5161_v1 = vmul.f32 %v1468_v59, %v1451_v55 }
0x292f   :  { %v1472_v3 = vpack.c.bf16 %v5161_v1, %v5161_v1 }
0x2931   :  { %1474 = vrot.lane.b32.xlu2 %v1472_v3, %s4558_s26 }
0x298b   :  { %v1475_v4 = vpop.permute.xlu2 %1474 }
0x298c   :  { %3879 = vmatmul.msk.bf16.vlgmr.msrb.gmra.mxu3 %vm94_vm0, %v1475_v4 }
0x2a0f   :  { %v1488_v16 = vpop.f32.mrf.mxu3 }
0x2a10   :  { %v1492_v2 = vadd.f32 %v1488_v16, %v1471_v54 }
0x2a12   :  { %4315 = vtanh.f32 %v1492_v2  ;;  %v3880_v58 = vmul.f32 -1.442695, %v1492_v2 }
0x2a14   :  { %4317 = vpow2.f32 %v3880_v58 }
0x2a17   :  { %v1490_v11 = vpop.f32.mrf.mxu3 }
0x2a18   :  { %v4316_v37 = vpop.eup %4315 }
0x2a19   :  { %1515 = vrot.lane.b32.xlu0 %v4316_v37, %s4557_s0 }
0x2a1a   :  { %v4318_v21 = vpop.eup %4317 }
0x2a1b   :  { %v1496_v6 = vadd.f32 1.0, %v4318_v21 }
0x2a1d   :  { %4319 = vrcp.f32 %v1496_v6  ;;  %v1508_v10 = vand.u32 2147483648, %v1496_v6  ;;  %vm1502_vm9 = vweird.f32 %v1496_v6  ;;  %v1506_v31 = vand.u32 2147483647, %v1496_v6 }
0x2a1f   :  { %v1509_v32 = vor.u32 1.1754944e-38, %v1508_v10  ;;  %vm1507_vm11 = vcmp.eq.f32.partialorder %v1506_v31, 8.507059e+37 }
0x2a23   :  { %v4320_v7 = vpop.eup %4319 }
0x2a24   :  { %v1498_v45 = vmul.f32 %v4320_v7, %v1496_v6  ;;  %vm1503_vm8 = vweird.f32 %v4320_v7 }
0x2a25   :  { %vm1504_vm10 = vmor %vm1502_vm9, %vm1503_vm8 }
0x2a26   :  { %v1499_v40 = vsub.f32 1.0, %v1498_v45 }
0x2a28   :  { %v1500_v23 = vmul.f32 %v4320_v7, %v1499_v40 }
0x2a2a   :  { %v1501_v8 = vadd.f32 %v4320_v7, %v1500_v23 }
0x2a2c   :  { %v1505_v54 = vsel %vm1504_vm10, %v4320_v7, %v1501_v8 }
0x2a2d   :  { %v1510_v42 = vsel %vm1507_vm11, %v1509_v32, %v1505_v54 }
0x2a2e   :  { %v1513_v33 = vmul.f32 %v1510_v42, %v1464_v17 }
0x2a8b   :  { %v1516_v39 = vpop.permute.xlu0 %1515 }
0x2a8c   :  { %v1518_v22 = vmul.f32 %v1516_v39, %v1510_v42 }
0x2a8e   :  { %1520 = vrot.lane.b32.xlu1 %v1518_v22, %s4557_s0 }
0x2b00   :  { %v1521_v43 = vpop.permute.xlu1 %1520 }
0x2b01   :  { %v1523_v12 = vadd.f32 %v1521_v43, %v1513_v33 }
0x2b03   :  { %4321 = vtanh.f32 %v1523_v12 }
0x2b09   :  { %v4322_v13 = vpop.eup %4321 }
0x2b0a   :  { %1526 = vrot.lane.b32.xlu2 %v4322_v13, %s4557_s0 }
0x2b64   :  { %v1527_v14 = vpop.permute.xlu2 %1526 }
0x2b65   :  { %v5175_v15 = vmul.f32 %v1527_v14, %v1510_v42 }
0x2b67   :  { %v1531_v18 = vpack.c.bf16 %v5175_v15, %v5175_v15 }
0x2b69   :  { %1533 = vrot.lane.b32.xlu0 %v1531_v18, %s4558_s26 }
0x2bdb   :  { %v1534_v19 = vpop.permute.xlu0 %1533 }
0x2bdc   :  { %3881 = vmatmul.msk.bf16.vlgmr.msrb.gmra.mxu1 %vm94_vm0, %v1534_v19 }
0x2c59   :  { %v1547_v20 = vpop.f32.mrf.mxu1 }
0x2c5a   :  { %v1551_v24 = vadd.f32 %v1547_v20, %v1530_v44 }
0x2c5c   :  { %4323 = vtanh.f32 %v1551_v24  ;;  %v3882_v41 = vmul.f32 -1.442695, %v1551_v24 }
0x2c5e   :  { %4325 = vpow2.f32 %v3882_v41 }
0x2c61   :  { %v1549_v25 = vpop.f32.mrf.mxu1 }
0x2c62   :  { %v4324_v27 = vpop.eup %4323 }
0x2c63   :  { %1574 = vrot.lane.b32.xlu1 %v4324_v27, %s4557_s0 }
0x2c64   :  { %v4326_v28 = vpop.eup %4325 }
0x2c65   :  { %v1555_v0 = vadd.f32 1.0, %v4326_v28 }
0x2c67   :  { %4327 = vrcp.f32 %v1555_v0  ;;  %v1567_v5 = vand.u32 2147483648, %v1555_v0  ;;  %vm1561_vm13 = vweird.f32 %v1555_v0  ;;  %v1565_v46 = vand.u32 2147483647, %v1555_v0 }
0x2c69   :  { %v1568_v52 = vor.u32 1.1754944e-38, %v1567_v5  ;;  %vm1566_vm15 = vcmp.eq.f32.partialorder %v1565_v46, 8.507059e+37 }
0x2c6d   :  { %v4328_v50 = vpop.eup %4327 }
0x2c6e   :  { %v1557_v29 = vmul.f32 %v4328_v50, %v1555_v0  ;;  %vm1562_vm12 = vweird.f32 %v4328_v50 }
0x2c6f   :  { %vm1563_vm14 = vmor %vm1561_vm13, %vm1562_vm12 }
0x2c70   :  { %v1558_v47 = vsub.f32 1.0, %v1557_v29 }
0x2c72   :  { %v1559_v48 = vmul.f32 %v4328_v50, %v1558_v47 }
0x2c74   :  { %v1560_v55 = vadd.f32 %v4328_v50, %v1559_v48 }
0x2c76   :  { %v1564_v44 = vsel %vm1563_vm14, %v4328_v50, %v1560_v55 }
0x2c77   :  { %v1569_v63 = vsel %vm1566_vm15, %v1568_v52, %v1564_v44 }
0x2c78   :  { %v1572_v3 = vmul.f32 %v1569_v63, %v1523_v12 }
0x2cd5   :  { %v1575_v17 = vpop.permute.xlu1 %1574 }
0x2cd6   :  { %v1577_v59 = vmul.f32 %v1575_v17, %v1569_v63 }
0x2cd8   :  { %1579 = vrot.lane.b32.xlu2 %v1577_v59, %s4557_s0 }
0x2d32   :  { %v1580_v4 = vpop.permute.xlu2 %1579 }
0x2d33   :  { %v1582_v16 = vadd.f32 %v1580_v4, %v1572_v3 }
0x2d35   :  { %4329 = vtanh.f32 %v1582_v16 }
0x2d3b   :  { %v4330_v2 = vpop.eup %4329 }
0x2d3c   :  { %1585 = vrot.lane.b32.xlu0 %v4330_v2, %s4557_s0 }
0x2dae   :  { %v1586_v11 = vpop.permute.xlu0 %1585 }
0x2daf   :  { %v5189_v37 = vmul.f32 %v1586_v11, %v1569_v63 }
0x2db1   :  { %v1590_v58 = vpack.c.bf16 %v5189_v37, %v5189_v37 }
0x2db3   :  { %1592 = vrot.lane.b32.xlu1 %v1590_v58, %s4558_s26 }
0x2e25   :  { %v1593_v21 = vpop.permute.xlu1 %1592 }
0x2e26   :  { %3883 = vmatmul.msk.bf16.vlgmr.msrb.gmra.mxu2 %vm94_vm0, %v1593_v21 }
0x2ea9   :  { %v1606_v6 = vpop.f32.mrf.mxu2 }
0x2eaa   :  { %v1610_v7 = vadd.f32 %v1606_v6, %v1589_v51 }
0x2eac   :  { %4331 = vtanh.f32 %v1610_v7  ;;  %v3884_v23 = vmul.f32 -1.442695, %v1610_v7 }
0x2eae   :  { %4333 = vpow2.f32 %v3884_v23 }
0x2eb1   :  { %v1608_v45 = vpop.f32.mrf.mxu2 }
0x2eb2   :  { %v4332_v40 = vpop.eup %4331 }
0x2eb3   :  { %1633 = vrot.lane.b32.xlu2 %v4332_v40, %s4557_s0 }
0x2eb4   :  { %v4334_v8 = vpop.eup %4333 }
0x2eb5   :  { %v1614_v10 = vadd.f32 1.0, %v4334_v8 }
0x2eb7   :  { %4335 = vrcp.f32 %v1614_v10  ;;  %v1626_v22 = vand.u32 2147483648, %v1614_v10  ;;  %vm1620_vm3 = vweird.f32 %v1614_v10  ;;  %v1624_v35 = vand.u32 2147483647, %v1614_v10 }
0x2eb9   :  { %v1627_v51 = vor.u32 1.1754944e-38, %v1626_v22  ;;  %vm1625_vm5 = vcmp.eq.f32.partialorder %v1624_v35, 8.507059e+37 }
0x2ebd   :  { %v4336_v31 = vpop.eup %4335 }
0x2ebe   :  { %v1616_v54 = vmul.f32 %v4336_v31, %v1614_v10  ;;  %vm1621_vm2 = vweird.f32 %v4336_v31 }
0x2ebf   :  { %vm1622_vm4 = vmor %vm1620_vm3, %vm1621_vm2 }
0x2ec0   :  { %v1617_v32 = vsub.f32 1.0, %v1616_v54 }
0x2ec2   :  { %v1618_v39 = vmul.f32 %v4336_v31, %v1617_v32 }
0x2ec4   :  { %v1619_v42 = vadd.f32 %v4336_v31, %v1618_v39 }
0x2ec6   :  { %v1623_v38 = vsel %vm1622_vm4, %v4336_v31, %v1619_v42 }
0x2ec7   :  { %v1628_v43 = vsel %vm1625_vm5, %v1627_v51, %v1623_v38 }
0x2ec8   :  { %v1631_v13 = vmul.f32 %v1628_v43, %v1582_v16 }
0x2f0d   :  { %v1634_v33 = vpop.permute.xlu2 %1633 }
0x2f0e   :  { %v1636_v12 = vmul.f32 %v1634_v33, %v1628_v43 }
0x2f10   :  { %1638 = vrot.lane.b32.xlu0 %v1636_v12, %s4557_s0 }
0x2f82   :  { %v1639_v14 = vpop.permute.xlu0 %1638 }
0x2f83   :  { %v1641_v18 = vadd.f32 %v1639_v14, %v1631_v13 }
0x2f85   :  { %4337 = vtanh.f32 %v1641_v18 }
0x2f8b   :  { %v4338_v19 = vpop.eup %4337 }
0x2f8c   :  { %1644 = vrot.lane.b32.xlu1 %v4338_v19, %s4557_s0 }
0x2ffe   :  { %v1645_v20 = vpop.permute.xlu1 %1644 }
0x2fff   :  { %v5203_v24 = vmul.f32 %v1645_v20, %v1628_v43 }
0x3001   :  { %v1649_v25 = vpack.c.bf16 %v5203_v24, %v5203_v24 }
0x3003   :  { %1651 = vrot.lane.b32.xlu2 %v1649_v25, %s4558_s26 }
0x305d   :  { %v1652_v27 = vpop.permute.xlu2 %1651 }
0x305e   :  { %3885 = vmatmul.msk.bf16.vlgmr.msra.gmra.mxu3 %vm94_vm0, %v1652_v27 }
0x30e1   :  { %v1665_v41 = vpop.f32.mrf.mxu3 }
0x30e2   :  { %v1669_v28 = vadd.f32 %v1665_v41, %v1648_v56 }
0x30e4   :  { %4339 = vtanh.f32 %v1669_v28  ;;  %v3886_v29 = vmul.f32 -1.442695, %v1669_v28 }
0x30e6   :  { %4341 = vpow2.f32 %v3886_v29 }
0x30e9   :  { %v1667_v0 = vpop.f32.mrf.mxu3 }
0x30ea   :  { %v4340_v50 = vpop.eup %4339 }
0x30eb   :  { %1692 = vrot.lane.b32.xlu0 %v4340_v50, %s4557_s0 }
0x30ec   :  { %v4342_v47 = vpop.eup %4341 }
0x30ed   :  { %v1673_v48 = vadd.f32 1.0, %v4342_v47 }
0x30ef   :  { %4343 = vrcp.f32 %v1673_v48  ;;  %v1685_v17 = vand.u32 2147483648, %v1673_v48  ;;  %vm1679_vm8 = vweird.f32 %v1673_v48  ;;  %v1683_v34 = vand.u32 2147483647, %v1673_v48 }
0x30f1   :  { %v1686_v56 = vor.u32 1.1754944e-38, %v1685_v17  ;;  %vm1684_vm10 = vcmp.eq.f32.partialorder %v1683_v34, 8.507059e+37 }
0x30f5   :  { %v4344_v55 = vpop.eup %4343 }
0x30f6   :  { %v1675_v5 = vmul.f32 %v4344_v55, %v1673_v48  ;;  %vm1680_vm7 = vweird.f32 %v4344_v55 }
0x30f7   :  { %vm1681_vm9 = vmor %vm1679_vm8, %vm1680_vm7 }
0x30f8   :  { %v1676_v46 = vsub.f32 1.0, %v1675_v5 }
0x30fa   :  { %v1677_v44 = vmul.f32 %v4344_v55, %v1676_v46 }
0x30fc   :  { %v1678_v52 = vadd.f32 %v4344_v55, %v1677_v44 }
0x30fe   :  { %v1682_v53 = vsel %vm1681_vm9, %v4344_v55, %v1678_v52 }
0x30ff   :  { %v1687_v59 = vsel %vm1684_vm10, %v1686_v56, %v1682_v53 }
0x3100   :  { %v1690_v4 = vmul.f32 %v1687_v59, %v1641_v18 }
0x315d   :  { %v1693_v63 = vpop.permute.xlu0 %1692 }
0x315e   :  { %v1695_v3 = vmul.f32 %v1693_v63, %v1687_v59 }
0x3160   :  { %1697 = vrot.lane.b32.xlu1 %v1695_v3, %s4557_s0 }
0x31d2   :  { %v1698_v16 = vpop.permute.xlu1 %1697 }
0x31d3   :  { %v1700_v2 = vadd.f32 %v1698_v16, %v1690_v4 }
0x31d5   :  { %4345 = vtanh.f32 %v1700_v2 }
0x31db   :  { %v4346_v11 = vpop.eup %4345 }
0x31dc   :  { %1703 = vrot.lane.b32.xlu2 %v4346_v11, %s4557_s0  ;;  %v4046_v11 = vld [vmem:[%s5938_s3 + $0x28] sm:$0xff] }
0x31dd   :  { %1914 = vmatpush.bf16.msrb.mxu3 %v4046_v11 }
0x3236   :  { %v1704_v58 = vpop.permute.xlu2 %1703 }
0x3237   :  { %v5217_v21 = vmul.f32 %v1704_v58, %v1687_v59 }
0x3239   :  { %v1708_v6 = vpack.c.bf16 %v5217_v21, %v5217_v21 }
0x323b   :  { %1710 = vrot.lane.b32.xlu0 %v1708_v6, %s4558_s26 }
0x32ad   :  { %v1711_v7 = vpop.permute.xlu0 %1710 }
0x32ae   :  { %3887 = vmatmul.msk.bf16.vlgmr.msra.gmra.mxu1 %vm94_vm0, %v1711_v7 }
0x332b   :  { %v1724_v45 = vpop.f32.mrf.mxu1 }
0x332c   :  { %v1728_v40 = vadd.f32 %v1724_v45, %v1707_v57 }
0x332e   :  { %4347 = vtanh.f32 %v1728_v40  ;;  %v3888_v10 = vmul.f32 -1.442695, %v1728_v40 }
0x3330   :  { %4349 = vpow2.f32 %v3888_v10 }
0x3333   :  { %v1726_v23 = vpop.f32.mrf.mxu1 }
0x3334   :  { %v4348_v8 = vpop.eup %4347 }
0x3335   :  { %1751 = vrot.lane.b32.xlu1 %v4348_v8, %s4557_s0 }
0x3336   :  { %v4350_v31 = vpop.eup %4349 }
0x3337   :  { %v1732_v54 = vadd.f32 1.0, %v4350_v31 }
0x3339   :  { %4351 = vrcp.f32 %v1732_v54  ;;  %v1744_v38 = vand.u32 2147483648, %v1732_v54  ;;  %vm1738_vm12 = vweird.f32 %v1732_v54  ;;  %v1742_v9 = vand.u32 2147483647, %v1732_v54 }
0x333b   :  { %v1745_v57 = vor.u32 1.1754944e-38, %v1744_v38  ;;  %vm1743_vm14 = vcmp.eq.f32.partialorder %v1742_v9, 8.507059e+37 }
0x333f   :  { %v4352_v32 = vpop.eup %4351 }
0x3340   :  { %v1734_v39 = vmul.f32 %v4352_v32, %v1732_v54  ;;  %vm1739_vm11 = vweird.f32 %v4352_v32 }
0x3341   :  { %vm1740_vm13 = vmor %vm1738_vm12, %vm1739_vm11 }
0x3342   :  { %v1735_v42 = vsub.f32 1.0, %v1734_v39 }
0x3344   :  { %v1736_v22 = vmul.f32 %v4352_v32, %v1735_v42 }
0x3346   :  { %v1737_v35 = vadd.f32 %v4352_v32, %v1736_v22 }
0x3348   :  { %v1741_v49 = vsel %vm1740_vm13, %v4352_v32, %v1737_v35 }
0x3349   :  { %v1746_v33 = vsel %vm1743_vm14, %v1745_v57, %v1741_v49  ;;  %v5270_v49 = vld [vmem:[%s5938_s3 + $0x88] sm:$0xff]  ;;  %v3913_v57 = vld [vmem:[%s5939_s5 + $0x38] sm:$0xff] }
0x334a   :  { %v1749_v12 = vmul.f32 %v1746_v33, %v1700_v2  ;;  %v4111_v2 = vpack.i.bf16 %v5217_v21, %v5175_v15  ;;  %v4116_v15 = vpack.i.bf16 %v5203_v24, %v5189_v37  ;;  %1964 = vmatpush.bf16.msrb.mxu1 %v5270_v49  ;;  %2027 = vmatpush.bf16.msrb.mxu2 %v5270_v49 }
0x334b   :  { %2086 = vmatpush.bf16.msra.mxu0 %v5270_v49 }
0x33a7   :  { %v1752_v51 = vpop.permute.xlu1 %1751 }
0x33a8   :  { %v1754_v43 = vmul.f32 %v1752_v51, %v1746_v33  ;;  %v5279_v51 = vld [vmem:[%s5938_s3 + $0x80] sm:$0xff] }
0x33a9   :  { %1965 = vmatpush.bf16.msrb.mxu1 %v5279_v51  ;;  %2028 = vmatpush.bf16.msrb.mxu2 %v5279_v51 }
0x33aa   :  { %1756 = vrot.lane.b32.xlu2 %v1754_v43, %s4557_s0  ;;  %2087 = vmatpush.bf16.msra.mxu0 %v5279_v51 }
0x33ad   :  { %2145 = vmatpush.bf16.msra.mxu1 %v5270_v49 }
0x33ae   :  { %2263 = vmatpush.bf16.msrb.mxu0 %v5270_v49 }
0x33b1   :  { %2146 = vmatpush.bf16.msra.mxu1 %v5279_v51 }
0x33b2   :  { %2264 = vmatpush.bf16.msrb.mxu0 %v5279_v51 }
0x3404   :  { %v1757_v13 = vpop.permute.xlu2 %1756 }
0x3405   :  { %v1759_v14 = vadd.f32 %v1757_v13, %v1749_v12 }
0x3407   :  { %4353 = vtanh.f32 %v1759_v14 }
0x340d   :  { %v4354_v18 = vpop.eup %4353 }
0x340e   :  { %1762 = vrot.lane.b32.xlu0 %v4354_v18, %s4557_s0 }
0x3480   :  { %v1763_v19 = vpop.permute.xlu0 %1762 }
0x3481   :  { %v1765_v20 = vmul.f32 %v1763_v19, %v1746_v33  ;;  %v3912_v33 = vld [vmem:[%s5939_s5 + $0x30] sm:$0xff] }
0x3482   :  { %v1942_v43 = vpack.c.bf16 %v3912_v33, %v3912_v33 }
0x3483   :  { %v1767_v25 = vpack.c.bf16 %v1765_v20, %v1765_v20  ;;  %v4106_v63 = vpack.i.bf16 %v1765_v20, %v5161_v1  ;;  %v4045_v1 = vld [vmem:[%s5938_s3 + $0x20] sm:$0xff] }
0x3484   :  { %1915 = vmatpush.bf16.msrb.mxu3 %v4045_v1  ;;  %3922 = vmatmul.msk.bf16.vlgmr.msrb.gmra.mxu1 %vm94_vm0, %v1942_v43 }
0x3485   :  { %1769 = vrot.lane.b32.xlu1 %v1767_v25, %s4558_s26  ;;  %2322 = vmatpush.bf16.msrb.mxu1 %v5270_v49 }
0x3489   :  { %2323 = vmatpush.bf16.msrb.mxu1 %v5279_v51 }
0x34f7   :  { %v1770_v27 = vpop.permute.xlu1 %1769 }
0x34f8   :  { %3889 = vmatmul.msk.bf16.vlgmr.msra.gmra.mxu2 %vm94_vm0, %v1770_v27  ;;  %v4167_v27 = vld [vmem:[%s5937_s4 + $0x3] ss:$0 sm:$0xff] }
0x34f9   :  { %2204 = vmatpush.bf16.msra.mxu2 %v5270_v49 }
0x34fd   :  { %2205 = vmatpush.bf16.msra.mxu2 %v5279_v51 }
0x357b   :  { %v1783_v41 = vpop.f32.mrf.mxu2 }
0x357c   :  { %v1787_v28 = vadd.f32 %v1783_v41, %v1766_v60 }
0x357e   :  { %4355 = vtanh.f32 %v1787_v28  ;;  %v3890_v29 = vmul.f32 -1.442695, %v1787_v28 }
0x3580   :  { %4357 = vpow2.f32 %v3890_v29  ;;  %v1967_v29 = vpop.f32.mrf.mxu1 }
0x3583   :  { %v1785_v0 = vpop.f32.mrf.mxu2 }
0x3584   :  { %v4356_v50 = vpop.eup %4355 }
0x3585   :  { %1810 = vrot.lane.b32.xlu2 %v4356_v50, %s4557_s0 }
0x3586   :  { %v4358_v47 = vpop.eup %4357 }
0x3587   :  { %v1791_v48 = vadd.f32 1.0, %v4358_v47 }
0x3589   :  { %4359 = vrcp.f32 %v1791_v48  ;;  %v1803_v17 = vand.u32 2147483648, %v1791_v48  ;;  %vm1797_vm2 = vweird.f32 %v1791_v48  ;;  %v1801_v61 = vand.u32 2147483647, %v1791_v48 }
0x358b   :  { %v1804_v60 = vor.u32 1.1754944e-38, %v1803_v17  ;;  %vm1802_vm4 = vcmp.eq.f32.partialorder %v1801_v61, 8.507059e+37 }
0x358f   :  { %v4360_v55 = vpop.eup %4359 }
0x3590   :  { %v1793_v5 = vmul.f32 %v4360_v55, %v1791_v48  ;;  %vm1798_vm15 = vweird.f32 %v4360_v55 }
0x3591   :  { %vm1799_vm3 = vmor %vm1797_vm2, %vm1798_vm15 }
0x3592   :  { %v1794_v46 = vsub.f32 1.0, %v1793_v5 }
0x3594   :  { %v1795_v44 = vmul.f32 %v4360_v55, %v1794_v46 }
0x3596   :  { %v1796_v52 = vadd.f32 %v4360_v55, %v1795_v44 }
0x3598   :  { %v1800_v62 = vsel %vm1799_vm3, %v4360_v55, %v1796_v52  ;;  %v1969_v55 = vpop.f32.mrf.mxu1 }
0x3599   :  { %v1805_v53 = vsel %vm1802_vm4, %v1804_v60, %v1800_v62 }
0x359a   :  { %v1808_v59 = vmul.f32 %v1805_v53, %v1759_v14 }
0x35df   :  { %v1811_v34 = vpop.permute.xlu2 %1810 }
0x35e0   :  { %v1813_v56 = vmul.f32 %v1811_v34, %v1805_v53 }
0x35e2   :  { %1815 = vrot.lane.b32.xlu0 %v1813_v56, %s4557_s0 }
0x35ea   :  { %4107 = vrot.lane.b32.xlu0 %v4106_v63, %s4558_s26 }
0x3654   :  { %v1816_v3 = vpop.permute.xlu0 %1815 }
0x3655   :  { %v1818_v4 = vadd.f32 %v1816_v3, %v1808_v59 }
0x3657   :  { %4361 = vtanh.f32 %v1818_v4 }
0x365c   :  { %v4108_v21 = vpop.permute.xlu0 %4107 }
0x365d   :  { %v4362_v16 = vpop.eup %4361  ;;  %v4110_v45 = vunpack.i.h.bf16 %v4108_v21  ;;  %v4109_v40 = vunpack.i.l.bf16 %v4108_v21 }
0x365e   :  { %1821 = vrot.lane.b32.xlu1 %v4362_v16, %s4557_s0 }
0x365f   :  { %v1842_v31 = vsel %vm26_vm6, %v4109_v40, %v4110_v45  ;;  %v1863_v19 = vsel %vm26_vm6, %v4110_v45, %v4109_v40 }
0x3666   :  { %4112 = vrot.lane.b32.xlu1 %v4111_v2, %s4558_s26 }
0x366e   :  { %1993 = vrot.lane.b32.xlu1 %v3913_v57, %s4557_s0 }
0x36d0   :  { %v1822_v58 = vpop.permute.xlu1 %1821 }
0x36d1   :  { %v1824_v6 = vmul.f32 %v1822_v58, %v1805_v53 }
0x36d3   :  { %v4101_v7 = vpack.i.bf16 %v1824_v6, %v5150_v36 }
0x36d5   :  { %4102 = vrot.lane.b32.xlu2 %v4101_v7, %s4558_s26 }
0x36d8   :  { %v4113_v39 = vpop.permute.xlu1 %4112 }
0x36d9   :  { %v4115_v42 = vunpack.i.h.bf16 %v4113_v39  ;;  %v4114_v22 = vunpack.i.l.bf16 %v4113_v39 }
0x36db   :  { %v1851_v38 = vsel %vm26_vm6, %v4114_v22, %v4115_v42  ;;  %v1862_v13 = vsel %vm26_vm6, %v4115_v42, %v4114_v22 }
0x36dd   :  { %4117 = vrot.lane.b32.xlu2 %v4116_v15, %s4558_s26 }
0x372f   :  { %v4103_v23 = vpop.permute.xlu2 %4102 }
0x3730   :  { %v4105_v8 = vunpack.i.h.bf16 %v4103_v23  ;;  %v4104_v10 = vunpack.i.l.bf16 %v4103_v23 }
0x3732   :  { %v1833_v54 = vsel %vm26_vm6, %v4104_v10, %v4105_v8  ;;  %v1864_v18 = vsel %vm26_vm6, %v4105_v8, %v4104_v10 }
0x3733   :  { %v1877_v36 = vpack.c.bf16 %v1842_v31, %v1833_v54  ;;  %v1880_v20 = vpack.c.bf16 %v1864_v18, %v1863_v19 }
0x3735   :  { %3908 = vmatmul.msk.bf16.vlgmr.msrb.gmra.mxu3 %vm94_vm0, %v1877_v36 }
0x3737   :  { %v4118_v32 = vpop.permute.xlu2 %4117 }
0x3738   :  { %v4120_v37 = vunpack.i.h.bf16 %v4118_v32  ;;  %v4119_v24 = vunpack.i.l.bf16 %v4118_v32 }
0x373a   :  { %v1860_v35 = vsel %vm26_vm6, %v4119_v24, %v4120_v37  ;;  %v1861_v12 = vsel %vm26_vm6, %v4120_v37, %v4119_v24  ;;  %v1994_v37 = vpop.permute.xlu1 %1993 }
0x373b   :  { %v1878_v9 = vpack.c.bf16 %v1860_v35, %v1851_v38  ;;  %v1879_v14 = vpack.c.bf16 %v1862_v13, %v1861_v12 }
0x3745   :  { %3909 = vmatmul.msk.bf16.gmra.mxu3 %vm94_vm0, %v1878_v9 }
0x3755   :  { %3910 = vmatmul.msk.bf16.gmra.mxu3 %vm94_vm0, %v1879_v14 }
0x3765   :  { %3911 = vmatmul.msk.bf16.gmra.mxu3 %vm94_vm0, %v1880_v20 }
0x37b8   :  { %v1917_v25 = vpop.f32.mrf.mxu3 }
0x37b9   :  { %v5348_v3 = vadd.f32 %v4167_v27, %v1917_v25 }
0x37c0   :  { %v1919_v41 = vpop.f32.mrf.mxu3 }
0x37c1   :  { %v5312_v28 = vadd.f32 %v4167_v27, %v1919_v41 }
0x37c8   :  { %v1922_v0 = vpop.f32.mrf.mxu3 }
0x37c9   :  { %v5314_v50 = vadd.f32 %v4167_v27, %v1922_v0 }
0x37d0   :  { %v1924_v47 = vpop.f32.mrf.mxu3 }
0x37d1   :  { %v5316_v48 = vadd.f32 %v4167_v27, %v1924_v47 }
0x37d8   :  { %v1927_v5 = vpop.f32.mrf.mxu3 }
0x37d9   :  { %v5318_v46 = vadd.f32 %v4167_v27, %v1927_v5 }
0x37db   :  { %v2131_v44 = vsel %vm4666_vm1, %v5316_v48, %v5318_v46  ;;  %v2190_v52 = vsel %vm4666_vm1, %v5318_v46, %v5316_v48 }
0x37e0   :  { %v1929_v17 = vpop.f32.mrf.mxu3 }
0x37e1   :  { %v5328_v61 = vadd.f32 %v4167_v27, %v1929_v17 }
0x37e3   :  { %v2072_v62 = vsel %vm4666_vm1, %v5314_v50, %v5328_v61  ;;  %v2249_v60 = vsel %vm4666_vm1, %v5328_v61, %v5314_v50 }
0x37e8   :  { %v1932_v34 = vpop.f32.mrf.mxu3 }
0x37e9   :  { %v5338_v53 = vadd.f32 %v4167_v27, %v1932_v34 }
0x37eb   :  { %v2013_v56 = vsel %vm4666_vm1, %v5312_v28, %v5338_v53  ;;  %v2308_v63 = vsel %vm4666_vm1, %v5338_v53, %v5312_v28 }
0x37f0   :  { %v1934_v59 = vpop.f32.mrf.mxu3 }
0x37f1   :  { %v5350_v4 = vadd.f32 %v4167_v27, %v1934_v59 }
0x37f3   :  { %v1941_v16 = vsel %vm4666_vm1, %v5348_v3, %v5350_v4  ;;  %v2367_v2 = vsel %vm4666_vm1, %v5350_v4, %v5348_v3 }
0x37f4   :  { %v1971_v11 = vadd.f32 %v1967_v29, %v1941_v16 }
0x37f6   :  { %4363 = vtanh.f32 %v1971_v11  ;;  %v3923_v58 = vmul.f32 -1.442695, %v1971_v11 }
0x37f8   :  { %4365 = vpow2.f32 %v3923_v58 }
0x37fc   :  { %v4364_v1 = vpop.eup %4363 }
0x37fd   :  { %1998 = vrot.lane.b32.xlu0 %v4364_v1, %s4557_s0 }
0x37fe   :  { %v4366_v6 = vpop.eup %4365 }
0x37ff   :  { %v1975_v7 = vadd.f32 1.0, %v4366_v6 }
0x3801   :  { %4367 = vrcp.f32 %v1975_v7  ;;  %v1987_v8 = vand.u32 2147483648, %v1975_v7  ;;  %vm1981_vm7 = vweird.f32 %v1975_v7  ;;  %v1985_v10 = vand.u32 2147483647, %v1975_v7 }
0x3803   :  { %v1988_v54 = vor.u32 1.1754944e-38, %v1987_v8  ;;  %vm1986_vm9 = vcmp.eq.f32.partialorder %v1985_v10, 8.507059e+37 }
0x3807   :  { %v4368_v15 = vpop.eup %4367 }
0x3808   :  { %v1977_v21 = vmul.f32 %v4368_v15, %v1975_v7  ;;  %vm1982_vm5 = vweird.f32 %v4368_v15 }
0x3809   :  { %vm1983_vm8 = vmor %vm1981_vm7, %vm1982_vm5 }
0x380a   :  { %v1978_v45 = vsub.f32 1.0, %v1977_v21 }
0x380c   :  { %v1979_v40 = vmul.f32 %v4368_v15, %v1978_v45 }
0x380e   :  { %v1980_v23 = vadd.f32 %v4368_v15, %v1979_v40 }
0x3810   :  { %v1984_v31 = vsel %vm1983_vm8, %v4368_v15, %v1980_v23 }
0x3811   :  { %v1989_v36 = vsel %vm1986_vm9, %v1988_v54, %v1984_v31 }
0x3812   :  { %v1996_v24 = vmul.f32 %v1994_v37, %v1989_v36 }
0x386f   :  { %v1999_v32 = vpop.permute.xlu0 %1998 }
0x3870   :  { %v2001_v39 = vmul.f32 %v1999_v32, %v1989_v36 }
0x3872   :  { %2003 = vrot.lane.b32.xlu2 %v2001_v39, %s4557_s0 }
0x38cc   :  { %v2004_v42 = vpop.permute.xlu2 %2003 }
0x38cd   :  { %v2006_v22 = vadd.f32 %v2004_v42, %v1996_v24 }
0x38cf   :  { %4369 = vtanh.f32 %v2006_v22 }
0x38d5   :  { %v4370_v35 = vpop.eup %4369 }
0x38d6   :  { %2009 = vrot.lane.b32.xlu0 %v4370_v35, %s4557_s0 }
0x3948   :  { %v2010_v38 = vpop.permute.xlu0 %2009 }
0x3949   :  { %v5363_v9 = vmul.f32 %v2010_v38, %v1989_v36 }
0x394b   :  { %v2014_v57 = vpack.c.bf16 %v5363_v9, %v5363_v9 }
0x394d   :  { %2016 = vrot.lane.b32.xlu1 %v2014_v57, %s4558_s26 }
0x39bf   :  { %v2017_v33 = vpop.permute.xlu1 %2016 }
0x39c0   :  { %3924 = vmatmul.msk.bf16.vlgmr.msrb.gmra.mxu2 %vm94_vm0, %v2017_v33 }
0x39c1   :  { %2381 = vmatpush.bf16.msrb.mxu2 %v5270_v49 }
0x39c5   :  { %2382 = vmatpush.bf16.msrb.mxu2 %v5279_v51 }
0x3a43   :  { %v2030_v43 = vpop.f32.mrf.mxu2 }
0x3a44   :  { %v2034_v12 = vadd.f32 %v2030_v43, %v2013_v56 }
0x3a46   :  { %4371 = vtanh.f32 %v2034_v12  ;;  %v3925_v18 = vmul.f32 -1.442695, %v2034_v12 }
0x3a48   :  { %4373 = vpow2.f32 %v3925_v18 }
0x3a4b   :  { %v2032_v13 = vpop.f32.mrf.mxu2 }
0x3a4c   :  { %v4372_v14 = vpop.eup %4371 }
0x3a4d   :  { %2057 = vrot.lane.b32.xlu2 %v4372_v14, %s4557_s0 }
0x3a4e   :  { %v4374_v19 = vpop.eup %4373 }
0x3a4f   :  { %v2038_v20 = vadd.f32 1.0, %v4374_v19 }
0x3a51   :  { %4375 = vrcp.f32 %v2038_v20  ;;  %v2050_v49 = vand.u32 2147483648, %v2038_v20  ;;  %vm2044_vm11 = vweird.f32 %v2038_v20  ;;  %v2048_v51 = vand.u32 2147483647, %v2038_v20 }
0x3a53   :  { %v2051_v55 = vor.u32 1.1754944e-38, %v2050_v49  ;;  %vm2049_vm13 = vcmp.eq.f32.partialorder %v2048_v51, 8.507059e+37 }
0x3a57   :  { %v4376_v25 = vpop.eup %4375 }
0x3a58   :  { %v2040_v27 = vmul.f32 %v4376_v25, %v2038_v20  ;;  %vm2045_vm10 = vweird.f32 %v4376_v25 }
0x3a59   :  { %vm2046_vm12 = vmor %vm2044_vm11, %vm2045_vm10 }
0x3a5a   :  { %v2041_v41 = vsub.f32 1.0, %v2040_v27 }
0x3a5c   :  { %v2042_v0 = vmul.f32 %v4376_v25, %v2041_v41 }
0x3a5e   :  { %v2043_v29 = vadd.f32 %v4376_v25, %v2042_v0 }
0x3a60   :  { %v2047_v47 = vsel %vm2046_vm12, %v4376_v25, %v2043_v29 }
0x3a61   :  { %v2052_v17 = vsel %vm2049_vm13, %v2051_v55, %v2047_v47 }
0x3a62   :  { %v2055_v56 = vmul.f32 %v2052_v17, %v2006_v22 }
0x3aa7   :  { %v2058_v5 = vpop.permute.xlu2 %2057 }
0x3aa8   :  { %v2060_v34 = vmul.f32 %v2058_v5, %v2052_v17 }
0x3aaa   :  { %2062 = vrot.lane.b32.xlu0 %v2060_v34, %s4557_s0 }
0x3b1c   :  { %v2063_v59 = vpop.permute.xlu0 %2062 }
0x3b1d   :  { %v2065_v16 = vadd.f32 %v2063_v59, %v2055_v56 }
0x3b1f   :  { %4377 = vtanh.f32 %v2065_v16 }
0x3b25   :  { %v4378_v11 = vpop.eup %4377 }
0x3b26   :  { %2068 = vrot.lane.b32.xlu1 %v4378_v11, %s4557_s0 }
0x3b98   :  { %v2069_v1 = vpop.permute.xlu1 %2068 }
0x3b99   :  { %v5374_v58 = vmul.f32 %v2069_v1, %v2052_v17 }
0x3b9b   :  { %v2073_v6 = vpack.c.bf16 %v5374_v58, %v5374_v58 }
0x3b9d   :  { %2075 = vrot.lane.b32.xlu2 %v2073_v6, %s4558_s26 }
0x3bf7   :  { %v2076_v7 = vpop.permute.xlu2 %2075 }
0x3bf8   :  { %3926 = vmatmul.msk.bf16.vlgmr.msra.gmra.mxu0 %vm94_vm0, %v2076_v7 }
0x3c75   :  { %v2089_v15 = vpop.f32.mrf.mxu0 }
0x3c76   :  { %v2093_v21 = vadd.f32 %v2089_v15, %v2072_v62 }
0x3c78   :  { %4379 = vtanh.f32 %v2093_v21  ;;  %v3927_v23 = vmul.f32 -1.442695, %v2093_v21 }
0x3c7a   :  { %4381 = vpow2.f32 %v3927_v23 }
0x3c7d   :  { %v2091_v45 = vpop.f32.mrf.mxu0 }
0x3c7e   :  { %v4380_v40 = vpop.eup %4379 }
0x3c7f   :  { %2116 = vrot.lane.b32.xlu0 %v4380_v40, %s4557_s0 }
0x3c80   :  { %v4382_v8 = vpop.eup %4381 }
0x3c81   :  { %v2097_v10 = vadd.f32 1.0, %v4382_v8 }
0x3c83   :  { %4383 = vrcp.f32 %v2097_v10  ;;  %v2109_v37 = vand.u32 2147483648, %v2097_v10  ;;  %vm2103_vm15 = vweird.f32 %v2097_v10  ;;  %v2107_v24 = vand.u32 2147483647, %v2097_v10 }
0x3c85   :  { %v2110_v42 = vor.u32 1.1754944e-38, %v2109_v37  ;;  %vm2108_vm3 = vcmp.eq.f32.partialorder %v2107_v24, 8.507059e+37 }
0x3c89   :  { %v4384_v31 = vpop.eup %4383 }
0x3c8a   :  { %v2099_v54 = vmul.f32 %v4384_v31, %v2097_v10  ;;  %vm2104_vm14 = vweird.f32 %v4384_v31 }
0x3c8b   :  { %vm2105_vm2 = vmor %vm2103_vm15, %vm2104_vm14 }
0x3c8c   :  { %v2100_v36 = vsub.f32 1.0, %v2099_v54 }
0x3c8e   :  { %v2101_v32 = vmul.f32 %v4384_v31, %v2100_v36 }
0x3c90   :  { %v2102_v39 = vadd.f32 %v4384_v31, %v2101_v32 }
0x3c92   :  { %v2106_v62 = vsel %vm2105_vm2, %v4384_v31, %v2102_v39 }
0x3c93   :  { %v2111_v35 = vsel %vm2108_vm3, %v2110_v42, %v2106_v62 }
0x3c94   :  { %v2114_v57 = vmul.f32 %v2111_v35, %v2065_v16 }
0x3cf1   :  { %v2117_v22 = vpop.permute.xlu0 %2116 }
0x3cf2   :  { %v2119_v38 = vmul.f32 %v2117_v22, %v2111_v35 }
0x3cf4   :  { %2121 = vrot.lane.b32.xlu1 %v2119_v38, %s4557_s0 }
0x3d66   :  { %v2122_v33 = vpop.permute.xlu1 %2121 }
0x3d67   :  { %v2124_v43 = vadd.f32 %v2122_v33, %v2114_v57 }
0x3d69   :  { %4385 = vtanh.f32 %v2124_v43 }
0x3d6f   :  { %v4386_v12 = vpop.eup %4385 }
0x3d70   :  { %2127 = vrot.lane.b32.xlu2 %v4386_v12, %s4557_s0 }
0x3dca   :  { %v2128_v13 = vpop.permute.xlu2 %2127 }
0x3dcb   :  { %v5388_v14 = vmul.f32 %v2128_v13, %v2111_v35 }
0x3dcd   :  { %v2132_v18 = vpack.c.bf16 %v5388_v14, %v5388_v14 }
0x3dcf   :  { %2134 = vrot.lane.b32.xlu0 %v2132_v18, %s4558_s26 }
0x3e41   :  { %v2135_v19 = vpop.permute.xlu0 %2134 }
0x3e42   :  { %3928 = vmatmul.msk.bf16.vlgmr.msra.gmra.mxu1 %vm94_vm0, %v2135_v19 }
0x3ebf   :  { %v2148_v20 = vpop.f32.mrf.mxu1 }
0x3ec0   :  { %v2152_v25 = vadd.f32 %v2148_v20, %v2131_v44 }
0x3ec2   :  { %4387 = vtanh.f32 %v2152_v25  ;;  %v3929_v0 = vmul.f32 -1.442695, %v2152_v25 }
0x3ec4   :  { %4389 = vpow2.f32 %v3929_v0 }
0x3ec7   :  { %v2150_v27 = vpop.f32.mrf.mxu1 }
0x3ec8   :  { %v4388_v41 = vpop.eup %4387 }
0x3ec9   :  { %2175 = vrot.lane.b32.xlu1 %v4388_v41, %s4557_s0 }
0x3eca   :  { %v4390_v29 = vpop.eup %4389 }
0x3ecb   :  { %v2156_v49 = vadd.f32 1.0, %v4390_v29 }
0x3ecd   :  { %4391 = vrcp.f32 %v2156_v49  ;;  %v2168_v34 = vand.u32 2147483648, %v2156_v49  ;;  %vm2162_vm5 = vweird.f32 %v2156_v49  ;;  %v2166_v56 = vand.u32 2147483647, %v2156_v49 }
0x3ecf   :  { %v2169_v59 = vor.u32 1.1754944e-38, %v2168_v34  ;;  %vm2167_vm8 = vcmp.eq.f32.partialorder %v2166_v56, 8.507059e+37 }
0x3ed3   :  { %v4392_v51 = vpop.eup %4391 }
0x3ed4   :  { %v2158_v47 = vmul.f32 %v4392_v51, %v2156_v49  ;;  %vm2163_vm4 = vweird.f32 %v4392_v51 }
0x3ed5   :  { %vm2164_vm7 = vmor %vm2162_vm5, %vm2163_vm4 }
0x3ed6   :  { %v2159_v55 = vsub.f32 1.0, %v2158_v47 }
0x3ed8   :  { %v2160_v5 = vmul.f32 %v4392_v51, %v2159_v55 }
0x3eda   :  { %v2161_v17 = vadd.f32 %v4392_v51, %v2160_v5 }
0x3edc   :  { %v2165_v44 = vsel %vm2164_vm7, %v4392_v51, %v2161_v17 }
0x3edd   :  { %v2170_v11 = vsel %vm2167_vm8, %v2169_v59, %v2165_v44 }
0x3ede   :  { %v2173_v6 = vmul.f32 %v2170_v11, %v2124_v43 }
0x3f3b   :  { %v2176_v16 = vpop.permute.xlu1 %2175 }
0x3f3c   :  { %v2178_v1 = vmul.f32 %v2176_v16, %v2170_v11 }
0x3f3e   :  { %2180 = vrot.lane.b32.xlu2 %v2178_v1, %s4557_s0 }
0x3f98   :  { %v2181_v7 = vpop.permute.xlu2 %2180 }
0x3f99   :  { %v2183_v15 = vadd.f32 %v2181_v7, %v2173_v6 }
0x3f9b   :  { %4393 = vtanh.f32 %v2183_v15 }
0x3fa1   :  { %v4394_v21 = vpop.eup %4393 }
0x3fa2   :  { %2186 = vrot.lane.b32.xlu0 %v4394_v21, %s4557_s0 }
0x4014   :  { %v2187_v45 = vpop.permute.xlu0 %2186 }
0x4015   :  { %v5402_v40 = vmul.f32 %v2187_v45, %v2170_v11 }
0x4017   :  { %v2191_v23 = vpack.c.bf16 %v5402_v40, %v5402_v40 }
0x4019   :  { %2193 = vrot.lane.b32.xlu1 %v2191_v23, %s4558_s26 }
0x408b   :  { %v2194_v8 = vpop.permute.xlu1 %2193 }
0x408c   :  { %3930 = vmatmul.msk.bf16.vlgmr.msra.gmra.mxu2 %vm94_vm0, %v2194_v8 }
0x410f   :  { %v2207_v10 = vpop.f32.mrf.mxu2 }
0x4110   :  { %v2211_v31 = vadd.f32 %v2207_v10, %v2190_v52 }
0x4112   :  { %4395 = vtanh.f32 %v2211_v31  ;;  %v3931_v32 = vmul.f32 -1.442695, %v2211_v31 }
0x4114   :  { %4397 = vpow2.f32 %v3931_v32 }
0x4117   :  { %v2209_v54 = vpop.f32.mrf.mxu2 }
0x4118   :  { %v4396_v36 = vpop.eup %4395 }
0x4119   :  { %2234 = vrot.lane.b32.xlu2 %v4396_v36, %s4557_s0 }
0x411a   :  { %v4398_v39 = vpop.eup %4397 }
0x411b   :  { %v2215_v37 = vadd.f32 1.0, %v4398_v39 }
0x411d   :  { %4399 = vrcp.f32 %v2215_v37  ;;  %v2227_v38 = vand.u32 2147483648, %v2215_v37  ;;  %vm2221_vm10 = vweird.f32 %v2215_v37  ;;  %v2225_v48 = vand.u32 2147483647, %v2215_v37 }
0x411f   :  { %v2228_v52 = vor.u32 1.1754944e-38, %v2227_v38  ;;  %vm2226_vm12 = vcmp.eq.f32.partialorder %v2225_v48, 8.507059e+37 }
0x4123   :  { %v4400_v24 = vpop.eup %4399 }
0x4124   :  { %v2217_v62 = vmul.f32 %v4400_v24, %v2215_v37  ;;  %vm2222_vm9 = vweird.f32 %v4400_v24 }
0x4125   :  { %vm2223_vm11 = vmor %vm2221_vm10, %vm2222_vm9 }
0x4126   :  { %v2218_v42 = vsub.f32 1.0, %v2217_v62 }
0x4128   :  { %v2219_v22 = vmul.f32 %v4400_v24, %v2218_v42 }
0x412a   :  { %v2220_v35 = vadd.f32 %v4400_v24, %v2219_v22 }
0x412c   :  { %v2224_v46 = vsel %vm2223_vm11, %v4400_v24, %v2220_v35 }
0x412d   :  { %v2229_v33 = vsel %vm2226_vm12, %v2228_v52, %v2224_v46 }
0x412e   :  { %v2232_v12 = vmul.f32 %v2229_v33, %v2183_v15 }
0x4173   :  { %v2235_v57 = vpop.permute.xlu2 %2234 }
0x4174   :  { %v2237_v43 = vmul.f32 %v2235_v57, %v2229_v33 }
0x4176   :  { %2239 = vrot.lane.b32.xlu0 %v2237_v43, %s4557_s0 }
0x41e8   :  { %v2240_v13 = vpop.permute.xlu0 %2239 }
0x41e9   :  { %v2242_v18 = vadd.f32 %v2240_v13, %v2232_v12 }
0x41eb   :  { %4401 = vtanh.f32 %v2242_v18 }
0x41f1   :  { %v4402_v19 = vpop.eup %4401 }
0x41f2   :  { %2245 = vrot.lane.b32.xlu1 %v4402_v19, %s4557_s0 }
0x4264   :  { %v2246_v20 = vpop.permute.xlu1 %2245 }
0x4265   :  { %v5416_v25 = vmul.f32 %v2246_v20, %v2229_v33 }
0x4267   :  { %v2250_v27 = vpack.c.bf16 %v5416_v25, %v5416_v25 }
0x4269   :  { %2252 = vrot.lane.b32.xlu2 %v2250_v27, %s4558_s26 }
0x42c3   :  { %v2253_v41 = vpop.permute.xlu2 %2252 }
0x42c4   :  { %3932 = vmatmul.msk.bf16.vlgmr.msrb.gmra.mxu0 %vm94_vm0, %v2253_v41 }
0x4341   :  { %v2266_v0 = vpop.f32.mrf.mxu0 }
0x4342   :  { %v2270_v29 = vadd.f32 %v2266_v0, %v2249_v60 }
0x4344   :  { %4403 = vtanh.f32 %v2270_v29  ;;  %v3933_v47 = vmul.f32 -1.442695, %v2270_v29 }
0x4346   :  { %4405 = vpow2.f32 %v3933_v47 }
0x4349   :  { %v2268_v49 = vpop.f32.mrf.mxu0 }
0x434a   :  { %v4404_v51 = vpop.eup %4403 }
0x434b   :  { %2293 = vrot.lane.b32.xlu0 %v4404_v51, %s4557_s0 }
0x434c   :  { %v4406_v55 = vpop.eup %4405 }
0x434d   :  { %v2274_v5 = vadd.f32 1.0, %v4406_v55 }
0x434f   :  { %4407 = vrcp.f32 %v2274_v5  ;;  %v2286_v16 = vand.u32 2147483648, %v2274_v5  ;;  %vm2280_vm14 = vweird.f32 %v2274_v5  ;;  %v2284_v50 = vand.u32 2147483647, %v2274_v5 }
0x4351   :  { %v2287_v60 = vor.u32 1.1754944e-38, %v2286_v16  ;;  %vm2285_vm2 = vcmp.eq.f32.partialorder %v2284_v50, 8.507059e+37 }
0x4355   :  { %v4408_v17 = vpop.eup %4407 }
0x4356   :  { %v2276_v34 = vmul.f32 %v4408_v17, %v2274_v5  ;;  %vm2281_vm13 = vweird.f32 %v4408_v17 }
0x4357   :  { %vm2282_vm15 = vmor %vm2280_vm14, %vm2281_vm13 }
0x4358   :  { %v2277_v56 = vsub.f32 1.0, %v2276_v34 }
0x435a   :  { %v2278_v44 = vmul.f32 %v4408_v17, %v2277_v56 }
0x435c   :  { %v2279_v59 = vadd.f32 %v4408_v17, %v2278_v44 }
0x435e   :  { %v2283_v61 = vsel %vm2282_vm15, %v4408_v17, %v2279_v59 }
0x435f   :  { %v2288_v1 = vsel %vm2285_vm2, %v2287_v60, %v2283_v61 }
0x4360   :  { %v2291_v7 = vmul.f32 %v2288_v1, %v2242_v18 }
0x43bd   :  { %v2294_v11 = vpop.permute.xlu0 %2293 }
0x43be   :  { %v2296_v6 = vmul.f32 %v2294_v11, %v2288_v1 }
0x43c0   :  { %2298 = vrot.lane.b32.xlu1 %v2296_v6, %s4557_s0 }
0x4432   :  { %v2299_v15 = vpop.permute.xlu1 %2298 }
0x4433   :  { %v2301_v21 = vadd.f32 %v2299_v15, %v2291_v7 }
0x4435   :  { %4409 = vtanh.f32 %v2301_v21 }
0x443b   :  { %v4410_v45 = vpop.eup %4409 }
0x443c   :  { %2304 = vrot.lane.b32.xlu2 %v4410_v45, %s4557_s0  ;;  %v4050_v45 = vld [vmem:[%s5938_s3 + $0x38] sm:$0xff] }
0x443d   :  { %2515 = vmatpush.bf16.msra.mxu0 %v4050_v45 }
0x4496   :  { %v2305_v23 = vpop.permute.xlu2 %2304 }
0x4497   :  { %v5430_v8 = vmul.f32 %v2305_v23, %v2288_v1 }
0x4499   :  { %v2309_v10 = vpack.c.bf16 %v5430_v8, %v5430_v8 }
0x449b   :  { %2311 = vrot.lane.b32.xlu0 %v2309_v10, %s4558_s26 }
0x450d   :  { %v2312_v31 = vpop.permute.xlu0 %2311 }
0x450e   :  { %3934 = vmatmul.msk.bf16.vlgmr.msrb.gmra.mxu1 %vm94_vm0, %v2312_v31 }
0x458b   :  { %v2325_v54 = vpop.f32.mrf.mxu1 }
0x458c   :  { %v2329_v36 = vadd.f32 %v2325_v54, %v2308_v63 }
0x458e   :  { %4411 = vtanh.f32 %v2329_v36  ;;  %v3935_v37 = vmul.f32 -1.442695, %v2329_v36 }
0x4590   :  { %4413 = vpow2.f32 %v3935_v37 }
0x4593   :  { %v2327_v32 = vpop.f32.mrf.mxu1 }
0x4594   :  { %v4412_v39 = vpop.eup %4411 }
0x4595   :  { %2352 = vrot.lane.b32.xlu1 %v4412_v39, %s4557_s0 }
0x4596   :  { %v4414_v24 = vpop.eup %4413 }
0x4597   :  { %v2333_v62 = vadd.f32 1.0, %v4414_v24 }
0x4599   :  { %4415 = vrcp.f32 %v2333_v62  ;;  %v2345_v46 = vand.u32 2147483648, %v2333_v62  ;;  %vm2339_vm4 = vweird.f32 %v2333_v62  ;;  %v2343_v28 = vand.u32 2147483647, %v2333_v62 }
0x459b   :  { %v2346_v63 = vor.u32 1.1754944e-38, %v2345_v46  ;;  %vm2344_vm7 = vcmp.eq.f32.partialorder %v2343_v28, 8.507059e+37 }
0x459f   :  { %v4416_v42 = vpop.eup %4415 }
0x45a0   :  { %v2335_v22 = vmul.f32 %v4416_v42, %v2333_v62  ;;  %vm2340_vm3 = vweird.f32 %v4416_v42 }
0x45a1   :  { %vm2341_vm5 = vmor %vm2339_vm4, %vm2340_vm3 }
0x45a2   :  { %v2336_v35 = vsub.f32 1.0, %v2335_v22 }
0x45a4   :  { %v2337_v38 = vmul.f32 %v4416_v42, %v2336_v35 }
0x45a6   :  { %v2338_v48 = vadd.f32 %v4416_v42, %v2337_v38 }
0x45a8   :  { %v2342_v53 = vsel %vm2341_vm5, %v4416_v42, %v2338_v48 }
0x45a9   :  { %v2347_v57 = vsel %vm2344_vm7, %v2346_v63, %v2342_v53  ;;  %v5490_v63 = vld [vmem:[%s5938_s3 + $0x90] sm:$0xff] }
0x45aa   :  { %v2350_v43 = vmul.f32 %v2347_v57, %v2301_v21  ;;  %v4131_v21 = vpack.i.bf16 %v5430_v8, %v5388_v14  ;;  %v4136_v14 = vpack.i.bf16 %v5416_v25, %v5402_v40  ;;  %v5478_v40 = vld [vmem:[%s5938_s3 + $0x98] sm:$0xff] }
0x45ab   :  { %2565 = vmatpush.bf16.msra.mxu1 %v5478_v40  ;;  %2628 = vmatpush.bf16.msra.mxu2 %v5478_v40 }
0x45ac   :  { %2687 = vmatpush.bf16.msra.mxu3 %v5478_v40 }
0x45af   :  { %2566 = vmatpush.bf16.msra.mxu1 %v5490_v63  ;;  %2629 = vmatpush.bf16.msra.mxu2 %v5490_v63 }
0x45b0   :  { %2688 = vmatpush.bf16.msra.mxu3 %v5490_v63 }
0x45b3   :  { %2746 = vmatpush.bf16.msrb.mxu1 %v5478_v40 }
0x45b4   :  { %2864 = vmatpush.bf16.msrb.mxu3 %v5478_v40 }
0x45b7   :  { %2747 = vmatpush.bf16.msrb.mxu1 %v5490_v63 }
0x45b8   :  { %2865 = vmatpush.bf16.msrb.mxu3 %v5490_v63 }
0x4607   :  { %v2353_v52 = vpop.permute.xlu1 %2352 }
0x4608   :  { %v2355_v33 = vmul.f32 %v2353_v52, %v2347_v57  ;;  %v3959_v52 = vld [vmem:[%s5939_s5 + $0x40] sm:$0xff] }
0x460a   :  { %2357 = vrot.lane.b32.xlu2 %v2355_v33, %s4557_s0  ;;  %v2543_v33 = vpack.c.bf16 %v3959_v52, %v3959_v52 }
0x460c   :  { %3969 = vmatmul.msk.bf16.vlgmr.msra.gmra.mxu1 %vm94_vm0, %v2543_v33 }
0x460d   :  { %2923 = vmatpush.bf16.msra.mxu1 %v5478_v40 }
0x4611   :  { %2924 = vmatpush.bf16.msra.mxu1 %v5490_v63 }
0x4664   :  { %v2358_v12 = vpop.permute.xlu2 %2357 }
0x4665   :  { %v2360_v13 = vadd.f32 %v2358_v12, %v2350_v43 }
0x4667   :  { %4417 = vtanh.f32 %v2360_v13 }
0x466d   :  { %v4418_v18 = vpop.eup %4417 }
0x466e   :  { %2363 = vrot.lane.b32.xlu0 %v4418_v18, %s4557_s0 }
0x46e0   :  { %v2364_v19 = vpop.permute.xlu0 %2363 }
0x46e1   :  { %v2366_v20 = vmul.f32 %v2364_v19, %v2347_v57  ;;  %v3960_v57 = vld [vmem:[%s5939_s5 + $0x48] sm:$0xff] }
0x46e3   :  { %v2368_v27 = vpack.c.bf16 %v2366_v20, %v2366_v20  ;;  %v4126_v11 = vpack.i.bf16 %v2366_v20, %v5374_v58  ;;  %v4049_v58 = vld [vmem:[%s5938_s3 + $0x30] sm:$0xff] }
0x46e4   :  { %2516 = vmatpush.bf16.msra.mxu0 %v4049_v58 }
0x46e5   :  { %2370 = vrot.lane.b32.xlu1 %v2368_v27, %s4558_s26 }
0x4757   :  { %v2371_v41 = vpop.permute.xlu1 %2370 }
0x4758   :  { %3936 = vmatmul.msk.bf16.vlgmr.msrb.gmra.mxu2 %vm94_vm0, %v2371_v41  ;;  %v4168_v41 = vld [vmem:[%s5937_s4 + $0x4] ss:$0 sm:$0xff] }
0x4759   :  { %2805 = vmatpush.bf16.msrb.mxu2 %v5478_v40 }
0x475d   :  { %2806 = vmatpush.bf16.msrb.mxu2 %v5490_v63 }
0x47db   :  { %v2384_v0 = vpop.f32.mrf.mxu2 }
0x47dc   :  { %v2388_v29 = vadd.f32 %v2384_v0, %v2367_v2 }
0x47de   :  { %4419 = vtanh.f32 %v2388_v29  ;;  %v3937_v47 = vmul.f32 -1.442695, %v2388_v29 }
0x47e0   :  { %4421 = vpow2.f32 %v3937_v47  ;;  %v2568_v47 = vpop.f32.mrf.mxu1 }
0x47e3   :  { %v2386_v49 = vpop.f32.mrf.mxu2 }
0x47e4   :  { %v4420_v51 = vpop.eup %4419 }
0x47e5   :  { %2411 = vrot.lane.b32.xlu2 %v4420_v51, %s4557_s0 }
0x47e6   :  { %v4422_v55 = vpop.eup %4421 }
0x47e7   :  { %v2392_v5 = vadd.f32 1.0, %v4422_v55 }
0x47e9   :  { %4423 = vrcp.f32 %v2392_v5  ;;  %v2404_v16 = vand.u32 2147483648, %v2392_v5  ;;  %vm2398_vm9 = vweird.f32 %v2392_v5  ;;  %v2402_v3 = vand.u32 2147483647, %v2392_v5 }
0x47eb   :  { %v2405_v2 = vor.u32 1.1754944e-38, %v2404_v16  ;;  %vm2403_vm11 = vcmp.eq.f32.partialorder %v2402_v3, 8.507059e+37 }
0x47ef   :  { %v4424_v17 = vpop.eup %4423 }
0x47f0   :  { %v2394_v34 = vmul.f32 %v4424_v17, %v2392_v5  ;;  %vm2399_vm8 = vweird.f32 %v4424_v17 }
0x47f1   :  { %vm2400_vm10 = vmor %vm2398_vm9, %vm2399_vm8 }
0x47f2   :  { %v2395_v56 = vsub.f32 1.0, %v2394_v34 }
0x47f4   :  { %v2396_v44 = vmul.f32 %v4424_v17, %v2395_v56 }
0x47f6   :  { %v2397_v59 = vadd.f32 %v4424_v17, %v2396_v44 }
0x47f8   :  { %v2401_v4 = vsel %vm2400_vm10, %v4424_v17, %v2397_v59  ;;  %v2570_v17 = vpop.f32.mrf.mxu1 }
0x47f9   :  { %v2406_v61 = vsel %vm2403_vm11, %v2405_v2, %v2401_v4 }
0x47fa   :  { %v2409_v1 = vmul.f32 %v2406_v61, %v2360_v13 }
0x483f   :  { %v2412_v50 = vpop.permute.xlu2 %2411 }
0x4840   :  { %v2414_v60 = vmul.f32 %v2412_v50, %v2406_v61 }
0x4842   :  { %2416 = vrot.lane.b32.xlu0 %v2414_v60, %s4557_s0 }
0x484a   :  { %4127 = vrot.lane.b32.xlu0 %v4126_v11, %s4558_s26 }
0x48b4   :  { %v2417_v6 = vpop.permute.xlu0 %2416 }
0x48b5   :  { %v2419_v7 = vadd.f32 %v2417_v6, %v2409_v1 }
0x48b7   :  { %4425 = vtanh.f32 %v2419_v7 }
0x48bc   :  { %v4128_v8 = vpop.permute.xlu0 %4127 }
0x48bd   :  { %v4426_v15 = vpop.eup %4425  ;;  %v4130_v54 = vunpack.i.h.bf16 %v4128_v8  ;;  %v4129_v36 = vunpack.i.l.bf16 %v4128_v8 }
0x48be   :  { %2422 = vrot.lane.b32.xlu1 %v4426_v15, %s4557_s0 }
0x48bf   :  { %v2443_v24 = vsel %vm26_vm6, %v4129_v36, %v4130_v54  ;;  %v2464_v19 = vsel %vm26_vm6, %v4130_v54, %v4129_v36 }
0x48c6   :  { %4132 = vrot.lane.b32.xlu1 %v4131_v21, %s4558_s26 }
0x48ce   :  { %2594 = vrot.lane.b32.xlu1 %v3960_v57, %s4557_s0 }
0x4930   :  { %v2423_v23 = vpop.permute.xlu1 %2422 }
0x4931   :  { %v2425_v10 = vmul.f32 %v2423_v23, %v2406_v61 }
0x4933   :  { %v4121_v31 = vpack.i.bf16 %v2425_v10, %v5363_v9 }
0x4935   :  { %4122 = vrot.lane.b32.xlu2 %v4121_v31, %s4558_s26 }
0x4938   :  { %v4133_v42 = vpop.permute.xlu1 %4132 }
0x4939   :  { %v4135_v38 = vunpack.i.h.bf16 %v4133_v42  ;;  %v4134_v48 = vunpack.i.l.bf16 %v4133_v42 }
0x493b   :  { %v2452_v28 = vsel %vm26_vm6, %v4134_v48, %v4135_v38  ;;  %v2463_v12 = vsel %vm26_vm6, %v4135_v38, %v4134_v48 }
0x493d   :  { %4137 = vrot.lane.b32.xlu2 %v4136_v14, %s4558_s26 }
0x498f   :  { %v4123_v32 = vpop.permute.xlu2 %4122 }
0x4990   :  { %v4125_v39 = vunpack.i.h.bf16 %v4123_v32  ;;  %v4124_v37 = vunpack.i.l.bf16 %v4123_v32 }
0x4992   :  { %v2434_v62 = vsel %vm26_vm6, %v4124_v37, %v4125_v39  ;;  %v2465_v18 = vsel %vm26_vm6, %v4125_v39, %v4124_v37 }
0x4993   :  { %v2478_v9 = vpack.c.bf16 %v2443_v24, %v2434_v62  ;;  %v2481_v20 = vpack.c.bf16 %v2465_v18, %v2464_v19 }
0x4995   :  { %3955 = vmatmul.msk.bf16.vlgmr.msra.gmra.mxu0 %vm94_vm0, %v2478_v9 }
0x4997   :  { %v4138_v25 = vpop.permute.xlu2 %4137 }
0x4998   :  { %v4140_v22 = vunpack.i.h.bf16 %v4138_v25  ;;  %v4139_v35 = vunpack.i.l.bf16 %v4138_v25 }
0x499a   :  { %v2461_v46 = vsel %vm26_vm6, %v4139_v35, %v4140_v22  ;;  %v2462_v43 = vsel %vm26_vm6, %v4140_v22, %v4139_v35  ;;  %v2595_v22 = vpop.permute.xlu1 %2594 }
0x499b   :  { %v2479_v53 = vpack.c.bf16 %v2461_v46, %v2452_v28  ;;  %v2480_v13 = vpack.c.bf16 %v2463_v12, %v2462_v43 }
0x49a5   :  { %3956 = vmatmul.msk.bf16.gmra.mxu0 %vm94_vm0, %v2479_v53 }
0x49b5   :  { %3957 = vmatmul.msk.bf16.gmra.mxu0 %vm94_vm0, %v2480_v13 }
0x49c5   :  { %3958 = vmatmul.msk.bf16.gmra.mxu0 %vm94_vm0, %v2481_v20 }
0x4a12   :  { %v2518_v27 = vpop.f32.mrf.mxu0 }
0x4a13   :  { %v5561_v6 = vadd.f32 %v4168_v41, %v2518_v27 }
0x4a1a   :  { %v2520_v0 = vpop.f32.mrf.mxu0 }
0x4a1b   :  { %v5525_v29 = vadd.f32 %v4168_v41, %v2520_v0 }
0x4a22   :  { %v2523_v49 = vpop.f32.mrf.mxu0 }
0x4a23   :  { %v5527_v51 = vadd.f32 %v4168_v41, %v2523_v49 }
0x4a2a   :  { %v2525_v55 = vpop.f32.mrf.mxu0 }
0x4a2b   :  { %v5529_v5 = vadd.f32 %v4168_v41, %v2525_v55 }
0x4a32   :  { %v2528_v34 = vpop.f32.mrf.mxu0 }
0x4a33   :  { %v5531_v56 = vadd.f32 %v4168_v41, %v2528_v34 }
0x4a35   :  { %v2732_v44 = vsel %vm4666_vm1, %v5529_v5, %v5531_v56  ;;  %v2791_v59 = vsel %vm4666_vm1, %v5531_v56, %v5529_v5 }
0x4a3a   :  { %v2530_v16 = vpop.f32.mrf.mxu0 }
0x4a3b   :  { %v5541_v3 = vadd.f32 %v4168_v41, %v2530_v16 }
0x4a3d   :  { %v2673_v4 = vsel %vm4666_vm1, %v5527_v51, %v5541_v3  ;;  %v2850_v2 = vsel %vm4666_vm1, %v5541_v3, %v5527_v51 }
0x4a42   :  { %v2533_v50 = vpop.f32.mrf.mxu0 }
0x4a43   :  { %v5551_v61 = vadd.f32 %v4168_v41, %v2533_v50 }
0x4a45   :  { %v2614_v60 = vsel %vm4666_vm1, %v5525_v29, %v5551_v61  ;;  %v2909_v11 = vsel %vm4666_vm1, %v5551_v61, %v5525_v29 }
0x4a4a   :  { %v2535_v1 = vpop.f32.mrf.mxu0 }
0x4a4b   :  { %v5563_v7 = vadd.f32 %v4168_v41, %v2535_v1 }
0x4a4d   :  { %v2542_v15 = vsel %vm4666_vm1, %v5561_v6, %v5563_v7  ;;  %v2968_v21 = vsel %vm4666_vm1, %v5563_v7, %v5561_v6 }
0x4a4e   :  { %v2572_v45 = vadd.f32 %v2568_v47, %v2542_v15 }
0x4a50   :  { %4427 = vtanh.f32 %v2572_v45  ;;  %v3970_v23 = vmul.f32 -1.442695, %v2572_v45 }
0x4a52   :  { %4429 = vpow2.f32 %v3970_v23 }
0x4a56   :  { %v4428_v58 = vpop.eup %4427 }
0x4a57   :  { %2599 = vrot.lane.b32.xlu0 %v4428_v58, %s4557_s0 }
0x4a58   :  { %v4430_v10 = vpop.eup %4429 }
0x4a59   :  { %v2576_v31 = vadd.f32 1.0, %v4430_v10 }
0x4a5b   :  { %4431 = vrcp.f32 %v2576_v31  ;;  %v2588_v39 = vand.u32 2147483648, %v2576_v31  ;;  %vm2582_vm13 = vweird.f32 %v2576_v31  ;;  %v2586_v37 = vand.u32 2147483647, %v2576_v31 }
0x4a5d   :  { %v2589_v62 = vor.u32 1.1754944e-38, %v2588_v39  ;;  %vm2587_vm15 = vcmp.eq.f32.partialorder %v2586_v37, 8.507059e+37 }
0x4a61   :  { %v4432_v14 = vpop.eup %4431 }
0x4a62   :  { %v2578_v8 = vmul.f32 %v4432_v14, %v2576_v31  ;;  %vm2583_vm12 = vweird.f32 %v4432_v14 }
0x4a63   :  { %vm2584_vm14 = vmor %vm2582_vm13, %vm2583_vm12 }
0x4a64   :  { %v2579_v54 = vsub.f32 1.0, %v2578_v8 }
0x4a66   :  { %v2580_v36 = vmul.f32 %v4432_v14, %v2579_v54 }
0x4a68   :  { %v2581_v32 = vadd.f32 %v4432_v14, %v2580_v36 }
0x4a6a   :  { %v2585_v24 = vsel %vm2584_vm14, %v4432_v14, %v2581_v32 }
0x4a6b   :  { %v2590_v9 = vsel %vm2587_vm15, %v2589_v62, %v2585_v24 }
0x4a6c   :  { %v2597_v35 = vmul.f32 %v2595_v22, %v2590_v9 }
0x4ac9   :  { %v2600_v25 = vpop.permute.xlu0 %2599 }
0x4aca   :  { %v2602_v42 = vmul.f32 %v2600_v25, %v2590_v9 }
0x4acc   :  { %2604 = vrot.lane.b32.xlu2 %v2602_v42, %s4557_s0 }
0x4b26   :  { %v2605_v38 = vpop.permute.xlu2 %2604 }
0x4b27   :  { %v2607_v48 = vadd.f32 %v2605_v38, %v2597_v35 }
0x4b29   :  { %4433 = vtanh.f32 %v2607_v48 }
0x4b2f   :  { %v4434_v46 = vpop.eup %4433 }
0x4b30   :  { %2610 = vrot.lane.b32.xlu0 %v4434_v46, %s4557_s0 }
0x4ba2   :  { %v2611_v28 = vpop.permute.xlu0 %2610 }
0x4ba3   :  { %v5576_v53 = vmul.f32 %v2611_v28, %v2590_v9 }
0x4ba5   :  { %v2615_v52 = vpack.c.bf16 %v5576_v53, %v5576_v53 }
0x4ba7   :  { %2617 = vrot.lane.b32.xlu1 %v2615_v52, %s4558_s26 }
0x4c19   :  { %v2618_v57 = vpop.permute.xlu1 %2617 }
0x4c1a   :  { %3971 = vmatmul.msk.bf16.vlgmr.msra.gmra.mxu2 %vm94_vm0, %v2618_v57 }
0x4c1b   :  { %2982 = vmatpush.bf16.msra.mxu2 %v5478_v40 }
0x4c1f   :  { %2983 = vmatpush.bf16.msra.mxu2 %v5490_v63 }
0x4c9d   :  { %v2631_v33 = vpop.f32.mrf.mxu2 }
0x4c9e   :  { %v2635_v43 = vadd.f32 %v2631_v33, %v2614_v60 }
0x4ca0   :  { %4435 = vtanh.f32 %v2635_v43  ;;  %v3972_v18 = vmul.f32 -1.442695, %v2635_v43 }
0x4ca2   :  { %4437 = vpow2.f32 %v3972_v18 }
0x4ca5   :  { %v2633_v12 = vpop.f32.mrf.mxu2 }
0x4ca6   :  { %v4436_v13 = vpop.eup %4435 }
0x4ca7   :  { %2658 = vrot.lane.b32.xlu2 %v4436_v13, %s4557_s0 }
0x4ca8   :  { %v4438_v19 = vpop.eup %4437 }
0x4ca9   :  { %v2639_v20 = vadd.f32 1.0, %v4438_v19 }
0x4cab   :  { %4439 = vrcp.f32 %v2639_v20  ;;  %v2651_v40 = vand.u32 2147483648, %v2639_v20  ;;  %vm2645_vm3 = vweird.f32 %v2639_v20  ;;  %v2649_v63 = vand.u32 2147483647, %v2639_v20 }
0x4cad   :  { %v2652_v17 = vor.u32 1.1754944e-38, %v2651_v40  ;;  %vm2650_vm5 = vcmp.eq.f32.partialorder %v2649_v63, 8.507059e+37 }
0x4cb1   :  { %v4440_v27 = vpop.eup %4439 }
0x4cb2   :  { %v2641_v41 = vmul.f32 %v4440_v27, %v2639_v20  ;;  %vm2646_vm2 = vweird.f32 %v4440_v27 }
0x4cb3   :  { %vm2647_vm4 = vmor %vm2645_vm3, %vm2646_vm2 }
0x4cb4   :  { %v2642_v0 = vsub.f32 1.0, %v2641_v41 }
0x4cb6   :  { %v2643_v49 = vmul.f32 %v4440_v27, %v2642_v0 }
0x4cb8   :  { %v2644_v47 = vadd.f32 %v4440_v27, %v2643_v49 }
0x4cba   :  { %v2648_v55 = vsel %vm2647_vm4, %v4440_v27, %v2644_v47 }
0x4cbb   :  { %v2653_v16 = vsel %vm2650_vm5, %v2652_v17, %v2648_v55 }
0x4cbc   :  { %v2656_v60 = vmul.f32 %v2653_v16, %v2607_v48 }
0x4d01   :  { %v2659_v34 = vpop.permute.xlu2 %2658 }
0x4d02   :  { %v2661_v50 = vmul.f32 %v2659_v34, %v2653_v16 }
0x4d04   :  { %2663 = vrot.lane.b32.xlu0 %v2661_v50, %s4557_s0 }
0x4d76   :  { %v2664_v1 = vpop.permute.xlu0 %2663 }
0x4d77   :  { %v2666_v15 = vadd.f32 %v2664_v1, %v2656_v60 }
0x4d79   :  { %4441 = vtanh.f32 %v2666_v15 }
0x4d7f   :  { %v4442_v45 = vpop.eup %4441 }
0x4d80   :  { %2669 = vrot.lane.b32.xlu1 %v4442_v45, %s4557_s0 }
0x4df2   :  { %v2670_v58 = vpop.permute.xlu1 %2669 }
0x4df3   :  { %v5587_v23 = vmul.f32 %v2670_v58, %v2653_v16 }
0x4df5   :  { %v2674_v10 = vpack.c.bf16 %v5587_v23, %v5587_v23 }
0x4df7   :  { %2676 = vrot.lane.b32.xlu2 %v2674_v10, %s4558_s26 }
0x4e51   :  { %v2677_v31 = vpop.permute.xlu2 %2676 }
0x4e52   :  { %3973 = vmatmul.msk.bf16.vlgmr.msra.gmra.mxu3 %vm94_vm0, %v2677_v31 }
0x4ed5   :  { %v2690_v14 = vpop.f32.mrf.mxu3 }
0x4ed6   :  { %v2694_v8 = vadd.f32 %v2690_v14, %v2673_v4 }
0x4ed8   :  { %4443 = vtanh.f32 %v2694_v8  ;;  %v3974_v32 = vmul.f32 -1.442695, %v2694_v8 }
0x4eda   :  { %4445 = vpow2.f32 %v3974_v32 }
0x4edd   :  { %v2692_v54 = vpop.f32.mrf.mxu3 }
0x4ede   :  { %v4444_v36 = vpop.eup %4443 }
0x4edf   :  { %2717 = vrot.lane.b32.xlu0 %v4444_v36, %s4557_s0 }
0x4ee0   :  { %v4446_v39 = vpop.eup %4445 }
0x4ee1   :  { %v2698_v37 = vadd.f32 1.0, %v4446_v39 }
0x4ee3   :  { %4447 = vrcp.f32 %v2698_v37  ;;  %v2710_v22 = vand.u32 2147483648, %v2698_v37  ;;  %vm2704_vm8 = vweird.f32 %v2698_v37  ;;  %v2708_v35 = vand.u32 2147483647, %v2698_v37 }
0x4ee5   :  { %v2711_v38 = vor.u32 1.1754944e-38, %v2710_v22  ;;  %vm2709_vm10 = vcmp.eq.f32.partialorder %v2708_v35, 8.507059e+37 }
0x4ee9   :  { %v4448_v24 = vpop.eup %4447 }
0x4eea   :  { %v2700_v62 = vmul.f32 %v4448_v24, %v2698_v37  ;;  %vm2705_vm7 = vweird.f32 %v4448_v24 }
0x4eeb   :  { %vm2706_vm9 = vmor %vm2704_vm8, %vm2705_vm7 }
0x4eec   :  { %v2701_v9 = vsub.f32 1.0, %v2700_v62 }
0x4eee   :  { %v2702_v25 = vmul.f32 %v4448_v24, %v2701_v9 }
0x4ef0   :  { %v2703_v42 = vadd.f32 %v4448_v24, %v2702_v25 }
0x4ef2   :  { %v2707_v4 = vsel %vm2706_vm9, %v4448_v24, %v2703_v42 }
0x4ef3   :  { %v2712_v46 = vsel %vm2709_vm10, %v2711_v38, %v2707_v4 }
0x4ef4   :  { %v2715_v52 = vmul.f32 %v2712_v46, %v2666_v15 }
0x4f51   :  { %v2718_v48 = vpop.permute.xlu0 %2717 }
0x4f52   :  { %v2720_v28 = vmul.f32 %v2718_v48, %v2712_v46 }
0x4f54   :  { %2722 = vrot.lane.b32.xlu1 %v2720_v28, %s4557_s0 }
0x4fc6   :  { %v2723_v57 = vpop.permute.xlu1 %2722 }
0x4fc7   :  { %v2725_v33 = vadd.f32 %v2723_v57, %v2715_v52 }
0x4fc9   :  { %4449 = vtanh.f32 %v2725_v33 }
0x4fcf   :  { %v4450_v43 = vpop.eup %4449 }
0x4fd0   :  { %2728 = vrot.lane.b32.xlu2 %v4450_v43, %s4557_s0 }
0x502a   :  { %v2729_v12 = vpop.permute.xlu2 %2728 }
0x502b   :  { %v5601_v13 = vmul.f32 %v2729_v12, %v2712_v46 }
0x502d   :  { %v2733_v18 = vpack.c.bf16 %v5601_v13, %v5601_v13 }
0x502f   :  { %2735 = vrot.lane.b32.xlu0 %v2733_v18, %s4558_s26 }
0x50a1   :  { %v2736_v19 = vpop.permute.xlu0 %2735 }
0x50a2   :  { %3975 = vmatmul.msk.bf16.vlgmr.msrb.gmra.mxu1 %vm94_vm0, %v2736_v19 }
0x511f   :  { %v2749_v20 = vpop.f32.mrf.mxu1 }
0x5120   :  { %v2753_v27 = vadd.f32 %v2749_v20, %v2732_v44 }
0x5122   :  { %4451 = vtanh.f32 %v2753_v27  ;;  %v3976_v49 = vmul.f32 -1.442695, %v2753_v27 }
0x5124   :  { %4453 = vpow2.f32 %v3976_v49 }
0x5127   :  { %v2751_v41 = vpop.f32.mrf.mxu1 }
0x5128   :  { %v4452_v0 = vpop.eup %4451 }
0x5129   :  { %2776 = vrot.lane.b32.xlu1 %v4452_v0, %s4557_s0 }
0x512a   :  { %v4454_v47 = vpop.eup %4453 }
0x512b   :  { %v2757_v40 = vadd.f32 1.0, %v4454_v47 }
0x512d   :  { %4455 = vrcp.f32 %v2757_v40  ;;  %v2769_v50 = vand.u32 2147483648, %v2757_v40  ;;  %vm2763_vm12 = vweird.f32 %v2757_v40  ;;  %v2767_v60 = vand.u32 2147483647, %v2757_v40 }
0x512f   :  { %v2770_v1 = vor.u32 1.1754944e-38, %v2769_v50  ;;  %vm2768_vm14 = vcmp.eq.f32.partialorder %v2767_v60, 8.507059e+37 }
0x5133   :  { %v4456_v63 = vpop.eup %4455 }
0x5134   :  { %v2759_v55 = vmul.f32 %v4456_v63, %v2757_v40  ;;  %vm2764_vm11 = vweird.f32 %v4456_v63 }
0x5135   :  { %vm2765_vm13 = vmor %vm2763_vm12, %vm2764_vm11 }
0x5136   :  { %v2760_v17 = vsub.f32 1.0, %v2759_v55 }
0x5138   :  { %v2761_v34 = vmul.f32 %v4456_v63, %v2760_v17 }
0x513a   :  { %v2762_v16 = vadd.f32 %v4456_v63, %v2761_v34 }
0x513c   :  { %v2766_v44 = vsel %vm2765_vm13, %v4456_v63, %v2762_v16 }
0x513d   :  { %v2771_v45 = vsel %vm2768_vm14, %v2770_v1, %v2766_v44 }
0x513e   :  { %v2774_v10 = vmul.f32 %v2771_v45, %v2725_v33 }
0x519b   :  { %v2777_v15 = vpop.permute.xlu1 %2776 }
0x519c   :  { %v2779_v58 = vmul.f32 %v2777_v15, %v2771_v45 }
0x519e   :  { %2781 = vrot.lane.b32.xlu2 %v2779_v58, %s4557_s0 }
0x51f8   :  { %v2782_v31 = vpop.permute.xlu2 %2781 }
0x51f9   :  { %v2784_v14 = vadd.f32 %v2782_v31, %v2774_v10 }
0x51fb   :  { %4457 = vtanh.f32 %v2784_v14 }
0x5201   :  { %v4458_v8 = vpop.eup %4457 }
0x5202   :  { %2787 = vrot.lane.b32.xlu0 %v4458_v8, %s4557_s0 }
0x5274   :  { %v2788_v54 = vpop.permute.xlu0 %2787 }
0x5275   :  { %v5615_v36 = vmul.f32 %v2788_v54, %v2771_v45 }
0x5277   :  { %v2792_v32 = vpack.c.bf16 %v5615_v36, %v5615_v36 }
0x5279   :  { %2794 = vrot.lane.b32.xlu1 %v2792_v32, %s4558_s26 }
0x52eb   :  { %v2795_v39 = vpop.permute.xlu1 %2794 }
0x52ec   :  { %3977 = vmatmul.msk.bf16.vlgmr.msrb.gmra.mxu2 %vm94_vm0, %v2795_v39 }
0x536f   :  { %v2808_v37 = vpop.f32.mrf.mxu2 }
0x5370   :  { %v2812_v24 = vadd.f32 %v2808_v37, %v2791_v59 }
0x5372   :  { %4459 = vtanh.f32 %v2812_v24  ;;  %v3978_v25 = vmul.f32 -1.442695, %v2812_v24 }
0x5374   :  { %4461 = vpow2.f32 %v3978_v25 }
0x5377   :  { %v2810_v62 = vpop.f32.mrf.mxu2 }
0x5378   :  { %v4460_v9 = vpop.eup %4459 }
0x5379   :  { %2835 = vrot.lane.b32.xlu2 %v4460_v9, %s4557_s0 }
0x537a   :  { %v4462_v42 = vpop.eup %4461 }
0x537b   :  { %v2816_v22 = vadd.f32 1.0, %v4462_v42 }
0x537d   :  { %4463 = vrcp.f32 %v2816_v22  ;;  %v2828_v28 = vand.u32 2147483648, %v2816_v22  ;;  %vm2822_vm2 = vweird.f32 %v2816_v22  ;;  %v2826_v5 = vand.u32 2147483647, %v2816_v22 }
0x537f   :  { %v2829_v59 = vor.u32 1.1754944e-38, %v2828_v28  ;;  %vm2827_vm4 = vcmp.eq.f32.partialorder %v2826_v5, 8.507059e+37 }
0x5383   :  { %v4464_v35 = vpop.eup %4463 }
0x5384   :  { %v2818_v4 = vmul.f32 %v4464_v35, %v2816_v22  ;;  %vm2823_vm15 = vweird.f32 %v4464_v35 }
0x5385   :  { %vm2824_vm3 = vmor %vm2822_vm2, %vm2823_vm15 }
0x5386   :  { %v2819_v38 = vsub.f32 1.0, %v2818_v4 }
0x5388   :  { %v2820_v48 = vmul.f32 %v4464_v35, %v2819_v38 }
0x538a   :  { %v2821_v46 = vadd.f32 %v4464_v35, %v2820_v48 }
0x538c   :  { %v2825_v56 = vsel %vm2824_vm3, %v4464_v35, %v2821_v46 }
0x538d   :  { %v2830_v57 = vsel %vm2827_vm4, %v2829_v59, %v2825_v56 }
0x538e   :  { %v2833_v43 = vmul.f32 %v2830_v57, %v2784_v14 }
0x53d3   :  { %v2836_v52 = vpop.permute.xlu2 %2835 }
0x53d4   :  { %v2838_v33 = vmul.f32 %v2836_v52, %v2830_v57 }
0x53d6   :  { %2840 = vrot.lane.b32.xlu0 %v2838_v33, %s4557_s0 }
0x5448   :  { %v2841_v12 = vpop.permute.xlu0 %2840 }
0x5449   :  { %v2843_v18 = vadd.f32 %v2841_v12, %v2833_v43 }
0x544b   :  { %4465 = vtanh.f32 %v2843_v18 }
0x5451   :  { %v4466_v19 = vpop.eup %4465 }
0x5452   :  { %2846 = vrot.lane.b32.xlu1 %v4466_v19, %s4557_s0 }
0x54c4   :  { %v2847_v20 = vpop.permute.xlu1 %2846 }
0x54c5   :  { %v5629_v27 = vmul.f32 %v2847_v20, %v2830_v57 }
0x54c7   :  { %v2851_v41 = vpack.c.bf16 %v5629_v27, %v5629_v27 }
0x54c9   :  { %2853 = vrot.lane.b32.xlu2 %v2851_v41, %s4558_s26 }
0x5523   :  { %v2854_v0 = vpop.permute.xlu2 %2853 }
0x5524   :  { %3979 = vmatmul.msk.bf16.vlgmr.msrb.gmra.mxu3 %vm94_vm0, %v2854_v0 }
0x55a7   :  { %v2867_v49 = vpop.f32.mrf.mxu3 }
0x55a8   :  { %v2871_v47 = vadd.f32 %v2867_v49, %v2850_v2 }
0x55aa   :  { %4467 = vtanh.f32 %v2871_v47  ;;  %v3980_v55 = vmul.f32 -1.442695, %v2871_v47 }
0x55ac   :  { %4469 = vpow2.f32 %v3980_v55 }
0x55af   :  { %v2869_v40 = vpop.f32.mrf.mxu3 }
0x55b0   :  { %v4468_v63 = vpop.eup %4467 }
0x55b1   :  { %2894 = vrot.lane.b32.xlu0 %v4468_v63, %s4557_s0 }
0x55b2   :  { %v4470_v17 = vpop.eup %4469 }
0x55b3   :  { %v2875_v34 = vadd.f32 1.0, %v4470_v17 }
0x55b5   :  { %4471 = vrcp.f32 %v2875_v34  ;;  %v2887_v15 = vand.u32 2147483648, %v2875_v34  ;;  %vm2881_vm7 = vweird.f32 %v2875_v34  ;;  %v2885_v51 = vand.u32 2147483647, %v2875_v34 }
0x55b7   :  { %v2888_v2 = vor.u32 1.1754944e-38, %v2887_v15  ;;  %vm2886_vm9 = vcmp.eq.f32.partialorder %v2885_v51, 8.507059e+37 }
0x55bb   :  { %v4472_v16 = vpop.eup %4471 }
0x55bc   :  { %v2877_v50 = vmul.f32 %v4472_v16, %v2875_v34  ;;  %vm2882_vm5 = vweird.f32 %v4472_v16 }
0x55bd   :  { %vm2883_vm8 = vmor %vm2881_vm7, %vm2882_vm5 }
0x55be   :  { %v2878_v60 = vsub.f32 1.0, %v2877_v50 }
0x55c0   :  { %v2879_v44 = vmul.f32 %v4472_v16, %v2878_v60 }
0x55c2   :  { %v2880_v1 = vadd.f32 %v4472_v16, %v2879_v44 }
0x55c4   :  { %v2884_v3 = vsel %vm2883_vm8, %v4472_v16, %v2880_v1 }
0x55c5   :  { %v2889_v58 = vsel %vm2886_vm9, %v2888_v2, %v2884_v3 }
0x55c6   :  { %v2892_v31 = vmul.f32 %v2889_v58, %v2843_v18 }
0x5623   :  { %v2895_v45 = vpop.permute.xlu0 %2894 }
0x5624   :  { %v2897_v10 = vmul.f32 %v2895_v45, %v2889_v58 }
0x5626   :  { %2899 = vrot.lane.b32.xlu1 %v2897_v10, %s4557_s0 }
0x5698   :  { %v2900_v14 = vpop.permute.xlu1 %2899 }
0x5699   :  { %v2902_v8 = vadd.f32 %v2900_v14, %v2892_v31 }
0x569b   :  { %4473 = vtanh.f32 %v2902_v8 }
0x56a1   :  { %v4474_v54 = vpop.eup %4473 }
0x56a2   :  { %2905 = vrot.lane.b32.xlu2 %v4474_v54, %s4557_s0  ;;  %v4054_v54 = vld [vmem:[%s5938_s3 + $0x48] sm:$0xff] }
0x56a3   :  { %3116 = vmatpush.bf16.msra.mxu3 %v4054_v54 }
0x56fc   :  { %v2906_v32 = vpop.permute.xlu2 %2905 }
0x56fd   :  { %v5643_v39 = vmul.f32 %v2906_v32, %v2889_v58 }
0x56ff   :  { %v2910_v37 = vpack.c.bf16 %v5643_v39, %v5643_v39 }
0x5701   :  { %2912 = vrot.lane.b32.xlu0 %v2910_v37, %s4558_s26 }
0x5773   :  { %v2913_v24 = vpop.permute.xlu0 %2912 }
0x5774   :  { %3981 = vmatmul.msk.bf16.vlgmr.msra.gmra.mxu1 %vm94_vm0, %v2913_v24 }
0x57f1   :  { %v2926_v62 = vpop.f32.mrf.mxu1 }
0x57f2   :  { %v2930_v9 = vadd.f32 %v2926_v62, %v2909_v11 }
0x57f4   :  { %4475 = vtanh.f32 %v2930_v9  ;;  %v3982_v22 = vmul.f32 -1.442695, %v2930_v9 }
0x57f6   :  { %4477 = vpow2.f32 %v3982_v22 }
0x57f9   :  { %v2928_v25 = vpop.f32.mrf.mxu1 }
0x57fa   :  { %v4476_v42 = vpop.eup %4475 }
0x57fb   :  { %2953 = vrot.lane.b32.xlu1 %v4476_v42, %s4557_s0 }
0x57fc   :  { %v4478_v35 = vpop.eup %4477 }
0x57fd   :  { %v2934_v4 = vadd.f32 1.0, %v4478_v35 }
0x57ff   :  { %4479 = vrcp.f32 %v2934_v4  ;;  %v2946_v56 = vand.u32 2147483648, %v2934_v4  ;;  %vm2940_vm11 = vweird.f32 %v2934_v4  ;;  %v2944_v29 = vand.u32 2147483647, %v2934_v4 }
0x5801   :  { %v2947_v11 = vor.u32 1.1754944e-38, %v2946_v56  ;;  %vm2945_vm13 = vcmp.eq.f32.partialorder %v2944_v29, 8.507059e+37 }
0x5805   :  { %v4480_v38 = vpop.eup %4479 }
0x5806   :  { %v2936_v48 = vmul.f32 %v4480_v38, %v2934_v4  ;;  %vm2941_vm10 = vweird.f32 %v4480_v38 }
0x5807   :  { %vm2942_vm12 = vmor %vm2940_vm11, %vm2941_vm10 }
0x5808   :  { %v2937_v46 = vsub.f32 1.0, %v2936_v48 }
0x580a   :  { %v2938_v28 = vmul.f32 %v4480_v38, %v2937_v46 }
0x580c   :  { %v2939_v5 = vadd.f32 %v4480_v38, %v2938_v28 }
0x580e   :  { %v2943_v61 = vsel %vm2942_vm12, %v4480_v38, %v2939_v5 }
0x580f   :  { %v2948_v52 = vsel %vm2945_vm13, %v2947_v11, %v2943_v61  ;;  %v5696_v61 = vld [vmem:[%s5938_s3 + $0xa8] sm:$0xff]  ;;  %v4007_v11 = vld [vmem:[%s5939_s5 + $0x58] sm:$0xff] }
0x5810   :  { %v2951_v33 = vmul.f32 %v2948_v52, %v2902_v8  ;;  %v4151_v8 = vpack.i.bf16 %v5643_v39, %v5601_v13  ;;  %v4156_v13 = vpack.i.bf16 %v5629_v27, %v5615_v36  ;;  %3166 = vmatpush.bf16.msrb.mxu1 %v5696_v61  ;;  %3229 = vmatpush.bf16.msrb.mxu2 %v5696_v61 }
0x5811   :  { %3288 = vmatpush.bf16.msrb.mxu0 %v5696_v61 }
0x586d   :  { %v2954_v59 = vpop.permute.xlu1 %2953 }
0x586e   :  { %v2956_v57 = vmul.f32 %v2954_v59, %v2948_v52  ;;  %v5705_v59 = vld [vmem:[%s5938_s3 + $0xa0] sm:$0xff] }
0x586f   :  { %3167 = vmatpush.bf16.msrb.mxu1 %v5705_v59  ;;  %3230 = vmatpush.bf16.msrb.mxu2 %v5705_v59 }
0x5870   :  { %2958 = vrot.lane.b32.xlu2 %v2956_v57, %s4557_s0  ;;  %3289 = vmatpush.bf16.msrb.mxu0 %v5705_v59 }
0x5873   :  { %3347 = vmatpush.bf16.msra.mxu1 %v5696_v61 }
0x5874   :  { %3465 = vmatpush.bf16.msra.mxu0 %v5696_v61 }
0x5877   :  { %3348 = vmatpush.bf16.msra.mxu1 %v5705_v59 }
0x5878   :  { %3466 = vmatpush.bf16.msra.mxu0 %v5705_v59 }
0x58ca   :  { %v2959_v43 = vpop.permute.xlu2 %2958 }
0x58cb   :  { %v2961_v12 = vadd.f32 %v2959_v43, %v2951_v33 }
0x58cd   :  { %4481 = vtanh.f32 %v2961_v12 }
0x58d3   :  { %v4482_v18 = vpop.eup %4481 }
0x58d4   :  { %2964 = vrot.lane.b32.xlu0 %v4482_v18, %s4557_s0 }
0x5946   :  { %v2965_v19 = vpop.permute.xlu0 %2964 }
0x5947   :  { %v2967_v20 = vmul.f32 %v2965_v19, %v2948_v52  ;;  %v4006_v52 = vld [vmem:[%s5939_s5 + $0x50] sm:$0xff] }
0x5948   :  { %v3144_v57 = vpack.c.bf16 %v4006_v52, %v4006_v52 }
0x5949   :  { %v2969_v41 = vpack.c.bf16 %v2967_v20, %v2967_v20  ;;  %v4146_v45 = vpack.i.bf16 %v2967_v20, %v5587_v23  ;;  %v4053_v23 = vld [vmem:[%s5938_s3 + $0x40] sm:$0xff] }
0x594a   :  { %3117 = vmatpush.bf16.msra.mxu3 %v4053_v23  ;;  %4016 = vmatmul.msk.bf16.vlgmr.msrb.gmra.mxu1 %vm94_vm0, %v3144_v57 }
0x594b   :  { %2971 = vrot.lane.b32.xlu1 %v2969_v41, %s4558_s26  ;;  %3524 = vmatpush.bf16.msrb.mxu1 %v5696_v61 }
0x594f   :  { %3525 = vmatpush.bf16.msrb.mxu1 %v5705_v59 }
0x59bd   :  { %v2972_v0 = vpop.permute.xlu1 %2971 }
0x59be   :  { %3983 = vmatmul.msk.bf16.vlgmr.msra.gmra.mxu2 %vm94_vm0, %v2972_v0  ;;  %v4169_v0 = vld [vmem:[%s5937_s4 + $0x5] ss:$0 sm:$0xff] }
0x59bf   :  { %3406 = vmatpush.bf16.msra.mxu2 %v5696_v61 }
0x59c3   :  { %3407 = vmatpush.bf16.msra.mxu2 %v5705_v59 }
0x5a41   :  { %v2985_v49 = vpop.f32.mrf.mxu2 }
0x5a42   :  { %v2989_v47 = vadd.f32 %v2985_v49, %v2968_v21 }
0x5a44   :  { %4483 = vtanh.f32 %v2989_v47  ;;  %v3984_v55 = vmul.f32 -1.442695, %v2989_v47 }
0x5a46   :  { %4485 = vpow2.f32 %v3984_v55  ;;  %v3169_v55 = vpop.f32.mrf.mxu1 }
0x5a49   :  { %v2987_v40 = vpop.f32.mrf.mxu2 }
0x5a4a   :  { %v4484_v63 = vpop.eup %4483 }
0x5a4b   :  { %3012 = vrot.lane.b32.xlu2 %v4484_v63, %s4557_s0 }
0x5a4c   :  { %v4486_v17 = vpop.eup %4485 }
0x5a4d   :  { %v2993_v34 = vadd.f32 1.0, %v4486_v17 }
0x5a4f   :  { %4487 = vrcp.f32 %v2993_v34  ;;  %v3005_v15 = vand.u32 2147483648, %v2993_v34  ;;  %vm2999_vm15 = vweird.f32 %v2993_v34  ;;  %v3003_v6 = vand.u32 2147483647, %v2993_v34 }
0x5a51   :  { %v3006_v21 = vor.u32 1.1754944e-38, %v3005_v15  ;;  %vm3004_vm3 = vcmp.eq.f32.partialorder %v3003_v6, 8.507059e+37 }
0x5a55   :  { %v4488_v16 = vpop.eup %4487 }
0x5a56   :  { %v2995_v50 = vmul.f32 %v4488_v16, %v2993_v34  ;;  %vm3000_vm14 = vweird.f32 %v4488_v16 }
0x5a57   :  { %vm3001_vm2 = vmor %vm2999_vm15, %vm3000_vm14 }
0x5a58   :  { %v2996_v60 = vsub.f32 1.0, %v2995_v50 }
0x5a5a   :  { %v2997_v44 = vmul.f32 %v4488_v16, %v2996_v60 }
0x5a5c   :  { %v2998_v1 = vadd.f32 %v4488_v16, %v2997_v44 }
0x5a5e   :  { %v3002_v7 = vsel %vm3001_vm2, %v4488_v16, %v2998_v1  ;;  %v3171_v16 = vpop.f32.mrf.mxu1 }
0x5a5f   :  { %v3007_v3 = vsel %vm3004_vm3, %v3006_v21, %v3002_v7 }
0x5a60   :  { %v3010_v58 = vmul.f32 %v3007_v3, %v2961_v12 }
0x5aa5   :  { %v3013_v51 = vpop.permute.xlu2 %3012 }
0x5aa6   :  { %v3015_v2 = vmul.f32 %v3013_v51, %v3007_v3 }
0x5aa8   :  { %3017 = vrot.lane.b32.xlu0 %v3015_v2, %s4557_s0 }
0x5ab0   :  { %4147 = vrot.lane.b32.xlu0 %v4146_v45, %s4558_s26 }
0x5b1a   :  { %v3018_v10 = vpop.permute.xlu0 %3017 }
0x5b1b   :  { %v3020_v31 = vadd.f32 %v3018_v10, %v3010_v58 }
0x5b1d   :  { %4489 = vtanh.f32 %v3020_v31 }
0x5b22   :  { %v4148_v39 = vpop.permute.xlu0 %4147 }
0x5b23   :  { %v4490_v14 = vpop.eup %4489  ;;  %v4150_v62 = vunpack.i.h.bf16 %v4148_v39  ;;  %v4149_v9 = vunpack.i.l.bf16 %v4148_v39 }
0x5b24   :  { %3023 = vrot.lane.b32.xlu1 %v4490_v14, %s4557_s0 }
0x5b25   :  { %v3044_v35 = vsel %vm26_vm6, %v4149_v9, %v4150_v62  ;;  %v3065_v19 = vsel %vm26_vm6, %v4150_v62, %v4149_v9 }
0x5b2c   :  { %4152 = vrot.lane.b32.xlu1 %v4151_v8, %s4558_s26 }
0x5b34   :  { %3195 = vrot.lane.b32.xlu1 %v4007_v11, %s4557_s0 }
0x5b96   :  { %v3024_v32 = vpop.permute.xlu1 %3023 }
0x5b97   :  { %v3026_v37 = vmul.f32 %v3024_v32, %v3007_v3 }
0x5b99   :  { %v4141_v24 = vpack.i.bf16 %v3026_v37, %v5576_v53 }
0x5b9b   :  { %4142 = vrot.lane.b32.xlu2 %v4141_v24, %s4558_s26 }
0x5b9e   :  { %v4153_v48 = vpop.permute.xlu1 %4152 }
0x5b9f   :  { %v4155_v46 = vunpack.i.h.bf16 %v4153_v48  ;;  %v4154_v28 = vunpack.i.l.bf16 %v4153_v48 }
0x5ba1   :  { %v3053_v56 = vsel %vm26_vm6, %v4154_v28, %v4155_v46  ;;  %v3064_v43 = vsel %vm26_vm6, %v4155_v46, %v4154_v28 }
0x5ba3   :  { %4157 = vrot.lane.b32.xlu2 %v4156_v13, %s4558_s26 }
0x5bf5   :  { %v4143_v25 = vpop.permute.xlu2 %4142 }
0x5bf6   :  { %v4145_v42 = vunpack.i.h.bf16 %v4143_v25  ;;  %v4144_v22 = vunpack.i.l.bf16 %v4143_v25 }
0x5bf8   :  { %v3035_v4 = vsel %vm26_vm6, %v4144_v22, %v4145_v42  ;;  %v3066_v18 = vsel %vm26_vm6, %v4145_v42, %v4144_v22 }
0x5bf9   :  { %v3079_v53 = vpack.c.bf16 %v3044_v35, %v3035_v4  ;;  %v3082_v20 = vpack.c.bf16 %v3066_v18, %v3065_v19 }
0x5bfb   :  { %4002 = vmatmul.msk.bf16.vlgmr.msra.gmra.mxu3 %vm94_vm0, %v3079_v53 }
0x5bfd   :  { %v4158_v38 = vpop.permute.xlu2 %4157 }
0x5bfe   :  { %v4160_v36 = vunpack.i.h.bf16 %v4158_v38  ;;  %v4159_v27 = vunpack.i.l.bf16 %v4158_v38 }
0x5c00   :  { %v3062_v5 = vsel %vm26_vm6, %v4159_v27, %v4160_v36  ;;  %v3063_v33 = vsel %vm26_vm6, %v4160_v36, %v4159_v27  ;;  %v3196_v36 = vpop.permute.xlu1 %3195 }
0x5c01   :  { %v3080_v29 = vpack.c.bf16 %v3062_v5, %v3053_v56  ;;  %v3081_v12 = vpack.c.bf16 %v3064_v43, %v3063_v33 }
0x5c0b   :  { %4003 = vmatmul.msk.bf16.gmra.mxu3 %vm94_vm0, %v3080_v29 }
0x5c1b   :  { %4004 = vmatmul.msk.bf16.gmra.mxu3 %vm94_vm0, %v3081_v12 }
0x5c2b   :  { %4005 = vmatmul.msk.bf16.gmra.mxu3 %vm94_vm0, %v3082_v20 }
0x5c7e   :  { %v3119_v41 = vpop.f32.mrf.mxu3 }
0x5c7f   :  { %v5774_v10 = vadd.f32 %v4169_v0, %v3119_v41 }
0x5c86   :  { %v3121_v49 = vpop.f32.mrf.mxu3 }
0x5c87   :  { %v5738_v47 = vadd.f32 %v4169_v0, %v3121_v49 }
0x5c8e   :  { %v3124_v40 = vpop.f32.mrf.mxu3 }
0x5c8f   :  { %v5740_v63 = vadd.f32 %v4169_v0, %v3124_v40 }
0x5c96   :  { %v3126_v17 = vpop.f32.mrf.mxu3 }
0x5c97   :  { %v5742_v34 = vadd.f32 %v4169_v0, %v3126_v17 }
0x5c9e   :  { %v3129_v50 = vpop.f32.mrf.mxu3 }
0x5c9f   :  { %v5744_v60 = vadd.f32 %v4169_v0, %v3129_v50 }
0x5ca1   :  { %v3333_v44 = vsel %vm4666_vm1, %v5742_v34, %v5744_v60  ;;  %v3392_v1 = vsel %vm4666_vm1, %v5744_v60, %v5742_v34 }
0x5ca6   :  { %v3131_v15 = vpop.f32.mrf.mxu3 }
0x5ca7   :  { %v5754_v6 = vadd.f32 %v4169_v0, %v3131_v15 }
0x5ca9   :  { %v3274_v7 = vsel %vm4666_vm1, %v5740_v63, %v5754_v6  ;;  %v3451_v21 = vsel %vm4666_vm1, %v5754_v6, %v5740_v63 }
0x5cae   :  { %v3134_v51 = vpop.f32.mrf.mxu3 }
0x5caf   :  { %v5764_v3 = vadd.f32 %v4169_v0, %v3134_v51 }
0x5cb1   :  { %v3215_v2 = vsel %vm4666_vm1, %v5738_v47, %v5764_v3  ;;  %v3510_v45 = vsel %vm4666_vm1, %v5764_v3, %v5738_v47 }
0x5cb6   :  { %v3136_v58 = vpop.f32.mrf.mxu3 }
0x5cb7   :  { %v5776_v31 = vadd.f32 %v4169_v0, %v3136_v58 }
0x5cb9   :  { %v3143_v14 = vsel %vm4666_vm1, %v5774_v10, %v5776_v31  ;;  %v3569_v8 = vsel %vm4666_vm1, %v5776_v31, %v5774_v10  ;;  %v5889_v10 = vld [vmem:[%s5940_s1] sm:$0xff] }
0x5cba   :  { %v3173_v54 = vadd.f32 %v3169_v55, %v3143_v14  ;;  %v41_v31 = vmax.f32 %v5889_v10, 1.0 }
0x5cbc   :  { %4491 = vtanh.f32 %v3173_v54  ;;  %v4017_v32 = vmul.f32 -1.442695, %v3173_v54 }
0x5cbe   :  { %4493 = vpow2.f32 %v4017_v32 }
0x5cc2   :  { %v4492_v23 = vpop.eup %4491 }
0x5cc3   :  { %3200 = vrot.lane.b32.xlu0 %v4492_v23, %s4557_s0 }
0x5cc4   :  { %v4494_v37 = vpop.eup %4493 }
0x5cc5   :  { %v3177_v24 = vadd.f32 1.0, %v4494_v37 }
0x5cc7   :  { %4495 = vrcp.f32 %v3177_v24  ;;  %v3189_v42 = vand.u32 2147483648, %v3177_v24  ;;  %vm3183_vm5 = vweird.f32 %v3177_v24  ;;  %v3187_v22 = vand.u32 2147483647, %v3177_v24 }
0x5cc9   :  { %v3190_v4 = vor.u32 1.1754944e-38, %v3189_v42  ;;  %vm3188_vm8 = vcmp.eq.f32.partialorder %v3187_v22, 8.507059e+37 }
0x5ccd   :  { %v4496_v13 = vpop.eup %4495 }
0x5cce   :  { %v3179_v39 = vmul.f32 %v4496_v13, %v3177_v24  ;;  %vm3184_vm4 = vweird.f32 %v4496_v13 }
0x5ccf   :  { %vm3185_vm7 = vmor %vm3183_vm5, %vm3184_vm4 }
0x5cd0   :  { %v3180_v62 = vsub.f32 1.0, %v3179_v39 }
0x5cd2   :  { %v3181_v9 = vmul.f32 %v4496_v13, %v3180_v62 }
0x5cd4   :  { %v3182_v25 = vadd.f32 %v4496_v13, %v3181_v9 }
0x5cd6   :  { %v3186_v35 = vsel %vm3185_vm7, %v4496_v13, %v3182_v25 }
0x5cd7   :  { %v3191_v53 = vsel %vm3188_vm8, %v3190_v4, %v3186_v35 }
0x5cd8   :  { %v3198_v27 = vmul.f32 %v3196_v36, %v3191_v53 }
0x5d35   :  { %v3201_v38 = vpop.permute.xlu0 %3200 }
0x5d36   :  { %v3203_v48 = vmul.f32 %v3201_v38, %v3191_v53 }
0x5d38   :  { %3205 = vrot.lane.b32.xlu2 %v3203_v48, %s4557_s0 }
0x5d92   :  { %v3206_v46 = vpop.permute.xlu2 %3205 }
0x5d93   :  { %v3208_v28 = vadd.f32 %v3206_v46, %v3198_v27 }
0x5d95   :  { %4497 = vtanh.f32 %v3208_v28 }
0x5d9b   :  { %v4498_v5 = vpop.eup %4497 }
0x5d9c   :  { %3211 = vrot.lane.b32.xlu0 %v4498_v5, %s4557_s0 }
0x5e0e   :  { %v3212_v56 = vpop.permute.xlu0 %3211 }
0x5e0f   :  { %v5789_v29 = vmul.f32 %v3212_v56, %v3191_v53 }
0x5e11   :  { %v3216_v11 = vpack.c.bf16 %v5789_v29, %v5789_v29 }
0x5e13   :  { %3218 = vrot.lane.b32.xlu1 %v3216_v11, %s4558_s26 }
0x5e85   :  { %v3219_v52 = vpop.permute.xlu1 %3218 }
0x5e86   :  { %4018 = vmatmul.msk.bf16.vlgmr.msrb.gmra.mxu2 %vm94_vm0, %v3219_v52 }
0x5e87   :  { %3583 = vmatpush.bf16.msrb.mxu2 %v5696_v61 }
0x5e8b   :  { %3584 = vmatpush.bf16.msrb.mxu2 %v5705_v59 }
0x5f09   :  { %v3232_v57 = vpop.f32.mrf.mxu2 }
0x5f0a   :  { %v3236_v33 = vadd.f32 %v3232_v57, %v3215_v2 }
0x5f0c   :  { %4499 = vtanh.f32 %v3236_v33  ;;  %v4019_v18 = vmul.f32 -1.442695, %v3236_v33 }
0x5f0e   :  { %4501 = vpow2.f32 %v4019_v18 }
0x5f11   :  { %v3234_v43 = vpop.f32.mrf.mxu2 }
0x5f12   :  { %v4500_v12 = vpop.eup %4499 }
0x5f13   :  { %3259 = vrot.lane.b32.xlu2 %v4500_v12, %s4557_s0 }
0x5f14   :  { %v4502_v19 = vpop.eup %4501 }
0x5f15   :  { %v3240_v20 = vadd.f32 1.0, %v4502_v19 }
0x5f17   :  { %4503 = vrcp.f32 %v3240_v20  ;;  %v3252_v61 = vand.u32 2147483648, %v3240_v20  ;;  %vm3246_vm10 = vweird.f32 %v3240_v20  ;;  %v3250_v59 = vand.u32 2147483647, %v3240_v20 }
0x5f19   :  { %v3253_v16 = vor.u32 1.1754944e-38, %v3252_v61  ;;  %vm3251_vm12 = vcmp.eq.f32.partialorder %v3250_v59, 8.507059e+37 }
0x5f1d   :  { %v4504_v41 = vpop.eup %4503 }
0x5f1e   :  { %v3242_v0 = vmul.f32 %v4504_v41, %v3240_v20  ;;  %vm3247_vm9 = vweird.f32 %v4504_v41 }
0x5f1f   :  { %vm3248_vm11 = vmor %vm3246_vm10, %vm3247_vm9 }
0x5f20   :  { %v3243_v49 = vsub.f32 1.0, %v3242_v0 }
0x5f22   :  { %v3244_v40 = vmul.f32 %v4504_v41, %v3243_v49 }
0x5f24   :  { %v3245_v55 = vadd.f32 %v4504_v41, %v3244_v40 }
0x5f26   :  { %v3249_v17 = vsel %vm3248_vm11, %v4504_v41, %v3245_v55 }
0x5f27   :  { %v3254_v15 = vsel %vm3251_vm12, %v3253_v16, %v3249_v17 }
0x5f28   :  { %v3257_v2 = vmul.f32 %v3254_v15, %v3208_v28 }
0x5f6d   :  { %v3260_v50 = vpop.permute.xlu2 %3259 }
0x5f6e   :  { %v3262_v51 = vmul.f32 %v3260_v50, %v3254_v15 }
0x5f70   :  { %3264 = vrot.lane.b32.xlu0 %v3262_v51, %s4557_s0 }
0x5fe2   :  { %v3265_v58 = vpop.permute.xlu0 %3264 }
0x5fe3   :  { %v3267_v14 = vadd.f32 %v3265_v58, %v3257_v2 }
0x5fe5   :  { %4505 = vtanh.f32 %v3267_v14 }
0x5feb   :  { %v4506_v54 = vpop.eup %4505 }
0x5fec   :  { %3270 = vrot.lane.b32.xlu1 %v4506_v54, %s4557_s0 }
0x605e   :  { %v3271_v23 = vpop.permute.xlu1 %3270 }
0x605f   :  { %v5800_v32 = vmul.f32 %v3271_v23, %v3254_v15 }
0x6061   :  { %v3275_v37 = vpack.c.bf16 %v5800_v32, %v5800_v32 }
0x6063   :  { %3277 = vrot.lane.b32.xlu2 %v3275_v37, %s4558_s26 }
0x60bd   :  { %v3278_v24 = vpop.permute.xlu2 %3277 }
0x60be   :  { %4020 = vmatmul.msk.bf16.vlgmr.msrb.gmra.mxu0 %vm94_vm0, %v3278_v24 }
0x613b   :  { %v3291_v13 = vpop.f32.mrf.mxu0 }
0x613c   :  { %v3295_v39 = vadd.f32 %v3291_v13, %v3274_v7 }
0x613e   :  { %4507 = vtanh.f32 %v3295_v39  ;;  %v4021_v25 = vmul.f32 -1.442695, %v3295_v39 }
0x6140   :  { %4509 = vpow2.f32 %v4021_v25 }
0x6143   :  { %v3293_v62 = vpop.f32.mrf.mxu0 }
0x6144   :  { %v4508_v9 = vpop.eup %4507 }
0x6145   :  { %3318 = vrot.lane.b32.xlu0 %v4508_v9, %s4557_s0 }
0x6146   :  { %v4510_v42 = vpop.eup %4509 }
0x6147   :  { %v3299_v22 = vadd.f32 1.0, %v4510_v42 }
0x6149   :  { %4511 = vrcp.f32 %v3299_v22  ;;  %v3311_v36 = vand.u32 2147483648, %v3299_v22  ;;  %vm3305_vm14 = vweird.f32 %v3299_v22  ;;  %v3309_v27 = vand.u32 2147483647, %v3299_v22 }
0x614b   :  { %v3312_v46 = vor.u32 1.1754944e-38, %v3311_v36  ;;  %vm3310_vm2 = vcmp.eq.f32.partialorder %v3309_v27, 8.507059e+37 }
0x614f   :  { %v4512_v35 = vpop.eup %4511 }
0x6150   :  { %v3301_v4 = vmul.f32 %v4512_v35, %v3299_v22  ;;  %vm3306_vm13 = vweird.f32 %v4512_v35 }
0x6151   :  { %vm3307_vm15 = vmor %vm3305_vm14, %vm3306_vm13 }
0x6152   :  { %v3302_v53 = vsub.f32 1.0, %v3301_v4 }
0x6154   :  { %v3303_v38 = vmul.f32 %v4512_v35, %v3302_v53 }
0x6156   :  { %v3304_v48 = vadd.f32 %v4512_v35, %v3303_v38 }
0x6158   :  { %v3308_v7 = vsel %vm3307_vm15, %v4512_v35, %v3304_v48 }
0x6159   :  { %v3313_v5 = vsel %vm3310_vm2, %v3312_v46, %v3308_v7 }
0x615a   :  { %v3316_v11 = vmul.f32 %v3313_v5, %v3267_v14 }
0x61b7   :  { %v3319_v28 = vpop.permute.xlu0 %3318 }
0x61b8   :  { %v3321_v56 = vmul.f32 %v3319_v28, %v3313_v5 }
0x61ba   :  { %3323 = vrot.lane.b32.xlu1 %v3321_v56, %s4557_s0 }
0x622c   :  { %v3324_v52 = vpop.permute.xlu1 %3323 }
0x622d   :  { %v3326_v57 = vadd.f32 %v3324_v52, %v3316_v11 }
0x622f   :  { %4513 = vtanh.f32 %v3326_v57 }
0x6235   :  { %v4514_v33 = vpop.eup %4513 }
0x6236   :  { %3329 = vrot.lane.b32.xlu2 %v4514_v33, %s4557_s0 }
0x6290   :  { %v3330_v43 = vpop.permute.xlu2 %3329 }
0x6291   :  { %v5814_v12 = vmul.f32 %v3330_v43, %v3313_v5 }
0x6293   :  { %v3334_v18 = vpack.c.bf16 %v5814_v12, %v5814_v12 }
0x6295   :  { %3336 = vrot.lane.b32.xlu0 %v3334_v18, %s4558_s26 }
0x6307   :  { %v3337_v19 = vpop.permute.xlu0 %3336 }
0x6308   :  { %4022 = vmatmul.msk.bf16.vlgmr.msra.gmra.mxu1 %vm94_vm0, %v3337_v19 }
0x6385   :  { %v3350_v20 = vpop.f32.mrf.mxu1 }
0x6386   :  { %v3354_v41 = vadd.f32 %v3350_v20, %v3333_v44 }
0x6388   :  { %4515 = vtanh.f32 %v3354_v41  ;;  %v4023_v40 = vmul.f32 -1.442695, %v3354_v41 }
0x638a   :  { %4517 = vpow2.f32 %v4023_v40 }
0x638d   :  { %v3352_v0 = vpop.f32.mrf.mxu1 }
0x638e   :  { %v4516_v49 = vpop.eup %4515 }
0x638f   :  { %3377 = vrot.lane.b32.xlu1 %v4516_v49, %s4557_s0 }
0x6390   :  { %v4518_v55 = vpop.eup %4517 }
0x6391   :  { %v3358_v61 = vadd.f32 1.0, %v4518_v55 }
0x6393   :  { %4519 = vrcp.f32 %v3358_v61  ;;  %v3370_v51 = vand.u32 2147483648, %v3358_v61  ;;  %vm3364_vm4 = vweird.f32 %v3358_v61  ;;  %v3368_v2 = vand.u32 2147483647, %v3358_v61 }
0x6395   :  { %v3371_v58 = vor.u32 1.1754944e-38, %v3370_v51  ;;  %vm3369_vm7 = vcmp.eq.f32.partialorder %v3368_v2, 8.507059e+37 }
0x6399   :  { %v4520_v59 = vpop.eup %4519 }
0x639a   :  { %v3360_v17 = vmul.f32 %v4520_v59, %v3358_v61  ;;  %vm3365_vm3 = vweird.f32 %v4520_v59 }
0x639b   :  { %vm3366_vm5 = vmor %vm3364_vm4, %vm3365_vm3 }
0x639c   :  { %v3361_v16 = vsub.f32 1.0, %v3360_v17 }
0x639e   :  { %v3362_v50 = vmul.f32 %v4520_v59, %v3361_v16 }
0x63a0   :  { %v3363_v15 = vadd.f32 %v4520_v59, %v3362_v50 }
0x63a2   :  { %v3367_v44 = vsel %vm3366_vm5, %v4520_v59, %v3363_v15 }
0x63a3   :  { %v3372_v54 = vsel %vm3369_vm7, %v3371_v58, %v3367_v44 }
0x63a4   :  { %v3375_v37 = vmul.f32 %v3372_v54, %v3326_v57 }
0x6401   :  { %v3378_v14 = vpop.permute.xlu1 %3377 }
0x6402   :  { %v3380_v23 = vmul.f32 %v3378_v14, %v3372_v54 }
0x6404   :  { %3382 = vrot.lane.b32.xlu2 %v3380_v23, %s4557_s0 }
0x645e   :  { %v3383_v24 = vpop.permute.xlu2 %3382 }
0x645f   :  { %v3385_v13 = vadd.f32 %v3383_v24, %v3375_v37 }
0x6461   :  { %4521 = vtanh.f32 %v3385_v13 }
0x6467   :  { %v4522_v39 = vpop.eup %4521 }
0x6468   :  { %3388 = vrot.lane.b32.xlu0 %v4522_v39, %s4557_s0 }
0x64da   :  { %v3389_v62 = vpop.permute.xlu0 %3388 }
0x64db   :  { %v5828_v9 = vmul.f32 %v3389_v62, %v3372_v54 }
0x64dd   :  { %v3393_v25 = vpack.c.bf16 %v5828_v9, %v5828_v9 }
0x64df   :  { %3395 = vrot.lane.b32.xlu1 %v3393_v25, %s4558_s26 }
0x6551   :  { %v3396_v42 = vpop.permute.xlu1 %3395 }
0x6552   :  { %4024 = vmatmul.msk.bf16.vlgmr.msra.gmra.mxu2 %vm94_vm0, %v3396_v42 }
0x65d5   :  { %v3409_v22 = vpop.f32.mrf.mxu2 }
0x65d6   :  { %v3413_v35 = vadd.f32 %v3409_v22, %v3392_v1 }
0x65d8   :  { %4523 = vtanh.f32 %v3413_v35  ;;  %v4025_v38 = vmul.f32 -1.442695, %v3413_v35 }
0x65da   :  { %4525 = vpow2.f32 %v4025_v38 }
0x65dd   :  { %v3411_v4 = vpop.f32.mrf.mxu2 }
0x65de   :  { %v4524_v53 = vpop.eup %4523 }
0x65df   :  { %3436 = vrot.lane.b32.xlu2 %v4524_v53, %s4557_s0 }
0x65e0   :  { %v4526_v48 = vpop.eup %4525 }
0x65e1   :  { %v3417_v36 = vadd.f32 1.0, %v4526_v48 }
0x65e3   :  { %4527 = vrcp.f32 %v3417_v36  ;;  %v3429_v56 = vand.u32 2147483648, %v3417_v36  ;;  %vm3423_vm9 = vweird.f32 %v3417_v36  ;;  %v3427_v34 = vand.u32 2147483647, %v3417_v36 }
0x65e5   :  { %v3430_v1 = vor.u32 1.1754944e-38, %v3429_v56  ;;  %vm3428_vm11 = vcmp.eq.f32.partialorder %v3427_v34, 8.507059e+37 }
0x65e9   :  { %v4528_v27 = vpop.eup %4527 }
0x65ea   :  { %v3419_v7 = vmul.f32 %v4528_v27, %v3417_v36  ;;  %vm3424_vm8 = vweird.f32 %v4528_v27 }
0x65eb   :  { %vm3425_vm10 = vmor %vm3423_vm9, %vm3424_vm8  ;;  %vm47_vm9 = vweird.f32 %v41_v31 }
0x65ec   :  { %v3420_v46 = vsub.f32 1.0, %v3419_v7 }
0x65ee   :  { %v3421_v28 = vmul.f32 %v4528_v27, %v3420_v46 }
0x65f0   :  { %v3422_v5 = vadd.f32 %v4528_v27, %v3421_v28 }
0x65f2   :  { %v3426_v60 = vsel %vm3425_vm10, %v4528_v27, %v3422_v5 }
0x65f3   :  { %v3431_v52 = vsel %vm3428_vm11, %v3430_v1, %v3426_v60 }
0x65f4   :  { %v3434_v33 = vmul.f32 %v3431_v52, %v3385_v13 }
0x6639   :  { %v3437_v11 = vpop.permute.xlu2 %3436 }
0x663a   :  { %v3439_v57 = vmul.f32 %v3437_v11, %v3431_v52 }
0x663c   :  { %3441 = vrot.lane.b32.xlu0 %v3439_v57, %s4557_s0 }
0x66ae   :  { %v3442_v43 = vpop.permute.xlu0 %3441 }
0x66af   :  { %v3444_v18 = vadd.f32 %v3442_v43, %v3434_v33 }
0x66b1   :  { %4529 = vtanh.f32 %v3444_v18 }
0x66b7   :  { %v4530_v19 = vpop.eup %4529 }
0x66b8   :  { %3447 = vrot.lane.b32.xlu1 %v4530_v19, %s4557_s0 }
0x672a   :  { %v3448_v20 = vpop.permute.xlu1 %3447 }
0x672b   :  { %v5842_v41 = vmul.f32 %v3448_v20, %v3431_v52 }
0x672d   :  { %v3452_v0 = vpack.c.bf16 %v5842_v41, %v5842_v41 }
0x672f   :  { %3454 = vrot.lane.b32.xlu2 %v3452_v0, %s4558_s26 }
0x6789   :  { %v3455_v49 = vpop.permute.xlu2 %3454 }
0x678a   :  { %4026 = vmatmul.msk.bf16.vlgmr.msra.gmra.mxu0 %vm94_vm0, %v3455_v49 }
0x6807   :  { %v3468_v40 = vpop.f32.mrf.mxu0 }
0x6808   :  { %v3472_v55 = vadd.f32 %v3468_v40, %v3451_v21 }
0x680a   :  { %4531 = vtanh.f32 %v3472_v55  ;;  %v4027_v17 = vmul.f32 -1.442695, %v3472_v55 }
0x680c   :  { %4533 = vpow2.f32 %v4027_v17 }
0x680f   :  { %v3470_v61 = vpop.f32.mrf.mxu0 }
0x6810   :  { %v4532_v59 = vpop.eup %4531 }
0x6811   :  { %3495 = vrot.lane.b32.xlu0 %v4532_v59, %s4557_s0 }
0x6812   :  { %v4534_v16 = vpop.eup %4533 }
0x6813   :  { %v3476_v50 = vadd.f32 1.0, %v4534_v16 }
0x6815   :  { %4535 = vrcp.f32 %v3476_v50  ;;  %v3488_v14 = vand.u32 2147483648, %v3476_v50  ;;  %vm3482_vm13 = vweird.f32 %v3476_v50  ;;  %v3486_v63 = vand.u32 2147483647, %v3476_v50 }
0x6817   :  { %v3489_v21 = vor.u32 1.1754944e-38, %v3488_v14  ;;  %vm3487_vm15 = vcmp.eq.f32.partialorder %v3486_v63, 8.507059e+37 }
0x681b   :  { %v4536_v15 = vpop.eup %4535 }
0x681c   :  { %v3478_v51 = vmul.f32 %v4536_v15, %v3476_v50  ;;  %vm3483_vm12 = vweird.f32 %v4536_v15 }
0x681d   :  { %vm3484_vm14 = vmor %vm3482_vm13, %vm3483_vm12 }
0x681e   :  { %v3479_v2 = vsub.f32 1.0, %v3478_v51 }
0x6820   :  { %v3480_v44 = vmul.f32 %v4536_v15, %v3479_v2 }
0x6822   :  { %v3481_v58 = vadd.f32 %v4536_v15, %v3480_v44 }
0x6824   :  { %v3485_v6 = vsel %vm3484_vm14, %v4536_v15, %v3481_v58  ;;  %vm3668_vm14 = vcmp.gt.f32.partialorder %v5889_v10, 0.0 }
0x6825   :  { %v3490_v23 = vsel %vm3487_vm15, %v3489_v21, %v3485_v6  ;;  %vm3686_vm15 = vcmp.gt.f32.partialorder %v5889_v10, 2.0 }
0x6826   :  { %v3493_v24 = vmul.f32 %v3490_v23, %v3444_v18 }
0x6883   :  { %v3496_v54 = vpop.permute.xlu0 %3495 }
0x6884   :  { %v3498_v37 = vmul.f32 %v3496_v54, %v3490_v23  ;;  %v53_v54 = vand.u32 2147483648, %v41_v31 }
0x6886   :  { %3500 = vrot.lane.b32.xlu1 %v3498_v37, %s4557_s0 }
0x68f8   :  { %v3501_v13 = vpop.permute.xlu1 %3500 }
0x68f9   :  { %v3503_v39 = vadd.f32 %v3501_v13, %v3493_v24  ;;  %v51_v24 = vand.u32 2147483647, %v41_v31 }
0x68fb   :  { %4537 = vtanh.f32 %v3503_v39  ;;  %vm52_vm13 = vcmp.eq.f32.partialorder %v51_v24, 8.507059e+37 }
0x6901   :  { %v4538_v62 = vpop.eup %4537 }
0x6902   :  { %3506 = vrot.lane.b32.xlu2 %v4538_v62, %s4557_s0 }
0x695c   :  { %v3507_v25 = vpop.permute.xlu2 %3506 }
0x695d   :  { %v5856_v42 = vmul.f32 %v3507_v25, %v3490_v23  ;;  %v54_v25 = vor.u32 1.1754944e-38, %v53_v54 }
0x695f   :  { %v3511_v22 = vpack.c.bf16 %v5856_v42, %v5856_v42 }
0x6961   :  { %3513 = vrot.lane.b32.xlu0 %v3511_v22, %s4558_s26 }
0x69d3   :  { %v3514_v35 = vpop.permute.xlu0 %3513 }
0x69d4   :  { %4028 = vmatmul.msk.bf16.vlgmr.msrb.gmra.mxu1 %vm94_vm0, %v3514_v35 }
0x6a51   :  { %v3527_v4 = vpop.f32.mrf.mxu1 }
0x6a52   :  { %v3531_v53 = vadd.f32 %v3527_v4, %v3510_v45 }
0x6a54   :  { %4539 = vtanh.f32 %v3531_v53  ;;  %v4029_v36 = vmul.f32 -1.442695, %v3531_v53 }
0x6a56   :  { %4541 = vpow2.f32 %v4029_v36 }
0x6a59   :  { %v3529_v38 = vpop.f32.mrf.mxu1 }
0x6a5a   :  { %v4540_v48 = vpop.eup %4539 }
0x6a5b   :  { %3554 = vrot.lane.b32.xlu1 %v4540_v48, %s4557_s0 }
0x6a5c   :  { %v4542_v27 = vpop.eup %4541 }
0x6a5d   :  { %v3535_v7 = vadd.f32 1.0, %v4542_v27 }
0x6a5f   :  { %4543 = vrcp.f32 %v3535_v7  ;;  %v3547_v60 = vand.u32 2147483648, %v3535_v7  ;;  %vm3541_vm3 = vweird.f32 %v3535_v7  ;;  %v3545_v47 = vand.u32 2147483647, %v3535_v7 }
0x6a61   :  { %v3548_v45 = vor.u32 1.1754944e-38, %v3547_v60  ;;  %vm3546_vm5 = vcmp.eq.f32.partialorder %v3545_v47, 8.507059e+37 }
0x6a65   :  { %v4544_v46 = vpop.eup %4543 }
0x6a66   :  { %v3537_v28 = vmul.f32 %v4544_v46, %v3535_v7  ;;  %vm3542_vm2 = vweird.f32 %v4544_v46 }
0x6a67   :  { %vm3543_vm4 = vmor %vm3541_vm3, %vm3542_vm2  ;;  %vm3695_vm2 = vcmp.gt.f32.partialorder %v5889_v10, 3.0  ;;  %vm3722_vm3 = vcmp.gt.f32.partialorder %v5889_v10, 6.0 }
0x6a68   :  { %v3538_v5 = vsub.f32 1.0, %v3537_v28 }
0x6a6a   :  { %v3539_v56 = vmul.f32 %v4544_v46, %v3538_v5 }
0x6a6c   :  { %v3540_v34 = vadd.f32 %v4544_v46, %v3539_v56 }
0x6a6e   :  { %v3544_v3 = vsel %vm3543_vm4, %v4544_v46, %v3540_v34  ;;  %vm3677_vm4 = vcmp.gt.f32.partialorder %v5889_v10, 1.0 }
0x6a6f   :  { %v3549_v11 = vsel %vm3546_vm5, %v3548_v45, %v3544_v3  ;;  %vm3713_vm5 = vcmp.gt.f32.partialorder %v5889_v10, 5.0 }
0x6a70   :  { %v3552_v57 = vmul.f32 %v3549_v11, %v3503_v39 }
0x6acd   :  { %v3555_v1 = vpop.permute.xlu1 %3554 }
0x6ace   :  { %v3557_v52 = vmul.f32 %v3555_v1, %v3549_v11 }
0x6ad0   :  { %3559 = vrot.lane.b32.xlu2 %v3557_v52, %s4557_s0 }
0x6b2a   :  { %v3560_v33 = vpop.permute.xlu2 %3559 }
0x6b2b   :  { %v5869_v43 = vadd.f32 %v3560_v33, %v3552_v57 }
0x6b2d   :  { %4545 = vtanh.f32 %v5869_v43 }
0x6b33   :  { %v4546_v18 = vpop.eup %4545 }
0x6b34   :  { %3565 = vrot.lane.b32.xlu0 %v4546_v18, %s4557_s0 }
0x6ba6   :  { %v3566_v19 = vpop.permute.xlu0 %3565 }
0x6ba7   :  { %v3568_v20 = vmul.f32 %v3566_v19, %v3549_v11 }
0x6ba9   :  { %v3570_v0 = vpack.c.bf16 %v3568_v20, %v3568_v20 }
0x6bab   :  { %3572 = vrot.lane.b32.xlu1 %v3570_v0, %s4558_s26 }
0x6c1d   :  { %v3573_v49 = vpop.permute.xlu1 %3572 }
0x6c1e   :  { %4030 = vmatmul.msk.bf16.vlgmr.msrb.gmra.mxu2 %vm94_vm0, %v3573_v49 }
0x6ca1   :  { %v3586_v40 = vpop.f32.mrf.mxu2 }
0x6ca2   :  { %v3590_v55 = vadd.f32 %v3586_v40, %v3569_v8  ;;  %v4559_v8 = vmov 0  }
0x6ca3   :  { %4161 = vset.pattern.permute.xlu0 %v4559_v8  ;;  %4162 = vset.pattern.permute.xlu1 %v4559_v8 }
0x6ca4   :  { %4547 = vtanh.f32 %v3590_v55  ;;  %v4031_v17 = vmul.f32 -1.442695, %v3590_v55  ;;  %4163 = vset.pattern.permute.xlu2 %v4559_v8 }
0x6ca6   :  { %4549 = vpow2.f32 %v4031_v17 }
0x6ca9   :  { %v3588_v61 = vpop.f32.mrf.mxu2 }
0x6caa   :  { %v4548_v59 = vpop.eup %4547 }
0x6cab   :  { %3613 = vrot.lane.b32.xlu2 %v4548_v59, %s4557_s0 }
0x6cac   :  { %v4550_v30 = vpop.eup %4549 }
0x6cad   :  { %v3594_v16 = vadd.f32 1.0, %v4550_v30 }
0x6caf   :  { %4551 = vrcp.f32 %v3594_v16  ;;  %v3606_v14 = vand.u32 2147483648, %v3594_v16  ;;  %vm3600_vm7 = vweird.f32 %v3594_v16  ;;  %v3604_v6 = vand.u32 2147483647, %v3594_v16 }
0x6cb0   :  { %4553 = vrcp.f32 %v41_v31 }
0x6cb1   :  { %v3607_v23 = vor.u32 1.1754944e-38, %v3606_v14  ;;  %vm3605_vm11 = vcmp.eq.f32.partialorder %v3604_v6, 8.507059e+37 }
0x6cb3   :  { %3629 = vrot.lane.b32.xlu2 %v5789_v29, %s4558_s26 }
0x6cb5   :  { %v4552_v29 = vpop.eup %4551 }
0x6cb6   :  { %v3596_v50 = vmul.f32 %v4552_v29, %v3594_v16  ;;  %vm3601_vm1 = vweird.f32 %v4552_v29 }
0x6cb7   :  { %vm3602_vm8 = vmor %vm3600_vm7, %vm3601_vm1  ;;  %vm3704_vm1 = vcmp.gt.f32.partialorder %v5889_v10, 4.0  ;;  %vm3731_vm7 = vcmp.gt.f32.partialorder %v5889_v10, 7.0 }
0x6cb8   :  { %v3597_v15 = vsub.f32 1.0, %v3596_v50 }
0x6cba   :  { %v3598_v2 = vmul.f32 %v4552_v29, %v3597_v15 }
0x6cbb   :  { %3642 = vrot.lane.b32.xlu2 %v3568_v20, %s4558_s26 }
0x6cbc   :  { %v3599_v58 = vadd.f32 %v4552_v29, %v3598_v2 }
0x6cbe   :  { %v3603_v21 = vsel %vm3602_vm8, %v4552_v29, %v3599_v58  ;;  %vm3754_vm8 = vcmask 7168  }
0x6cbf   :  { %v3608_v39 = vsel %vm3605_vm11, %v3607_v23, %v3603_v21  ;;  %v4170_v21 = vld [vmem:[%s5937_s4 + $0x6] ss:$0 sm:$0xff] }
0x6cc0   :  { %v3611_v38 = vmul.f32 %v3608_v39, %v5869_v43 }
0x6cc3   :  { %3647 = vrot.lane.b32.xlu2 %v5814_v12, %s4558_s26  ;;  %v4554_v12 = vpop.eup %4553 }
0x6cc4   :  { %v43_v51 = vmul.f32 %v4554_v12, %v41_v31  ;;  %vm48_vm10 = vweird.f32 %v4554_v12 }
0x6cc5   :  { %vm49_vm12 = vmor %vm47_vm9, %vm48_vm10 }
0x6cc6   :  { %v44_v44 = vsub.f32 1.0, %v43_v51 }
0x6cc8   :  { %v45_v63 = vmul.f32 %v4554_v12, %v44_v44 }
0x6cca   :  { %v46_v37 = vadd.f32 %v4554_v12, %v45_v63 }
0x6ccc   :  { %v50_v22 = vsel %vm49_vm12, %v4554_v12, %v46_v37 }
0x6ccd   :  { %v55_v35 = vsel %vm52_vm13, %v54_v25, %v50_v22 }
0x6cce   :  { %v3669_v4 = vsel %vm3668_vm14, %v55_v35, 0.0  ;;  %v3687_v53 = vsel %vm3686_vm15, %v55_v35, 0.0  ;;  %v3696_v27 = vsel %vm3695_vm2, %v55_v35, 0.0  ;;  %v3723_v46 = vsel %vm3722_vm3, %v55_v35, 0.0 }
0x6ccf   :  { %3690 = vperm.xlu2 %4163, %v3687_v53   ;;  %v3714_v28 = vsel %vm3713_vm5, %v55_v35, 0.0  ;;  %v3732_v34 = vsel %vm3731_vm7, %v55_v35, 0.0 }
0x6cd7   :  { %3699 = vperm.xlu2 %4163, %v3696_v27  }
0x6cdf   :  { %3726 = vperm.xlu2 %4163, %v3723_v46  }
0x6d05   :  { %v3614_v13 = vpop.permute.xlu2 %3613 }
0x6d06   :  { %v3616_v62 = vmul.f32 %v3614_v13, %v3608_v39 }
0x6d08   :  { %3618 = vrot.lane.b32.xlu0 %v3616_v62, %s4557_s0 }
0x6d10   :  { %3672 = vperm.xlu0 %4161, %v3669_v4  }
0x6d18   :  { %3656 = vrot.lane.b32.xlu0 %v5828_v9, %s4558_s26  ;;  %v3678_v9 = vsel %vm3677_vm4, %v55_v35, 0.0 }
0x6d7a   :  { %v3619_v48 = vpop.permute.xlu0 %3618 }
0x6d7b   :  { %v3621_v36 = vadd.f32 %v3619_v48, %v3611_v38 }
0x6d7d   :  { %4555 = vtanh.f32 %v3621_v36 }
0x6d82   :  { %v3673_v3 = vpop.permute.xlu0 %3672 }
0x6d83   :  { %v4556_v7 = vpop.eup %4555 }
0x6d84   :  { %3624 = vrot.lane.b32.xlu1 %v4556_v7, %s4557_s0 }
0x6d8a   :  { %v3657_v11 = vpop.permute.xlu0 %3656 }
0x6d8c   :  { %3638 = vrot.lane.b32.xlu1 %v5800_v32, %s4558_s26  ;;  %v3705_v32 = vsel %vm3704_vm1, %v55_v35, 0.0 }
0x6d94   :  { %3681 = vperm.xlu1 %4162, %v3678_v9  }
0x6d9c   :  { %3651 = vrot.lane.b32.xlu1 %v5856_v42, %s4558_s26  ;;  %v3630_v42 = vpop.permute.xlu2 %3629 }
0x6da4   :  { %3660 = vrot.lane.b32.xlu1 %v5842_v41, %s4558_s26  ;;  %v3643_v47 = vpop.permute.xlu2 %3642 }
0x6dac   :  { %3717 = vperm.xlu1 %4162, %v3714_v28   ;;  %v3648_v45 = vpop.permute.xlu2 %3647 }
0x6db4   :  { %v3691_v52 = vpop.permute.xlu2 %3690 }
0x6dbc   :  { %v3700_v20 = vpop.permute.xlu2 %3699 }
0x6dc4   :  { %v3727_v15 = vpop.permute.xlu2 %3726 }
0x6df6   :  { %v3625_v5 = vpop.permute.xlu1 %3624 }
0x6df7   :  { %v3627_v56 = vmul.f32 %v3625_v5, %v3608_v39 }
0x6df9   :  { %3633 = vrot.lane.b32.xlu0 %v3627_v56, %s4558_s26  ;;  %s4560_s26 = smov 96  }
0x6dfe   :  { %v3639_v60 = vpop.permute.xlu1 %3638 }
0x6dff   :  { %v3645_v43 = vsel %vm26_vm6, %v3639_v60, %v3643_v47  ;;  %v3666_v51 = vsel %vm26_vm6, %v3643_v47, %v3639_v60 }
0x6e00   :  { %v3729_v44 = vmul.f32 %v3727_v15, %v3666_v51 }
0x6e01   :  { %3708 = vperm.xlu0 %4161, %v3705_v32  }
0x6e06   :  { %v3682_v41 = vpop.permute.xlu1 %3681 }
0x6e07   :  { %v3684_v0 = vmul.f32 %v3682_v41, %v3645_v43 }
0x6e09   :  { %3735 = vperm.xlu0 %4161, %v3732_v34  }
0x6e0e   :  { %v3652_v1 = vpop.permute.xlu1 %3651 }
0x6e0f   :  { %v3654_v18 = vsel %vm26_vm6, %v3648_v45, %v3652_v1  ;;  %v3665_v29 = vsel %vm26_vm6, %v3652_v1, %v3648_v45 }
0x6e10   :  { %v3693_v55 = vmul.f32 %v3691_v52, %v3654_v18 }
0x6e16   :  { %v3661_v57 = vpop.permute.xlu1 %3660 }
0x6e17   :  { %v3663_v40 = vsel %vm26_vm6, %v3657_v11, %v3661_v57  ;;  %v3664_v10 = vsel %vm26_vm6, %v3661_v57, %v3657_v11 }
0x6e18   :  { %v3702_v59 = vmul.f32 %v3700_v20, %v3663_v40 }
0x6e1e   :  { %v3718_v30 = vpop.permute.xlu1 %3717 }
0x6e1f   :  { %v3720_v50 = vmul.f32 %v3718_v30, %v3665_v29 }
0x6e6b   :  { %v3634_v33 = vpop.permute.xlu0 %3633 }
0x6e6c   :  { %v3636_v19 = vsel %vm26_vm6, %v3630_v42, %v3634_v33  ;;  %v3667_v58 = vsel %vm26_vm6, %v3634_v33, %v3630_v42 }
0x6e6d   :  { %v3675_v49 = vmul.f32 %v3673_v3, %v3636_v19 }
0x6e6f   :  { %v3685_v61 = vadd.f32 %v3684_v0, %v3675_v49 }
0x6e71   :  { %v3694_v17 = vadd.f32 %v3693_v55, %v3685_v61 }
0x6e73   :  { %v3709_v16 = vpop.permute.xlu0 %3708  ;;  %v3703_v31 = vadd.f32 %v3702_v59, %v3694_v17 }
0x6e74   :  { %v3711_v8 = vmul.f32 %v3709_v16, %v3664_v10 }
0x6e76   :  { %v3712_v12 = vadd.f32 %v3711_v8, %v3703_v31 }
0x6e78   :  { %v3721_v2 = vadd.f32 %v3720_v50, %v3712_v12 }
0x6e7a   :  { %v3730_v63 = vadd.f32 %v3729_v44, %v3721_v2 }
0x6e7b   :  { %v3736_v14 = vpop.permute.xlu0 %3735 }
0x6e7c   :  { %v3738_v6 = vmul.f32 %v3736_v14, %v3667_v58 }
0x6e7e   :  { %v3739_v54 = vadd.f32 %v3738_v6, %v3730_v63 }
0x6e80   :  { %v3745_v23 = vmul.f32 %v4170_v21, %v3739_v54 }
0x6e82   :  { %v3746_v37 = vsel %vm94_vm0, %v3745_v23, 0.0 }
0x6e83   :  { %3747 = vadd.xlane.f32.xlu1 %v3746_v37 }
0x6ef6   :  { %v3748_v24 = vpop.xlane.xlu1 %3747 }
0x6ef7   :  { %v3749_v13 = vadd.f32 %v4170_v21, %v3748_v24 }
0x6ef9   :  { %3751 = vrot.lane.b32.xlu2 %v3749_v13, %s4560_s26 }
0x6f53   :  { %v3752_v39 = vpop.permute.xlu2 %3751 }
0x6f54   :  { %3755 = vst.msk [vmem:[%s5941_s6] sm:$0xff] %vm3754_vm8, %v3752_v39 }

</bundles_post_ra>
